<compile_context>
chip_gen: v7x
topology: tpu7x:2x2x1
jax: 0.10.0
libtpu: 0.0.40
codegen_flags: <defaults>
</compile_context>

<pallas_src>
import functools

import jax
import jax.numpy as jnp
from jax.experimental import pallas as pl
from jax.experimental.pallas import tpu as pltpu


CHANNELS, N_HID, N_Z = 3, 2304, 32

# (Cin, Cout, kernel, stride) per layer
ENC_CFG = [(CHANNELS, 32, 4, 2), (32, 64, 4, 2), (64, 128, 4, 2), (128, 256, 4, 2)]
DEC_CFG = [(N_HID, 256, 3, 2), (256, 128, 4, 2), (128, 64, 4, 2),
           (64, 32, 6, 2), (32, CHANNELS, 6, 2)]


def _round_up(x, m):
    return (x + m - 1) // m * m


# ----------------------------------------------------------------------------
# Pallas GEMM kernel: out = act(A @ B + bias); bf16 operands, f32 accumulate.
# ----------------------------------------------------------------------------
def _gemm_bias_act_kernel(a_ref, b_ref, bias_ref, o_ref, *, act):
    r = jnp.dot(a_ref[...], b_ref[...], preferred_element_type=jnp.float32)
    r = r + bias_ref[...]                       # (1, tn) broadcasts over rows
    if act == "relu":
        r = jnp.maximum(r, 0.0)
    elif act == "sigmoid":
        r = jax.nn.sigmoid(r)
    o_ref[...] = r.astype(o_ref.dtype)


def gemm_bias_act(A, Wp, biasp, n_out, act="none"):
    """A: (M, K) float; Wp: (Kp, Np) bf16 pre-padded; biasp: (1, Np) f32.
    Returns act(A @ W + bias)[:, :n_out] in f32."""
    M, K = A.shape
    Kp, Np = Wp.shape
    assert Kp == _round_up(K, 128) and Np % 128 == 0

    tm = min(256, _round_up(M, 16))             # 16: bf16 sublane packing
    tn = 256 if Np % 256 == 0 else 128          # feed the 256-wide MXU when we can
    Mp = _round_up(M, tm)

    Ap = jnp.pad(A.astype(jnp.bfloat16), ((0, Mp - M), (0, Kp - K)))

    out = pl.pallas_call(
        functools.partial(_gemm_bias_act_kernel, act=act),
        out_shape=jax.ShapeDtypeStruct((Mp, Np), jnp.float32),
        grid_spec=pltpu.PrefetchScalarGridSpec(
            num_scalar_prefetch=0,
            grid=(Mp // tm, Np // tn),
            in_specs=[
                pl.BlockSpec((tm, Kp), lambda i, j: (i, 0)),
                pl.BlockSpec((Kp, tn), lambda i, j: (0, j)),
                pl.BlockSpec((1, tn), lambda i, j: (0, j)),
            ],
            out_specs=pl.BlockSpec((tm, tn), lambda i, j: (i, j)),
        ),
        compiler_params=pltpu.CompilerParams(
            dimension_semantics=("parallel", "parallel")),
    )(Ap, Wp, biasp)
    return out[:M, :n_out]


# ----------------------------------------------------------------------------
# Conv via im2col + Pallas GEMM (encoder)
# ----------------------------------------------------------------------------
def _im2col(x, k, stride):
    """x: (B,H,W,C) -> (B*OH*OW, k*k*C) with column order (kh, kw, c)."""
    B, H, W, C = x.shape
    OH = (H - k) // stride + 1
    OW = (W - k) // stride + 1
    cols = []
    for i in range(k):
        for j in range(k):
            cols.append(x[:, i:i + stride * (OH - 1) + 1:stride,
                          j:j + stride * (OW - 1) + 1:stride, :])
    patches = jnp.stack(cols, axis=3)            # (B, OH, OW, k*k, C)
    return patches.reshape(B * OH * OW, k * k * C), OH, OW


def conv2d(x_nhwc, Wp, biasp, cout, k, stride, act):
    B = x_nhwc.shape[0]
    A, OH, OW = _im2col(x_nhwc, k, stride)
    out = gemm_bias_act(A, Wp, biasp, cout, act)
    return out.reshape(B, OH, OW, cout)


# ----------------------------------------------------------------------------
# ConvTranspose via col2im GEMM + overlap-add (decoder) — no zero-dilation MACs
# ----------------------------------------------------------------------------
def _col2im(Y, B, H, W, k, s, cout):
    """Y: (B*H*W, k*k*cout), column order (kh, kw, co) -> overlap-add into
    (B, (H-1)*s+k, (W-1)*s+k, cout).  Requires k % s == 0 (true for d2..d5)."""
    assert k % s == 0
    OH, OW = (H - 1) * s + k, (W - 1) * s + k
    Y = Y.reshape(B, H, W, k, k, cout)
    out = jnp.zeros((B, OH, OW, cout), Y.dtype)
    g = k // s
    for gh in range(g):
        for gw in range(g):
            c = Y[:, :, :, gh * s:(gh + 1) * s, gw * s:(gw + 1) * s, :]
            c = jnp.transpose(c, (0, 1, 3, 2, 4, 5)).reshape(B, H * s, W * s, cout)
            out = out.at[:, gh * s:gh * s + H * s, gw * s:gw * s + W * s, :].add(c)
    return out


def conv_transpose2d(x_nhwc, Wp, zero_biasp, bias, cout, k, s, act):
    """One dense Pallas GEMM per layer; bias + activation are applied after the
    overlap-add (they must come post-sum, so they cannot live in the GEMM)."""
    B, H, W, Cin = x_nhwc.shape
    Y = gemm_bias_act(x_nhwc.reshape(B * H * W, Cin), Wp, zero_biasp,
                      k * k * cout, "none")
    out = _col2im(Y, B, H, W, k, s, cout) + bias
    if act == "relu":
        out = jnp.maximum(out, 0.0)
    elif act == "sigmoid":
        out = jax.nn.sigmoid(out)
    return out


# ----------------------------------------------------------------------------
# Parameters
# ----------------------------------------------------------------------------
def init_params(key):
    def norm(key, shape, scale=0.05):
        return scale * jax.random.normal(key, shape, jnp.float32)

    keys = jax.random.split(key, 32)
    p = {}
    # encoder convs: (Cout, Cin, k, k) (PyTorch Conv2d layout)
    for n, (ci, co, k, s) in enumerate(ENC_CFG, 1):
        p[f"e{n}_w"] = norm(keys[2 * n], (co, ci, k, k))
        p[f"e{n}_b"] = norm(keys[2 * n + 1], (co,))
    # fc layers: (out, in) (PyTorch Linear layout)
    p["fc1_w"] = norm(keys[10], (N_Z, N_HID)); p["fc1_b"] = norm(keys[11], (N_Z,))
    p["fc2_w"] = norm(keys[12], (N_Z, N_HID)); p["fc2_b"] = norm(keys[13], (N_Z,))
    p["fc3_w"] = norm(keys[14], (N_HID, N_Z)); p["fc3_b"] = norm(keys[15], (N_HID,))
    # decoder conv-transposes: (Cin, Cout, k, k) (PyTorch ConvTranspose2d layout)
    for n, (ci, co, k, s) in enumerate(DEC_CFG, 1):
        p[f"d{n}_w"] = norm(keys[16 + 2 * n], (ci, co, k, k))
        p[f"d{n}_b"] = norm(keys[17 + 2 * n], (co,))
    return p


def _prep_gemm_weight(Wm, bias):
    """Wm: (K, N) f32, bias: (N,) -> (Kp, Np) bf16 weight + (1, Np) f32 bias."""
    K, N = Wm.shape
    Kp, Np = _round_up(K, 128), _round_up(N, 128)
    Wp = jnp.pad(Wm, ((0, Kp - K), (0, Np - N))).astype(jnp.bfloat16)
    bp = jnp.pad(bias.astype(jnp.float32), (0, Np - N)).reshape(1, Np)
    return Wp, bp


def prepare_params(p):
    """One-time weight preprocessing hoisted out of the jitted forward."""
    q = {}
    # encoder convs: (Cout, Cin, k, k) -> GEMM layout (k*k*Cin, Cout)
    for n, (ci, co, k, s) in enumerate(ENC_CFG, 1):
        Wm = jnp.transpose(p[f"e{n}_w"], (2, 3, 1, 0)).reshape(k * k * ci, co)
        q[f"e{n}_w"], q[f"e{n}_b"] = _prep_gemm_weight(Wm, p[f"e{n}_b"])
    # fc1 + fc2 fused into a single (N_HID, 2*N_Z) GEMM
    W12 = jnp.concatenate([p["fc1_w"], p["fc2_w"]], axis=0).T      # (2304, 64)
    b12 = jnp.concatenate([p["fc1_b"], p["fc2_b"]], axis=0)
    q["fc12_w"], q["fc12_b"] = _prep_gemm_weight(W12, b12)
    q["fc3_w"], q["fc3_b"] = _prep_gemm_weight(p["fc3_w"].T, p["fc3_b"])
    # decoder: (Cin, Cout, k, k) -> col2im GEMM layout (Cin, k*k*Cout)
    for n, (ci, co, k, s) in enumerate(DEC_CFG, 1):
        Wc = jnp.transpose(p[f"d{n}_w"], (0, 2, 3, 1)).reshape(ci, k * k * co)
        if n == 1:
            # 1x1 spatial input: exactly one GEMM, so (tap-tiled) bias + ReLU
            # can be fused into the kernel epilogue.
            q["d1_w"], q["d1_b"] = _prep_gemm_weight(Wc, jnp.tile(p["d1_b"], k * k))
        else:
            q[f"d{n}_w"], q[f"d{n}_b0"] = _prep_gemm_weight(
                Wc, jnp.zeros((k * k * co,), jnp.float32))
            q[f"d{n}_b"] = p[f"d{n}_b"]           # added after the overlap-add
    return q


# ----------------------------------------------------------------------------
# VAE forward
# ----------------------------------------------------------------------------
@jax.jit
def vae_forward(q, x_nchw, eps):
    B = x_nchw.shape[0]
    h = jnp.transpose(x_nchw, (0, 2, 3, 1))                      # NCHW -> NHWC

    # -------- encoder --------
    for n, (ci, co, k, s) in enumerate(ENC_CFG, 1):
        h = conv2d(h, q[f"e{n}_w"], q[f"e{n}_b"], co, k, s, "relu")
    # PyTorch Flatten operates on NCHW -> (B, C*H*W)
    flat = jnp.transpose(h, (0, 3, 1, 2)).reshape(B, -1)         # (B, 2304)

    ms = gemm_bias_act(flat, q["fc12_w"], q["fc12_b"], 2 * N_Z, "none")
    mu, logsigma = ms[:, :N_Z], ms[:, N_Z:]
    z = mu + jnp.exp(logsigma) * eps          # reparameterize (64 elems, XLA)

    # -------- decoder --------
    h3 = gemm_bias_act(z, q["fc3_w"], q["fc3_b"], N_HID, "none")  # (B, 2304)
    ci, co, k, s = DEC_CFG[0]
    d = gemm_bias_act(h3, q["d1_w"], q["d1_b"], k * k * co, "relu")
    d = d.reshape(B, k, k, co)                                    # (B, 3, 3, 256)
    for n, (ci, co, k, s) in enumerate(DEC_CFG[1:], 2):
        act = "sigmoid" if n == len(DEC_CFG) else "relu"
        d = conv_transpose2d(d, q[f"d{n}_w"], q[f"d{n}_b0"], q[f"d{n}_b"],
                             co, k, s, act)
    x_hat = jnp.transpose(d, (0, 3, 1, 2))                        # NHWC -> NCHW
    return x_hat, mu, logsigma, z


if __name__ == "__main__":
    key = jax.random.PRNGKey(0)
    pkey, xkey, ekey = jax.random.split(key, 3)

    params = init_params(pkey)
    prep = prepare_params(params)        # one-time weight prep (hoisted)

    # Input spatial size 78 is forced by the module: four k=4,s=2 convs give
    # 3x3x256 = 2304 features = n_hid expected by fc1/fc2 and Unflatten(2304,1,1).
    B = 2
    x = jax.random.normal(xkey, (B, CHANNELS, 78, 78), jnp.float32)
    eps = jax.random.normal(ekey, (B, N_Z), jnp.float32)   # torch.randn equivalent

    x_hat, mu, logsigma, z = vae_forward(prep, x, eps)
    jax.block_until_ready((x_hat, mu, logsigma, z))

    assert x_hat.shape == (B, CHANNELS, 84, 84)
    assert mu.shape == (B, N_Z) and logsigma.shape == (B, N_Z) and z.shape == (B, N_Z)
    print("KERNEL_OK")
</pallas_src>

<mosaic_0001>
module attributes {stable_mosaic.version = 11 : i64} {
  func.func @_gemm_bias_act_kernel(%arg0: i32, %arg1: i32, %arg2: memref<256x128xbf16, #tpu.memory_space<vmem>>, %arg3: memref<128x128xbf16, #tpu.memory_space<vmem>>, %arg4: memref<1x128xf32, #tpu.memory_space<vmem>>, %arg5: memref<256x128xf32, #tpu.memory_space<vmem>>) attributes {dimension_semantics = [#tpu.dimension_semantics<parallel>, #tpu.dimension_semantics<parallel>], iteration_bounds = array<i64: 12, 1>, scalar_prefetch = 0 : i64, scratch_operands = 0 : i64, tpu.core_type = #tpu.core_type<tc>, window_params = [{transform_indices = @transform_0, window_bounds = array<i64: 256, 128>}, {transform_indices = @transform_1, window_bounds = array<i64: 128, 128>}, {transform_indices = @transform_2, window_bounds = array<i64: 1, 128>}, {transform_indices = @transform_3, window_bounds = array<i64: 256, 128>}]} {
    %c0 = arith.constant 0 : index
    %c0_0 = arith.constant 0 : index
    %0 = vector.load %arg2[%c0, %c0_0] : memref<256x128xbf16, #tpu.memory_space<vmem>>, vector<256x128xbf16>
    %c0_1 = arith.constant 0 : index
    %c0_2 = arith.constant 0 : index
    %1 = vector.load %arg3[%c0_1, %c0_2] : memref<128x128xbf16, #tpu.memory_space<vmem>>, vector<128x128xbf16>
    %cst = arith.constant dense<0.000000e+00> : vector<256x128xf32>
    %2 = tpu.matmul %0, %1, %cst {dimension_numbers = #tpu.dot_dimension_numbers<[1], [0], [0], [1], [0, 0, 1, 1], [], []>} : vector<256x128xbf16>, vector<128x128xbf16>, vector<256x128xf32> -> vector<256x128xf32>
    %c0_3 = arith.constant 0 : index
    %c0_4 = arith.constant 0 : index
    %3 = vector.load %arg4[%c0_3, %c0_4] : memref<1x128xf32, #tpu.memory_space<vmem>>, vector<1x128xf32>
    %4 = vector.broadcast %3 : vector<1x128xf32> to vector<256x128xf32>
    %5 = arith.addf %2, %4 : vector<256x128xf32>
    %cst_5 = arith.constant 0.000000e+00 : f32
    %6 = vector.broadcast %cst_5 : f32 to vector<256x128xf32>
    %7 = arith.maximumf %5, %6 : vector<256x128xf32>
    %c0_6 = arith.constant 0 : index
    %c0_7 = arith.constant 0 : index
    %8 = vector.load %arg5[%c0_6, %c0_7] : memref<256x128xf32, #tpu.memory_space<vmem>>, vector<256x128xf32>
    tpu.vector_store %arg5[%c0_6, %c0_7], %7 {strides = array<i32>} : memref<256x128xf32, #tpu.memory_space<vmem>>, vector<256x128xf32>,
    return
  }
  func.func @transform_0(%arg0: i32, %arg1: i32) -> (i32, i32) {
    %c0_i32 = arith.constant 0 : i32
    %c0_i32_0 = arith.constant 0 : i32
    return %arg0, %c0_i32 : i32, i32
  }
  func.func @transform_1(%arg0: i32, %arg1: i32) -> (i32, i32) {
    %c0_i32 = arith.constant 0 : i32
    %c0_i32_0 = arith.constant 0 : i32
    return %c0_i32, %arg1 : i32, i32
  }
  func.func @transform_2(%arg0: i32, %arg1: i32) -> (i32, i32) {
    %c0_i32 = arith.constant 0 : i32
    %c0_i32_0 = arith.constant 0 : i32
    return %c0_i32, %arg1 : i32, i32
  }
  func.func @transform_3(%arg0: i32, %arg1: i32) -> (i32, i32) {
    %c0_i32 = arith.constant 0 : i32
    return %arg0, %arg1 : i32, i32
  }
}

module attributes {stable_mosaic.version = 11 : i64} {
  func.func @_gemm_bias_act_kernel(%arg0: i32, %arg1: i32, %arg2: memref<256x512xbf16, #tpu.memory_space<vmem>>, %arg3: memref<512x128xbf16, #tpu.memory_space<vmem>>, %arg4: memref<1x128xf32, #tpu.memory_space<vmem>>, %arg5: memref<256x128xf32, #tpu.memory_space<vmem>>) attributes {dimension_semantics = [#tpu.dimension_semantics<parallel>, #tpu.dimension_semantics<parallel>], iteration_bounds = array<i64: 3, 1>, scalar_prefetch = 0 : i64, scratch_operands = 0 : i64, tpu.core_type = #tpu.core_type<tc>, window_params = [{transform_indices = @transform_0, window_bounds = array<i64: 256, 512>}, {transform_indices = @transform_1, window_bounds = array<i64: 512, 128>}, {transform_indices = @transform_2, window_bounds = array<i64: 1, 128>}, {transform_indices = @transform_3, window_bounds = array<i64: 256, 128>}]} {
    %c0 = arith.constant 0 : index
    %c0_0 = arith.constant 0 : index
    %0 = vector.load %arg2[%c0, %c0_0] : memref<256x512xbf16, #tpu.memory_space<vmem>>, vector<256x512xbf16>
    %c0_1 = arith.constant 0 : index
    %c0_2 = arith.constant 0 : index
    %1 = vector.load %arg3[%c0_1, %c0_2] : memref<512x128xbf16, #tpu.memory_space<vmem>>, vector<512x128xbf16>
    %cst = arith.constant dense<0.000000e+00> : vector<256x128xf32>
    %2 = tpu.matmul %0, %1, %cst {dimension_numbers = #tpu.dot_dimension_numbers<[1], [0], [0], [1], [0, 0, 1, 1], [], []>} : vector<256x512xbf16>, vector<512x128xbf16>, vector<256x128xf32> -> vector<256x128xf32>
    %c0_3 = arith.constant 0 : index
    %c0_4 = arith.constant 0 : index
    %3 = vector.load %arg4[%c0_3, %c0_4] : memref<1x128xf32, #tpu.memory_space<vmem>>, vector<1x128xf32>
    %4 = vector.broadcast %3 : vector<1x128xf32> to vector<256x128xf32>
    %5 = arith.addf %2, %4 : vector<256x128xf32>
    %cst_5 = arith.constant 0.000000e+00 : f32
    %6 = vector.broadcast %cst_5 : f32 to vector<256x128xf32>
    %7 = arith.maximumf %5, %6 : vector<256x128xf32>
    %c0_6 = arith.constant 0 : index
    %c0_7 = arith.constant 0 : index
    %8 = vector.load %arg5[%c0_6, %c0_7] : memref<256x128xf32, #tpu.memory_space<vmem>>, vector<256x128xf32>
    tpu.vector_store %arg5[%c0_6, %c0_7], %7 {strides = array<i32>} : memref<256x128xf32, #tpu.memory_space<vmem>>, vector<256x128xf32>,
    return
  }
  func.func @transform_0(%arg0: i32, %arg1: i32) -> (i32, i32) {
    %c0_i32 = arith.constant 0 : i32
    %c0_i32_0 = arith.constant 0 : i32
    return %arg0, %c0_i32 : i32, i32
  }
  func.func @transform_1(%arg0: i32, %arg1: i32) -> (i32, i32) {
    %c0_i32 = arith.constant 0 : i32
    %c0_i32_0 = arith.constant 0 : i32
    return %c0_i32, %arg1 : i32, i32
  }
  func.func @transform_2(%arg0: i32, %arg1: i32) -> (i32, i32) {
    %c0_i32 = arith.constant 0 : i32
    %c0_i32_0 = arith.constant 0 : i32
    return %c0_i32, %arg1 : i32, i32
  }
  func.func @transform_3(%arg0: i32, %arg1: i32) -> (i32, i32) {
    %c0_i32 = arith.constant 0 : i32
    return %arg0, %arg1 : i32, i32
  }
}

module attributes {stable_mosaic.version = 11 : i64} {
  func.func @_gemm_bias_act_kernel(%arg0: i32, %arg1: i32, %arg2: memref<128x1024xbf16, #tpu.memory_space<vmem>>, %arg3: memref<1024x128xbf16, #tpu.memory_space<vmem>>, %arg4: memref<1x128xf32, #tpu.memory_space<vmem>>, %arg5: memref<128x128xf32, #tpu.memory_space<vmem>>) attributes {dimension_semantics = [#tpu.dimension_semantics<parallel>, #tpu.dimension_semantics<parallel>], iteration_bounds = array<i64: 1, 1>, scalar_prefetch = 0 : i64, scratch_operands = 0 : i64, tpu.core_type = #tpu.core_type<tc>, window_params = [{transform_indices = @transform_0, window_bounds = array<i64: 128, 1024>}, {transform_indices = @transform_1, window_bounds = array<i64: 1024, 128>}, {transform_indices = @transform_2, window_bounds = array<i64: 1, 128>}, {transform_indices = @transform_3, window_bounds = array<i64: 128, 128>}]} {
    %c0 = arith.constant 0 : index
    %c0_0 = arith.constant 0 : index
    %0 = vector.load %arg2[%c0, %c0_0] : memref<128x1024xbf16, #tpu.memory_space<vmem>>, vector<128x1024xbf16>
    %c0_1 = arith.constant 0 : index
    %c0_2 = arith.constant 0 : index
    %1 = vector.load %arg3[%c0_1, %c0_2] : memref<1024x128xbf16, #tpu.memory_space<vmem>>, vector<1024x128xbf16>
    %cst = arith.constant dense<0.000000e+00> : vector<128x128xf32>
    %2 = tpu.matmul %0, %1, %cst {dimension_numbers = #tpu.dot_dimension_numbers<[1], [0], [0], [1], [0, 0, 1, 1], [], []>} : vector<128x1024xbf16>, vector<1024x128xbf16>, vector<128x128xf32> -> vector<128x128xf32>
    %c0_3 = arith.constant 0 : index
    %c0_4 = arith.constant 0 : index
    %3 = vector.load %arg4[%c0_3, %c0_4] : memref<1x128xf32, #tpu.memory_space<vmem>>, vector<1x128xf32>
    %4 = vector.broadcast %3 : vector<1x128xf32> to vector<128x128xf32>
    %5 = arith.addf %2, %4 : vector<128x128xf32>
    %cst_5 = arith.constant 0.000000e+00 : f32
    %6 = vector.broadcast %cst_5 : f32 to vector<128x128xf32>
    %7 = arith.maximumf %5, %6 : vector<128x128xf32>
    %c0_6 = arith.constant 0 : index
    %c0_7 = arith.constant 0 : index
    %8 = vector.load %arg5[%c0_6, %c0_7] : memref<128x128xf32, #tpu.memory_space<vmem>>, vector<128x128xf32>
    tpu.vector_store %arg5[%c0_6, %c0_7], %7 {strides = array<i32>} : memref<128x128xf32, #tpu.memory_space<vmem>>, vector<128x128xf32>,
    return
  }
  func.func @transform_0(%arg0: i32, %arg1: i32) -> (i32, i32) {
    %c0_i32 = arith.constant 0 : i32
    %c0_i32_0 = arith.constant 0 : i32
    return %arg0, %c0_i32 : i32, i32
  }
  func.func @transform_1(%arg0: i32, %arg1: i32) -> (i32, i32) {
    %c0_i32 = arith.constant 0 : i32
    %c0_i32_0 = arith.constant 0 : i32
    return %c0_i32, %arg1 : i32, i32
  }
  func.func @transform_2(%arg0: i32, %arg1: i32) -> (i32, i32) {
    %c0_i32 = arith.constant 0 : i32
    %c0_i32_0 = arith.constant 0 : i32
    return %c0_i32, %arg1 : i32, i32
  }
  func.func @transform_3(%arg0: i32, %arg1: i32) -> (i32, i32) {
    %c0_i32 = arith.constant 0 : i32
    return %arg0, %arg1 : i32, i32
  }
}

module attributes {stable_mosaic.version = 11 : i64} {
  func.func @_gemm_bias_act_kernel(%arg0: i32, %arg1: i32, %arg2: memref<32x2048xbf16, #tpu.memory_space<vmem>>, %arg3: memref<2048x256xbf16, #tpu.memory_space<vmem>>, %arg4: memref<1x256xf32, #tpu.memory_space<vmem>>, %arg5: memref<32x256xf32, #tpu.memory_space<vmem>>) attributes {dimension_semantics = [#tpu.dimension_semantics<parallel>, #tpu.dimension_semantics<parallel>], iteration_bounds = array<i64: 1, 1>, scalar_prefetch = 0 : i64, scratch_operands = 0 : i64, tpu.core_type = #tpu.core_type<tc>, window_params = [{transform_indices = @transform_0, window_bounds = array<i64: 32, 2048>}, {transform_indices = @transform_1, window_bounds = array<i64: 2048, 256>}, {transform_indices = @transform_2, window_bounds = array<i64: 1, 256>}, {transform_indices = @transform_3, window_bounds = array<i64: 32, 256>}]} {
    %c0 = arith.constant 0 : index
    %c0_0 = arith.constant 0 : index
    %0 = vector.load %arg2[%c0, %c0_0] : memref<32x2048xbf16, #tpu.memory_space<vmem>>, vector<32x2048xbf16>
    %c0_1 = arith.constant 0 : index
    %c0_2 = arith.constant 0 : index
    %1 = vector.load %arg3[%c0_1, %c0_2] : memref<2048x256xbf16, #tpu.memory_space<vmem>>, vector<2048x256xbf16>
    %cst = arith.constant dense<0.000000e+00> : vector<32x256xf32>
    %2 = tpu.matmul %0, %1, %cst {dimension_numbers = #tpu.dot_dimension_numbers<[1], [0], [0], [1], [0, 0, 1, 1], [], []>} : vector<32x2048xbf16>, vector<2048x256xbf16>, vector<32x256xf32> -> vector<32x256xf32>
    %c0_3 = arith.constant 0 : index
    %c0_4 = arith.constant 0 : index
    %3 = vector.load %arg4[%c0_3, %c0_4] : memref<1x256xf32, #tpu.memory_space<vmem>>, vector<1x256xf32>
    %4 = vector.broadcast %3 : vector<1x256xf32> to vector<32x256xf32>
    %5 = arith.addf %2, %4 : vector<32x256xf32>
    %cst_5 = arith.constant 0.000000e+00 : f32
    %6 = vector.broadcast %cst_5 : f32 to vector<32x256xf32>
    %7 = arith.maximumf %5, %6 : vector<32x256xf32>
    %c0_6 = arith.constant 0 : index
    %c0_7 = arith.constant 0 : index
    %8 = vector.load %arg5[%c0_6, %c0_7] : memref<32x256xf32, #tpu.memory_space<vmem>>, vector<32x256xf32>
    tpu.vector_store %arg5[%c0_6, %c0_7], %7 {strides = array<i32>} : memref<32x256xf32, #tpu.memory_space<vmem>>, vector<32x256xf32>,
    return
  }
  func.func @transform_0(%arg0: i32, %arg1: i32) -> (i32, i32) {
    %c0_i32 = arith.constant 0 : i32
    %c0_i32_0 = arith.constant 0 : i32
    return %arg0, %c0_i32 : i32, i32
  }
  func.func @transform_1(%arg0: i32, %arg1: i32) -> (i32, i32) {
    %c0_i32 = arith.constant 0 : i32
    %c0_i32_0 = arith.constant 0 : i32
    return %c0_i32, %arg1 : i32, i32
  }
  func.func @transform_2(%arg0: i32, %arg1: i32) -> (i32, i32) {
    %c0_i32 = arith.constant 0 : i32
    %c0_i32_0 = arith.constant 0 : i32
    return %c0_i32, %arg1 : i32, i32
  }
  func.func @transform_3(%arg0: i32, %arg1: i32) -> (i32, i32) {
    %c0_i32 = arith.constant 0 : i32
    return %arg0, %arg1 : i32, i32
  }
}

module attributes {stable_mosaic.version = 11 : i64} {
  func.func @_gemm_bias_act_kernel(%arg0: i32, %arg1: i32, %arg2: memref<16x2304xbf16, #tpu.memory_space<vmem>>, %arg3: memref<2304x128xbf16, #tpu.memory_space<vmem>>, %arg4: memref<1x128xf32, #tpu.memory_space<vmem>>, %arg5: memref<16x128xf32, #tpu.memory_space<vmem>>) attributes {dimension_semantics = [#tpu.dimension_semantics<parallel>, #tpu.dimension_semantics<parallel>], iteration_bounds = array<i64: 1, 1>, scalar_prefetch = 0 : i64, scratch_operands = 0 : i64, tpu.core_type = #tpu.core_type<tc>, window_params = [{transform_indices = @transform_0, window_bounds = array<i64: 16, 2304>}, {transform_indices = @transform_1, window_bounds = array<i64: 2304, 128>}, {transform_indices = @transform_2, window_bounds = array<i64: 1, 128>}, {transform_indices = @transform_3, window_bounds = array<i64: 16, 128>}]} {
    %c0 = arith.constant 0 : index
    %c0_0 = arith.constant 0 : index
    %0 = vector.load %arg2[%c0, %c0_0] : memref<16x2304xbf16, #tpu.memory_space<vmem>>, vector<16x2304xbf16>
    %c0_1 = arith.constant 0 : index
    %c0_2 = arith.constant 0 : index
    %1 = vector.load %arg3[%c0_1, %c0_2] : memref<2304x128xbf16, #tpu.memory_space<vmem>>, vector<2304x128xbf16>
    %cst = arith.constant dense<0.000000e+00> : vector<16x128xf32>
    %2 = tpu.matmul %0, %1, %cst {dimension_numbers = #tpu.dot_dimension_numbers<[1], [0], [0], [1], [0, 0, 1, 1], [], []>} : vector<16x2304xbf16>, vector<2304x128xbf16>, vector<16x128xf32> -> vector<16x128xf32>
    %c0_3 = arith.constant 0 : index
    %c0_4 = arith.constant 0 : index
    %3 = vector.load %arg4[%c0_3, %c0_4] : memref<1x128xf32, #tpu.memory_space<vmem>>, vector<1x128xf32>
    %4 = vector.broadcast %3 : vector<1x128xf32> to vector<16x128xf32>
    %5 = arith.addf %2, %4 : vector<16x128xf32>
    %c0_5 = arith.constant 0 : index
    %c0_6 = arith.constant 0 : index
    %6 = vector.load %arg5[%c0_5, %c0_6] : memref<16x128xf32, #tpu.memory_space<vmem>>, vector<16x128xf32>
    tpu.vector_store %arg5[%c0_5, %c0_6], %5 {strides = array<i32>} : memref<16x128xf32, #tpu.memory_space<vmem>>, vector<16x128xf32>,
    return
  }
  func.func @transform_0(%arg0: i32, %arg1: i32) -> (i32, i32) {
    %c0_i32 = arith.constant 0 : i32
    %c0_i32_0 = arith.constant 0 : i32
    return %arg0, %c0_i32 : i32, i32
  }
  func.func @transform_1(%arg0: i32, %arg1: i32) -> (i32, i32) {
    %c0_i32 = arith.constant 0 : i32
    %c0_i32_0 = arith.constant 0 : i32
    return %c0_i32, %arg1 : i32, i32
  }
  func.func @transform_2(%arg0: i32, %arg1: i32) -> (i32, i32) {
    %c0_i32 = arith.constant 0 : i32
    %c0_i32_0 = arith.constant 0 : i32
    return %c0_i32, %arg1 : i32, i32
  }
  func.func @transform_3(%arg0: i32, %arg1: i32) -> (i32, i32) {
    %c0_i32 = arith.constant 0 : i32
    return %arg0, %arg1 : i32, i32
  }
}

module attributes {stable_mosaic.version = 11 : i64} {
  func.func @_gemm_bias_act_kernel(%arg0: i32, %arg1: i32, %arg2: memref<16x128xbf16, #tpu.memory_space<vmem>>, %arg3: memref<128x256xbf16, #tpu.memory_space<vmem>>, %arg4: memref<1x256xf32, #tpu.memory_space<vmem>>, %arg5: memref<16x256xf32, #tpu.memory_space<vmem>>) attributes {dimension_semantics = [#tpu.dimension_semantics<parallel>, #tpu.dimension_semantics<parallel>], iteration_bounds = array<i64: 1, 9>, scalar_prefetch = 0 : i64, scratch_operands = 0 : i64, tpu.core_type = #tpu.core_type<tc>, window_params = [{transform_indices = @transform_0, window_bounds = array<i64: 16, 128>}, {transform_indices = @transform_1, window_bounds = array<i64: 128, 256>}, {transform_indices = @transform_2, window_bounds = array<i64: 1, 256>}, {transform_indices = @transform_3, window_bounds = array<i64: 16, 256>}]} {
    %c0 = arith.constant 0 : index
    %c0_0 = arith.constant 0 : index
    %0 = vector.load %arg2[%c0, %c0_0] : memref<16x128xbf16, #tpu.memory_space<vmem>>, vector<16x128xbf16>
    %c0_1 = arith.constant 0 : index
    %c0_2 = arith.constant 0 : index
    %1 = vector.load %arg3[%c0_1, %c0_2] : memref<128x256xbf16, #tpu.memory_space<vmem>>, vector<128x256xbf16>
    %cst = arith.constant dense<0.000000e+00> : vector<16x256xf32>
    %2 = tpu.matmul %0, %1, %cst {dimension_numbers = #tpu.dot_dimension_numbers<[1], [0], [0], [1], [0, 0, 1, 1], [], []>} : vector<16x128xbf16>, vector<128x256xbf16>, vector<16x256xf32> -> vector<16x256xf32>
    %c0_3 = arith.constant 0 : index
    %c0_4 = arith.constant 0 : index
    %3 = vector.load %arg4[%c0_3, %c0_4] : memref<1x256xf32, #tpu.memory_space<vmem>>, vector<1x256xf32>
    %4 = vector.broadcast %3 : vector<1x256xf32> to vector<16x256xf32>
    %5 = arith.addf %2, %4 : vector<16x256xf32>
    %c0_5 = arith.constant 0 : index
    %c0_6 = arith.constant 0 : index
    %6 = vector.load %arg5[%c0_5, %c0_6] : memref<16x256xf32, #tpu.memory_space<vmem>>, vector<16x256xf32>
    tpu.vector_store %arg5[%c0_5, %c0_6], %5 {strides = array<i32>} : memref<16x256xf32, #tpu.memory_space<vmem>>, vector<16x256xf32>,
    return
  }
  func.func @transform_0(%arg0: i32, %arg1: i32) -> (i32, i32) {
    %c0_i32 = arith.constant 0 : i32
    %c0_i32_0 = arith.constant 0 : i32
    return %arg0, %c0_i32 : i32, i32
  }
  func.func @transform_1(%arg0: i32, %arg1: i32) -> (i32, i32) {
    %c0_i32 = arith.constant 0 : i32
    %c0_i32_0 = arith.constant 0 : i32
    return %c0_i32, %arg1 : i32, i32
  }
  func.func @transform_2(%arg0: i32, %arg1: i32) -> (i32, i32) {
    %c0_i32 = arith.constant 0 : i32
    %c0_i32_0 = arith.constant 0 : i32
    return %c0_i32, %arg1 : i32, i32
  }
  func.func @transform_3(%arg0: i32, %arg1: i32) -> (i32, i32) {
    %c0_i32 = arith.constant 0 : i32
    return %arg0, %arg1 : i32, i32
  }
}

module attributes {stable_mosaic.version = 11 : i64} {
  func.func @_gemm_bias_act_kernel(%arg0: i32, %arg1: i32, %arg2: memref<16x2304xbf16, #tpu.memory_space<vmem>>, %arg3: memref<2304x256xbf16, #tpu.memory_space<vmem>>, %arg4: memref<1x256xf32, #tpu.memory_space<vmem>>, %arg5: memref<16x256xf32, #tpu.memory_space<vmem>>) attributes {dimension_semantics = [#tpu.dimension_semantics<parallel>, #tpu.dimension_semantics<parallel>], iteration_bounds = array<i64: 1, 9>, scalar_prefetch = 0 : i64, scratch_operands = 0 : i64, tpu.core_type = #tpu.core_type<tc>, window_params = [{transform_indices = @transform_0, window_bounds = array<i64: 16, 2304>}, {transform_indices = @transform_1, window_bounds = array<i64: 2304, 256>}, {transform_indices = @transform_2, window_bounds = array<i64: 1, 256>}, {transform_indices = @transform_3, window_bounds = array<i64: 16, 256>}]} {
    %c0 = arith.constant 0 : index
    %c0_0 = arith.constant 0 : index
    %0 = vector.load %arg2[%c0, %c0_0] : memref<16x2304xbf16, #tpu.memory_space<vmem>>, vector<16x2304xbf16>
    %c0_1 = arith.constant 0 : index
    %c0_2 = arith.constant 0 : index
    %1 = vector.load %arg3[%c0_1, %c0_2] : memref<2304x256xbf16, #tpu.memory_space<vmem>>, vector<2304x256xbf16>
    %cst = arith.constant dense<0.000000e+00> : vector<16x256xf32>
    %2 = tpu.matmul %0, %1, %cst {dimension_numbers = #tpu.dot_dimension_numbers<[1], [0], [0], [1], [0, 0, 1, 1], [], []>} : vector<16x2304xbf16>, vector<2304x256xbf16>, vector<16x256xf32> -> vector<16x256xf32>
    %c0_3 = arith.constant 0 : index
    %c0_4 = arith.constant 0 : index
    %3 = vector.load %arg4[%c0_3, %c0_4] : memref<1x256xf32, #tpu.memory_space<vmem>>, vector<1x256xf32>
    %4 = vector.broadcast %3 : vector<1x256xf32> to vector<16x256xf32>
    %5 = arith.addf %2, %4 : vector<16x256xf32>
    %cst_5 = arith.constant 0.000000e+00 : f32
    %6 = vector.broadcast %cst_5 : f32 to vector<16x256xf32>
    %7 = arith.maximumf %5, %6 : vector<16x256xf32>
    %c0_6 = arith.constant 0 : index
    %c0_7 = arith.constant 0 : index
    %8 = vector.load %arg5[%c0_6, %c0_7] : memref<16x256xf32, #tpu.memory_space<vmem>>, vector<16x256xf32>
    tpu.vector_store %arg5[%c0_6, %c0_7], %7 {strides = array<i32>} : memref<16x256xf32, #tpu.memory_space<vmem>>, vector<16x256xf32>,
    return
  }
  func.func @transform_0(%arg0: i32, %arg1: i32) -> (i32, i32) {
    %c0_i32 = arith.constant 0 : i32
    %c0_i32_0 = arith.constant 0 : i32
    return %arg0, %c0_i32 : i32, i32
  }
  func.func @transform_1(%arg0: i32, %arg1: i32) -> (i32, i32) {
    %c0_i32 = arith.constant 0 : i32
    %c0_i32_0 = arith.constant 0 : i32
    return %c0_i32, %arg1 : i32, i32
  }
  func.func @transform_2(%arg0: i32, %arg1: i32) -> (i32, i32) {
    %c0_i32 = arith.constant 0 : i32
    %c0_i32_0 = arith.constant 0 : i32
    return %c0_i32, %arg1 : i32, i32
  }
  func.func @transform_3(%arg0: i32, %arg1: i32) -> (i32, i32) {
    %c0_i32 = arith.constant 0 : i32
    return %arg0, %arg1 : i32, i32
  }
}

module attributes {stable_mosaic.version = 11 : i64} {
  func.func @_gemm_bias_act_kernel(%arg0: i32, %arg1: i32, %arg2: memref<32x256xbf16, #tpu.memory_space<vmem>>, %arg3: memref<256x256xbf16, #tpu.memory_space<vmem>>, %arg4: memref<1x256xf32, #tpu.memory_space<vmem>>, %arg5: memref<32x256xf32, #tpu.memory_space<vmem>>) attributes {dimension_semantics = [#tpu.dimension_semantics<parallel>, #tpu.dimension_semantics<parallel>], iteration_bounds = array<i64: 1, 8>, scalar_prefetch = 0 : i64, scratch_operands = 0 : i64, tpu.core_type = #tpu.core_type<tc>, window_params = [{transform_indices = @transform_0, window_bounds = array<i64: 32, 256>}, {transform_indices = @transform_1, window_bounds = array<i64: 256, 256>}, {transform_indices = @transform_2, window_bounds = array<i64: 1, 256>}, {transform_indices = @transform_3, window_bounds = array<i64: 32, 256>}]} {
    %c0 = arith.constant 0 : index
    %c0_0 = arith.constant 0 : index
    %0 = vector.load %arg2[%c0, %c0_0] : memref<32x256xbf16, #tpu.memory_space<vmem>>, vector<32x256xbf16>
    %c0_1 = arith.constant 0 : index
    %c0_2 = arith.constant 0 : index
    %1 = vector.load %arg3[%c0_1, %c0_2] : memref<256x256xbf16, #tpu.memory_space<vmem>>, vector<256x256xbf16>
    %cst = arith.constant dense<0.000000e+00> : vector<32x256xf32>
    %2 = tpu.matmul %0, %1, %cst {dimension_numbers = #tpu.dot_dimension_numbers<[1], [0], [0], [1], [0, 0, 1, 1], [], []>} : vector<32x256xbf16>, vector<256x256xbf16>, vector<32x256xf32> -> vector<32x256xf32>
    %c0_3 = arith.constant 0 : index
    %c0_4 = arith.constant 0 : index
    %3 = vector.load %arg4[%c0_3, %c0_4] : memref<1x256xf32, #tpu.memory_space<vmem>>, vector<1x256xf32>
    %4 = vector.broadcast %3 : vector<1x256xf32> to vector<32x256xf32>
    %5 = arith.addf %2, %4 : vector<32x256xf32>
    %c0_5 = arith.constant 0 : index
    %c0_6 = arith.constant 0 : index
    %6 = vector.load %arg5[%c0_5, %c0_6] : memref<32x256xf32, #tpu.memory_space<vmem>>, vector<32x256xf32>
    tpu.vector_store %arg5[%c0_5, %c0_6], %5 {strides = array<i32>} : memref<32x256xf32, #tpu.memory_space<vmem>>, vector<32x256xf32>,
    return
  }
  func.func @transform_0(%arg0: i32, %arg1: i32) -> (i32, i32) {
    %c0_i32 = arith.constant 0 : i32
    %c0_i32_0 = arith.constant 0 : i32
    return %arg0, %c0_i32 : i32, i32
  }
  func.func @transform_1(%arg0: i32, %arg1: i32) -> (i32, i32) {
    %c0_i32 = arith.constant 0 : i32
    %c0_i32_0 = arith.constant 0 : i32
    return %c0_i32, %arg1 : i32, i32
  }
  func.func @transform_2(%arg0: i32, %arg1: i32) -> (i32, i32) {
    %c0_i32 = arith.constant 0 : i32
    %c0_i32_0 = arith.constant 0 : i32
    return %c0_i32, %arg1 : i32, i32
  }
  func.func @transform_3(%arg0: i32, %arg1: i32) -> (i32, i32) {
    %c0_i32 = arith.constant 0 : i32
    return %arg0, %arg1 : i32, i32
  }
}

module attributes {stable_mosaic.version = 11 : i64} {
  func.func @_gemm_bias_act_kernel(%arg0: i32, %arg1: i32, %arg2: memref<128x128xbf16, #tpu.memory_space<vmem>>, %arg3: memref<128x256xbf16, #tpu.memory_space<vmem>>, %arg4: memref<1x256xf32, #tpu.memory_space<vmem>>, %arg5: memref<128x256xf32, #tpu.memory_space<vmem>>) attributes {dimension_semantics = [#tpu.dimension_semantics<parallel>, #tpu.dimension_semantics<parallel>], iteration_bounds = array<i64: 1, 4>, scalar_prefetch = 0 : i64, scratch_operands = 0 : i64, tpu.core_type = #tpu.core_type<tc>, window_params = [{transform_indices = @transform_0, window_bounds = array<i64: 128, 128>}, {transform_indices = @transform_1, window_bounds = array<i64: 128, 256>}, {transform_indices = @transform_2, window_bounds = array<i64: 1, 256>}, {transform_indices = @transform_3, window_bounds = array<i64: 128, 256>}]} {
    %c0 = arith.constant 0 : index
    %c0_0 = arith.constant 0 : index
    %0 = vector.load %arg2[%c0, %c0_0] : memref<128x128xbf16, #tpu.memory_space<vmem>>, vector<128x128xbf16>
    %c0_1 = arith.constant 0 : index
    %c0_2 = arith.constant 0 : index
    %1 = vector.load %arg3[%c0_1, %c0_2] : memref<128x256xbf16, #tpu.memory_space<vmem>>, vector<128x256xbf16>
    %cst = arith.constant dense<0.000000e+00> : vector<128x256xf32>
    %2 = tpu.matmul %0, %1, %cst {dimension_numbers = #tpu.dot_dimension_numbers<[1], [0], [0], [1], [0, 0, 1, 1], [], []>} : vector<128x128xbf16>, vector<128x256xbf16>, vector<128x256xf32> -> vector<128x256xf32>
    %c0_3 = arith.constant 0 : index
    %c0_4 = arith.constant 0 : index
    %3 = vector.load %arg4[%c0_3, %c0_4] : memref<1x256xf32, #tpu.memory_space<vmem>>, vector<1x256xf32>
    %4 = vector.broadcast %3 : vector<1x256xf32> to vector<128x256xf32>
    %5 = arith.addf %2, %4 : vector<128x256xf32>
    %c0_5 = arith.constant 0 : index
    %c0_6 = arith.constant 0 : index
    %6 = vector.load %arg5[%c0_5, %c0_6] : memref<128x256xf32, #tpu.memory_space<vmem>>, vector<128x256xf32>
    tpu.vector_store %arg5[%c0_5, %c0_6], %5 {strides = array<i32>} : memref<128x256xf32, #tpu.memory_space<vmem>>, vector<128x256xf32>,
    return
  }
  func.func @transform_0(%arg0: i32, %arg1: i32) -> (i32, i32) {
    %c0_i32 = arith.constant 0 : i32
    %c0_i32_0 = arith.constant 0 : i32
    return %arg0, %c0_i32 : i32, i32
  }
  func.func @transform_1(%arg0: i32, %arg1: i32) -> (i32, i32) {
    %c0_i32 = arith.constant 0 : i32
    %c0_i32_0 = arith.constant 0 : i32
    return %c0_i32, %arg1 : i32, i32
  }
  func.func @transform_2(%arg0: i32, %arg1: i32) -> (i32, i32) {
    %c0_i32 = arith.constant 0 : i32
    %c0_i32_0 = arith.constant 0 : i32
    return %c0_i32, %arg1 : i32, i32
  }
  func.func @transform_3(%arg0: i32, %arg1: i32) -> (i32, i32) {
    %c0_i32 = arith.constant 0 : i32
    return %arg0, %arg1 : i32, i32
  }
}

module attributes {stable_mosaic.version = 11 : i64} {
  func.func @_gemm_bias_act_kernel(%arg0: i32, %arg1: i32, %arg2: memref<256x128xbf16, #tpu.memory_space<vmem>>, %arg3: memref<128x128xbf16, #tpu.memory_space<vmem>>, %arg4: memref<1x128xf32, #tpu.memory_space<vmem>>, %arg5: memref<256x128xf32, #tpu.memory_space<vmem>>) attributes {dimension_semantics = [#tpu.dimension_semantics<parallel>, #tpu.dimension_semantics<parallel>], iteration_bounds = array<i64: 3, 9>, scalar_prefetch = 0 : i64, scratch_operands = 0 : i64, tpu.core_type = #tpu.core_type<tc>, window_params = [{transform_indices = @transform_0, window_bounds = array<i64: 256, 128>}, {transform_indices = @transform_1, window_bounds = array<i64: 128, 128>}, {transform_indices = @transform_2, window_bounds = array<i64: 1, 128>}, {transform_indices = @transform_3, window_bounds = array<i64: 256, 128>}]} {
    %c0 = arith.constant 0 : index
    %c0_0 = arith.constant 0 : index
    %0 = vector.load %arg2[%c0, %c0_0] : memref<256x128xbf16, #tpu.memory_space<vmem>>, vector<256x128xbf16>
    %c0_1 = arith.constant 0 : index
    %c0_2 = arith.constant 0 : index
    %1 = vector.load %arg3[%c0_1, %c0_2] : memref<128x128xbf16, #tpu.memory_space<vmem>>, vector<128x128xbf16>
    %cst = arith.constant dense<0.000000e+00> : vector<256x128xf32>
    %2 = tpu.matmul %0, %1, %cst {dimension_numbers = #tpu.dot_dimension_numbers<[1], [0], [0], [1], [0, 0, 1, 1], [], []>} : vector<256x128xbf16>, vector<128x128xbf16>, vector<256x128xf32> -> vector<256x128xf32>
    %c0_3 = arith.constant 0 : index
    %c0_4 = arith.constant 0 : index
    %3 = vector.load %arg4[%c0_3, %c0_4] : memref<1x128xf32, #tpu.memory_space<vmem>>, vector<1x128xf32>
    %4 = vector.broadcast %3 : vector<1x128xf32> to vector<256x128xf32>
    %5 = arith.addf %2, %4 : vector<256x128xf32>
    %c0_5 = arith.constant 0 : index
    %c0_6 = arith.constant 0 : index
    %6 = vector.load %arg5[%c0_5, %c0_6] : memref<256x128xf32, #tpu.memory_space<vmem>>, vector<256x128xf32>
    tpu.vector_store %arg5[%c0_5, %c0_6], %5 {strides = array<i32>} : memref<256x128xf32, #tpu.memory_space<vmem>>, vector<256x128xf32>,
    return
  }
  func.func @transform_0(%arg0: i32, %arg1: i32) -> (i32, i32) {
    %c0_i32 = arith.constant 0 : i32
    %c0_i32_0 = arith.constant 0 : i32
    return %arg0, %c0_i32 : i32, i32
  }
  func.func @transform_1(%arg0: i32, %arg1: i32) -> (i32, i32) {
    %c0_i32 = arith.constant 0 : i32
    %c0_i32_0 = arith.constant 0 : i32
    return %c0_i32, %arg1 : i32, i32
  }
  func.func @transform_2(%arg0: i32, %arg1: i32) -> (i32, i32) {
    %c0_i32 = arith.constant 0 : i32
    %c0_i32_0 = arith.constant 0 : i32
    return %c0_i32, %arg1 : i32, i32
  }
  func.func @transform_3(%arg0: i32, %arg1: i32) -> (i32, i32) {
    %c0_i32 = arith.constant 0 : i32
    return %arg0, %arg1 : i32, i32
  }
}

module attributes {stable_mosaic.version = 11 : i64} {
  func.func @_gemm_bias_act_kernel(%arg0: i32, %arg1: i32, %arg2: memref<256x128xbf16, #tpu.memory_space<vmem>>, %arg3: memref<128x128xbf16, #tpu.memory_space<vmem>>, %arg4: memref<1x128xf32, #tpu.memory_space<vmem>>, %arg5: memref<256x128xf32, #tpu.memory_space<vmem>>) attributes {dimension_semantics = [#tpu.dimension_semantics<parallel>, #tpu.dimension_semantics<parallel>], iteration_bounds = array<i64: 13, 1>, scalar_prefetch = 0 : i64, scratch_operands = 0 : i64, tpu.core_type = #tpu.core_type<tc>, window_params = [{transform_indices = @transform_0, window_bounds = array<i64: 256, 128>}, {transform_indices = @transform_1, window_bounds = array<i64: 128, 128>}, {transform_indices = @transform_2, window_bounds = array<i64: 1, 128>}, {transform_indices = @transform_3, window_bounds = array<i64: 256, 128>}]} {
    %c0 = arith.constant 0 : index
    %c0_0 = arith.constant 0 : index
    %0 = vector.load %arg2[%c0, %c0_0] : memref<256x128xbf16, #tpu.memory_space<vmem>>, vector<256x128xbf16>
    %c0_1 = arith.constant 0 : index
    %c0_2 = arith.constant 0 : index
    %1 = vector.load %arg3[%c0_1, %c0_2] : memref<128x128xbf16, #tpu.memory_space<vmem>>, vector<128x128xbf16>
    %cst = arith.constant dense<0.000000e+00> : vector<256x128xf32>
    %2 = tpu.matmul %0, %1, %cst {dimension_numbers = #tpu.dot_dimension_numbers<[1], [0], [0], [1], [0, 0, 1, 1], [], []>} : vector<256x128xbf16>, vector<128x128xbf16>, vector<256x128xf32> -> vector<256x128xf32>
    %c0_3 = arith.constant 0 : index
    %c0_4 = arith.constant 0 : index
    %3 = vector.load %arg4[%c0_3, %c0_4] : memref<1x128xf32, #tpu.memory_space<vmem>>, vector<1x128xf32>
    %4 = vector.broadcast %3 : vector<1x128xf32> to vector<256x128xf32>
    %5 = arith.addf %2, %4 : vector<256x128xf32>
    %c0_5 = arith.constant 0 : index
    %c0_6 = arith.constant 0 : index
    %6 = vector.load %arg5[%c0_5, %c0_6] : memref<256x128xf32, #tpu.memory_space<vmem>>, vector<256x128xf32>
    tpu.vector_store %arg5[%c0_5, %c0_6], %5 {strides = array<i32>} : memref<256x128xf32, #tpu.memory_space<vmem>>, vector<256x128xf32>,
    return
  }
  func.func @transform_0(%arg0: i32, %arg1: i32) -> (i32, i32) {
    %c0_i32 = arith.constant 0 : i32
    %c0_i32_0 = arith.constant 0 : i32
    return %arg0, %c0_i32 : i32, i32
  }
  func.func @transform_1(%arg0: i32, %arg1: i32) -> (i32, i32) {
    %c0_i32 = arith.constant 0 : i32
    %c0_i32_0 = arith.constant 0 : i32
    return %c0_i32, %arg1 : i32, i32
  }
  func.func @transform_2(%arg0: i32, %arg1: i32) -> (i32, i32) {
    %c0_i32 = arith.constant 0 : i32
    %c0_i32_0 = arith.constant 0 : i32
    return %c0_i32, %arg1 : i32, i32
  }
  func.func @transform_3(%arg0: i32, %arg1: i32) -> (i32, i32) {
    %c0_i32 = arith.constant 0 : i32
    return %arg0, %arg1 : i32, i32
  }
}

</mosaic_0001>

<bundles_post_ra>
// kernel: vae_forward.11
= control target key start
LH: loop header
LB: loop body
LE: loop exit
PB: predicated region body
PF: predicated region fallthrough
CT: control target
= control target key end

     0   :  { %s970_s12 = smov 0   ;;  %s972_s13 = smov 0   ;;  %s1120_s0 = inlined_call_operand.vmem [shape: bf16[3072,128], index: 0, kind: input, shape index: {}]   ;;  %s1121_s1 = inlined_call_operand.vmem [shape: bf16[128,128], index: 1, kind: input, shape index: {}]   ;;  %s1122_s2 = inlined_call_operand.vmem [shape: f32[1,128], index: 2, kind: input, shape index: {}]   ;;  %s1123_s3 = inlined_call_operand.vmem [shape: f32[3072,128], index: 3, kind: output, shape index: {}]  }
   0x1   :  { %s974_s14 = smov 0  }
   0x2 LB: > { %s25_s15 = sadd.s32 1, %s944_s13  ;;  %p758_p0 = scmp.ge.s32.totalorder %s948_s14, 1  ;;  %s948_s14 = sphi %s974_s14, %s13_s14   ;;  %s944_s13 = sphi %s972_s13, %s1125_s13   ;;  %s940_s12 = sphi %s970_s12, %s1124_s12  }
   0x3   : > { %p27_p1 = scmp.ge.s32.totalorder %s25_s15, 12  ;;  %p169_p2 = scmp.lt.s32.totalorder %s948_s14, 13 }
   0x5   : > { %s1127_s15 = smov (%p27_p1, %s25_s15), 0  ;;  %p170_p3 = pnand %p758_p0, %p169_p2 }
   0x6   : > { %v902_v0 = vld [vmem:[%s1121_s1] sm:$0xff] (!%p170_p3)   ;;  %s759_s18 = sshll.u32 (!%p170_p3), %s940_s12, 5  ;;  %v903_v1 = vld [vmem:[%s1121_s1 + $0x8] sm:$0xff] (!%p170_p3)   ;;  %v904_v2 = vld [vmem:[%s1121_s1 + $0x10] sm:$0xff] (!%p170_p3)  }
   0x7   : > { %173 = sbr.rel (%p170_p3) target bundleno = 283 (0x11b), region = 32  ;;  %p204_p4 = scmp.lt.s32.totalorder (!%p170_p3), %s759_s18, 383  ;;  %814 = vmatprep.subr.bf16.mxu0 (!%p170_p3), %v902_v0  ;;  %862 = vmatprep.subr.bf16.mxu1 (!%p170_p3), %v902_v0  ;;  %v905_v3 = vld [vmem:[%s1121_s1 + $0x18] sm:$0xff] (!%p170_p3)   ;;  %v906_v6 = vld [vmem:[%s1121_s1 + $0x20] sm:$0xff] (!%p170_p3)   ;;  %v907_v7 = vld [vmem:[%s1121_s1 + $0x28] sm:$0xff] (!%p170_p3)  }
   0x8   : > { %815 = vmatpush3.bf16.msra.mxu0 (!%p170_p3), %v902_v0  ;;  %870 = vmatpush3.bf16.msra.mxu1 (!%p170_p3), %v902_v0  ;;  %v908_v8 = vld [vmem:[%s1121_s1 + $0x30] sm:$0xff] (!%p170_p3)   ;;  %v909_v9 = vld [vmem:[%s1121_s1 + $0x38] sm:$0xff] (!%p170_p3)   ;;  %v1039_v24 = vld [vmem:[%s1122_s2] ss:$0 sm:$0xff] (!%p170_p3) }
   0x9   : > { %816 = vmatprep.subr.bf16.mxu0 (!%p170_p3), %v903_v1  ;;  %863 = vmatprep.subr.bf16.mxu1 (!%p170_p3), %v903_v1 }
   0xc   : > { %817 = vmatpush3.bf16.msra.mxu0 (!%p170_p3), %v903_v1  ;;  %871 = vmatpush3.bf16.msra.mxu1 (!%p170_p3), %v903_v1 }
   0xd   : > { %818 = vmatprep.subr.bf16.mxu0 (!%p170_p3), %v904_v2  ;;  %864 = vmatprep.subr.bf16.mxu1 (!%p170_p3), %v904_v2 }
   0xe   : > { %s1129_s18 = smov (!%p204_p4, %s759_s18), 383 }
   0xf   : > { %s760_s23 = sshll.u32 %s1129_s18, 2  ;;  %s762_s12 = sshll.u32 %s1129_s18, 3 }
  0x10   : > { %s1003_s26 = scalar_lea.vmem %s1120_s0, %s760_s23  ;;  %819 = vmatpush3.bf16.msra.mxu0 %v904_v2  ;;  %872 = vmatpush3.bf16.msra.mxu1 %v904_v2  ;;  %s1047_s19 = scalar_lea.vmem %s1123_s3, %s762_s12 }
  0x11   : > { %v910_v4 = vld [vmem:[%s1003_s26] sm:$0xff]   ;;  %820 = vmatprep.subr.bf16.mxu0 %v905_v3  ;;  %865 = vmatprep.subr.bf16.mxu1 %v905_v3  ;;  %v912_v10 = vld [vmem:[%s1003_s26 + $0x8] sm:$0xff]   ;;  %v914_v12 = vld [vmem:[%s1003_s26 + $0x10] sm:$0xff]  }
  0x12   : > { %v911_v5 = vld [vmem:[%s1003_s26 + $0x40] sm:$0xff]   ;;  %830 = vmatprep.mubr.bf16.mxu0 %v910_v4  ;;  %v913_v11 = vld [vmem:[%s1003_s26 + $0x48] sm:$0xff]   ;;  %v915_v13 = vld [vmem:[%s1003_s26 + $0x50] sm:$0xff]  }
  0x13   : > { %846 = vmatprep.mubr.bf16.mxu1 %v911_v5  ;;  %v916_v14 = vld [vmem:[%s1003_s26 + $0x18] sm:$0xff]   ;;  %v918_v16 = vld [vmem:[%s1003_s26 + $0x20] sm:$0xff]   ;;  %v920_v18 = vld [vmem:[%s1003_s26 + $0x28] sm:$0xff]  }
  0x14   : > { %821 = vmatpush3.bf16.msra.mxu0 %v905_v3  ;;  %873 = vmatpush3.bf16.msra.mxu1 %v905_v3  ;;  %v917_v15 = vld [vmem:[%s1003_s26 + $0x58] sm:$0xff]   ;;  %v919_v17 = vld [vmem:[%s1003_s26 + $0x60] sm:$0xff]   ;;  %v921_v19 = vld [vmem:[%s1003_s26 + $0x68] sm:$0xff]  }
  0x15   : > { %822 = vmatprep.subr.bf16.mxu0 %v906_v6  ;;  %866 = vmatprep.subr.bf16.mxu1 %v906_v6  ;;  %v922_v20 = vld [vmem:[%s1003_s26 + $0x30] sm:$0xff]   ;;  %v924_v22 = vld [vmem:[%s1003_s26 + $0x38] sm:$0xff]  }
  0x16   : > { %v923_v21 = vld [vmem:[%s1003_s26 + $0x70] sm:$0xff]   ;;  %v925_v23 = vld [vmem:[%s1003_s26 + $0x78] sm:$0xff]  }
  0x18   : > { %823 = vmatpush3.bf16.msra.mxu0 %v906_v6  ;;  %874 = vmatpush3.bf16.msra.mxu1 %v906_v6 }
  0x19   : > { %824 = vmatprep.subr.bf16.mxu0 %v907_v7  ;;  %867 = vmatprep.subr.bf16.mxu1 %v907_v7 }
  0x1c   : > { %825 = vmatpush3.bf16.msra.mxu0 %v907_v7  ;;  %875 = vmatpush3.bf16.msra.mxu1 %v907_v7 }
  0x1d   : > { %826 = vmatprep.subr.bf16.mxu0 %v908_v8  ;;  %868 = vmatprep.subr.bf16.mxu1 %v908_v8 }
  0x20   : > { %827 = vmatpush3.bf16.msra.mxu0 %v908_v8  ;;  %876 = vmatpush3.bf16.msra.mxu1 %v908_v8 }
  0x21   : > { %828 = vmatprep.subr.bf16.mxu0 %v909_v9  ;;  %869 = vmatprep.subr.bf16.mxu1 %v909_v9 }
  0x24   : > { %829 = vmatpush3.bf16.msra.mxu0 %v909_v9  ;;  %877 = vmatpush3.bf16.msra.mxu1 %v909_v9 }
  0x27   : > { %831 = vmatmul.mubr.bf16.vlgmr.msra.gmra.mrb[0].mxu0 %v912_v10  ;;  %847 = vmatmul.mubr.bf16.vlgmr.msra.gmra.mrb[0].mxu1 %v913_v11 }
  0x28   : > { %834 = vmatprep.mubr.bf16.mxu0 %v914_v12  ;;  %850 = vmatprep.mubr.bf16.mxu1 %v915_v13 }
  0x2f   : > { %835 = vmatmul.mubr.bf16.gmra.mrb[4].mxu0 %v916_v14  ;;  %851 = vmatmul.mubr.bf16.gmra.mrb[4].mxu1 %v917_v15 }
  0x30   : > { %838 = vmatprep.mubr.bf16.mxu0 %v918_v16  ;;  %854 = vmatprep.mubr.bf16.mxu1 %v919_v17 }
  0x37   : > { %839 = vmatmul.mubr.bf16.gmra.mrb[8].mxu0 %v920_v18  ;;  %855 = vmatmul.mubr.bf16.gmra.mrb[8].mxu1 %v921_v19 }
  0x38   : > { %842 = vmatprep.mubr.bf16.mxu0 %v922_v20  ;;  %858 = vmatprep.mubr.bf16.mxu1 %v923_v21 }
  0x3f   : > { %843 = vmatmul.mubr.bf16.gmra.mrb[12].mxu0 %v924_v22  ;;  %859 = vmatmul.mubr.bf16.gmra.mrb[12].mxu1 %v925_v23 }
  0xfa   : > { %v832_v25 = vpop.f32.mrb[0].mxu0  ;;  %v848_v26 = vpop.f32.mrb[0].mxu1 }
  0xfb   : > { %v468_v27 = vadd.f32 %v832_v25, %v1039_v24  ;;  %v532_v28 = vadd.f32 %v848_v26, %v1039_v24  ;;  %v459_v29 = vpop.f32.mrb[1].mxu0  ;;  %v523_v30 = vpop.f32.mrb[1].mxu1 }
  0xfc   : > { %v460_v31 = vadd.f32 %v1039_v24, %v459_v29  ;;  %v524_v32 = vadd.f32 %v1039_v24, %v523_v30  ;;  %v833_v33 = vpop.f32.mrb[2].mxu0  ;;  %v849_v34 = vpop.f32.mrb[2].mxu1 }
  0xfd   : > { %v588_v35 = vmax.f32 %v468_v27, 0.0  ;;  %v604_v36 = vmax.f32 %v532_v28, 0.0  ;;  %v471_v37 = vadd.f32 %v833_v33, %v1039_v24  ;;  %v535_v38 = vadd.f32 %v849_v34, %v1039_v24  ;;  %v462_v39 = vpop.f32.mrb[3].mxu0  ;;  %v526_v40 = vpop.f32.mrb[3].mxu1 }
  0xfe   : > { %v586_v41 = vmax.f32 %v460_v31, 0.0  ;;  %v602_v42 = vmax.f32 %v524_v32, 0.0  ;;  %v463_v43 = vadd.f32 %v1039_v24, %v462_v39  ;;  %v527_v44 = vadd.f32 %v1039_v24, %v526_v40 }
  0xff   : > { %620 = vst [vmem:[%s1047_s19 + $0x10] sm:$0xff] %v588_v35  ;;  %636 = vst [vmem:[%s1047_s19 + $0x90] sm:$0xff] %v604_v36  ;;  %v589_v45 = vmax.f32 %v471_v37, 0.0  ;;  %v605_v46 = vmax.f32 %v535_v38, 0.0 }
 0x100   : > { %618 = vst [vmem:[%s1047_s19] sm:$0xff] %v586_v41  ;;  %634 = vst [vmem:[%s1047_s19 + $0x80] sm:$0xff] %v602_v42  ;;  %v587_v47 = vmax.f32 %v463_v43, 0.0  ;;  %v603_v48 = vmax.f32 %v527_v44, 0.0 }
 0x101   : > { %621 = vst [vmem:[%s1047_s19 + $0x18] sm:$0xff] %v589_v45  ;;  %637 = vst [vmem:[%s1047_s19 + $0x98] sm:$0xff] %v605_v46 }
 0x102   : > { %619 = vst [vmem:[%s1047_s19 + $0x8] sm:$0xff] %v587_v47  ;;  %635 = vst [vmem:[%s1047_s19 + $0x88] sm:$0xff] %v603_v48  ;;  %v836_v49 = vpop.f32.mrb[4].mxu0  ;;  %v852_v50 = vpop.f32.mrb[4].mxu1 }
 0x103   : > { %v484_v51 = vadd.f32 %v836_v49, %v1039_v24  ;;  %v548_v52 = vadd.f32 %v852_v50, %v1039_v24  ;;  %v475_v53 = vpop.f32.mrb[5].mxu0  ;;  %v539_v54 = vpop.f32.mrb[5].mxu1 }
 0x104   : > { %v476_v55 = vadd.f32 %v1039_v24, %v475_v53  ;;  %v540_v56 = vadd.f32 %v1039_v24, %v539_v54  ;;  %v837_v57 = vpop.f32.mrb[6].mxu0  ;;  %v853_v58 = vpop.f32.mrb[6].mxu1 }
 0x105   : > { %v592_v59 = vmax.f32 %v484_v51, 0.0  ;;  %v608_v60 = vmax.f32 %v548_v52, 0.0  ;;  %v487_v61 = vadd.f32 %v837_v57, %v1039_v24  ;;  %v551_v62 = vadd.f32 %v853_v58, %v1039_v24  ;;  %v478_v63 = vpop.f32.mrb[7].mxu0  ;;  %v542_v0 = vpop.f32.mrb[7].mxu1 }
 0x106   : > { %v590_v1 = vmax.f32 %v476_v55, 0.0  ;;  %v606_v2 = vmax.f32 %v540_v56, 0.0  ;;  %v479_v3 = vadd.f32 %v1039_v24, %v478_v63  ;;  %v543_v4 = vadd.f32 %v1039_v24, %v542_v0 }
 0x107   : > { %624 = vst [vmem:[%s1047_s19 + $0x30] sm:$0xff] %v592_v59  ;;  %640 = vst [vmem:[%s1047_s19 + $0xb0] sm:$0xff] %v608_v60  ;;  %v593_v5 = vmax.f32 %v487_v61, 0.0  ;;  %v609_v6 = vmax.f32 %v551_v62, 0.0 }
 0x108   : > { %622 = vst [vmem:[%s1047_s19 + $0x20] sm:$0xff] %v590_v1  ;;  %638 = vst [vmem:[%s1047_s19 + $0xa0] sm:$0xff] %v606_v2  ;;  %v591_v7 = vmax.f32 %v479_v3, 0.0  ;;  %v607_v8 = vmax.f32 %v543_v4, 0.0 }
 0x109   : > { %625 = vst [vmem:[%s1047_s19 + $0x38] sm:$0xff] %v593_v5  ;;  %641 = vst [vmem:[%s1047_s19 + $0xb8] sm:$0xff] %v609_v6 }
 0x10a   : > { %623 = vst [vmem:[%s1047_s19 + $0x28] sm:$0xff] %v591_v7  ;;  %639 = vst [vmem:[%s1047_s19 + $0xa8] sm:$0xff] %v607_v8  ;;  %v840_v9 = vpop.f32.mrb[8].mxu0  ;;  %v856_v10 = vpop.f32.mrb[8].mxu1 }
 0x10b   : > { %v500_v11 = vadd.f32 %v840_v9, %v1039_v24  ;;  %v564_v12 = vadd.f32 %v856_v10, %v1039_v24  ;;  %v491_v13 = vpop.f32.mrb[9].mxu0  ;;  %v555_v14 = vpop.f32.mrb[9].mxu1 }
 0x10c   : > { %v492_v15 = vadd.f32 %v1039_v24, %v491_v13  ;;  %v556_v16 = vadd.f32 %v1039_v24, %v555_v14  ;;  %v841_v17 = vpop.f32.mrb[10].mxu0  ;;  %v857_v18 = vpop.f32.mrb[10].mxu1 }
 0x10d   : > { %v596_v19 = vmax.f32 %v500_v11, 0.0  ;;  %v612_v20 = vmax.f32 %v564_v12, 0.0  ;;  %v503_v21 = vadd.f32 %v841_v17, %v1039_v24  ;;  %v567_v22 = vadd.f32 %v857_v18, %v1039_v24  ;;  %v494_v23 = vpop.f32.mrb[11].mxu0  ;;  %v558_v25 = vpop.f32.mrb[11].mxu1 }
 0x10e   : > { %v594_v26 = vmax.f32 %v492_v15, 0.0  ;;  %v610_v27 = vmax.f32 %v556_v16, 0.0  ;;  %v495_v28 = vadd.f32 %v1039_v24, %v494_v23  ;;  %v559_v29 = vadd.f32 %v1039_v24, %v558_v25 }
 0x10f   : > { %628 = vst [vmem:[%s1047_s19 + $0x50] sm:$0xff] %v596_v19  ;;  %644 = vst [vmem:[%s1047_s19 + $0xd0] sm:$0xff] %v612_v20  ;;  %v597_v30 = vmax.f32 %v503_v21, 0.0  ;;  %v613_v31 = vmax.f32 %v567_v22, 0.0 }
 0x110   : > { %626 = vst [vmem:[%s1047_s19 + $0x40] sm:$0xff] %v594_v26  ;;  %642 = vst [vmem:[%s1047_s19 + $0xc0] sm:$0xff] %v610_v27  ;;  %v595_v32 = vmax.f32 %v495_v28, 0.0  ;;  %v611_v33 = vmax.f32 %v559_v29, 0.0 }
 0x111   : > { %629 = vst [vmem:[%s1047_s19 + $0x58] sm:$0xff] %v597_v30  ;;  %645 = vst [vmem:[%s1047_s19 + $0xd8] sm:$0xff] %v613_v31 }
 0x112   : > { %627 = vst [vmem:[%s1047_s19 + $0x48] sm:$0xff] %v595_v32  ;;  %643 = vst [vmem:[%s1047_s19 + $0xc8] sm:$0xff] %v611_v33  ;;  %v844_v34 = vpop.f32.mrb[12].mxu0  ;;  %v860_v35 = vpop.f32.mrb[12].mxu1 }
 0x113   : > { %v516_v36 = vadd.f32 %v844_v34, %v1039_v24  ;;  %v580_v37 = vadd.f32 %v860_v35, %v1039_v24  ;;  %v507_v38 = vpop.f32.mrb[13].mxu0  ;;  %v571_v39 = vpop.f32.mrb[13].mxu1 }
 0x114   : > { %v508_v40 = vadd.f32 %v1039_v24, %v507_v38  ;;  %v572_v41 = vadd.f32 %v1039_v24, %v571_v39  ;;  %v845_v42 = vpop.f32.mrb[14].mxu0  ;;  %v861_v43 = vpop.f32.mrb[14].mxu1 }
 0x115   : > { %v600_v44 = vmax.f32 %v516_v36, 0.0  ;;  %v616_v45 = vmax.f32 %v580_v37, 0.0  ;;  %v519_v46 = vadd.f32 %v845_v42, %v1039_v24  ;;  %v583_v47 = vadd.f32 %v861_v43, %v1039_v24  ;;  %v510_v48 = vpop.f32.mrb[15].mxu0  ;;  %v574_v49 = vpop.f32.mrb[15].mxu1 }
 0x116   : > { %v598_v50 = vmax.f32 %v508_v40, 0.0  ;;  %v614_v51 = vmax.f32 %v572_v41, 0.0  ;;  %v511_v52 = vadd.f32 %v1039_v24, %v510_v48  ;;  %v575_v53 = vadd.f32 %v1039_v24, %v574_v49 }
 0x117   : > { %632 = vst [vmem:[%s1047_s19 + $0x70] sm:$0xff] %v600_v44  ;;  %648 = vst [vmem:[%s1047_s19 + $0xf0] sm:$0xff] %v616_v45  ;;  %v601_v54 = vmax.f32 %v519_v46, 0.0  ;;  %v617_v55 = vmax.f32 %v583_v47, 0.0 }
 0x118   : > { %630 = vst [vmem:[%s1047_s19 + $0x60] sm:$0xff] %v598_v50  ;;  %646 = vst [vmem:[%s1047_s19 + $0xe0] sm:$0xff] %v614_v51  ;;  %v599_v56 = vmax.f32 %v511_v52, 0.0  ;;  %v615_v57 = vmax.f32 %v575_v53, 0.0 }
 0x119   : > { %633 = vst [vmem:[%s1047_s19 + $0x78] sm:$0xff] %v601_v54  ;;  %649 = vst [vmem:[%s1047_s19 + $0xf8] sm:$0xff] %v617_v55 }
 0x11a   : > { %631 = vst [vmem:[%s1047_s19 + $0x68] sm:$0xff] %v599_v56  ;;  %647 = vst [vmem:[%s1047_s19 + $0xe8] sm:$0xff] %v615_v57 }
 0x11b PF: > { %s13_s14 = sadd.s32 1, %s948_s14   ;;  %s1124_s12 = smov %s944_s13 }
 0x11c   : > { %p10_p5 = scmp.ge.s32.totalorder %s13_s14, 14   ;;  %s1125_s13 = smov %s1127_s15 }
 0x11e   :  { %12 = sbr.rel (!%p10_p5) target bundleno = 2 (0x2), region = 68 }

// kernel: vae_forward.12
= control target key start
LH: loop header
LB: loop body
LE: loop exit
PB: predicated region body
PF: predicated region fallthrough
CT: control target
= control target key end

     0   :  { %s1896_s12 = smov 0   ;;  %s1898_s13 = smov 0   ;;  %s2169_s0 = inlined_call_operand.vmem [shape: bf16[768,512], index: 0, kind: input, shape index: {}]   ;;  %s2170_s1 = inlined_call_operand.vmem [shape: bf16[512,128], index: 1, kind: input, shape index: {}]   ;;  %s2171_s2 = inlined_call_operand.vmem [shape: f32[1,128], index: 2, kind: input, shape index: {}]   ;;  %s2172_s3 = inlined_call_operand.vmem [shape: f32[768,128], index: 3, kind: output, shape index: {}]  }
   0x1   :  { %s1900_s14 = smov 0  }
   0x2 LB: > { %s25_s15 = sadd.s32 1, %s1870_s13  ;;  %p1370_p0 = scmp.ge.s32.totalorder %s1874_s14, 1  ;;  %s1874_s14 = sphi %s1900_s14, %s13_s14   ;;  %s1870_s13 = sphi %s1898_s13, %s2174_s13   ;;  %s1866_s12 = sphi %s1896_s12, %s2173_s12  }
   0x3   : > { %p27_p1 = scmp.ge.s32.totalorder %s25_s15, 3  ;;  %p170_p2 = scmp.lt.s32.totalorder %s1874_s14, 4 }
   0x5   : > { %s2176_s15 = smov (%p27_p1, %s25_s15), 0  ;;  %p171_p3 = pnand %p1370_p0, %p170_p2 }
   0x6   : > { %v1724_v0 = vld [vmem:[%s2170_s1 + $0x40] sm:$0xff] (!%p171_p3)   ;;  %v1728_v4 = vld [vmem:[%s2170_s1 + $0x48] sm:$0xff] (!%p171_p3)   ;;  %v1732_v8 = vld [vmem:[%s2170_s1 + $0x50] sm:$0xff] (!%p171_p3)   ;;  %s1371_s25 = sshll.u32 (!%p171_p3), %s1866_s12, 5 }
   0x7   : > { %174 = sbr.rel (%p171_p3) target bundleno = 384 (0x180), region = 32  ;;  %v1725_v1 = vld [vmem:[%s2170_s1 + $0xc0] sm:$0xff] (!%p171_p3)   ;;  %1476 = vmatprep.subr.bf16.mxu0 (!%p171_p3), %v1724_v0  ;;  %v1729_v5 = vld [vmem:[%s2170_s1 + $0xc8] sm:$0xff] (!%p171_p3)   ;;  %v1733_v9 = vld [vmem:[%s2170_s1 + $0xd0] sm:$0xff] (!%p171_p3)   ;;  %p206_p4 = scmp.lt.s32.totalorder (!%p171_p3), %s1371_s25, 95 }
   0x8   : > { %v1726_v2 = vld [vmem:[%s2170_s1] sm:$0xff] (!%p171_p3)   ;;  %1588 = vmatprep.subr.bf16.mxu1 (!%p171_p3), %v1725_v1  ;;  %v1730_v6 = vld [vmem:[%s2170_s1 + $0x8] sm:$0xff] (!%p171_p3)   ;;  %v1734_v10 = vld [vmem:[%s2170_s1 + $0x10] sm:$0xff] (!%p171_p3)  }
   0x9   : > { %v1727_v3 = vld [vmem:[%s2170_s1 + $0x80] sm:$0xff] (!%p171_p3)   ;;  %1477 = vmatpush3.bf16.msra.mxu0 (!%p171_p3), %v1726_v2  ;;  %v1731_v7 = vld [vmem:[%s2170_s1 + $0x88] sm:$0xff] (!%p171_p3)   ;;  %v1735_v11 = vld [vmem:[%s2170_s1 + $0x90] sm:$0xff] (!%p171_p3)  }
   0xa   : > { %1589 = vmatpush3.bf16.msra.mxu1 (!%p171_p3), %v1727_v3  ;;  %1478 = vmatprep.subr.bf16.mxu0 (!%p171_p3), %v1728_v4  ;;  %v1736_v12 = vld [vmem:[%s2170_s1 + $0x58] sm:$0xff] (!%p171_p3)   ;;  %v1740_v16 = vld [vmem:[%s2170_s1 + $0x60] sm:$0xff] (!%p171_p3)   ;;  %v1744_v20 = vld [vmem:[%s2170_s1 + $0x68] sm:$0xff] (!%p171_p3)  }
   0xb   : > { %1590 = vmatprep.subr.bf16.mxu1 (!%p171_p3), %v1729_v5  ;;  %v1737_v13 = vld [vmem:[%s2170_s1 + $0xd8] sm:$0xff] (!%p171_p3)   ;;  %v1741_v17 = vld [vmem:[%s2170_s1 + $0xe0] sm:$0xff] (!%p171_p3)   ;;  %v1745_v21 = vld [vmem:[%s2170_s1 + $0xe8] sm:$0xff] (!%p171_p3)  }
   0xc   : > { %v1738_v14 = vld [vmem:[%s2170_s1 + $0x18] sm:$0xff] (!%p171_p3)   ;;  %v1742_v18 = vld [vmem:[%s2170_s1 + $0x20] sm:$0xff] (!%p171_p3)   ;;  %v1746_v22 = vld [vmem:[%s2170_s1 + $0x28] sm:$0xff] (!%p171_p3)  }
   0xd   : > { %1479 = vmatpush3.bf16.msra.mxu0 (!%p171_p3), %v1730_v6  ;;  %v1739_v15 = vld [vmem:[%s2170_s1 + $0x98] sm:$0xff] (!%p171_p3)   ;;  %v1743_v19 = vld [vmem:[%s2170_s1 + $0xa0] sm:$0xff] (!%p171_p3)   ;;  %v1747_v23 = vld [vmem:[%s2170_s1 + $0xa8] sm:$0xff] (!%p171_p3)  }
   0xe   : > { %1591 = vmatpush3.bf16.msra.mxu1 %v1731_v7  ;;  %1480 = vmatprep.subr.bf16.mxu0 %v1732_v8  ;;  %s2178_s25 = smov (!%p206_p4, %s1371_s25), 95  ;;  %v1748_v24 = vld [vmem:[%s2170_s1 + $0x70] sm:$0xff]   ;;  %v1752_v28 = vld [vmem:[%s2170_s1 + $0x78] sm:$0xff]  }
   0xf   : > { %1592 = vmatprep.subr.bf16.mxu1 %v1733_v9  ;;  %v1749_v25 = vld [vmem:[%s2170_s1 + $0xf0] sm:$0xff]   ;;  %s1475_s24 = sshll.u32 %s2178_s25, 4  ;;  %v1753_v29 = vld [vmem:[%s2170_s1 + $0xf8] sm:$0xff]   ;;  %s1375_s17 = sshll.u32 %s2178_s25, 3 }
  0x10   : > { %v1750_v26 = vld [vmem:[%s2170_s1 + $0x30] sm:$0xff]   ;;  %s2013_s12 = scalar_lea.vmem %s2169_s0, %s1475_s24  ;;  %v1754_v30 = vld [vmem:[%s2170_s1 + $0x38] sm:$0xff]   ;;  %s2096_s20 = scalar_lea.vmem %s2172_s3, %s1375_s17 }
  0x11   : > { %1481 = vmatpush3.bf16.msra.mxu0 %v1734_v10  ;;  %v1751_v27 = vld [vmem:[%s2170_s1 + $0xb0] sm:$0xff]   ;;  %v1755_v31 = vld [vmem:[%s2170_s1 + $0xb8] sm:$0xff]  }
  0x12   : > { %1593 = vmatpush3.bf16.msra.mxu1 %v1735_v11  ;;  %1482 = vmatprep.subr.bf16.mxu0 %v1736_v12  ;;  %v1756_v32 = vld [vmem:[%s2013_s12] ss:$16 sps:$4 sm:$0xff]   ;;  %v1758_v33 = vld [vmem:[%s2013_s12 + $0x4] ss:$16 sps:$4 sm:$0xff]   ;;  %v1759_v34 = vld [vmem:[%s2013_s12 + $0x8] ss:$16 sps:$4 sm:$0xff]  }
  0x13   : > { %1594 = vmatprep.subr.bf16.mxu1 %v1737_v13  ;;  %v1761_v35 = vld [vmem:[%s2013_s12 + $0xc] ss:$16 sps:$4 sm:$0xff]   ;;  %908 = vmatprep.mubr.bf16.mxu0 %v1758_v33  ;;  %v1762_v36 = vld [vmem:[%s2013_s12 + $0x24] ss:$16 sps:$4 sm:$0xff]   ;;  %v1766_v38 = vld [vmem:[%s2013_s12 + $0x20] ss:$16 sps:$4 sm:$0xff]  }
  0x14   : > { %1069 = vmatprep.mubr.bf16.mxu1 %v1761_v35  ;;  %v1764_v37 = vld [vmem:[%s2013_s12 + $0x2c] ss:$16 sps:$4 sm:$0xff]   ;;  %v1767_v39 = vld [vmem:[%s2013_s12 + $0x28] ss:$16 sps:$4 sm:$0xff]   ;;  %v1768_v40 = vld [vmem:[%s2013_s12 + $0x44] ss:$16 sps:$4 sm:$0xff]  }
  0x15   : > { %1483 = vmatpush3.bf16.msra.mxu0 %v1738_v14  ;;  %v1770_v41 = vld [vmem:[%s2013_s12 + $0x4c] ss:$16 sps:$4 sm:$0xff]   ;;  %v1772_v42 = vld [vmem:[%s2013_s12 + $0x40] ss:$16 sps:$4 sm:$0xff]   ;;  %v1773_v43 = vld [vmem:[%s2013_s12 + $0x48] ss:$16 sps:$4 sm:$0xff]  }
  0x16   : > { %1595 = vmatpush3.bf16.msra.mxu1 %v1739_v15  ;;  %1484 = vmatprep.subr.bf16.mxu0 %v1740_v16  ;;  %v1774_v44 = vld [vmem:[%s2013_s12 + $0x64] ss:$16 sps:$4 sm:$0xff]   ;;  %v1776_v45 = vld [vmem:[%s2013_s12 + $0x6c] ss:$16 sps:$4 sm:$0xff]   ;;  %v1778_v46 = vld [vmem:[%s2013_s12 + $0x60] ss:$16 sps:$4 sm:$0xff]  }
  0x17   : > { %1596 = vmatprep.subr.bf16.mxu1 %v1741_v17  ;;  %v1779_v47 = vld [vmem:[%s2013_s12 + $0x68] ss:$16 sps:$4 sm:$0xff]   ;;  %v1780_v48 = vld [vmem:[%s2013_s12 + $0x84] ss:$16 sps:$4 sm:$0xff]   ;;  %v1782_v49 = vld [vmem:[%s2013_s12 + $0x8c] ss:$16 sps:$4 sm:$0xff]  }
  0x18   : > { %v1784_v50 = vld [vmem:[%s2013_s12 + $0x80] ss:$16 sps:$4 sm:$0xff]   ;;  %v1785_v51 = vld [vmem:[%s2013_s12 + $0x88] ss:$16 sps:$4 sm:$0xff]   ;;  %v1786_v52 = vld [vmem:[%s2013_s12 + $0xa4] ss:$16 sps:$4 sm:$0xff]  }
  0x19   : > { %1485 = vmatpush3.bf16.msra.mxu0 %v1742_v18  ;;  %v1788_v53 = vld [vmem:[%s2013_s12 + $0xac] ss:$16 sps:$4 sm:$0xff]   ;;  %v1790_v54 = vld [vmem:[%s2013_s12 + $0xa0] ss:$16 sps:$4 sm:$0xff]   ;;  %v1791_v55 = vld [vmem:[%s2013_s12 + $0xa8] ss:$16 sps:$4 sm:$0xff]  }
  0x1a   : > { %1597 = vmatpush3.bf16.msra.mxu1 %v1743_v19  ;;  %1486 = vmatprep.subr.bf16.mxu0 %v1744_v20  ;;  %v1792_v56 = vld [vmem:[%s2013_s12 + $0xc4] ss:$16 sps:$4 sm:$0xff]   ;;  %v1794_v57 = vld [vmem:[%s2013_s12 + $0xcc] ss:$16 sps:$4 sm:$0xff]   ;;  %v1796_v58 = vld [vmem:[%s2013_s12 + $0xc0] ss:$16 sps:$4 sm:$0xff]  }
  0x1b   : > { %1598 = vmatprep.subr.bf16.mxu1 %v1745_v21  ;;  %v1797_v59 = vld [vmem:[%s2013_s12 + $0xc8] ss:$16 sps:$4 sm:$0xff]   ;;  %v1798_v60 = vld [vmem:[%s2013_s12 + $0xe4] ss:$16 sps:$4 sm:$0xff]   ;;  %v1800_v61 = vld [vmem:[%s2013_s12 + $0xec] ss:$16 sps:$4 sm:$0xff]  }
  0x1c   : > { %v1802_v62 = vld [vmem:[%s2013_s12 + $0xe0] ss:$16 sps:$4 sm:$0xff]   ;;  %v1803_v63 = vld [vmem:[%s2013_s12 + $0xe8] ss:$16 sps:$4 sm:$0xff]   ;;  %v1804_v0 = vld [vmem:[%s2013_s12 + $0x104] ss:$16 sps:$4 sm:$0xff]  }
  0x1d   : > { %1487 = vmatpush3.bf16.msra.mxu0 %v1746_v22  ;;  %v1806_v1 = vld [vmem:[%s2013_s12 + $0x10c] ss:$16 sps:$4 sm:$0xff]   ;;  %v1808_v2 = vld [vmem:[%s2013_s12 + $0x100] ss:$16 sps:$4 sm:$0xff]   ;;  %v1809_v3 = vld [vmem:[%s2013_s12 + $0x108] ss:$16 sps:$4 sm:$0xff]  }
  0x1e   : > { %1599 = vmatpush3.bf16.msra.mxu1 %v1747_v23  ;;  %1488 = vmatprep.subr.bf16.mxu0 %v1748_v24  ;;  %v1810_v4 = vld [vmem:[%s2013_s12 + $0x124] ss:$16 sps:$4 sm:$0xff]   ;;  %v1812_v5 = vld [vmem:[%s2013_s12 + $0x12c] ss:$16 sps:$4 sm:$0xff]   ;;  %v1814_v6 = vld [vmem:[%s2013_s12 + $0x120] ss:$16 sps:$4 sm:$0xff]  }
  0x1f   : > { %1600 = vmatprep.subr.bf16.mxu1 %v1749_v25  ;;  %v1815_v7 = vld [vmem:[%s2013_s12 + $0x128] ss:$16 sps:$4 sm:$0xff]   ;;  %v1816_v8 = vld [vmem:[%s2013_s12 + $0x144] ss:$16 sps:$4 sm:$0xff]   ;;  %v1818_v9 = vld [vmem:[%s2013_s12 + $0x14c] ss:$16 sps:$4 sm:$0xff]  }
  0x20   : > { %v1820_v10 = vld [vmem:[%s2013_s12 + $0x140] ss:$16 sps:$4 sm:$0xff]   ;;  %v1821_v11 = vld [vmem:[%s2013_s12 + $0x148] ss:$16 sps:$4 sm:$0xff]   ;;  %v1822_v12 = vld [vmem:[%s2013_s12 + $0x164] ss:$16 sps:$4 sm:$0xff]  }
  0x21   : > { %1489 = vmatpush3.bf16.msra.mxu0 %v1750_v26  ;;  %v1824_v13 = vld [vmem:[%s2013_s12 + $0x16c] ss:$16 sps:$4 sm:$0xff]   ;;  %v1826_v14 = vld [vmem:[%s2013_s12 + $0x160] ss:$16 sps:$4 sm:$0xff]   ;;  %v1827_v15 = vld [vmem:[%s2013_s12 + $0x168] ss:$16 sps:$4 sm:$0xff]  }
  0x22   : > { %1601 = vmatpush3.bf16.msra.mxu1 %v1751_v27  ;;  %1490 = vmatprep.subr.bf16.mxu0 %v1752_v28  ;;  %v1828_v16 = vld [vmem:[%s2013_s12 + $0x184] ss:$16 sps:$4 sm:$0xff]   ;;  %v1830_v17 = vld [vmem:[%s2013_s12 + $0x18c] ss:$16 sps:$4 sm:$0xff]   ;;  %v1832_v18 = vld [vmem:[%s2013_s12 + $0x180] ss:$16 sps:$4 sm:$0xff]  }
  0x23   : > { %1602 = vmatprep.subr.bf16.mxu1 %v1753_v29  ;;  %v1833_v19 = vld [vmem:[%s2013_s12 + $0x188] ss:$16 sps:$4 sm:$0xff]   ;;  %v1834_v20 = vld [vmem:[%s2013_s12 + $0x1a4] ss:$16 sps:$4 sm:$0xff]   ;;  %v1836_v21 = vld [vmem:[%s2013_s12 + $0x1ac] ss:$16 sps:$4 sm:$0xff]  }
  0x24   : > { %v1838_v22 = vld [vmem:[%s2013_s12 + $0x1a0] ss:$16 sps:$4 sm:$0xff]   ;;  %v1839_v23 = vld [vmem:[%s2013_s12 + $0x1a8] ss:$16 sps:$4 sm:$0xff]   ;;  %v1840_v24 = vld [vmem:[%s2013_s12 + $0x1c4] ss:$16 sps:$4 sm:$0xff]  }
  0x25   : > { %1491 = vmatpush3.bf16.msra.mxu0 %v1754_v30  ;;  %v1842_v25 = vld [vmem:[%s2013_s12 + $0x1cc] ss:$16 sps:$4 sm:$0xff]   ;;  %v1844_v26 = vld [vmem:[%s2013_s12 + $0x1c0] ss:$16 sps:$4 sm:$0xff]   ;;  %v1845_v27 = vld [vmem:[%s2013_s12 + $0x1c8] ss:$16 sps:$4 sm:$0xff]  }
  0x26   : > { %1603 = vmatpush3.bf16.msra.mxu1 %v1755_v31  ;;  %v1846_v28 = vld [vmem:[%s2013_s12 + $0x1e4] ss:$16 sps:$4 sm:$0xff]   ;;  %v1848_v29 = vld [vmem:[%s2013_s12 + $0x1ec] ss:$16 sps:$4 sm:$0xff]   ;;  %v1850_v30 = vld [vmem:[%s2013_s12 + $0x1e0] ss:$16 sps:$4 sm:$0xff]  }
  0x27   : > { %v1851_v31 = vld [vmem:[%s2013_s12 + $0x1e8] ss:$16 sps:$4 sm:$0xff]  }
  0x28   : > { %909 = vmatmul.mubr.bf16.vlgmr.msra.gmra.mrb[0].mxu0 %v1756_v32 }
  0x29   : > { %1070 = vmatmul.mubr.bf16.vlgmr.msra.gmra.mrb[0].mxu1 %v1759_v34  ;;  %916 = vmatprep.mubr.bf16.mxu0 %v1762_v36  ;;  %v2088_v34 = vld [vmem:[%s2171_s2] ss:$0 sm:$0xff] }
  0x2a   : > { %1077 = vmatprep.mubr.bf16.mxu1 %v1764_v37 }
  0x30   : > { %917 = vmatmul.mubr.bf16.gmra.mrb[4].mxu0 %v1766_v38 }
  0x31   : > { %1078 = vmatmul.mubr.bf16.gmra.mrb[4].mxu1 %v1767_v39  ;;  %924 = vmatprep.mubr.bf16.mxu0 %v1768_v40 }
  0x32   : > { %1085 = vmatprep.mubr.bf16.mxu1 %v1770_v41 }
  0x38   : > { %925 = vmatmul.mubr.bf16.gmra.mrb[8].mxu0 %v1772_v42 }
  0x39   : > { %1086 = vmatmul.mubr.bf16.gmra.mrb[8].mxu1 %v1773_v43  ;;  %932 = vmatprep.mubr.bf16.mxu0 %v1774_v44 }
  0x3a   : > { %1093 = vmatprep.mubr.bf16.mxu1 %v1776_v45 }
  0x40   : > { %933 = vmatmul.mubr.bf16.gmra.mrb[12].mxu0 %v1778_v46 }
  0x41   : > { %1094 = vmatmul.mubr.bf16.gmra.mrb[12].mxu1 %v1779_v47  ;;  %940 = vmatprep.mubr.bf16.mxu0 %v1780_v48 }
  0x42   : > { %1101 = vmatprep.mubr.bf16.mxu1 %v1782_v49 }
  0x48   : > { %941 = vmatmul.mubr.bf16.gmra.mrb[16].mxu0 %v1784_v50 }
  0x49   : > { %1102 = vmatmul.mubr.bf16.gmra.mrb[16].mxu1 %v1785_v51  ;;  %948 = vmatprep.mubr.bf16.mxu0 %v1786_v52 }
  0x4a   : > { %1109 = vmatprep.mubr.bf16.mxu1 %v1788_v53 }
  0x50   : > { %949 = vmatmul.mubr.bf16.gmra.mrb[20].mxu0 %v1790_v54 }
  0x51   : > { %1110 = vmatmul.mubr.bf16.gmra.mrb[20].mxu1 %v1791_v55  ;;  %956 = vmatprep.mubr.bf16.mxu0 %v1792_v56 }
  0x52   : > { %1117 = vmatprep.mubr.bf16.mxu1 %v1794_v57 }
  0x58   : > { %957 = vmatmul.mubr.bf16.gmra.mrb[24].mxu0 %v1796_v58 }
  0x59   : > { %1118 = vmatmul.mubr.bf16.gmra.mrb[24].mxu1 %v1797_v59  ;;  %964 = vmatprep.mubr.bf16.mxu0 %v1798_v60 }
  0x5a   : > { %1125 = vmatprep.mubr.bf16.mxu1 %v1800_v61 }
  0x60   : > { %965 = vmatmul.mubr.bf16.gmra.mrb[28].mxu0 %v1802_v62 }
  0x61   : > { %1126 = vmatmul.mubr.bf16.gmra.mrb[28].mxu1 %v1803_v63  ;;  %972 = vmatprep.mubr.bf16.mxu0 %v1804_v0 }
  0x62   : > { %1133 = vmatprep.mubr.bf16.mxu1 %v1806_v1 }
  0x68   : > { %973 = vmatmul.mubr.bf16.gmra.mrb[32].mxu0 %v1808_v2 }
  0x69   : > { %1134 = vmatmul.mubr.bf16.gmra.mrb[32].mxu1 %v1809_v3  ;;  %980 = vmatprep.mubr.bf16.mxu0 %v1810_v4 }
  0x6a   : > { %1141 = vmatprep.mubr.bf16.mxu1 %v1812_v5 }
  0x70   : > { %981 = vmatmul.mubr.bf16.gmra.mrb[36].mxu0 %v1814_v6 }
  0x71   : > { %1142 = vmatmul.mubr.bf16.gmra.mrb[36].mxu1 %v1815_v7  ;;  %988 = vmatprep.mubr.bf16.mxu0 %v1816_v8 }
  0x72   : > { %1149 = vmatprep.mubr.bf16.mxu1 %v1818_v9 }
  0x78   : > { %989 = vmatmul.mubr.bf16.gmra.mrb[40].mxu0 %v1820_v10 }
  0x79   : > { %1150 = vmatmul.mubr.bf16.gmra.mrb[40].mxu1 %v1821_v11  ;;  %996 = vmatprep.mubr.bf16.mxu0 %v1822_v12 }
  0x7a   : > { %1157 = vmatprep.mubr.bf16.mxu1 %v1824_v13 }
  0x80   : > { %997 = vmatmul.mubr.bf16.gmra.mrb[44].mxu0 %v1826_v14 }
  0x81   : > { %1158 = vmatmul.mubr.bf16.gmra.mrb[44].mxu1 %v1827_v15  ;;  %1004 = vmatprep.mubr.bf16.mxu0 %v1828_v16 }
  0x82   : > { %1165 = vmatprep.mubr.bf16.mxu1 %v1830_v17 }
  0x88   : > { %1005 = vmatmul.mubr.bf16.gmra.mrb[48].mxu0 %v1832_v18 }
  0x89   : > { %1166 = vmatmul.mubr.bf16.gmra.mrb[48].mxu1 %v1833_v19  ;;  %1012 = vmatprep.mubr.bf16.mxu0 %v1834_v20 }
  0x8a   : > { %1173 = vmatprep.mubr.bf16.mxu1 %v1836_v21 }
  0x90   : > { %1013 = vmatmul.mubr.bf16.gmra.mrb[52].mxu0 %v1838_v22 }
  0x91   : > { %1174 = vmatmul.mubr.bf16.gmra.mrb[52].mxu1 %v1839_v23  ;;  %1020 = vmatprep.mubr.bf16.mxu0 %v1840_v24 }
  0x92   : > { %1181 = vmatprep.mubr.bf16.mxu1 %v1842_v25 }
  0x98   : > { %1021 = vmatmul.mubr.bf16.gmra.mrb[56].mxu0 %v1844_v26 }
  0x99   : > { %1182 = vmatmul.mubr.bf16.gmra.mrb[56].mxu1 %v1845_v27  ;;  %1028 = vmatprep.mubr.bf16.mxu0 %v1846_v28 }
  0x9a   : > { %1189 = vmatprep.mubr.bf16.mxu1 %v1848_v29 }
  0xa0   : > { %1029 = vmatmul.mubr.bf16.gmra.mrb[60].mxu0 %v1850_v30 }
  0xa1   : > { %1190 = vmatmul.mubr.bf16.gmra.mrb[60].mxu1 %v1851_v31 }
  0xfb   : > { %v1492_v32 = vpop.f32.mrb[0].mxu0 }
  0xfc   : > { %v1604_v33 = vpop.f32.mrb[0].mxu1  ;;  %v1493_v35 = vpop.f32.mrb[1].mxu0 }
  0xfd   : > { %v1494_v36 = vadd.f32 %v1493_v35, %v1492_v32  ;;  %v1605_v37 = vpop.f32.mrb[1].mxu1  ;;  %v1495_v38 = vpop.f32.mrb[2].mxu0 }
  0xfe   : > { %v1606_v39 = vadd.f32 %v1605_v37, %v1604_v33  ;;  %v1607_v40 = vpop.f32.mrb[2].mxu1  ;;  %v1496_v41 = vpop.f32.mrb[3].mxu0 }
  0xff   : > { %v911_v42 = vadd.f32 %v1494_v36, %v2088_v34  ;;  %v1497_v43 = vadd.f32 %v1496_v41, %v1495_v38  ;;  %v1608_v44 = vpop.f32.mrb[3].mxu1 }
 0x100   : > { %v1609_v45 = vadd.f32 %v1608_v44, %v1607_v40 }
 0x101   : > { %v1072_v46 = vadd.f32 %v1606_v39, %v911_v42  ;;  %v914_v47 = vadd.f32 %v1497_v43, %v2088_v34 }
 0x103   : > { %v1198_v48 = vmax.f32 %v1072_v46, 0.0  ;;  %v1075_v49 = vadd.f32 %v1609_v45, %v914_v47  ;;  %v1498_v50 = vpop.f32.mrb[4].mxu0 }
 0x104   : > { %v1610_v51 = vpop.f32.mrb[4].mxu1  ;;  %v1499_v52 = vpop.f32.mrb[5].mxu0 }
 0x105   : > { %1230 = vst [vmem:[%s2096_s20] sm:$0xff] %v1198_v48  ;;  %v1199_v53 = vmax.f32 %v1075_v49, 0.0  ;;  %v1500_v54 = vadd.f32 %v1499_v52, %v1498_v50  ;;  %v1611_v55 = vpop.f32.mrb[5].mxu1  ;;  %v1501_v56 = vpop.f32.mrb[6].mxu0 }
 0x106   : > { %v1612_v57 = vadd.f32 %v1611_v55, %v1610_v51  ;;  %v1613_v58 = vpop.f32.mrb[6].mxu1  ;;  %v1502_v59 = vpop.f32.mrb[7].mxu0 }
 0x107   : > { %1231 = vst [vmem:[%s2096_s20 + $0x8] sm:$0xff] %v1199_v53  ;;  %v919_v60 = vadd.f32 %v1500_v54, %v2088_v34  ;;  %v1503_v61 = vadd.f32 %v1502_v59, %v1501_v56  ;;  %v1614_v62 = vpop.f32.mrb[7].mxu1 }
 0x108   : > { %v1615_v63 = vadd.f32 %v1614_v62, %v1613_v58 }
 0x109   : > { %v1080_v0 = vadd.f32 %v1612_v57, %v919_v60  ;;  %v922_v1 = vadd.f32 %v1503_v61, %v2088_v34 }
 0x10b   : > { %v1200_v2 = vmax.f32 %v1080_v0, 0.0  ;;  %v1083_v3 = vadd.f32 %v1615_v63, %v922_v1  ;;  %v1504_v4 = vpop.f32.mrb[8].mxu0 }
 0x10c   : > { %v1616_v5 = vpop.f32.mrb[8].mxu1  ;;  %v1505_v6 = vpop.f32.mrb[9].mxu0 }
 0x10d   : > { %1232 = vst [vmem:[%s2096_s20 + $0x10] sm:$0xff] %v1200_v2  ;;  %v1201_v7 = vmax.f32 %v1083_v3, 0.0  ;;  %v1506_v8 = vadd.f32 %v1505_v6, %v1504_v4  ;;  %v1617_v9 = vpop.f32.mrb[9].mxu1  ;;  %v1507_v10 = vpop.f32.mrb[10].mxu0 }
 0x10e   : > { %v1618_v11 = vadd.f32 %v1617_v9, %v1616_v5  ;;  %v1619_v12 = vpop.f32.mrb[10].mxu1  ;;  %v1508_v13 = vpop.f32.mrb[11].mxu0 }
 0x10f   : > { %1233 = vst [vmem:[%s2096_s20 + $0x18] sm:$0xff] %v1201_v7  ;;  %v927_v14 = vadd.f32 %v1506_v8, %v2088_v34  ;;  %v1509_v15 = vadd.f32 %v1508_v13, %v1507_v10  ;;  %v1620_v16 = vpop.f32.mrb[11].mxu1 }
 0x110   : > { %v1621_v17 = vadd.f32 %v1620_v16, %v1619_v12 }
 0x111   : > { %v1088_v18 = vadd.f32 %v1618_v11, %v927_v14  ;;  %v930_v19 = vadd.f32 %v1509_v15, %v2088_v34 }
 0x113   : > { %v1202_v20 = vmax.f32 %v1088_v18, 0.0  ;;  %v1091_v21 = vadd.f32 %v1621_v17, %v930_v19  ;;  %v1510_v22 = vpop.f32.mrb[12].mxu0 }
 0x114   : > { %v1622_v23 = vpop.f32.mrb[12].mxu1  ;;  %v1511_v24 = vpop.f32.mrb[13].mxu0 }
 0x115   : > { %1234 = vst [vmem:[%s2096_s20 + $0x20] sm:$0xff] %v1202_v20  ;;  %v1203_v25 = vmax.f32 %v1091_v21, 0.0  ;;  %v1512_v26 = vadd.f32 %v1511_v24, %v1510_v22  ;;  %v1623_v27 = vpop.f32.mrb[13].mxu1  ;;  %v1513_v28 = vpop.f32.mrb[14].mxu0 }
 0x116   : > { %v1624_v29 = vadd.f32 %v1623_v27, %v1622_v23  ;;  %v1625_v30 = vpop.f32.mrb[14].mxu1  ;;  %v1514_v31 = vpop.f32.mrb[15].mxu0 }
 0x117   : > { %1235 = vst [vmem:[%s2096_s20 + $0x28] sm:$0xff] %v1203_v25  ;;  %v935_v32 = vadd.f32 %v1512_v26, %v2088_v34  ;;  %v1515_v33 = vadd.f32 %v1514_v31, %v1513_v28  ;;  %v1626_v35 = vpop.f32.mrb[15].mxu1 }
 0x118   : > { %v1627_v36 = vadd.f32 %v1626_v35, %v1625_v30 }
 0x119   : > { %v1096_v37 = vadd.f32 %v1624_v29, %v935_v32  ;;  %v938_v38 = vadd.f32 %v1515_v33, %v2088_v34 }
 0x11b   : > { %v1204_v39 = vmax.f32 %v1096_v37, 0.0  ;;  %v1099_v40 = vadd.f32 %v1627_v36, %v938_v38  ;;  %v1516_v41 = vpop.f32.mrb[16].mxu0 }
 0x11c   : > { %v1628_v42 = vpop.f32.mrb[16].mxu1  ;;  %v1517_v43 = vpop.f32.mrb[17].mxu0 }
 0x11d   : > { %1236 = vst [vmem:[%s2096_s20 + $0x30] sm:$0xff] %v1204_v39  ;;  %v1205_v44 = vmax.f32 %v1099_v40, 0.0  ;;  %v1518_v45 = vadd.f32 %v1517_v43, %v1516_v41  ;;  %v1629_v46 = vpop.f32.mrb[17].mxu1  ;;  %v1519_v47 = vpop.f32.mrb[18].mxu0 }
 0x11e   : > { %v1630_v48 = vadd.f32 %v1629_v46, %v1628_v42  ;;  %v1631_v49 = vpop.f32.mrb[18].mxu1  ;;  %v1520_v50 = vpop.f32.mrb[19].mxu0 }
 0x11f   : > { %1237 = vst [vmem:[%s2096_s20 + $0x38] sm:$0xff] %v1205_v44  ;;  %v943_v51 = vadd.f32 %v1518_v45, %v2088_v34  ;;  %v1521_v52 = vadd.f32 %v1520_v50, %v1519_v47  ;;  %v1632_v53 = vpop.f32.mrb[19].mxu1 }
 0x120   : > { %v1633_v54 = vadd.f32 %v1632_v53, %v1631_v49 }
 0x121   : > { %v1104_v55 = vadd.f32 %v1630_v48, %v943_v51  ;;  %v946_v56 = vadd.f32 %v1521_v52, %v2088_v34 }
 0x123   : > { %v1206_v57 = vmax.f32 %v1104_v55, 0.0  ;;  %v1107_v58 = vadd.f32 %v1633_v54, %v946_v56  ;;  %v1522_v59 = vpop.f32.mrb[20].mxu0 }
 0x124   : > { %v1634_v60 = vpop.f32.mrb[20].mxu1  ;;  %v1523_v61 = vpop.f32.mrb[21].mxu0 }
 0x125   : > { %1238 = vst [vmem:[%s2096_s20 + $0x40] sm:$0xff] %v1206_v57  ;;  %v1207_v62 = vmax.f32 %v1107_v58, 0.0  ;;  %v1524_v63 = vadd.f32 %v1523_v61, %v1522_v59  ;;  %v1635_v0 = vpop.f32.mrb[21].mxu1  ;;  %v1525_v1 = vpop.f32.mrb[22].mxu0 }
 0x126   : > { %v1636_v2 = vadd.f32 %v1635_v0, %v1634_v60  ;;  %v1637_v3 = vpop.f32.mrb[22].mxu1  ;;  %v1526_v4 = vpop.f32.mrb[23].mxu0 }
 0x127   : > { %1239 = vst [vmem:[%s2096_s20 + $0x48] sm:$0xff] %v1207_v62  ;;  %v951_v5 = vadd.f32 %v1524_v63, %v2088_v34  ;;  %v1527_v6 = vadd.f32 %v1526_v4, %v1525_v1  ;;  %v1638_v7 = vpop.f32.mrb[23].mxu1 }
 0x128   : > { %v1639_v8 = vadd.f32 %v1638_v7, %v1637_v3 }
 0x129   : > { %v1112_v9 = vadd.f32 %v1636_v2, %v951_v5  ;;  %v954_v10 = vadd.f32 %v1527_v6, %v2088_v34 }
 0x12b   : > { %v1208_v11 = vmax.f32 %v1112_v9, 0.0  ;;  %v1115_v12 = vadd.f32 %v1639_v8, %v954_v10  ;;  %v1528_v13 = vpop.f32.mrb[24].mxu0 }
 0x12c   : > { %v1640_v14 = vpop.f32.mrb[24].mxu1  ;;  %v1529_v15 = vpop.f32.mrb[25].mxu0 }
 0x12d   : > { %1240 = vst [vmem:[%s2096_s20 + $0x50] sm:$0xff] %v1208_v11  ;;  %v1209_v16 = vmax.f32 %v1115_v12, 0.0  ;;  %v1530_v17 = vadd.f32 %v1529_v15, %v1528_v13  ;;  %v1641_v18 = vpop.f32.mrb[25].mxu1  ;;  %v1531_v19 = vpop.f32.mrb[26].mxu0 }
 0x12e   : > { %v1642_v20 = vadd.f32 %v1641_v18, %v1640_v14  ;;  %v1643_v21 = vpop.f32.mrb[26].mxu1  ;;  %v1532_v22 = vpop.f32.mrb[27].mxu0 }
 0x12f   : > { %1241 = vst [vmem:[%s2096_s20 + $0x58] sm:$0xff] %v1209_v16  ;;  %v959_v23 = vadd.f32 %v1530_v17, %v2088_v34  ;;  %v1533_v24 = vadd.f32 %v1532_v22, %v1531_v19  ;;  %v1644_v25 = vpop.f32.mrb[27].mxu1 }
 0x130   : > { %v1645_v26 = vadd.f32 %v1644_v25, %v1643_v21 }
 0x131   : > { %v1120_v27 = vadd.f32 %v1642_v20, %v959_v23  ;;  %v962_v28 = vadd.f32 %v1533_v24, %v2088_v34 }
 0x133   : > { %v1210_v29 = vmax.f32 %v1120_v27, 0.0  ;;  %v1123_v30 = vadd.f32 %v1645_v26, %v962_v28  ;;  %v1534_v31 = vpop.f32.mrb[28].mxu0 }
 0x134   : > { %v1646_v32 = vpop.f32.mrb[28].mxu1  ;;  %v1535_v33 = vpop.f32.mrb[29].mxu0 }
 0x135   : > { %1242 = vst [vmem:[%s2096_s20 + $0x60] sm:$0xff] %v1210_v29  ;;  %v1211_v35 = vmax.f32 %v1123_v30, 0.0  ;;  %v1536_v36 = vadd.f32 %v1535_v33, %v1534_v31  ;;  %v1647_v37 = vpop.f32.mrb[29].mxu1  ;;  %v1537_v38 = vpop.f32.mrb[30].mxu0 }
 0x136   : > { %v1648_v39 = vadd.f32 %v1647_v37, %v1646_v32  ;;  %v1649_v40 = vpop.f32.mrb[30].mxu1  ;;  %v1538_v41 = vpop.f32.mrb[31].mxu0 }
 0x137   : > { %1243 = vst [vmem:[%s2096_s20 + $0x68] sm:$0xff] %v1211_v35  ;;  %v967_v42 = vadd.f32 %v1536_v36, %v2088_v34  ;;  %v1539_v43 = vadd.f32 %v1538_v41, %v1537_v38  ;;  %v1650_v44 = vpop.f32.mrb[31].mxu1 }
 0x138   : > { %v1651_v45 = vadd.f32 %v1650_v44, %v1649_v40 }
 0x139   : > { %v1128_v46 = vadd.f32 %v1648_v39, %v967_v42  ;;  %v970_v47 = vadd.f32 %v1539_v43, %v2088_v34 }
 0x13b   : > { %v1212_v48 = vmax.f32 %v1128_v46, 0.0  ;;  %v1131_v49 = vadd.f32 %v1651_v45, %v970_v47  ;;  %v1540_v50 = vpop.f32.mrb[32].mxu0 }
 0x13c   : > { %v1652_v51 = vpop.f32.mrb[32].mxu1  ;;  %v1541_v52 = vpop.f32.mrb[33].mxu0 }
 0x13d   : > { %1244 = vst [vmem:[%s2096_s20 + $0x70] sm:$0xff] %v1212_v48  ;;  %v1213_v53 = vmax.f32 %v1131_v49, 0.0  ;;  %v1542_v54 = vadd.f32 %v1541_v52, %v1540_v50  ;;  %v1653_v55 = vpop.f32.mrb[33].mxu1  ;;  %v1543_v56 = vpop.f32.mrb[34].mxu0 }
 0x13e   : > { %v1654_v57 = vadd.f32 %v1653_v55, %v1652_v51  ;;  %v1655_v58 = vpop.f32.mrb[34].mxu1  ;;  %v1544_v59 = vpop.f32.mrb[35].mxu0 }
 0x13f   : > { %1245 = vst [vmem:[%s2096_s20 + $0x78] sm:$0xff] %v1213_v53  ;;  %v975_v60 = vadd.f32 %v1542_v54, %v2088_v34  ;;  %v1545_v61 = vadd.f32 %v1544_v59, %v1543_v56  ;;  %v1656_v62 = vpop.f32.mrb[35].mxu1 }
 0x140   : > { %v1657_v63 = vadd.f32 %v1656_v62, %v1655_v58 }
 0x141   : > { %v1136_v0 = vadd.f32 %v1654_v57, %v975_v60  ;;  %v978_v1 = vadd.f32 %v1545_v61, %v2088_v34 }
 0x143   : > { %v1214_v2 = vmax.f32 %v1136_v0, 0.0  ;;  %v1139_v3 = vadd.f32 %v1657_v63, %v978_v1  ;;  %v1546_v4 = vpop.f32.mrb[36].mxu0 }
 0x144   : > { %v1658_v5 = vpop.f32.mrb[36].mxu1  ;;  %v1547_v6 = vpop.f32.mrb[37].mxu0 }
 0x145   : > { %1246 = vst [vmem:[%s2096_s20 + $0x80] sm:$0xff] %v1214_v2  ;;  %v1215_v7 = vmax.f32 %v1139_v3, 0.0  ;;  %v1548_v8 = vadd.f32 %v1547_v6, %v1546_v4  ;;  %v1659_v9 = vpop.f32.mrb[37].mxu1  ;;  %v1549_v10 = vpop.f32.mrb[38].mxu0 }
 0x146   : > { %v1660_v11 = vadd.f32 %v1659_v9, %v1658_v5  ;;  %v1661_v12 = vpop.f32.mrb[38].mxu1  ;;  %v1550_v13 = vpop.f32.mrb[39].mxu0 }
 0x147   : > { %1247 = vst [vmem:[%s2096_s20 + $0x88] sm:$0xff] %v1215_v7  ;;  %v983_v14 = vadd.f32 %v1548_v8, %v2088_v34  ;;  %v1551_v15 = vadd.f32 %v1550_v13, %v1549_v10  ;;  %v1662_v16 = vpop.f32.mrb[39].mxu1 }
 0x148   : > { %v1663_v17 = vadd.f32 %v1662_v16, %v1661_v12 }
 0x149   : > { %v1144_v18 = vadd.f32 %v1660_v11, %v983_v14  ;;  %v986_v19 = vadd.f32 %v1551_v15, %v2088_v34 }
 0x14b   : > { %v1216_v20 = vmax.f32 %v1144_v18, 0.0  ;;  %v1147_v21 = vadd.f32 %v1663_v17, %v986_v19  ;;  %v1552_v22 = vpop.f32.mrb[40].mxu0 }
 0x14c   : > { %v1664_v23 = vpop.f32.mrb[40].mxu1  ;;  %v1553_v24 = vpop.f32.mrb[41].mxu0 }
 0x14d   : > { %1248 = vst [vmem:[%s2096_s20 + $0x90] sm:$0xff] %v1216_v20  ;;  %v1217_v25 = vmax.f32 %v1147_v21, 0.0  ;;  %v1554_v26 = vadd.f32 %v1553_v24, %v1552_v22  ;;  %v1665_v27 = vpop.f32.mrb[41].mxu1  ;;  %v1555_v28 = vpop.f32.mrb[42].mxu0 }
 0x14e   : > { %v1666_v29 = vadd.f32 %v1665_v27, %v1664_v23  ;;  %v1667_v30 = vpop.f32.mrb[42].mxu1  ;;  %v1556_v31 = vpop.f32.mrb[43].mxu0 }
 0x14f   : > { %1249 = vst [vmem:[%s2096_s20 + $0x98] sm:$0xff] %v1217_v25  ;;  %v991_v32 = vadd.f32 %v1554_v26, %v2088_v34  ;;  %v1557_v33 = vadd.f32 %v1556_v31, %v1555_v28  ;;  %v1668_v35 = vpop.f32.mrb[43].mxu1 }
 0x150   : > { %v1669_v36 = vadd.f32 %v1668_v35, %v1667_v30 }
 0x151   : > { %v1152_v37 = vadd.f32 %v1666_v29, %v991_v32  ;;  %v994_v38 = vadd.f32 %v1557_v33, %v2088_v34 }
 0x153   : > { %v1218_v39 = vmax.f32 %v1152_v37, 0.0  ;;  %v1155_v40 = vadd.f32 %v1669_v36, %v994_v38  ;;  %v1558_v41 = vpop.f32.mrb[44].mxu0 }
 0x154   : > { %v1670_v42 = vpop.f32.mrb[44].mxu1  ;;  %v1559_v43 = vpop.f32.mrb[45].mxu0 }
 0x155   : > { %1250 = vst [vmem:[%s2096_s20 + $0xa0] sm:$0xff] %v1218_v39  ;;  %v1219_v44 = vmax.f32 %v1155_v40, 0.0  ;;  %v1560_v45 = vadd.f32 %v1559_v43, %v1558_v41  ;;  %v1671_v46 = vpop.f32.mrb[45].mxu1  ;;  %v1561_v47 = vpop.f32.mrb[46].mxu0 }
 0x156   : > { %v1672_v48 = vadd.f32 %v1671_v46, %v1670_v42  ;;  %v1673_v49 = vpop.f32.mrb[46].mxu1  ;;  %v1562_v50 = vpop.f32.mrb[47].mxu0 }
 0x157   : > { %1251 = vst [vmem:[%s2096_s20 + $0xa8] sm:$0xff] %v1219_v44  ;;  %v999_v51 = vadd.f32 %v1560_v45, %v2088_v34  ;;  %v1563_v52 = vadd.f32 %v1562_v50, %v1561_v47  ;;  %v1674_v53 = vpop.f32.mrb[47].mxu1 }
 0x158   : > { %v1675_v54 = vadd.f32 %v1674_v53, %v1673_v49 }
 0x159   : > { %v1160_v55 = vadd.f32 %v1672_v48, %v999_v51  ;;  %v1002_v56 = vadd.f32 %v1563_v52, %v2088_v34 }
 0x15b   : > { %v1220_v57 = vmax.f32 %v1160_v55, 0.0  ;;  %v1163_v58 = vadd.f32 %v1675_v54, %v1002_v56  ;;  %v1564_v59 = vpop.f32.mrb[48].mxu0 }
 0x15c   : > { %v1676_v60 = vpop.f32.mrb[48].mxu1  ;;  %v1565_v61 = vpop.f32.mrb[49].mxu0 }
 0x15d   : > { %1252 = vst [vmem:[%s2096_s20 + $0xb0] sm:$0xff] %v1220_v57  ;;  %v1221_v62 = vmax.f32 %v1163_v58, 0.0  ;;  %v1566_v63 = vadd.f32 %v1565_v61, %v1564_v59  ;;  %v1677_v0 = vpop.f32.mrb[49].mxu1  ;;  %v1567_v1 = vpop.f32.mrb[50].mxu0 }
 0x15e   : > { %v1678_v2 = vadd.f32 %v1677_v0, %v1676_v60  ;;  %v1679_v3 = vpop.f32.mrb[50].mxu1  ;;  %v1568_v4 = vpop.f32.mrb[51].mxu0 }
 0x15f   : > { %1253 = vst [vmem:[%s2096_s20 + $0xb8] sm:$0xff] %v1221_v62  ;;  %v1007_v5 = vadd.f32 %v1566_v63, %v2088_v34  ;;  %v1569_v6 = vadd.f32 %v1568_v4, %v1567_v1  ;;  %v1680_v7 = vpop.f32.mrb[51].mxu1 }
 0x160   : > { %v1681_v8 = vadd.f32 %v1680_v7, %v1679_v3 }
 0x161   : > { %v1168_v9 = vadd.f32 %v1678_v2, %v1007_v5  ;;  %v1010_v10 = vadd.f32 %v1569_v6, %v2088_v34 }
 0x163   : > { %v1222_v11 = vmax.f32 %v1168_v9, 0.0  ;;  %v1171_v12 = vadd.f32 %v1681_v8, %v1010_v10  ;;  %v1570_v13 = vpop.f32.mrb[52].mxu0 }
 0x164   : > { %v1682_v14 = vpop.f32.mrb[52].mxu1  ;;  %v1571_v15 = vpop.f32.mrb[53].mxu0 }
 0x165   : > { %1254 = vst [vmem:[%s2096_s20 + $0xc0] sm:$0xff] %v1222_v11  ;;  %v1223_v16 = vmax.f32 %v1171_v12, 0.0  ;;  %v1572_v17 = vadd.f32 %v1571_v15, %v1570_v13  ;;  %v1683_v18 = vpop.f32.mrb[53].mxu1  ;;  %v1573_v19 = vpop.f32.mrb[54].mxu0 }
 0x166   : > { %v1684_v20 = vadd.f32 %v1683_v18, %v1682_v14  ;;  %v1685_v21 = vpop.f32.mrb[54].mxu1  ;;  %v1574_v22 = vpop.f32.mrb[55].mxu0 }
 0x167   : > { %1255 = vst [vmem:[%s2096_s20 + $0xc8] sm:$0xff] %v1223_v16  ;;  %v1015_v23 = vadd.f32 %v1572_v17, %v2088_v34  ;;  %v1575_v24 = vadd.f32 %v1574_v22, %v1573_v19  ;;  %v1686_v25 = vpop.f32.mrb[55].mxu1 }
 0x168   : > { %v1687_v26 = vadd.f32 %v1686_v25, %v1685_v21 }
 0x169   : > { %v1176_v27 = vadd.f32 %v1684_v20, %v1015_v23  ;;  %v1018_v28 = vadd.f32 %v1575_v24, %v2088_v34 }
 0x16b   : > { %v1224_v29 = vmax.f32 %v1176_v27, 0.0  ;;  %v1179_v30 = vadd.f32 %v1687_v26, %v1018_v28  ;;  %v1576_v31 = vpop.f32.mrb[56].mxu0 }
 0x16c   : > { %v1688_v32 = vpop.f32.mrb[56].mxu1  ;;  %v1577_v33 = vpop.f32.mrb[57].mxu0 }
 0x16d   : > { %1256 = vst [vmem:[%s2096_s20 + $0xd0] sm:$0xff] %v1224_v29  ;;  %v1225_v35 = vmax.f32 %v1179_v30, 0.0  ;;  %v1578_v36 = vadd.f32 %v1577_v33, %v1576_v31  ;;  %v1689_v37 = vpop.f32.mrb[57].mxu1  ;;  %v1579_v38 = vpop.f32.mrb[58].mxu0 }
 0x16e   : > { %v1690_v39 = vadd.f32 %v1689_v37, %v1688_v32  ;;  %v1691_v40 = vpop.f32.mrb[58].mxu1  ;;  %v1580_v41 = vpop.f32.mrb[59].mxu0 }
 0x16f   : > { %1257 = vst [vmem:[%s2096_s20 + $0xd8] sm:$0xff] %v1225_v35  ;;  %v1023_v42 = vadd.f32 %v1578_v36, %v2088_v34  ;;  %v1581_v43 = vadd.f32 %v1580_v41, %v1579_v38  ;;  %v1692_v44 = vpop.f32.mrb[59].mxu1 }
 0x170   : > { %v1693_v45 = vadd.f32 %v1692_v44, %v1691_v40 }
 0x171   : > { %v1184_v46 = vadd.f32 %v1690_v39, %v1023_v42  ;;  %v1026_v47 = vadd.f32 %v1581_v43, %v2088_v34 }
 0x173   : > { %v1226_v48 = vmax.f32 %v1184_v46, 0.0  ;;  %v1187_v49 = vadd.f32 %v1693_v45, %v1026_v47  ;;  %v1582_v50 = vpop.f32.mrb[60].mxu0 }
 0x174   : > { %v1694_v51 = vpop.f32.mrb[60].mxu1  ;;  %v1583_v52 = vpop.f32.mrb[61].mxu0 }
 0x175   : > { %1258 = vst [vmem:[%s2096_s20 + $0xe0] sm:$0xff] %v1226_v48  ;;  %v1227_v53 = vmax.f32 %v1187_v49, 0.0  ;;  %v1584_v54 = vadd.f32 %v1583_v52, %v1582_v50  ;;  %v1695_v55 = vpop.f32.mrb[61].mxu1  ;;  %v1585_v56 = vpop.f32.mrb[62].mxu0 }
 0x176   : > { %v1696_v57 = vadd.f32 %v1695_v55, %v1694_v51  ;;  %v1697_v58 = vpop.f32.mrb[62].mxu1  ;;  %v1586_v59 = vpop.f32.mrb[63].mxu0 }
 0x177   : > { %1259 = vst [vmem:[%s2096_s20 + $0xe8] sm:$0xff] %v1227_v53  ;;  %v1031_v60 = vadd.f32 %v1584_v54, %v2088_v34  ;;  %v1587_v61 = vadd.f32 %v1586_v59, %v1585_v56  ;;  %v1698_v62 = vpop.f32.mrb[63].mxu1 }
 0x178   : > { %v1699_v63 = vadd.f32 %v1698_v62, %v1697_v58 }
 0x179   : > { %v1192_v0 = vadd.f32 %v1696_v57, %v1031_v60  ;;  %v1034_v1 = vadd.f32 %v1587_v61, %v2088_v34 }
 0x17b   : > { %v1228_v2 = vmax.f32 %v1192_v0, 0.0  ;;  %v1195_v3 = vadd.f32 %v1699_v63, %v1034_v1 }
 0x17d   : > { %1260 = vst [vmem:[%s2096_s20 + $0xf0] sm:$0xff] %v1228_v2  ;;  %v1229_v4 = vmax.f32 %v1195_v3, 0.0 }
 0x17f   : > { %1261 = vst [vmem:[%s2096_s20 + $0xf8] sm:$0xff] %v1229_v4 }
 0x180 PF: > { %s13_s14 = sadd.s32 1, %s1874_s14   ;;  %s2173_s12 = smov %s1870_s13 }
 0x181   : > { %p10_p5 = scmp.ge.s32.totalorder %s13_s14, 5   ;;  %s2174_s13 = smov %s2176_s15 }
 0x183   :  { %12 = sbr.rel (!%p10_p5) target bundleno = 2 (0x2), region = 68 }

// kernel: vae_forward.13
= control target key start
LH: loop header
LB: loop body
LE: loop exit
PB: predicated region body
PF: predicated region fallthrough
CT: control target
= control target key end

     0   :  { %s2312_s1 = inlined_call_operand.vmem [shape: bf16[1024,128], index: 1, kind: input, shape index: {}]   ;;  %s2313_s0 = inlined_call_operand.vmem [shape: bf16[128,1024], index: 0, kind: input, shape index: {}]   ;;  %s2314_s2 = inlined_call_operand.vmem [shape: f32[1,128], index: 2, kind: input, shape index: {}]   ;;  %s2315_s3 = inlined_call_operand.vmem [shape: f32[128,128], index: 3, kind: output, shape index: {}]  }
   0x1   :  { %v1727_v0 = vld [vmem:[%s2312_s1 + $0x40] sm:$0xff]   ;;  %v1731_v4 = vld [vmem:[%s2312_s1 + $0x48] sm:$0xff]   ;;  %v1735_v8 = vld [vmem:[%s2312_s1 + $0x50] sm:$0xff]  }
   0x2   :  { %v1728_v1 = vld [vmem:[%s2312_s1 + $0xc0] sm:$0xff]   ;;  %1471 = vmatprep.subr.bf16.mxu0 %v1727_v0  ;;  %v1732_v5 = vld [vmem:[%s2312_s1 + $0xc8] sm:$0xff]   ;;  %v1736_v9 = vld [vmem:[%s2312_s1 + $0xd0] sm:$0xff]  }
   0x3   :  { %v1729_v2 = vld [vmem:[%s2312_s1] sm:$0xff]   ;;  %1535 = vmatprep.subr.bf16.mxu1 %v1728_v1  ;;  %v1733_v6 = vld [vmem:[%s2312_s1 + $0x8] sm:$0xff]   ;;  %v1737_v10 = vld [vmem:[%s2312_s1 + $0x10] sm:$0xff]  }
   0x4   :  { %v1730_v3 = vld [vmem:[%s2312_s1 + $0x80] sm:$0xff]   ;;  %1472 = vmatpush3.bf16.msra.mxu0 %v1729_v2  ;;  %v1734_v7 = vld [vmem:[%s2312_s1 + $0x88] sm:$0xff]   ;;  %v1738_v11 = vld [vmem:[%s2312_s1 + $0x90] sm:$0xff]  }
   0x5   :  { %1536 = vmatpush3.bf16.msra.mxu1 %v1730_v3  ;;  %1473 = vmatprep.subr.bf16.mxu0 %v1731_v4  ;;  %v1739_v12 = vld [vmem:[%s2312_s1 + $0x58] sm:$0xff]   ;;  %v1743_v16 = vld [vmem:[%s2312_s1 + $0x60] sm:$0xff]   ;;  %v1747_v20 = vld [vmem:[%s2312_s1 + $0x68] sm:$0xff]  }
   0x6   :  { %1537 = vmatprep.subr.bf16.mxu1 %v1732_v5  ;;  %v1740_v13 = vld [vmem:[%s2312_s1 + $0xd8] sm:$0xff]   ;;  %v1744_v17 = vld [vmem:[%s2312_s1 + $0xe0] sm:$0xff]   ;;  %v1748_v21 = vld [vmem:[%s2312_s1 + $0xe8] sm:$0xff]  }
   0x7   :  { %v1741_v14 = vld [vmem:[%s2312_s1 + $0x18] sm:$0xff]   ;;  %v1745_v18 = vld [vmem:[%s2312_s1 + $0x20] sm:$0xff]   ;;  %v1749_v22 = vld [vmem:[%s2312_s1 + $0x28] sm:$0xff]  }
   0x8   :  { %1474 = vmatpush3.bf16.msra.mxu0 %v1733_v6  ;;  %v1742_v15 = vld [vmem:[%s2312_s1 + $0x98] sm:$0xff]   ;;  %v1746_v19 = vld [vmem:[%s2312_s1 + $0xa0] sm:$0xff]   ;;  %v1750_v23 = vld [vmem:[%s2312_s1 + $0xa8] sm:$0xff]  }
   0x9   :  { %1538 = vmatpush3.bf16.msra.mxu1 %v1734_v7  ;;  %1475 = vmatprep.subr.bf16.mxu0 %v1735_v8  ;;  %v1751_v24 = vld [vmem:[%s2312_s1 + $0x70] sm:$0xff]   ;;  %v1755_v28 = vld [vmem:[%s2312_s1 + $0x78] sm:$0xff]   ;;  %v15_v32 = vld [vmem:[%s2313_s0] sm:$0xff] }
   0xa   :  { %1539 = vmatprep.subr.bf16.mxu1 %v1736_v9  ;;  %v1752_v25 = vld [vmem:[%s2312_s1 + $0xf0] sm:$0xff]   ;;  %v1756_v29 = vld [vmem:[%s2312_s1 + $0xf8] sm:$0xff]   ;;  %v19_v33 = vld [vmem:[%s2313_s0 + $0x20] sm:$0xff] }
   0xb   :  { %v1753_v26 = vld [vmem:[%s2312_s1 + $0x30] sm:$0xff]   ;;  %v1757_v30 = vld [vmem:[%s2312_s1 + $0x38] sm:$0xff]   ;;  %v16_v34 = vld [vmem:[%s2313_s0 + $0x8] sm:$0xff]  ;;  %v1343_v35 = vcombine.low %v15_v32, %v19_v33  ;;  %v1344_v36 = vcombine.high %v15_v32, %v19_v33 }
   0xc   :  { %1476 = vmatpush3.bf16.msra.mxu0 %v1737_v10  ;;  %v1754_v27 = vld [vmem:[%s2312_s1 + $0xb0] sm:$0xff]   ;;  %v1758_v31 = vld [vmem:[%s2312_s1 + $0xb8] sm:$0xff]   ;;  %v20_v37 = vld [vmem:[%s2313_s0 + $0x28] sm:$0xff] }
   0xd   :  { %1540 = vmatpush3.bf16.msra.mxu1 %v1738_v11  ;;  %1477 = vmatprep.subr.bf16.mxu0 %v1739_v12  ;;  %v1345_v38 = vcombine.low %v16_v34, %v20_v37  ;;  %v1346_v39 = vcombine.high %v16_v34, %v20_v37  ;;  %v1759_v40 = vld [vmem:[%s2312_s1 + $0x140] sm:$0xff]   ;;  %v24_v47 = vld [vmem:[%s2313_s0 + $0x48] sm:$0xff]  ;;  %v1767_v62 = vld [vmem:[%s2312_s1 + $0x150] sm:$0xff]  }
   0xe   :  { %1541 = vmatprep.subr.bf16.mxu1 %v1740_v13  ;;  %950 = vmatprep.mubr.bf16.mxu0 %v1344_v36  ;;  %v1760_v41 = vld [vmem:[%s2312_s1 + $0x100] sm:$0xff]   ;;  %v28_v48 = vld [vmem:[%s2313_s0 + $0x68] sm:$0xff]  ;;  %v1768_v63 = vld [vmem:[%s2312_s1 + $0x110] sm:$0xff]  }
   0xf   :  { %1047 = vmatprep.mubr.bf16.mxu1 %v1346_v39  ;;  %v1761_v42 = vld [vmem:[%s2312_s1 + $0x1c0] sm:$0xff]   ;;  %v1354_v49 = vcombine.high %v24_v47, %v28_v48  ;;  %v1763_v50 = vld [vmem:[%s2312_s1 + $0x148] sm:$0xff]   ;;  %v1353_v53 = vcombine.low %v24_v47, %v28_v48  ;;  %v1769_v0 = vld [vmem:[%s2312_s1 + $0x1d0] sm:$0xff]  }
  0x10   :  { %1478 = vmatpush3.bf16.msra.mxu0 %v1741_v14  ;;  %v1762_v43 = vld [vmem:[%s2312_s1 + $0x180] sm:$0xff]   ;;  %v1764_v52 = vld [vmem:[%s2312_s1 + $0x108] sm:$0xff]   ;;  %v1770_v1 = vld [vmem:[%s2312_s1 + $0x190] sm:$0xff]  }
  0x11   :  { %1542 = vmatpush3.bf16.msra.mxu1 %v1742_v15  ;;  %1479 = vmatprep.subr.bf16.mxu0 %v1743_v16  ;;  %v23_v44 = vld [vmem:[%s2313_s0 + $0x40] sm:$0xff]  ;;  %v1765_v54 = vld [vmem:[%s2312_s1 + $0x1c8] sm:$0xff]   ;;  %v1771_v10 = vld [vmem:[%s2312_s1 + $0x158] sm:$0xff]  }
  0x12   :  { %1543 = vmatprep.subr.bf16.mxu1 %v1744_v17  ;;  %v27_v45 = vld [vmem:[%s2313_s0 + $0x60] sm:$0xff]  ;;  %v1766_v55 = vld [vmem:[%s2312_s1 + $0x188] sm:$0xff]   ;;  %v1772_v11 = vld [vmem:[%s2312_s1 + $0x118] sm:$0xff]  }
  0x13   :  { %v1352_v46 = vcombine.high %v23_v44, %v27_v45  ;;  %v1351_v51 = vcombine.low %v23_v44, %v27_v45  ;;  %v31_v56 = vld [vmem:[%s2313_s0 + $0x80] sm:$0xff]  ;;  %v32_v58 = vld [vmem:[%s2313_s0 + $0x88] sm:$0xff]  ;;  %v1773_v12 = vld [vmem:[%s2312_s1 + $0x1d8] sm:$0xff]  }
  0x14   :  { %1480 = vmatpush3.bf16.msra.mxu0 %v1745_v18  ;;  %v35_v57 = vld [vmem:[%s2313_s0 + $0xa0] sm:$0xff]  ;;  %v36_v59 = vld [vmem:[%s2313_s0 + $0xa8] sm:$0xff]  ;;  %v1774_v13 = vld [vmem:[%s2312_s1 + $0x198] sm:$0xff]  }
  0x15   :  { %1544 = vmatpush3.bf16.msra.mxu1 %v1746_v19  ;;  %1481 = vmatprep.subr.bf16.mxu0 %v1747_v20  ;;  %v1360_v60 = vcombine.high %v31_v56, %v35_v57  ;;  %v1362_v61 = vcombine.high %v32_v58, %v36_v59  ;;  %v1359_v2 = vcombine.low %v31_v56, %v35_v57  ;;  %v39_v3 = vld [vmem:[%s2313_s0 + $0xc0] sm:$0xff]  ;;  %v40_v5 = vld [vmem:[%s2313_s0 + $0xc8] sm:$0xff]  ;;  %v1784_v39 = vld [vmem:[%s2312_s1 + $0x130] sm:$0xff]  }
  0x16   :  { %1545 = vmatprep.subr.bf16.mxu1 %v1748_v21  ;;  %v43_v4 = vld [vmem:[%s2313_s0 + $0xe0] sm:$0xff]  ;;  %v1361_v6 = vcombine.low %v32_v58, %v36_v59  ;;  %v44_v8 = vld [vmem:[%s2313_s0 + $0xe8] sm:$0xff]  ;;  %v1788_v48 = vld [vmem:[%s2312_s1 + $0x138] sm:$0xff]  }
  0x17   :  { %v1368_v7 = vcombine.high %v39_v3, %v43_v4  ;;  %v1370_v9 = vcombine.high %v40_v5, %v44_v8  ;;  %v47_v14 = vld [vmem:[%s2313_s0 + $0x100] sm:$0xff]  ;;  %v48_v16 = vld [vmem:[%s2313_s0 + $0x108] sm:$0xff]  ;;  %v1367_v19 = vcombine.low %v39_v3, %v43_v4  ;;  %v1369_v21 = vcombine.low %v40_v5, %v44_v8  ;;  %v26_v8 = vld [vmem:[%s2313_s0 + $0x58] sm:$0xff] }
  0x18   :  { %1482 = vmatpush3.bf16.msra.mxu0 %v1749_v22  ;;  %v51_v15 = vld [vmem:[%s2313_s0 + $0x120] sm:$0xff]  ;;  %v52_v17 = vld [vmem:[%s2313_s0 + $0x128] sm:$0xff] }
  0x19   :  { %1546 = vmatpush3.bf16.msra.mxu1 %v1750_v23  ;;  %1483 = vmatprep.subr.bf16.mxu0 %v1751_v24  ;;  %v1775_v18 = vld [vmem:[%s2312_s1 + $0x160] sm:$0xff]   ;;  %v1376_v22 = vcombine.high %v47_v14, %v51_v15  ;;  %v1378_v24 = vcombine.high %v48_v16, %v52_v17  ;;  %v1781_v32 = vld [vmem:[%s2312_s1 + $0x1e8] sm:$0xff]   ;;  %v1375_v34 = vcombine.low %v47_v14, %v51_v15  ;;  %v33_v14 = vld [vmem:[%s2313_s0 + $0x90] sm:$0xff] }
  0x1a   :  { %1547 = vmatprep.subr.bf16.mxu1 %v1752_v25  ;;  %v1776_v20 = vld [vmem:[%s2312_s1 + $0x120] sm:$0xff]   ;;  %v1782_v33 = vld [vmem:[%s2312_s1 + $0x1a8] sm:$0xff]   ;;  %v37_v15 = vld [vmem:[%s2313_s0 + $0xb0] sm:$0xff] }
  0x1b   :  { %v1777_v23 = vld [vmem:[%s2312_s1 + $0x1e0] sm:$0xff]   ;;  %v64_v44 = vld [vmem:[%s2313_s0 + $0x188] sm:$0xff] }
  0x1c   :  { %1484 = vmatpush3.bf16.msra.mxu0 %v1753_v26  ;;  %v1778_v25 = vld [vmem:[%s2312_s1 + $0x1a0] sm:$0xff]   ;;  %v68_v45 = vld [vmem:[%s2313_s0 + $0x1a8] sm:$0xff] }
  0x1d   :  { %1548 = vmatpush3.bf16.msra.mxu1 %v1754_v27  ;;  %1485 = vmatprep.subr.bf16.mxu0 %v1755_v28  ;;  %v55_v26 = vld [vmem:[%s2313_s0 + $0x140] sm:$0xff]  ;;  %v1779_v28 = vld [vmem:[%s2312_s1 + $0x168] sm:$0xff]   ;;  %v1393_v59 = vcombine.low %v64_v44, %v68_v45 }
  0x1e   :  { %1549 = vmatprep.subr.bf16.mxu1 %v1756_v29  ;;  %v59_v27 = vld [vmem:[%s2313_s0 + $0x160] sm:$0xff]  ;;  %v56_v29 = vld [vmem:[%s2313_s0 + $0x148] sm:$0xff] }
  0x1f   :  { %v1384_v36 = vcombine.high %v55_v26, %v59_v27  ;;  %v1383_v47 = vcombine.low %v55_v26, %v59_v27  ;;  %v72_v56 = vld [vmem:[%s2313_s0 + $0x1c8] sm:$0xff]  ;;  %v1363_v26 = vcombine.low %v33_v14, %v37_v15 }
  0x20   :  { %1486 = vmatpush3.bf16.msra.mxu0 %v1757_v30  ;;  %v60_v30 = vld [vmem:[%s2313_s0 + $0x168] sm:$0xff] }
  0x21   :  { %1550 = vmatpush3.bf16.msra.mxu1 %v1758_v31  ;;  %1599 = vmatprep.subr.bf16.mxu0 %v1759_v40  ;;  %v1780_v31 = vld [vmem:[%s2312_s1 + $0x128] sm:$0xff]   ;;  %v1386_v37 = vcombine.high %v56_v29, %v60_v30  ;;  %v1785_v40 = vld [vmem:[%s2312_s1 + $0x1f0] sm:$0xff]  }
  0x22   :  { %1663 = vmatprep.subr.bf16.mxu1 %v1761_v42  ;;  %v67_v42 = vld [vmem:[%s2313_s0 + $0x1a0] sm:$0xff]  ;;  %v76_v57 = vld [vmem:[%s2313_s0 + $0x1e8] sm:$0xff] }
  0x23   :  { %951 = vmatmul.mubr.bf16.vlgmr.msra.gmra.mrb[0].mxu0 %v1343_v35  ;;  %v1377_v35 = vcombine.low %v48_v16, %v52_v17  ;;  %v1401_v3 = vcombine.low %v72_v56, %v76_v57  ;;  %v34_v16 = vld [vmem:[%s2313_s0 + $0x98] sm:$0xff] }
  0x24   :  { %1048 = vmatmul.mubr.bf16.vlgmr.msra.gmra.mrb[0].mxu1 %v1345_v38  ;;  %1600 = vmatpush3.bf16.msra.mxu0 %v1760_v41  ;;  %v1783_v38 = vld [vmem:[%s2312_s1 + $0x170] sm:$0xff]   ;;  %v63_v41 = vld [vmem:[%s2313_s0 + $0x180] sm:$0xff]  ;;  %v38_v17 = vld [vmem:[%s2313_s0 + $0xb8] sm:$0xff] }
  0x25   :  { %1664 = vmatpush3.bf16.msra.mxu1 %v1762_v43  ;;  %958 = vmatprep.mubr.bf16.mxu0 %v1352_v46  ;;  %v1786_v43 = vld [vmem:[%s2312_s1 + $0x1b0] sm:$0xff]   ;;  %v1787_v46 = vld [vmem:[%s2312_s1 + $0x178] sm:$0xff]   ;;  %v1391_v58 = vcombine.low %v63_v41, %v67_v42  ;;  %v1365_v27 = vcombine.low %v34_v16, %v38_v17 }
  0x26   :  { %1055 = vmatprep.mubr.bf16.mxu1 %v1354_v49  ;;  %1601 = vmatprep.subr.bf16.mxu0 %v1763_v50  ;;  %v1385_v49 = vcombine.low %v56_v29, %v60_v30  ;;  %v1392_v50 = vcombine.high %v63_v41, %v67_v42  ;;  %v49_v30 = vld [vmem:[%s2313_s0 + $0x110] sm:$0xff]  ;;  %v62_v41 = vld [vmem:[%s2313_s0 + $0x178] sm:$0xff] }
  0x27   :  { %1665 = vmatprep.subr.bf16.mxu1 %v1765_v54  ;;  %v71_v54 = vld [vmem:[%s2313_s0 + $0x1c0] sm:$0xff] }
  0x28   :  { %1602 = vmatpush3.bf16.msra.mxu0 %v1764_v52  ;;  %v1394_v52 = vcombine.high %v64_v44, %v68_v45 }
  0x29   :  { %1666 = vmatpush3.bf16.msra.mxu1 %v1766_v55  ;;  %1603 = vmatprep.subr.bf16.mxu0 %v1767_v62  ;;  %v75_v55 = vld [vmem:[%s2313_s0 + $0x1e0] sm:$0xff]  ;;  %v17_v62 = vld [vmem:[%s2313_s0 + $0x10] sm:$0xff] }
  0x2a   :  { %1667 = vmatprep.subr.bf16.mxu1 %v1769_v0  ;;  %v18_v0 = vld [vmem:[%s2313_s0 + $0x18] sm:$0xff] }
  0x2b   :  { %959 = vmatmul.mubr.bf16.gmra.mrb[4].mxu0 %v1351_v51  ;;  %v1789_v51 = vld [vmem:[%s2312_s1 + $0x1f8] sm:$0xff]  }
  0x2c   :  { %1056 = vmatmul.mubr.bf16.gmra.mrb[4].mxu1 %v1353_v53  ;;  %966 = vmatprep.mubr.bf16.mxu0 %v1360_v60  ;;  %v1790_v53 = vld [vmem:[%s2312_s1 + $0x1b8] sm:$0xff]   ;;  %v1400_v60 = vcombine.high %v71_v54, %v75_v55 }
  0x2d   :  { %1063 = vmatprep.mubr.bf16.mxu1 %v1362_v61  ;;  %1604 = vmatpush3.bf16.msra.mxu0 %v1768_v63  ;;  %v1402_v61 = vcombine.high %v72_v56, %v76_v57  ;;  %v21_v63 = vld [vmem:[%s2313_s0 + $0x30] sm:$0xff]  ;;  %v74_v56 = vld [vmem:[%s2313_s0 + $0x1d8] sm:$0xff] }
  0x2e   :  { %1668 = vmatpush3.bf16.msra.mxu1 %v1770_v1  ;;  %1605 = vmatprep.subr.bf16.mxu0 %v1771_v10  ;;  %v22_v1 = vld [vmem:[%s2313_s0 + $0x38] sm:$0xff]  ;;  %v1348_v4 = vcombine.high %v17_v62, %v21_v63  ;;  %v1347_v10 = vcombine.low %v17_v62, %v21_v63 }
  0x2f   :  { %1669 = vmatprep.subr.bf16.mxu1 %v1773_v12  ;;  %v1350_v5 = vcombine.high %v18_v0, %v22_v1  ;;  %v78_v57 = vld [vmem:[%s2313_s0 + $0x1f8] sm:$0xff] }
  0x30   :  { %v1405_v63 = vcombine.low %v74_v56, %v78_v57 }
  0x31   :  { %1606 = vmatpush3.bf16.msra.mxu0 %v1772_v11  ;;  %v1349_v11 = vcombine.low %v18_v0, %v22_v1 }
  0x32   :  { %1670 = vmatpush3.bf16.msra.mxu1 %v1774_v13  ;;  %1607 = vmatprep.subr.bf16.mxu0 %v1775_v18 }
  0x33   :  { %967 = vmatmul.mubr.bf16.gmra.mrb[8].mxu0 %v1359_v2  ;;  %1671 = vmatprep.subr.bf16.mxu1 %v1777_v23  ;;  %v1399_v2 = vcombine.low %v71_v54, %v75_v55  ;;  %v45_v23 = vld [vmem:[%s2313_s0 + $0xf0] sm:$0xff] }
  0x34   :  { %1064 = vmatmul.mubr.bf16.gmra.mrb[8].mxu1 %v1361_v6  ;;  %974 = vmatprep.mubr.bf16.mxu0 %v1368_v7  ;;  %v25_v6 = vld [vmem:[%s2313_s0 + $0x50] sm:$0xff] }
  0x35   :  { %1071 = vmatprep.mubr.bf16.mxu1 %v1370_v9  ;;  %1608 = vmatpush3.bf16.msra.mxu0 %v1776_v20  ;;  %v29_v7 = vld [vmem:[%s2313_s0 + $0x70] sm:$0xff]  ;;  %v30_v9 = vld [vmem:[%s2313_s0 + $0x78] sm:$0xff]  ;;  %v1364_v20 = vcombine.high %v33_v14, %v37_v15 }
  0x36   :  { %1672 = vmatpush3.bf16.msra.mxu1 %v1778_v25  ;;  %1609 = vmatprep.subr.bf16.mxu0 %v1779_v28  ;;  %v1356_v12 = vcombine.high %v25_v6, %v29_v7  ;;  %v1358_v13 = vcombine.high %v26_v8, %v30_v9  ;;  %v1355_v18 = vcombine.low %v25_v6, %v29_v7  ;;  %v46_v25 = vld [vmem:[%s2313_s0 + $0xf8] sm:$0xff]  ;;  %v73_v54 = vld [vmem:[%s2313_s0 + $0x1d0] sm:$0xff] }
  0x37   :  { %1673 = vmatprep.subr.bf16.mxu1 %v1781_v32  ;;  %v50_v32 = vld [vmem:[%s2313_s0 + $0x118] sm:$0xff]  ;;  %v77_v55 = vld [vmem:[%s2313_s0 + $0x1f0] sm:$0xff] }
  0x38   :  { %v1403_v62 = vcombine.low %v73_v54, %v77_v55 }
  0x39   :  { %1610 = vmatpush3.bf16.msra.mxu0 %v1780_v31  ;;  %v53_v31 = vld [vmem:[%s2313_s0 + $0x130] sm:$0xff] }
  0x3a   :  { %1674 = vmatpush3.bf16.msra.mxu1 %v1782_v33  ;;  %1611 = vmatprep.subr.bf16.mxu0 %v1783_v38  ;;  %v54_v33 = vld [vmem:[%s2313_s0 + $0x138] sm:$0xff]  ;;  %v57_v38 = vld [vmem:[%s2313_s0 + $0x150] sm:$0xff]  ;;  %v1379_v42 = vcombine.low %v49_v30, %v53_v31 }
  0x3b   :  { %975 = vmatmul.mubr.bf16.gmra.mrb[12].mxu0 %v1367_v19  ;;  %1675 = vmatprep.subr.bf16.mxu1 %v1785_v40  ;;  %v1357_v19 = vcombine.low %v26_v8, %v30_v9  ;;  %v58_v40 = vld [vmem:[%s2313_s0 + $0x158] sm:$0xff] }
  0x3c   :  { %1072 = vmatmul.mubr.bf16.gmra.mrb[12].mxu1 %v1369_v21  ;;  %982 = vmatprep.mubr.bf16.mxu0 %v1376_v22  ;;  %v1366_v21 = vcombine.high %v34_v16, %v38_v17  ;;  %v41_v22 = vld [vmem:[%s2313_s0 + $0xd0] sm:$0xff]  ;;  %v1390_v45 = vcombine.high %v58_v40, %v62_v41 }
  0x3d   :  { %1079 = vmatprep.mubr.bf16.mxu1 %v1378_v24  ;;  %1612 = vmatpush3.bf16.msra.mxu0 %v1784_v39  ;;  %v42_v24 = vld [vmem:[%s2313_s0 + $0xd8] sm:$0xff]  ;;  %v1372_v28 = vcombine.high %v41_v22, %v45_v23  ;;  %v61_v39 = vld [vmem:[%s2313_s0 + $0x170] sm:$0xff] }
  0x3e   :  { %1676 = vmatpush3.bf16.msra.mxu1 %v1786_v43  ;;  %1613 = vmatprep.subr.bf16.mxu0 %v1787_v46  ;;  %v1374_v29 = vcombine.high %v42_v24, %v46_v25  ;;  %v1381_v43 = vcombine.low %v50_v32, %v54_v33  ;;  %v1388_v44 = vcombine.high %v57_v38, %v61_v39  ;;  %v65_v46 = vld [vmem:[%s2313_s0 + $0x190] sm:$0xff] }
  0x3f   :  { %1677 = vmatprep.subr.bf16.mxu1 %v1789_v51  ;;  %v1389_v51 = vcombine.low %v58_v40, %v62_v41 }
  0x41   :  { %1614 = vmatpush3.bf16.msra.mxu0 %v1788_v48  ;;  %v66_v48 = vld [vmem:[%s2313_s0 + $0x198] sm:$0xff] }
  0x42   :  { %1678 = vmatpush3.bf16.msra.mxu1 %v1790_v53 }
  0x43   :  { %983 = vmatmul.mubr.bf16.gmra.mrb[16].mxu0 %v1375_v34  ;;  %v1371_v34 = vcombine.low %v41_v22, %v45_v23 }
  0x44   :  { %1080 = vmatmul.mubr.bf16.gmra.mrb[16].mxu1 %v1377_v35  ;;  %990 = vmatprep.mubr.bf16.mxu0 %v1384_v36  ;;  %v1373_v35 = vcombine.low %v42_v24, %v46_v25  ;;  %v1380_v36 = vcombine.high %v49_v30, %v53_v31 }
  0x45   :  { %1087 = vmatprep.mubr.bf16.mxu1 %v1386_v37  ;;  %v1382_v37 = vcombine.high %v50_v32, %v54_v33 }
  0x4b   :  { %991 = vmatmul.mubr.bf16.gmra.mrb[20].mxu0 %v1383_v47  ;;  %v69_v47 = vld [vmem:[%s2313_s0 + $0x1b0] sm:$0xff] }
  0x4c   :  { %1088 = vmatmul.mubr.bf16.gmra.mrb[20].mxu1 %v1385_v49  ;;  %998 = vmatprep.mubr.bf16.mxu0 %v1392_v50  ;;  %v70_v49 = vld [vmem:[%s2313_s0 + $0x1b8] sm:$0xff]  ;;  %v1387_v50 = vcombine.low %v57_v38, %v61_v39 }
  0x4d   :  { %1095 = vmatprep.mubr.bf16.mxu1 %v1394_v52  ;;  %v1396_v52 = vcombine.high %v65_v46, %v69_v47  ;;  %v1398_v53 = vcombine.high %v66_v48, %v70_v49 }
  0x53   :  { %999 = vmatmul.mubr.bf16.gmra.mrb[24].mxu0 %v1391_v58  ;;  %v1395_v58 = vcombine.low %v65_v46, %v69_v47 }
  0x54   :  { %1096 = vmatmul.mubr.bf16.gmra.mrb[24].mxu1 %v1393_v59  ;;  %1006 = vmatprep.mubr.bf16.mxu0 %v1400_v60  ;;  %v1397_v59 = vcombine.low %v66_v48, %v70_v49  ;;  %v1404_v60 = vcombine.high %v73_v54, %v77_v55 }
  0x55   :  { %1103 = vmatprep.mubr.bf16.mxu1 %v1402_v61  ;;  %v1406_v61 = vcombine.high %v74_v56, %v78_v57 }
  0x5b   :  { %1007 = vmatmul.mubr.bf16.gmra.mrb[28].mxu0 %v1399_v2  ;;  %v2198_v2 = vld [vmem:[%s2314_s2] ss:$0 sm:$0xff] }
  0x5c   :  { %1104 = vmatmul.mubr.bf16.gmra.mrb[28].mxu1 %v1401_v3  ;;  %1144 = vmatprep.mubr.bf16.mxu0 %v1348_v4 }
  0x5d   :  { %1241 = vmatprep.mubr.bf16.mxu1 %v1350_v5 }
  0x63   :  { %1145 = vmatmul.mubr.bf16.vlgmr.msra.gmra.mrb[32].mxu0 %v1347_v10 }
  0x64   :  { %1242 = vmatmul.mubr.bf16.vlgmr.msra.gmra.mrb[32].mxu1 %v1349_v11  ;;  %1152 = vmatprep.mubr.bf16.mxu0 %v1356_v12 }
  0x65   :  { %1249 = vmatprep.mubr.bf16.mxu1 %v1358_v13 }
  0x6b   :  { %1153 = vmatmul.mubr.bf16.gmra.mrb[36].mxu0 %v1355_v18 }
  0x6c   :  { %1250 = vmatmul.mubr.bf16.gmra.mrb[36].mxu1 %v1357_v19  ;;  %1160 = vmatprep.mubr.bf16.mxu0 %v1364_v20 }
  0x6d   :  { %1257 = vmatprep.mubr.bf16.mxu1 %v1366_v21 }
  0x73   :  { %1161 = vmatmul.mubr.bf16.gmra.mrb[40].mxu0 %v1363_v26 }
  0x74   :  { %1258 = vmatmul.mubr.bf16.gmra.mrb[40].mxu1 %v1365_v27  ;;  %1168 = vmatprep.mubr.bf16.mxu0 %v1372_v28 }
  0x75   :  { %1265 = vmatprep.mubr.bf16.mxu1 %v1374_v29 }
  0x7b   :  { %1169 = vmatmul.mubr.bf16.gmra.mrb[44].mxu0 %v1371_v34 }
  0x7c   :  { %1266 = vmatmul.mubr.bf16.gmra.mrb[44].mxu1 %v1373_v35  ;;  %1176 = vmatprep.mubr.bf16.mxu0 %v1380_v36 }
  0x7d   :  { %1273 = vmatprep.mubr.bf16.mxu1 %v1382_v37 }
  0x83   :  { %1177 = vmatmul.mubr.bf16.gmra.mrb[48].mxu0 %v1379_v42 }
  0x84   :  { %1274 = vmatmul.mubr.bf16.gmra.mrb[48].mxu1 %v1381_v43  ;;  %1184 = vmatprep.mubr.bf16.mxu0 %v1388_v44 }
  0x85   :  { %1281 = vmatprep.mubr.bf16.mxu1 %v1390_v45 }
  0x8b   :  { %1185 = vmatmul.mubr.bf16.gmra.mrb[52].mxu0 %v1387_v50 }
  0x8c   :  { %1282 = vmatmul.mubr.bf16.gmra.mrb[52].mxu1 %v1389_v51  ;;  %1192 = vmatprep.mubr.bf16.mxu0 %v1396_v52 }
  0x8d   :  { %1289 = vmatprep.mubr.bf16.mxu1 %v1398_v53 }
  0x93   :  { %1193 = vmatmul.mubr.bf16.gmra.mrb[56].mxu0 %v1395_v58 }
  0x94   :  { %1290 = vmatmul.mubr.bf16.gmra.mrb[56].mxu1 %v1397_v59  ;;  %1200 = vmatprep.mubr.bf16.mxu0 %v1404_v60 }
  0x95   :  { %1297 = vmatprep.mubr.bf16.mxu1 %v1406_v61 }
  0x9b   :  { %1201 = vmatmul.mubr.bf16.gmra.mrb[60].mxu0 %v1403_v62 }
  0x9c   :  { %1298 = vmatmul.mubr.bf16.gmra.mrb[60].mxu1 %v1405_v63 }
  0xf6   :  { %v1487_v0 = vpop.f32.mrb[0].mxu0 }
  0xf7   :  { %v1551_v1 = vpop.f32.mrb[0].mxu1  ;;  %v1488_v3 = vpop.f32.mrb[1].mxu0 }
  0xf8   :  { %v1489_v4 = vadd.f32 %v1488_v3, %v1487_v0  ;;  %v1552_v5 = vpop.f32.mrb[1].mxu1  ;;  %v1490_v6 = vpop.f32.mrb[2].mxu0 }
  0xf9   :  { %v1553_v7 = vadd.f32 %v1552_v5, %v1551_v1  ;;  %v1554_v8 = vpop.f32.mrb[2].mxu1  ;;  %v1491_v9 = vpop.f32.mrb[3].mxu0 }
  0xfa   :  { %v953_v10 = vadd.f32 %v1489_v4, %v2198_v2  ;;  %v1492_v11 = vadd.f32 %v1491_v9, %v1490_v6  ;;  %v1555_v12 = vpop.f32.mrb[3].mxu1 }
  0xfb   :  { %v1556_v13 = vadd.f32 %v1555_v12, %v1554_v8 }
  0xfc   :  { %v2201_v14 = vadd.f32 %v1553_v7, %v953_v10  ;;  %v956_v15 = vadd.f32 %v1492_v11, %v2198_v2 }
  0xfe   :  { %v2204_v16 = vadd.f32 %v1556_v13, %v956_v15  ;;  %v1493_v17 = vpop.f32.mrb[4].mxu0 }
  0xff   :  { %v1557_v18 = vpop.f32.mrb[4].mxu1  ;;  %v1494_v19 = vpop.f32.mrb[5].mxu0 }
 0x100   :  { %v1495_v20 = vadd.f32 %v1494_v19, %v1493_v17  ;;  %v1558_v21 = vpop.f32.mrb[5].mxu1  ;;  %v1496_v22 = vpop.f32.mrb[6].mxu0 }
 0x101   :  { %v1559_v23 = vadd.f32 %v1558_v21, %v1557_v18  ;;  %v1560_v24 = vpop.f32.mrb[6].mxu1  ;;  %v1497_v25 = vpop.f32.mrb[7].mxu0 }
 0x102   :  { %v961_v26 = vadd.f32 %v1495_v20, %v2198_v2  ;;  %v1498_v27 = vadd.f32 %v1497_v25, %v1496_v22  ;;  %v1561_v28 = vpop.f32.mrb[7].mxu1 }
 0x103   :  { %v1562_v29 = vadd.f32 %v1561_v28, %v1560_v24 }
 0x104   :  { %v2207_v30 = vadd.f32 %v1559_v23, %v961_v26  ;;  %v964_v31 = vadd.f32 %v1498_v27, %v2198_v2 }
 0x106   :  { %v2210_v32 = vadd.f32 %v1562_v29, %v964_v31  ;;  %v1499_v33 = vpop.f32.mrb[8].mxu0 }
 0x107   :  { %v1563_v34 = vpop.f32.mrb[8].mxu1  ;;  %v1500_v35 = vpop.f32.mrb[9].mxu0 }
 0x108   :  { %v1501_v36 = vadd.f32 %v1500_v35, %v1499_v33  ;;  %v1564_v37 = vpop.f32.mrb[9].mxu1  ;;  %v1502_v38 = vpop.f32.mrb[10].mxu0 }
 0x109   :  { %v1565_v39 = vadd.f32 %v1564_v37, %v1563_v34  ;;  %v1566_v40 = vpop.f32.mrb[10].mxu1  ;;  %v1503_v41 = vpop.f32.mrb[11].mxu0 }
 0x10a   :  { %v969_v42 = vadd.f32 %v1501_v36, %v2198_v2  ;;  %v1504_v43 = vadd.f32 %v1503_v41, %v1502_v38  ;;  %v1567_v44 = vpop.f32.mrb[11].mxu1 }
 0x10b   :  { %v1568_v45 = vadd.f32 %v1567_v44, %v1566_v40 }
 0x10c   :  { %v2213_v46 = vadd.f32 %v1565_v39, %v969_v42  ;;  %v972_v47 = vadd.f32 %v1504_v43, %v2198_v2 }
 0x10e   :  { %v2216_v48 = vadd.f32 %v1568_v45, %v972_v47  ;;  %v1505_v49 = vpop.f32.mrb[12].mxu0 }
 0x10f   :  { %v1569_v50 = vpop.f32.mrb[12].mxu1  ;;  %v1506_v51 = vpop.f32.mrb[13].mxu0 }
 0x110   :  { %v1507_v52 = vadd.f32 %v1506_v51, %v1505_v49  ;;  %v1570_v53 = vpop.f32.mrb[13].mxu1  ;;  %v1508_v54 = vpop.f32.mrb[14].mxu0 }
 0x111   :  { %v1571_v55 = vadd.f32 %v1570_v53, %v1569_v50  ;;  %v1572_v56 = vpop.f32.mrb[14].mxu1  ;;  %v1509_v57 = vpop.f32.mrb[15].mxu0 }
 0x112   :  { %v977_v58 = vadd.f32 %v1507_v52, %v2198_v2  ;;  %v1510_v59 = vadd.f32 %v1509_v57, %v1508_v54  ;;  %v1573_v60 = vpop.f32.mrb[15].mxu1 }
 0x113   :  { %v1574_v61 = vadd.f32 %v1573_v60, %v1572_v56 }
 0x114   :  { %v2219_v62 = vadd.f32 %v1571_v55, %v977_v58  ;;  %v980_v63 = vadd.f32 %v1510_v59, %v2198_v2 }
 0x116   :  { %v2222_v0 = vadd.f32 %v1574_v61, %v980_v63  ;;  %v1511_v1 = vpop.f32.mrb[16].mxu0 }
 0x117   :  { %v1575_v3 = vpop.f32.mrb[16].mxu1  ;;  %v1512_v4 = vpop.f32.mrb[17].mxu0 }
 0x118   :  { %v1513_v5 = vadd.f32 %v1512_v4, %v1511_v1  ;;  %v1576_v6 = vpop.f32.mrb[17].mxu1  ;;  %v1514_v7 = vpop.f32.mrb[18].mxu0 }
 0x119   :  { %v1577_v8 = vadd.f32 %v1576_v6, %v1575_v3  ;;  %v1578_v9 = vpop.f32.mrb[18].mxu1  ;;  %v1515_v10 = vpop.f32.mrb[19].mxu0 }
 0x11a   :  { %v985_v11 = vadd.f32 %v1513_v5, %v2198_v2  ;;  %v1516_v12 = vadd.f32 %v1515_v10, %v1514_v7  ;;  %v1579_v13 = vpop.f32.mrb[19].mxu1 }
 0x11b   :  { %v1580_v15 = vadd.f32 %v1579_v13, %v1578_v9 }
 0x11c   :  { %v2225_v17 = vadd.f32 %v1577_v8, %v985_v11  ;;  %v988_v18 = vadd.f32 %v1516_v12, %v2198_v2 }
 0x11e   :  { %v2228_v19 = vadd.f32 %v1580_v15, %v988_v18  ;;  %v1517_v20 = vpop.f32.mrb[20].mxu0 }
 0x11f   :  { %v1581_v21 = vpop.f32.mrb[20].mxu1  ;;  %v1518_v22 = vpop.f32.mrb[21].mxu0 }
 0x120   :  { %v1519_v23 = vadd.f32 %v1518_v22, %v1517_v20  ;;  %v1582_v24 = vpop.f32.mrb[21].mxu1  ;;  %v1520_v25 = vpop.f32.mrb[22].mxu0 }
 0x121   :  { %v1583_v26 = vadd.f32 %v1582_v24, %v1581_v21  ;;  %v1584_v27 = vpop.f32.mrb[22].mxu1  ;;  %v1521_v28 = vpop.f32.mrb[23].mxu0 }
 0x122   :  { %v993_v29 = vadd.f32 %v1519_v23, %v2198_v2  ;;  %v1522_v31 = vadd.f32 %v1521_v28, %v1520_v25  ;;  %v1585_v33 = vpop.f32.mrb[23].mxu1 }
 0x123   :  { %v1586_v34 = vadd.f32 %v1585_v33, %v1584_v27 }
 0x124   :  { %v2231_v35 = vadd.f32 %v1583_v26, %v993_v29  ;;  %v996_v36 = vadd.f32 %v1522_v31, %v2198_v2 }
 0x126   :  { %v2234_v37 = vadd.f32 %v1586_v34, %v996_v36  ;;  %v1523_v38 = vpop.f32.mrb[24].mxu0 }
 0x127   :  { %v1587_v39 = vpop.f32.mrb[24].mxu1  ;;  %v1524_v40 = vpop.f32.mrb[25].mxu0 }
 0x128   :  { %v1525_v41 = vadd.f32 %v1524_v40, %v1523_v38  ;;  %v1588_v42 = vpop.f32.mrb[25].mxu1  ;;  %v1526_v43 = vpop.f32.mrb[26].mxu0 }
 0x129   :  { %v1589_v44 = vadd.f32 %v1588_v42, %v1587_v39  ;;  %v1590_v45 = vpop.f32.mrb[26].mxu1  ;;  %v1527_v47 = vpop.f32.mrb[27].mxu0 }
 0x12a   :  { %v1001_v49 = vadd.f32 %v1525_v41, %v2198_v2  ;;  %v1528_v50 = vadd.f32 %v1527_v47, %v1526_v43  ;;  %v1591_v51 = vpop.f32.mrb[27].mxu1 }
 0x12b   :  { %v1592_v52 = vadd.f32 %v1591_v51, %v1590_v45 }
 0x12c   :  { %v2237_v53 = vadd.f32 %v1589_v44, %v1001_v49  ;;  %v1004_v54 = vadd.f32 %v1528_v50, %v2198_v2 }
 0x12e   :  { %v2240_v55 = vadd.f32 %v1592_v52, %v1004_v54  ;;  %v1529_v56 = vpop.f32.mrb[28].mxu0 }
 0x12f   :  { %v1593_v57 = vpop.f32.mrb[28].mxu1  ;;  %v1530_v58 = vpop.f32.mrb[29].mxu0 }
 0x130   :  { %v1531_v59 = vadd.f32 %v1530_v58, %v1529_v56  ;;  %v1594_v60 = vpop.f32.mrb[29].mxu1  ;;  %v1532_v61 = vpop.f32.mrb[30].mxu0 }
 0x131   :  { %v1595_v63 = vadd.f32 %v1594_v60, %v1593_v57  ;;  %v1596_v1 = vpop.f32.mrb[30].mxu1  ;;  %v1533_v3 = vpop.f32.mrb[31].mxu0 }
 0x132   :  { %v1009_v4 = vadd.f32 %v1531_v59, %v2198_v2  ;;  %v1534_v5 = vadd.f32 %v1533_v3, %v1532_v61  ;;  %v1597_v6 = vpop.f32.mrb[31].mxu1 }
 0x133   :  { %v1598_v7 = vadd.f32 %v1597_v6, %v1596_v1 }
 0x134   :  { %v2243_v8 = vadd.f32 %v1595_v63, %v1009_v4  ;;  %v1012_v9 = vadd.f32 %v1534_v5, %v2198_v2 }
 0x136   :  { %v2246_v10 = vadd.f32 %v1598_v7, %v1012_v9  ;;  %v1615_v11 = vpop.f32.mrb[32].mxu0 }
 0x137   :  { %v1679_v12 = vpop.f32.mrb[32].mxu1  ;;  %v1616_v13 = vpop.f32.mrb[33].mxu0 }
 0x138   :  { %v1617_v15 = vadd.f32 %v1616_v13, %v1615_v11  ;;  %v1680_v18 = vpop.f32.mrb[33].mxu1  ;;  %v1618_v20 = vpop.f32.mrb[34].mxu0 }
 0x139   :  { %v1681_v21 = vadd.f32 %v1680_v18, %v1679_v12  ;;  %v1682_v22 = vpop.f32.mrb[34].mxu1  ;;  %v1619_v23 = vpop.f32.mrb[35].mxu0 }
 0x13a   :  { %v1147_v24 = vadd.f32 %v1617_v15, %v2201_v14  ;;  %v1620_v25 = vadd.f32 %v1619_v23, %v1618_v20  ;;  %v1683_v26 = vpop.f32.mrb[35].mxu1 }
 0x13b   :  { %v1684_v27 = vadd.f32 %v1683_v26, %v1682_v22 }
 0x13c   :  { %v1244_v28 = vadd.f32 %v1681_v21, %v1147_v24  ;;  %v1150_v29 = vadd.f32 %v1620_v25, %v2204_v16 }
 0x13e   :  { %v1306_v2 = vmax.f32 %v1244_v28, 0.0  ;;  %v1247_v31 = vadd.f32 %v1684_v27, %v1150_v29  ;;  %v1621_v33 = vpop.f32.mrb[36].mxu0 }
 0x13f   :  { %v1685_v34 = vpop.f32.mrb[36].mxu1  ;;  %v1622_v36 = vpop.f32.mrb[37].mxu0 }
 0x140   :  { %1322 = vst [vmem:[%s2315_s3] sm:$0xff] %v1306_v2  ;;  %v1307_v38 = vmax.f32 %v1247_v31, 0.0  ;;  %v1623_v39 = vadd.f32 %v1622_v36, %v1621_v33  ;;  %v1686_v40 = vpop.f32.mrb[37].mxu1  ;;  %v1624_v41 = vpop.f32.mrb[38].mxu0 }
 0x141   :  { %v1687_v14 = vadd.f32 %v1686_v40, %v1685_v34  ;;  %v1688_v42 = vpop.f32.mrb[38].mxu1  ;;  %v1625_v43 = vpop.f32.mrb[39].mxu0 }
 0x142   :  { %1323 = vst [vmem:[%s2315_s3 + $0x8] sm:$0xff] %v1307_v38  ;;  %v1155_v16 = vadd.f32 %v1623_v39, %v2207_v30  ;;  %v1626_v44 = vadd.f32 %v1625_v43, %v1624_v41  ;;  %v1689_v45 = vpop.f32.mrb[39].mxu1 }
 0x143   :  { %v1690_v47 = vadd.f32 %v1689_v45, %v1688_v42 }
 0x144   :  { %v1252_v49 = vadd.f32 %v1687_v14, %v1155_v16  ;;  %v1158_v50 = vadd.f32 %v1626_v44, %v2210_v32 }
 0x146   :  { %v1308_v51 = vmax.f32 %v1252_v49, 0.0  ;;  %v1255_v52 = vadd.f32 %v1690_v47, %v1158_v50  ;;  %v1627_v54 = vpop.f32.mrb[40].mxu0 }
 0x147   :  { %v1691_v56 = vpop.f32.mrb[40].mxu1  ;;  %v1628_v57 = vpop.f32.mrb[41].mxu0 }
 0x148   :  { %1324 = vst [vmem:[%s2315_s3 + $0x10] sm:$0xff] %v1308_v51  ;;  %v1309_v58 = vmax.f32 %v1255_v52, 0.0  ;;  %v1629_v59 = vadd.f32 %v1628_v57, %v1627_v54  ;;  %v1692_v60 = vpop.f32.mrb[41].mxu1  ;;  %v1630_v61 = vpop.f32.mrb[42].mxu0 }
 0x149   :  { %v1693_v30 = vadd.f32 %v1692_v60, %v1691_v56  ;;  %v1694_v63 = vpop.f32.mrb[42].mxu1  ;;  %v1631_v1 = vpop.f32.mrb[43].mxu0 }
 0x14a   :  { %1325 = vst [vmem:[%s2315_s3 + $0x18] sm:$0xff] %v1309_v58  ;;  %v1163_v32 = vadd.f32 %v1629_v59, %v2213_v46  ;;  %v1632_v3 = vadd.f32 %v1631_v1, %v1630_v61  ;;  %v1695_v4 = vpop.f32.mrb[43].mxu1 }
 0x14b   :  { %v1696_v5 = vadd.f32 %v1695_v4, %v1694_v63 }
 0x14c   :  { %v1260_v6 = vadd.f32 %v1693_v30, %v1163_v32  ;;  %v1166_v7 = vadd.f32 %v1632_v3, %v2216_v48 }
 0x14e   :  { %v1310_v9 = vmax.f32 %v1260_v6, 0.0  ;;  %v1263_v11 = vadd.f32 %v1696_v5, %v1166_v7  ;;  %v1633_v12 = vpop.f32.mrb[44].mxu0 }
 0x14f   :  { %v1697_v13 = vpop.f32.mrb[44].mxu1  ;;  %v1634_v15 = vpop.f32.mrb[45].mxu0 }
 0x150   :  { %1326 = vst [vmem:[%s2315_s3 + $0x20] sm:$0xff] %v1310_v9  ;;  %v1311_v18 = vmax.f32 %v1263_v11, 0.0  ;;  %v1635_v20 = vadd.f32 %v1634_v15, %v1633_v12  ;;  %v1698_v21 = vpop.f32.mrb[45].mxu1  ;;  %v1636_v22 = vpop.f32.mrb[46].mxu0 }
 0x151   :  { %v1699_v46 = vadd.f32 %v1698_v21, %v1697_v13  ;;  %v1700_v23 = vpop.f32.mrb[46].mxu1  ;;  %v1637_v24 = vpop.f32.mrb[47].mxu0 }
 0x152   :  { %1327 = vst [vmem:[%s2315_s3 + $0x28] sm:$0xff] %v1311_v18  ;;  %v1171_v48 = vadd.f32 %v1635_v20, %v2219_v62  ;;  %v1638_v25 = vadd.f32 %v1637_v24, %v1636_v22  ;;  %v1701_v26 = vpop.f32.mrb[47].mxu1 }
 0x153   :  { %v1702_v27 = vadd.f32 %v1701_v26, %v1700_v23 }
 0x154   :  { %v1268_v28 = vadd.f32 %v1699_v46, %v1171_v48  ;;  %v1174_v29 = vadd.f32 %v1638_v25, %v2222_v0 }
 0x156   :  { %v1312_v2 = vmax.f32 %v1268_v28, 0.0  ;;  %v1271_v31 = vadd.f32 %v1702_v27, %v1174_v29  ;;  %v1639_v33 = vpop.f32.mrb[48].mxu0 }
 0x157   :  { %v1703_v34 = vpop.f32.mrb[48].mxu1  ;;  %v1640_v36 = vpop.f32.mrb[49].mxu0 }
 0x158   :  { %1328 = vst [vmem:[%s2315_s3 + $0x30] sm:$0xff] %v1312_v2  ;;  %v1313_v38 = vmax.f32 %v1271_v31, 0.0  ;;  %v1641_v39 = vadd.f32 %v1640_v36, %v1639_v33  ;;  %v1704_v40 = vpop.f32.mrb[49].mxu1  ;;  %v1642_v41 = vpop.f32.mrb[50].mxu0 }
 0x159   :  { %v1705_v62 = vadd.f32 %v1704_v40, %v1703_v34  ;;  %v1706_v14 = vpop.f32.mrb[50].mxu1  ;;  %v1643_v42 = vpop.f32.mrb[51].mxu0 }
 0x15a   :  { %1329 = vst [vmem:[%s2315_s3 + $0x38] sm:$0xff] %v1313_v38  ;;  %v1179_v0 = vadd.f32 %v1641_v39, %v2225_v17  ;;  %v1644_v43 = vadd.f32 %v1643_v42, %v1642_v41  ;;  %v1707_v16 = vpop.f32.mrb[51].mxu1 }
 0x15b   :  { %v1708_v44 = vadd.f32 %v1707_v16, %v1706_v14 }
 0x15c   :  { %v1276_v45 = vadd.f32 %v1705_v62, %v1179_v0  ;;  %v1182_v47 = vadd.f32 %v1644_v43, %v2228_v19 }
 0x15e   :  { %v1314_v49 = vmax.f32 %v1276_v45, 0.0  ;;  %v1279_v50 = vadd.f32 %v1708_v44, %v1182_v47  ;;  %v1645_v51 = vpop.f32.mrb[52].mxu0 }
 0x15f   :  { %v1709_v52 = vpop.f32.mrb[52].mxu1  ;;  %v1646_v54 = vpop.f32.mrb[53].mxu0 }
 0x160   :  { %1330 = vst [vmem:[%s2315_s3 + $0x40] sm:$0xff] %v1314_v49  ;;  %v1315_v56 = vmax.f32 %v1279_v50, 0.0  ;;  %v1647_v57 = vadd.f32 %v1646_v54, %v1645_v51  ;;  %v1710_v58 = vpop.f32.mrb[53].mxu1  ;;  %v1648_v59 = vpop.f32.mrb[54].mxu0 }
 0x161   :  { %v1711_v17 = vadd.f32 %v1710_v58, %v1709_v52  ;;  %v1712_v60 = vpop.f32.mrb[54].mxu1  ;;  %v1649_v61 = vpop.f32.mrb[55].mxu0 }
 0x162   :  { %1331 = vst [vmem:[%s2315_s3 + $0x48] sm:$0xff] %v1315_v56  ;;  %v1187_v19 = vadd.f32 %v1647_v57, %v2231_v35  ;;  %v1650_v30 = vadd.f32 %v1649_v61, %v1648_v59  ;;  %v1713_v63 = vpop.f32.mrb[55].mxu1 }
 0x163   :  { %v1714_v1 = vadd.f32 %v1713_v63, %v1712_v60 }
 0x164   :  { %v1284_v32 = vadd.f32 %v1711_v17, %v1187_v19  ;;  %v1190_v3 = vadd.f32 %v1650_v30, %v2234_v37 }
 0x166   :  { %v1316_v4 = vmax.f32 %v1284_v32, 0.0  ;;  %v1287_v5 = vadd.f32 %v1714_v1, %v1190_v3  ;;  %v1651_v6 = vpop.f32.mrb[56].mxu0 }
 0x167   :  { %v1715_v7 = vpop.f32.mrb[56].mxu1  ;;  %v1652_v9 = vpop.f32.mrb[57].mxu0 }
 0x168   :  { %1332 = vst [vmem:[%s2315_s3 + $0x50] sm:$0xff] %v1316_v4  ;;  %v1317_v11 = vmax.f32 %v1287_v5, 0.0  ;;  %v1653_v12 = vadd.f32 %v1652_v9, %v1651_v6  ;;  %v1716_v13 = vpop.f32.mrb[57].mxu1  ;;  %v1654_v15 = vpop.f32.mrb[58].mxu0 }
 0x169   :  { %v1717_v35 = vadd.f32 %v1716_v13, %v1715_v7  ;;  %v1718_v18 = vpop.f32.mrb[58].mxu1  ;;  %v1655_v20 = vpop.f32.mrb[59].mxu0 }
 0x16a   :  { %1333 = vst [vmem:[%s2315_s3 + $0x58] sm:$0xff] %v1317_v11  ;;  %v1195_v37 = vadd.f32 %v1653_v12, %v2237_v53  ;;  %v1656_v21 = vadd.f32 %v1655_v20, %v1654_v15  ;;  %v1719_v22 = vpop.f32.mrb[59].mxu1 }
 0x16b   :  { %v1720_v46 = vadd.f32 %v1719_v22, %v1718_v18 }
 0x16c   :  { %v1292_v23 = vadd.f32 %v1717_v35, %v1195_v37  ;;  %v1198_v24 = vadd.f32 %v1656_v21, %v2240_v55 }
 0x16e   :  { %v1318_v48 = vmax.f32 %v1292_v23, 0.0  ;;  %v1295_v25 = vadd.f32 %v1720_v46, %v1198_v24  ;;  %v1657_v26 = vpop.f32.mrb[60].mxu0 }
 0x16f   :  { %v1721_v27 = vpop.f32.mrb[60].mxu1  ;;  %v1658_v28 = vpop.f32.mrb[61].mxu0 }
 0x170   :  { %1334 = vst [vmem:[%s2315_s3 + $0x60] sm:$0xff] %v1318_v48  ;;  %v1319_v29 = vmax.f32 %v1295_v25, 0.0  ;;  %v1659_v2 = vadd.f32 %v1658_v28, %v1657_v26  ;;  %v1722_v31 = vpop.f32.mrb[61].mxu1  ;;  %v1660_v33 = vpop.f32.mrb[62].mxu0 }
 0x171   :  { %v1723_v53 = vadd.f32 %v1722_v31, %v1721_v27  ;;  %v1724_v34 = vpop.f32.mrb[62].mxu1  ;;  %v1661_v36 = vpop.f32.mrb[63].mxu0 }
 0x172   :  { %1335 = vst [vmem:[%s2315_s3 + $0x68] sm:$0xff] %v1319_v29  ;;  %v1203_v55 = vadd.f32 %v1659_v2, %v2243_v8  ;;  %v1662_v38 = vadd.f32 %v1661_v36, %v1660_v33  ;;  %v1725_v39 = vpop.f32.mrb[63].mxu1 }
 0x173   :  { %v1726_v40 = vadd.f32 %v1725_v39, %v1724_v34 }
 0x174   :  { %v1300_v41 = vadd.f32 %v1723_v53, %v1203_v55  ;;  %v1206_v62 = vadd.f32 %v1662_v38, %v2246_v10 }
 0x176   :  { %v1320_v14 = vmax.f32 %v1300_v41, 0.0  ;;  %v1303_v42 = vadd.f32 %v1726_v40, %v1206_v62 }
 0x178   :  { %1336 = vst [vmem:[%s2315_s3 + $0x70] sm:$0xff] %v1320_v14  ;;  %v1321_v0 = vmax.f32 %v1303_v42, 0.0 }
 0x17a   :  { %1337 = vst [vmem:[%s2315_s3 + $0x78] sm:$0xff] %v1321_v0 }

// kernel: vae_forward.14
= control target key start
LH: loop header
LB: loop body
LE: loop exit
PB: predicated region body
PF: predicated region fallthrough
CT: control target
= control target key end

     0   :  { %s3893_s1 = inlined_call_operand.vmem [shape: bf16[2048,256], index: 1, kind: input, shape index: {}]   ;;  %s3894_s0 = inlined_call_operand.vmem [shape: bf16[32,2048], index: 0, kind: input, shape index: {}]   ;;  %s3895_s2 = inlined_call_operand.vmem [shape: f32[1,256], index: 2, kind: input, shape index: {}]   ;;  %s3896_s3 = inlined_call_operand.vmem [shape: f32[32,256], index: 3, kind: output, shape index: {}]  }
   0x1   :  { %v2550_v0 = vld [vmem:[%s3893_s1 + $0x4] ss:$8 sps:$4 sm:$0xff]   ;;  %v2554_v2 = vld [vmem:[%s3893_s1] ss:$8 sps:$4 sm:$0xff]   ;;  %v2556_v4 = vld [vmem:[%s3893_s1 + $0x14] ss:$8 sps:$4 sm:$0xff]  }
   0x2   :  { %v2552_v1 = vld [vmem:[%s3893_s1 + $0x404] ss:$8 sps:$4 sm:$0xff]   ;;  %1754 = vmatprep.subr.bf16.mxu1 %v2550_v0  ;;  %v2555_v3 = vld [vmem:[%s3893_s1 + $0x400] ss:$8 sps:$4 sm:$0xff]   ;;  %v2558_v5 = vld [vmem:[%s3893_s1 + $0x414] ss:$8 sps:$4 sm:$0xff]  }
   0x3   :  { %1966 = vmatprep.subr.bf16.mxu0 %v2552_v1  ;;  %1755 = vmatpush1.bf16.msra.mxu1 %v2554_v2  ;;  %v2560_v6 = vld [vmem:[%s3893_s1 + $0x10] ss:$8 sps:$4 sm:$0xff]   ;;  %v2562_v8 = vld [vmem:[%s3893_s1 + $0x24] ss:$8 sps:$4 sm:$0xff]   ;;  %v2566_v10 = vld [vmem:[%s3893_s1 + $0x20] ss:$8 sps:$4 sm:$0xff]  }
   0x4   :  { %1967 = vmatpush1.bf16.msra.mxu0 %v2555_v3  ;;  %1756 = vmatprep.subr.bf16.mxu1 %v2556_v4  ;;  %v2561_v7 = vld [vmem:[%s3893_s1 + $0x410] ss:$8 sps:$4 sm:$0xff]   ;;  %v2564_v9 = vld [vmem:[%s3893_s1 + $0x424] ss:$8 sps:$4 sm:$0xff]   ;;  %v2567_v11 = vld [vmem:[%s3893_s1 + $0x420] ss:$8 sps:$4 sm:$0xff]  }
   0x5   :  { %1968 = vmatprep.subr.bf16.mxu0 %v2558_v5  ;;  %v2568_v12 = vld [vmem:[%s3893_s1 + $0x34] ss:$8 sps:$4 sm:$0xff]   ;;  %v2572_v14 = vld [vmem:[%s3893_s1 + $0x30] ss:$8 sps:$4 sm:$0xff]   ;;  %v2574_v16 = vld [vmem:[%s3893_s1 + $0x44] ss:$8 sps:$4 sm:$0xff]  }
   0x6   :  { %v2570_v13 = vld [vmem:[%s3893_s1 + $0x434] ss:$8 sps:$4 sm:$0xff]   ;;  %v2573_v15 = vld [vmem:[%s3893_s1 + $0x430] ss:$8 sps:$4 sm:$0xff]   ;;  %v2576_v17 = vld [vmem:[%s3893_s1 + $0x444] ss:$8 sps:$4 sm:$0xff]  }
   0x7   :  { %1757 = vmatpush1.bf16.msra.mxu1 %v2560_v6  ;;  %v2578_v18 = vld [vmem:[%s3893_s1 + $0x40] ss:$8 sps:$4 sm:$0xff]   ;;  %v2580_v20 = vld [vmem:[%s3893_s1 + $0x54] ss:$8 sps:$4 sm:$0xff]   ;;  %v2584_v22 = vld [vmem:[%s3893_s1 + $0x50] ss:$8 sps:$4 sm:$0xff]  }
   0x8   :  { %1969 = vmatpush1.bf16.msra.mxu0 %v2561_v7  ;;  %1758 = vmatprep.subr.bf16.mxu1 %v2562_v8  ;;  %v2579_v19 = vld [vmem:[%s3893_s1 + $0x440] ss:$8 sps:$4 sm:$0xff]   ;;  %v2582_v21 = vld [vmem:[%s3893_s1 + $0x454] ss:$8 sps:$4 sm:$0xff]   ;;  %v2585_v23 = vld [vmem:[%s3893_s1 + $0x450] ss:$8 sps:$4 sm:$0xff]  }
   0x9   :  { %1970 = vmatprep.subr.bf16.mxu0 %v2564_v9  ;;  %v2586_v24 = vld [vmem:[%s3893_s1 + $0x64] ss:$8 sps:$4 sm:$0xff]   ;;  %v2590_v26 = vld [vmem:[%s3893_s1 + $0x60] ss:$8 sps:$4 sm:$0xff]   ;;  %v2592_v28 = vld [vmem:[%s3893_s1 + $0x74] ss:$8 sps:$4 sm:$0xff]  }
   0xa   :  { %v2588_v25 = vld [vmem:[%s3893_s1 + $0x464] ss:$8 sps:$4 sm:$0xff]   ;;  %v2591_v27 = vld [vmem:[%s3893_s1 + $0x460] ss:$8 sps:$4 sm:$0xff]   ;;  %v2594_v29 = vld [vmem:[%s3893_s1 + $0x474] ss:$8 sps:$4 sm:$0xff]  }
   0xb   :  { %1759 = vmatpush1.bf16.msra.mxu1 %v2566_v10  ;;  %v2596_v30 = vld [vmem:[%s3893_s1 + $0x70] ss:$8 sps:$4 sm:$0xff]   ;;  %v2598_v32 = vld [vmem:[%s3893_s1 + $0x84] ss:$8 sps:$4 sm:$0xff]   ;;  %v2602_v34 = vld [vmem:[%s3893_s1 + $0x80] ss:$8 sps:$4 sm:$0xff]  }
   0xc   :  { %1971 = vmatpush1.bf16.msra.mxu0 %v2567_v11  ;;  %1760 = vmatprep.subr.bf16.mxu1 %v2568_v12  ;;  %v2597_v31 = vld [vmem:[%s3893_s1 + $0x470] ss:$8 sps:$4 sm:$0xff]   ;;  %v2600_v33 = vld [vmem:[%s3893_s1 + $0x484] ss:$8 sps:$4 sm:$0xff]   ;;  %v2603_v35 = vld [vmem:[%s3893_s1 + $0x480] ss:$8 sps:$4 sm:$0xff]  }
   0xd   :  { %1972 = vmatprep.subr.bf16.mxu0 %v2570_v13  ;;  %v2604_v36 = vld [vmem:[%s3893_s1 + $0x94] ss:$8 sps:$4 sm:$0xff]   ;;  %v2608_v38 = vld [vmem:[%s3893_s1 + $0x90] ss:$8 sps:$4 sm:$0xff]   ;;  %v2610_v40 = vld [vmem:[%s3893_s1 + $0xa4] ss:$8 sps:$4 sm:$0xff]  }
   0xe   :  { %v2606_v37 = vld [vmem:[%s3893_s1 + $0x494] ss:$8 sps:$4 sm:$0xff]   ;;  %v2609_v39 = vld [vmem:[%s3893_s1 + $0x490] ss:$8 sps:$4 sm:$0xff]   ;;  %v2612_v41 = vld [vmem:[%s3893_s1 + $0x4a4] ss:$8 sps:$4 sm:$0xff]  }
   0xf   :  { %1761 = vmatpush1.bf16.msra.mxu1 %v2572_v14  ;;  %v2614_v42 = vld [vmem:[%s3893_s1 + $0xa0] ss:$8 sps:$4 sm:$0xff]   ;;  %v2616_v44 = vld [vmem:[%s3893_s1 + $0xb4] ss:$8 sps:$4 sm:$0xff]   ;;  %v2620_v46 = vld [vmem:[%s3893_s1 + $0xb0] ss:$8 sps:$4 sm:$0xff]  }
  0x10   :  { %1973 = vmatpush1.bf16.msra.mxu0 %v2573_v15  ;;  %1762 = vmatprep.subr.bf16.mxu1 %v2574_v16  ;;  %v2615_v43 = vld [vmem:[%s3893_s1 + $0x4a0] ss:$8 sps:$4 sm:$0xff]   ;;  %v2618_v45 = vld [vmem:[%s3893_s1 + $0x4b4] ss:$8 sps:$4 sm:$0xff]   ;;  %v2621_v47 = vld [vmem:[%s3893_s1 + $0x4b0] ss:$8 sps:$4 sm:$0xff]  }
  0x11   :  { %1974 = vmatprep.subr.bf16.mxu0 %v2576_v17  ;;  %v14_v48 = vld [vmem:[%s3894_s0] sm:$0xff]  ;;  %v2628_v58 = vld [vmem:[%s3893_s1 + $0xd4] ss:$8 sps:$4 sm:$0xff]   ;;  %v2632_v60 = vld [vmem:[%s3893_s1 + $0xd0] ss:$8 sps:$4 sm:$0xff]  }
  0x12   :  { %v22_v49 = vld [vmem:[%s3894_s0 + $0x40] sm:$0xff]  ;;  %v2630_v59 = vld [vmem:[%s3893_s1 + $0x4d4] ss:$8 sps:$4 sm:$0xff]   ;;  %v2633_v61 = vld [vmem:[%s3893_s1 + $0x4d0] ss:$8 sps:$4 sm:$0xff]  }
  0x13   :  { %1763 = vmatpush1.bf16.msra.mxu1 %v2578_v18  ;;  %v2622_v50 = vld [vmem:[%s3893_s1 + $0xc4] ss:$8 sps:$4 sm:$0xff]   ;;  %v2199_v52 = vcombine.high %v14_v48, %v22_v49  ;;  %v2626_v56 = vld [vmem:[%s3893_s1 + $0xc0] ss:$8 sps:$4 sm:$0xff]   ;;  %v2640_v2 = vld [vmem:[%s3893_s1 + $0xf4] ss:$8 sps:$4 sm:$0xff]   ;;  %v2198_v8 = vcombine.low %v14_v48, %v22_v49 }
  0x14   :  { %1975 = vmatpush1.bf16.msra.mxu0 %v2579_v19  ;;  %1764 = vmatprep.subr.bf16.mxu1 %v2580_v20  ;;  %v2624_v51 = vld [vmem:[%s3893_s1 + $0x4c4] ss:$8 sps:$4 sm:$0xff]   ;;  %v2627_v57 = vld [vmem:[%s3893_s1 + $0x4c0] ss:$8 sps:$4 sm:$0xff]   ;;  %v2642_v3 = vld [vmem:[%s3893_s1 + $0x4f4] ss:$8 sps:$4 sm:$0xff]  }
  0x15   :  { %1976 = vmatprep.subr.bf16.mxu0 %v2582_v21  ;;  %v18_v53 = vld [vmem:[%s3894_s0 + $0x20] sm:$0xff]  ;;  %1786 = vmatprep.mubr.bf16.mxu1 %v2199_v52  ;;  %v2644_v4 = vld [vmem:[%s3893_s1 + $0xf0] ss:$8 sps:$4 sm:$0xff]   ;;  %v2654_v12 = vld [vmem:[%s3893_s1 + $0x114] ss:$8 sps:$4 sm:$0xff]  }
  0x16   :  { %v26_v54 = vld [vmem:[%s3894_s0 + $0x60] sm:$0xff]  ;;  %v2645_v5 = vld [vmem:[%s3893_s1 + $0x4f0] ss:$8 sps:$4 sm:$0xff]   ;;  %v2657_v13 = vld [vmem:[%s3893_s1 + $0x514] ss:$8 sps:$4 sm:$0xff]  }
  0x17   :  { %1765 = vmatpush1.bf16.msra.mxu1 %v2584_v22  ;;  %v2207_v55 = vcombine.high %v18_v53, %v26_v54  ;;  %v2634_v62 = vld [vmem:[%s3893_s1 + $0xe4] ss:$8 sps:$4 sm:$0xff]   ;;  %v2638_v0 = vld [vmem:[%s3893_s1 + $0xe0] ss:$8 sps:$4 sm:$0xff]   ;;  %v2206_v10 = vcombine.low %v18_v53, %v26_v54  ;;  %v2652_v14 = vld [vmem:[%s3893_s1 + $0x110] ss:$8 sps:$4 sm:$0xff]  }
  0x18   :  { %1977 = vmatpush1.bf16.msra.mxu0 %v2585_v23  ;;  %1766 = vmatprep.subr.bf16.mxu1 %v2586_v24  ;;  %v2636_v63 = vld [vmem:[%s3893_s1 + $0x4e4] ss:$8 sps:$4 sm:$0xff]   ;;  %v2639_v1 = vld [vmem:[%s3893_s1 + $0x4e0] ss:$8 sps:$4 sm:$0xff]   ;;  %v2655_v15 = vld [vmem:[%s3893_s1 + $0x510] ss:$8 sps:$4 sm:$0xff]  }
  0x19   :  { %1978 = vmatprep.subr.bf16.mxu0 %v2588_v25  ;;  %1998 = vmatprep.mubr.bf16.mxu0 %v2207_v55  ;;  %v2648_v6 = vld [vmem:[%s3893_s1 + $0x104] ss:$8 sps:$4 sm:$0xff]   ;;  %v2646_v9 = vld [vmem:[%s3893_s1 + $0x100] ss:$8 sps:$4 sm:$0xff]   ;;  %v2666_v20 = vld [vmem:[%s3893_s1 + $0x134] ss:$8 sps:$4 sm:$0xff]  }
  0x1a   :  { %v2651_v7 = vld [vmem:[%s3893_s1 + $0x504] ss:$8 sps:$4 sm:$0xff]   ;;  %v2649_v11 = vld [vmem:[%s3893_s1 + $0x500] ss:$8 sps:$4 sm:$0xff]   ;;  %v2669_v21 = vld [vmem:[%s3893_s1 + $0x534] ss:$8 sps:$4 sm:$0xff]  }
  0x1b   :  { %1767 = vmatpush1.bf16.msra.mxu1 %v2590_v26  ;;  %v2660_v16 = vld [vmem:[%s3893_s1 + $0x124] ss:$8 sps:$4 sm:$0xff]   ;;  %v2658_v18 = vld [vmem:[%s3893_s1 + $0x120] ss:$8 sps:$4 sm:$0xff]   ;;  %v2664_v22 = vld [vmem:[%s3893_s1 + $0x130] ss:$8 sps:$4 sm:$0xff]  }
  0x1c   :  { %1979 = vmatpush1.bf16.msra.mxu0 %v2591_v27  ;;  %1768 = vmatprep.subr.bf16.mxu1 %v2592_v28  ;;  %v2663_v17 = vld [vmem:[%s3893_s1 + $0x524] ss:$8 sps:$4 sm:$0xff]   ;;  %v2661_v19 = vld [vmem:[%s3893_s1 + $0x520] ss:$8 sps:$4 sm:$0xff]   ;;  %v2667_v23 = vld [vmem:[%s3893_s1 + $0x530] ss:$8 sps:$4 sm:$0xff]  }
  0x1d   :  { %1980 = vmatprep.subr.bf16.mxu0 %v2594_v29  ;;  %v2672_v24 = vld [vmem:[%s3893_s1 + $0x144] ss:$8 sps:$4 sm:$0xff]   ;;  %v2670_v26 = vld [vmem:[%s3893_s1 + $0x140] ss:$8 sps:$4 sm:$0xff]   ;;  %v2678_v28 = vld [vmem:[%s3893_s1 + $0x154] ss:$8 sps:$4 sm:$0xff]  }
  0x1e   :  { %v2675_v25 = vld [vmem:[%s3893_s1 + $0x544] ss:$8 sps:$4 sm:$0xff]   ;;  %v2673_v27 = vld [vmem:[%s3893_s1 + $0x540] ss:$8 sps:$4 sm:$0xff]   ;;  %v2681_v29 = vld [vmem:[%s3893_s1 + $0x554] ss:$8 sps:$4 sm:$0xff]  }
  0x1f   :  { %1769 = vmatpush1.bf16.msra.mxu1 %v2596_v30  ;;  %v30_v30 = vld [vmem:[%s3894_s0 + $0x80] sm:$0xff]  ;;  %v3275_v49 = vld [vmem:[%s3894_s0 + $0x28] sm:$0xff]  ;;  %v2691_v52 = vld [vmem:[%s3893_s1 + $0x570] ss:$8 sps:$4 sm:$0xff]  }
  0x20   :  { %1981 = vmatpush1.bf16.msra.mxu0 %v2597_v31  ;;  %1770 = vmatprep.subr.bf16.mxu1 %v2598_v32  ;;  %v38_v31 = vld [vmem:[%s3894_s0 + $0xc0] sm:$0xff]  ;;  %v2676_v32 = vld [vmem:[%s3893_s1 + $0x150] ss:$8 sps:$4 sm:$0xff]  }
  0x21   :  { %1982 = vmatprep.subr.bf16.mxu0 %v2600_v33  ;;  %v2215_v33 = vcombine.high %v30_v30, %v38_v31  ;;  %v2696_v54 = vld [vmem:[%s3893_s1 + $0x184] ss:$8 sps:$4 sm:$0xff]  }
  0x22   :  { %v2699_v55 = vld [vmem:[%s3893_s1 + $0x584] ss:$8 sps:$4 sm:$0xff]  }
  0x23   :  { %1771 = vmatpush1.bf16.msra.mxu1 %v2602_v34  ;;  %v2679_v34 = vld [vmem:[%s3893_s1 + $0x550] ss:$8 sps:$4 sm:$0xff]  }
  0x24   :  { %1983 = vmatpush1.bf16.msra.mxu0 %v2603_v35  ;;  %1772 = vmatprep.subr.bf16.mxu1 %v2604_v36  ;;  %v34_v35 = vld [vmem:[%s3894_s0 + $0xa0] sm:$0xff] }
  0x25   :  { %1984 = vmatprep.subr.bf16.mxu0 %v2606_v37  ;;  %v42_v36 = vld [vmem:[%s3894_s0 + $0xe0] sm:$0xff]  ;;  %v2214_v37 = vcombine.low %v30_v30, %v38_v31  ;;  %v2750_v30 = vld [vmem:[%s3893_s1 + $0x214] ss:$8 sps:$4 sm:$0xff]  }
  0x26   :  { %v2753_v31 = vld [vmem:[%s3893_s1 + $0x614] ss:$8 sps:$4 sm:$0xff]  }
  0x27   :  { %1773 = vmatpush1.bf16.msra.mxu1 %v2608_v38  ;;  %v2684_v38 = vld [vmem:[%s3893_s1 + $0x164] ss:$8 sps:$4 sm:$0xff]  }
  0x28   :  { %1985 = vmatpush1.bf16.msra.mxu0 %v2609_v39  ;;  %1774 = vmatprep.subr.bf16.mxu1 %v2610_v40  ;;  %v2223_v39 = vcombine.high %v34_v35, %v42_v36  ;;  %v2222_v40 = vcombine.low %v34_v35, %v42_v36  ;;  %v2748_v36 = vld [vmem:[%s3893_s1 + $0x210] ss:$8 sps:$4 sm:$0xff]  }
  0x29   :  { %1986 = vmatprep.subr.bf16.mxu0 %v2612_v41  ;;  %v2687_v41 = vld [vmem:[%s3893_s1 + $0x564] ss:$8 sps:$4 sm:$0xff]  }
  0x2b   :  { %1775 = vmatpush1.bf16.msra.mxu1 %v2614_v42  ;;  %v2682_v42 = vld [vmem:[%s3893_s1 + $0x160] ss:$8 sps:$4 sm:$0xff]  }
  0x2c   :  { %1987 = vmatpush1.bf16.msra.mxu0 %v2615_v43  ;;  %1776 = vmatprep.subr.bf16.mxu1 %v2616_v44  ;;  %v2685_v43 = vld [vmem:[%s3893_s1 + $0x560] ss:$8 sps:$4 sm:$0xff]  }
  0x2d   :  { %1988 = vmatprep.subr.bf16.mxu0 %v2618_v45  ;;  %v3257_v44 = vld [vmem:[%s3894_s0 + $0x8] sm:$0xff] }
  0x2e   :  { %v3262_v45 = vld [vmem:[%s3894_s0 + $0x48] sm:$0xff] }
  0x2f   :  { %1777 = vmatpush1.bf16.msra.mxu1 %v2620_v46  ;;  %v2690_v46 = vld [vmem:[%s3893_s1 + $0x174] ss:$8 sps:$4 sm:$0xff]   ;;  %v2201_v48 = vcombine.high %v3257_v44, %v3262_v45 }
  0x30   :  { %1989 = vmatpush1.bf16.msra.mxu0 %v2621_v47  ;;  %1778 = vmatprep.subr.bf16.mxu1 %v2622_v50  ;;  %v2693_v47 = vld [vmem:[%s3893_s1 + $0x574] ss:$8 sps:$4 sm:$0xff]   ;;  %v3280_v50 = vld [vmem:[%s3894_s0 + $0x68] sm:$0xff] }
  0x31   :  { %1990 = vmatprep.subr.bf16.mxu0 %v2624_v51  ;;  %v2688_v51 = vld [vmem:[%s3893_s1 + $0x170] ss:$8 sps:$4 sm:$0xff]   ;;  %v2209_v53 = vcombine.high %v3275_v49, %v3280_v50 }
  0x33   :  { %1779 = vmatpush1.bf16.msra.mxu1 %v2626_v56  ;;  %v2694_v56 = vld [vmem:[%s3893_s1 + $0x180] ss:$8 sps:$4 sm:$0xff]  }
  0x34   :  { %1991 = vmatpush1.bf16.msra.mxu0 %v2627_v57  ;;  %1780 = vmatprep.subr.bf16.mxu1 %v2628_v58  ;;  %v2697_v57 = vld [vmem:[%s3893_s1 + $0x580] ss:$8 sps:$4 sm:$0xff]   ;;  %v2702_v58 = vld [vmem:[%s3893_s1 + $0x194] ss:$8 sps:$4 sm:$0xff]  }
  0x35   :  { %1992 = vmatprep.subr.bf16.mxu0 %v2630_v59  ;;  %v2705_v59 = vld [vmem:[%s3893_s1 + $0x594] ss:$8 sps:$4 sm:$0xff]  }
  0x37   :  { %1781 = vmatpush1.bf16.msra.mxu1 %v2632_v60  ;;  %v2700_v60 = vld [vmem:[%s3893_s1 + $0x190] ss:$8 sps:$4 sm:$0xff]  }
  0x38   :  { %1993 = vmatpush1.bf16.msra.mxu0 %v2633_v61  ;;  %1782 = vmatprep.subr.bf16.mxu1 %v2634_v62  ;;  %v2703_v61 = vld [vmem:[%s3893_s1 + $0x590] ss:$8 sps:$4 sm:$0xff]   ;;  %v2708_v62 = vld [vmem:[%s3893_s1 + $0x1a4] ss:$8 sps:$4 sm:$0xff]  }
  0x39   :  { %1994 = vmatprep.subr.bf16.mxu0 %v2636_v63  ;;  %v2711_v63 = vld [vmem:[%s3893_s1 + $0x5a4] ss:$8 sps:$4 sm:$0xff]  }
  0x3b   :  { %1783 = vmatpush1.bf16.msra.mxu1 %v2638_v0  ;;  %v2706_v0 = vld [vmem:[%s3893_s1 + $0x1a0] ss:$8 sps:$4 sm:$0xff]  }
  0x3c   :  { %1995 = vmatpush1.bf16.msra.mxu0 %v2639_v1  ;;  %1784 = vmatprep.subr.bf16.mxu1 %v2640_v2  ;;  %v2709_v1 = vld [vmem:[%s3893_s1 + $0x5a0] ss:$8 sps:$4 sm:$0xff]   ;;  %v2714_v2 = vld [vmem:[%s3893_s1 + $0x1b4] ss:$8 sps:$4 sm:$0xff]  }
  0x3d   :  { %1996 = vmatprep.subr.bf16.mxu0 %v2642_v3  ;;  %v2717_v3 = vld [vmem:[%s3893_s1 + $0x5b4] ss:$8 sps:$4 sm:$0xff]  }
  0x3f   :  { %1785 = vmatpush1.bf16.msra.mxu1 %v2644_v4  ;;  %v2712_v4 = vld [vmem:[%s3893_s1 + $0x1b0] ss:$8 sps:$4 sm:$0xff]  }
  0x40   :  { %1997 = vmatpush1.bf16.msra.mxu0 %v2645_v5  ;;  %1807 = vmatprep.subr.bf16.mxu1 %v2648_v6  ;;  %v2715_v5 = vld [vmem:[%s3893_s1 + $0x5b0] ss:$8 sps:$4 sm:$0xff]   ;;  %v2720_v6 = vld [vmem:[%s3893_s1 + $0x1c4] ss:$8 sps:$4 sm:$0xff]  }
  0x41   :  { %2019 = vmatprep.subr.bf16.mxu0 %v2651_v7  ;;  %v2723_v7 = vld [vmem:[%s3893_s1 + $0x5c4] ss:$8 sps:$4 sm:$0xff]  }
  0x42   :  { %1787 = vmatmul.mubr.bf16.vlgmr.msra.gmra.mrb[0].mxu1 %v2198_v8  ;;  %v2718_v8 = vld [vmem:[%s3893_s1 + $0x1c0] ss:$8 sps:$4 sm:$0xff]  }
  0x43   :  { %1999 = vmatmul.mubr.bf16.vlgmr.msra.gmra.mrb[0].mxu0 %v2206_v10  ;;  %1808 = vmatpush1.bf16.msra.mxu1 %v2646_v9  ;;  %v2721_v9 = vld [vmem:[%s3893_s1 + $0x5c0] ss:$8 sps:$4 sm:$0xff]   ;;  %v2726_v10 = vld [vmem:[%s3893_s1 + $0x1d4] ss:$8 sps:$4 sm:$0xff]  }
  0x44   :  { %2020 = vmatpush1.bf16.msra.mxu0 %v2649_v11  ;;  %1809 = vmatprep.subr.bf16.mxu1 %v2654_v12  ;;  %v2729_v11 = vld [vmem:[%s3893_s1 + $0x5d4] ss:$8 sps:$4 sm:$0xff]   ;;  %v2724_v12 = vld [vmem:[%s3893_s1 + $0x1d0] ss:$8 sps:$4 sm:$0xff]  }
  0x45   :  { %2021 = vmatprep.subr.bf16.mxu0 %v2657_v13  ;;  %1796 = vmatprep.mubr.bf16.mxu1 %v2215_v33  ;;  %v2727_v13 = vld [vmem:[%s3893_s1 + $0x5d0] ss:$8 sps:$4 sm:$0xff]   ;;  %v43_v33 = vld [vmem:[%s3894_s0 + $0xe8] sm:$0xff] }
  0x46   :  { %2008 = vmatprep.mubr.bf16.mxu0 %v2223_v39  ;;  %v2759_v39 = vld [vmem:[%s3893_s1 + $0x624] ss:$8 sps:$4 sm:$0xff]  }
  0x47   :  { %1810 = vmatpush1.bf16.msra.mxu1 %v2652_v14  ;;  %v2732_v14 = vld [vmem:[%s3893_s1 + $0x1e4] ss:$8 sps:$4 sm:$0xff]  }
  0x48   :  { %2022 = vmatpush1.bf16.msra.mxu0 %v2655_v15  ;;  %1811 = vmatprep.subr.bf16.mxu1 %v2660_v16  ;;  %v2735_v15 = vld [vmem:[%s3893_s1 + $0x5e4] ss:$8 sps:$4 sm:$0xff]   ;;  %v2730_v16 = vld [vmem:[%s3893_s1 + $0x1e0] ss:$8 sps:$4 sm:$0xff]  }
  0x49   :  { %2023 = vmatprep.subr.bf16.mxu0 %v2663_v17  ;;  %v2733_v17 = vld [vmem:[%s3893_s1 + $0x5e0] ss:$8 sps:$4 sm:$0xff]  }
  0x4a   :  { %1797 = vmatmul.mubr.bf16.gmra.mrb[4].mxu1 %v2214_v37  ;;  %v2751_v37 = vld [vmem:[%s3893_s1 + $0x610] ss:$8 sps:$4 sm:$0xff]  }
  0x4b   :  { %1812 = vmatpush1.bf16.msra.mxu1 %v2658_v18  ;;  %2009 = vmatmul.mubr.bf16.gmra.mrb[4].mxu0 %v2222_v40  ;;  %v2738_v18 = vld [vmem:[%s3893_s1 + $0x1f4] ss:$8 sps:$4 sm:$0xff]   ;;  %v2754_v40 = vld [vmem:[%s3893_s1 + $0x220] ss:$8 sps:$4 sm:$0xff]  }
  0x4c   :  { %2024 = vmatpush1.bf16.msra.mxu0 %v2661_v19  ;;  %1813 = vmatprep.subr.bf16.mxu1 %v2666_v20  ;;  %v2741_v19 = vld [vmem:[%s3893_s1 + $0x5f4] ss:$8 sps:$4 sm:$0xff]   ;;  %v2736_v20 = vld [vmem:[%s3893_s1 + $0x1f0] ss:$8 sps:$4 sm:$0xff]  }
  0x4d   :  { %2025 = vmatprep.subr.bf16.mxu0 %v2669_v21  ;;  %1839 = vmatprep.mubr.bf16.mxu1 %v2201_v48  ;;  %v2739_v21 = vld [vmem:[%s3893_s1 + $0x5f0] ss:$8 sps:$4 sm:$0xff]   ;;  %v2762_v48 = vld [vmem:[%s3893_s1 + $0x234] ss:$8 sps:$4 sm:$0xff]  }
  0x4e   :  { %2051 = vmatprep.mubr.bf16.mxu0 %v2209_v53  ;;  %v2763_v53 = vld [vmem:[%s3893_s1 + $0x630] ss:$8 sps:$4 sm:$0xff]  }
  0x4f   :  { %1814 = vmatpush1.bf16.msra.mxu1 %v2664_v22  ;;  %v2744_v22 = vld [vmem:[%s3893_s1 + $0x204] ss:$8 sps:$4 sm:$0xff]  }
  0x50   :  { %2026 = vmatpush1.bf16.msra.mxu0 %v2667_v23  ;;  %1815 = vmatprep.subr.bf16.mxu1 %v2672_v24  ;;  %v2747_v23 = vld [vmem:[%s3893_s1 + $0x604] ss:$8 sps:$4 sm:$0xff]   ;;  %v2742_v24 = vld [vmem:[%s3893_s1 + $0x200] ss:$8 sps:$4 sm:$0xff]  }
  0x51   :  { %2027 = vmatprep.subr.bf16.mxu0 %v2675_v25  ;;  %v2745_v25 = vld [vmem:[%s3893_s1 + $0x600] ss:$8 sps:$4 sm:$0xff]  }
  0x53   :  { %1816 = vmatpush1.bf16.msra.mxu1 %v2670_v26  ;;  %v31_v26 = vld [vmem:[%s3894_s0 + $0x88] sm:$0xff] }
  0x54   :  { %2028 = vmatpush1.bf16.msra.mxu0 %v2673_v27  ;;  %1817 = vmatprep.subr.bf16.mxu1 %v2678_v28  ;;  %v2200_v27 = vcombine.low %v3257_v44, %v3262_v45  ;;  %v2208_v28 = vcombine.low %v3275_v49, %v3280_v50  ;;  %v3446_v45 = vld [vmem:[%s3894_s0 + $0x50] sm:$0xff] }
  0x55   :  { %2029 = vmatprep.subr.bf16.mxu0 %v2681_v29  ;;  %v39_v29 = vld [vmem:[%s3894_s0 + $0xc8] sm:$0xff]  ;;  %v2765_v49 = vld [vmem:[%s3893_s1 + $0x634] ss:$8 sps:$4 sm:$0xff]  }
  0x57   :  { %1818 = vmatpush1.bf16.msra.mxu1 %v2676_v32  ;;  %v35_v32 = vld [vmem:[%s3894_s0 + $0xa8] sm:$0xff] }
  0x58   :  { %2030 = vmatpush1.bf16.msra.mxu0 %v2679_v34  ;;  %1819 = vmatprep.subr.bf16.mxu1 %v2684_v38  ;;  %v2217_v34 = vcombine.high %v31_v26, %v39_v29  ;;  %v2225_v35 = vcombine.high %v35_v32, %v43_v33  ;;  %v2756_v38 = vld [vmem:[%s3893_s1 + $0x224] ss:$8 sps:$4 sm:$0xff]   ;;  %v2224_v44 = vcombine.low %v35_v32, %v43_v33  ;;  %v2826_v32 = vld [vmem:[%s3893_s1 + $0x2e0] ss:$8 sps:$4 sm:$0xff]  }
  0x59   :  { %2031 = vmatprep.subr.bf16.mxu0 %v2687_v41  ;;  %v2757_v41 = vld [vmem:[%s3893_s1 + $0x620] ss:$8 sps:$4 sm:$0xff]  }
  0x5a   :  { %v2829_v33 = vld [vmem:[%s3893_s1 + $0x6e0] ss:$8 sps:$4 sm:$0xff]  }
  0x5b   :  { %1820 = vmatpush1.bf16.msra.mxu1 %v2682_v42  ;;  %v3441_v42 = vld [vmem:[%s3894_s0 + $0x10] sm:$0xff] }
  0x5c   :  { %2032 = vmatpush1.bf16.msra.mxu0 %v2685_v43  ;;  %1821 = vmatprep.subr.bf16.mxu1 %v2690_v46  ;;  %v2216_v43 = vcombine.low %v31_v26, %v39_v29  ;;  %v3451_v46 = vld [vmem:[%s3894_s0 + $0x30] sm:$0xff]  ;;  %v2203_v50 = vcombine.high %v3441_v42, %v3446_v45 }
  0x5d   :  { %2033 = vmatprep.subr.bf16.mxu0 %v2693_v47  ;;  %v3456_v47 = vld [vmem:[%s3894_s0 + $0x70] sm:$0xff] }
  0x5e   :  { %v2822_v26 = vld [vmem:[%s3893_s1 + $0x2d4] ss:$8 sps:$4 sm:$0xff]   ;;  %v2823_v29 = vld [vmem:[%s3893_s1 + $0x6d0] ss:$8 sps:$4 sm:$0xff]  }
  0x5f   :  { %1822 = vmatpush1.bf16.msra.mxu1 %v2688_v51  ;;  %v2211_v51 = vcombine.high %v3451_v46, %v3456_v47 }
  0x60   :  { %2034 = vmatpush1.bf16.msra.mxu0 %v2691_v52  ;;  %1823 = vmatprep.subr.bf16.mxu1 %v2696_v54  ;;  %v2760_v52 = vld [vmem:[%s3893_s1 + $0x230] ss:$8 sps:$4 sm:$0xff]   ;;  %v2768_v54 = vld [vmem:[%s3893_s1 + $0x244] ss:$8 sps:$4 sm:$0xff]  }
  0x61   :  { %2035 = vmatprep.subr.bf16.mxu0 %v2699_v55  ;;  %v2771_v55 = vld [vmem:[%s3893_s1 + $0x644] ss:$8 sps:$4 sm:$0xff]  }
  0x63   :  { %1824 = vmatpush1.bf16.msra.mxu1 %v2694_v56  ;;  %v2766_v56 = vld [vmem:[%s3893_s1 + $0x240] ss:$8 sps:$4 sm:$0xff]  }
  0x64   :  { %2036 = vmatpush1.bf16.msra.mxu0 %v2697_v57  ;;  %1825 = vmatprep.subr.bf16.mxu1 %v2702_v58  ;;  %v2769_v57 = vld [vmem:[%s3893_s1 + $0x640] ss:$8 sps:$4 sm:$0xff]   ;;  %v2774_v58 = vld [vmem:[%s3893_s1 + $0x254] ss:$8 sps:$4 sm:$0xff]  }
  0x65   :  { %2037 = vmatprep.subr.bf16.mxu0 %v2705_v59  ;;  %v2777_v59 = vld [vmem:[%s3893_s1 + $0x654] ss:$8 sps:$4 sm:$0xff]  }
  0x67   :  { %1826 = vmatpush1.bf16.msra.mxu1 %v2700_v60  ;;  %v2772_v60 = vld [vmem:[%s3893_s1 + $0x250] ss:$8 sps:$4 sm:$0xff]  }
  0x68   :  { %2038 = vmatpush1.bf16.msra.mxu0 %v2703_v61  ;;  %1827 = vmatprep.subr.bf16.mxu1 %v2708_v62  ;;  %v2775_v61 = vld [vmem:[%s3893_s1 + $0x650] ss:$8 sps:$4 sm:$0xff]   ;;  %v2780_v62 = vld [vmem:[%s3893_s1 + $0x264] ss:$8 sps:$4 sm:$0xff]  }
  0x69   :  { %2039 = vmatprep.subr.bf16.mxu0 %v2711_v63  ;;  %v2783_v63 = vld [vmem:[%s3893_s1 + $0x664] ss:$8 sps:$4 sm:$0xff]  }
  0x6b   :  { %1828 = vmatpush1.bf16.msra.mxu1 %v2706_v0  ;;  %v2778_v0 = vld [vmem:[%s3893_s1 + $0x260] ss:$8 sps:$4 sm:$0xff]  }
  0x6c   :  { %2040 = vmatpush1.bf16.msra.mxu0 %v2709_v1  ;;  %1829 = vmatprep.subr.bf16.mxu1 %v2714_v2  ;;  %v2781_v1 = vld [vmem:[%s3893_s1 + $0x660] ss:$8 sps:$4 sm:$0xff]   ;;  %v2786_v2 = vld [vmem:[%s3893_s1 + $0x274] ss:$8 sps:$4 sm:$0xff]  }
  0x6d   :  { %2041 = vmatprep.subr.bf16.mxu0 %v2717_v3  ;;  %v2789_v3 = vld [vmem:[%s3893_s1 + $0x674] ss:$8 sps:$4 sm:$0xff]  }
  0x6f   :  { %1830 = vmatpush1.bf16.msra.mxu1 %v2712_v4  ;;  %v2784_v4 = vld [vmem:[%s3893_s1 + $0x270] ss:$8 sps:$4 sm:$0xff]  }
  0x70   :  { %2042 = vmatpush1.bf16.msra.mxu0 %v2715_v5  ;;  %1831 = vmatprep.subr.bf16.mxu1 %v2720_v6  ;;  %v2787_v5 = vld [vmem:[%s3893_s1 + $0x670] ss:$8 sps:$4 sm:$0xff]   ;;  %v2792_v6 = vld [vmem:[%s3893_s1 + $0x284] ss:$8 sps:$4 sm:$0xff]  }
  0x71   :  { %2043 = vmatprep.subr.bf16.mxu0 %v2723_v7  ;;  %v2795_v7 = vld [vmem:[%s3893_s1 + $0x684] ss:$8 sps:$4 sm:$0xff]  }
  0x73   :  { %1832 = vmatpush1.bf16.msra.mxu1 %v2718_v8  ;;  %v2790_v8 = vld [vmem:[%s3893_s1 + $0x280] ss:$8 sps:$4 sm:$0xff]  }
  0x74   :  { %2044 = vmatpush1.bf16.msra.mxu0 %v2721_v9  ;;  %1833 = vmatprep.subr.bf16.mxu1 %v2726_v10  ;;  %v2793_v9 = vld [vmem:[%s3893_s1 + $0x680] ss:$8 sps:$4 sm:$0xff]   ;;  %v2798_v10 = vld [vmem:[%s3893_s1 + $0x294] ss:$8 sps:$4 sm:$0xff]  }
  0x75   :  { %2045 = vmatprep.subr.bf16.mxu0 %v2729_v11  ;;  %v2801_v11 = vld [vmem:[%s3893_s1 + $0x694] ss:$8 sps:$4 sm:$0xff]  }
  0x77   :  { %1834 = vmatpush1.bf16.msra.mxu1 %v2724_v12  ;;  %v2796_v12 = vld [vmem:[%s3893_s1 + $0x290] ss:$8 sps:$4 sm:$0xff]  }
  0x78   :  { %2046 = vmatpush1.bf16.msra.mxu0 %v2727_v13  ;;  %1835 = vmatprep.subr.bf16.mxu1 %v2732_v14  ;;  %v2799_v13 = vld [vmem:[%s3893_s1 + $0x690] ss:$8 sps:$4 sm:$0xff]   ;;  %v2804_v14 = vld [vmem:[%s3893_s1 + $0x2a4] ss:$8 sps:$4 sm:$0xff]  }
  0x79   :  { %2047 = vmatprep.subr.bf16.mxu0 %v2735_v15  ;;  %v2807_v15 = vld [vmem:[%s3893_s1 + $0x6a4] ss:$8 sps:$4 sm:$0xff]  }
  0x7b   :  { %1836 = vmatpush1.bf16.msra.mxu1 %v2730_v16  ;;  %v2802_v16 = vld [vmem:[%s3893_s1 + $0x2a0] ss:$8 sps:$4 sm:$0xff]  }
  0x7c   :  { %2048 = vmatpush1.bf16.msra.mxu0 %v2733_v17  ;;  %1837 = vmatprep.subr.bf16.mxu1 %v2738_v18  ;;  %v2805_v17 = vld [vmem:[%s3893_s1 + $0x6a0] ss:$8 sps:$4 sm:$0xff]   ;;  %v2810_v18 = vld [vmem:[%s3893_s1 + $0x2b4] ss:$8 sps:$4 sm:$0xff]  }
  0x7d   :  { %2049 = vmatprep.subr.bf16.mxu0 %v2741_v19  ;;  %v2813_v19 = vld [vmem:[%s3893_s1 + $0x6b4] ss:$8 sps:$4 sm:$0xff]  }
  0x7f   :  { %1838 = vmatpush1.bf16.msra.mxu1 %v2736_v20  ;;  %v2808_v20 = vld [vmem:[%s3893_s1 + $0x2b0] ss:$8 sps:$4 sm:$0xff]  }
  0x80   :  { %2050 = vmatpush1.bf16.msra.mxu0 %v2739_v21  ;;  %1860 = vmatprep.subr.bf16.mxu1 %v2744_v22  ;;  %v2811_v21 = vld [vmem:[%s3893_s1 + $0x6b0] ss:$8 sps:$4 sm:$0xff]   ;;  %v2816_v22 = vld [vmem:[%s3893_s1 + $0x2c4] ss:$8 sps:$4 sm:$0xff]  }
  0x81   :  { %2072 = vmatprep.subr.bf16.mxu0 %v2747_v23  ;;  %v2819_v23 = vld [vmem:[%s3893_s1 + $0x6c4] ss:$8 sps:$4 sm:$0xff]  }
  0x82   :  { %1840 = vmatmul.mubr.bf16.vlgmr.msra.gmra.mrb[0].mxu1 %v2200_v27  ;;  %v2825_v27 = vld [vmem:[%s3893_s1 + $0x6d4] ss:$8 sps:$4 sm:$0xff]  }
  0x83   :  { %2052 = vmatmul.mubr.bf16.vlgmr.msra.gmra.mrb[0].mxu0 %v2208_v28  ;;  %1861 = vmatpush1.bf16.msra.mxu1 %v2742_v24  ;;  %v2814_v24 = vld [vmem:[%s3893_s1 + $0x2c0] ss:$8 sps:$4 sm:$0xff]   ;;  %v2820_v28 = vld [vmem:[%s3893_s1 + $0x2d0] ss:$8 sps:$4 sm:$0xff]  }
  0x84   :  { %2073 = vmatpush1.bf16.msra.mxu0 %v2745_v25  ;;  %1862 = vmatprep.subr.bf16.mxu1 %v2750_v30  ;;  %v2817_v25 = vld [vmem:[%s3893_s1 + $0x6c0] ss:$8 sps:$4 sm:$0xff]   ;;  %v2828_v30 = vld [vmem:[%s3893_s1 + $0x2e4] ss:$8 sps:$4 sm:$0xff]  }
  0x85   :  { %2074 = vmatprep.subr.bf16.mxu0 %v2753_v31  ;;  %1849 = vmatprep.mubr.bf16.mxu1 %v2217_v34  ;;  %v2831_v31 = vld [vmem:[%s3893_s1 + $0x6e4] ss:$8 sps:$4 sm:$0xff]   ;;  %v2834_v34 = vld [vmem:[%s3893_s1 + $0x2f4] ss:$8 sps:$4 sm:$0xff]  }
  0x86   :  { %2061 = vmatprep.mubr.bf16.mxu0 %v2225_v35  ;;  %v2837_v35 = vld [vmem:[%s3893_s1 + $0x6f4] ss:$8 sps:$4 sm:$0xff]  }
  0x87   :  { %1863 = vmatpush1.bf16.msra.mxu1 %v2748_v36  ;;  %v2832_v36 = vld [vmem:[%s3893_s1 + $0x2f0] ss:$8 sps:$4 sm:$0xff]  }
  0x88   :  { %2075 = vmatpush1.bf16.msra.mxu0 %v2751_v37  ;;  %1864 = vmatprep.subr.bf16.mxu1 %v2756_v38  ;;  %v2835_v37 = vld [vmem:[%s3893_s1 + $0x6f0] ss:$8 sps:$4 sm:$0xff]   ;;  %v2840_v38 = vld [vmem:[%s3893_s1 + $0x304] ss:$8 sps:$4 sm:$0xff]  }
  0x89   :  { %2076 = vmatprep.subr.bf16.mxu0 %v2759_v39  ;;  %v2843_v39 = vld [vmem:[%s3893_s1 + $0x704] ss:$8 sps:$4 sm:$0xff]  }
  0x8a   :  { %1850 = vmatmul.mubr.bf16.gmra.mrb[4].mxu1 %v2216_v43  ;;  %v2210_v43 = vcombine.low %v3451_v46, %v3456_v47  ;;  %v2846_v46 = vld [vmem:[%s3893_s1 + $0x314] ss:$8 sps:$4 sm:$0xff]  }
  0x8b   :  { %2062 = vmatmul.mubr.bf16.gmra.mrb[4].mxu0 %v2224_v44  ;;  %1865 = vmatpush1.bf16.msra.mxu1 %v2754_v40  ;;  %v32_v40 = vld [vmem:[%s3894_s0 + $0x90] sm:$0xff] }
  0x8c   :  { %2077 = vmatpush1.bf16.msra.mxu0 %v2757_v41  ;;  %1866 = vmatprep.subr.bf16.mxu1 %v2762_v48  ;;  %v2202_v41 = vcombine.low %v3441_v42, %v3446_v45  ;;  %v40_v44 = vld [vmem:[%s3894_s0 + $0xd0] sm:$0xff]  ;;  %v2838_v42 = vld [vmem:[%s3893_s1 + $0x300] ss:$8 sps:$4 sm:$0xff]  }
  0x8d   :  { %2078 = vmatprep.subr.bf16.mxu0 %v2765_v49  ;;  %1892 = vmatprep.mubr.bf16.mxu1 %v2203_v50  ;;  %v36_v48 = vld [vmem:[%s3894_s0 + $0xb0] sm:$0xff]  ;;  %v2841_v45 = vld [vmem:[%s3893_s1 + $0x700] ss:$8 sps:$4 sm:$0xff]   ;;  %v2219_v50 = vcombine.high %v32_v40, %v40_v44 }
  0x8e   :  { %2104 = vmatprep.mubr.bf16.mxu0 %v2211_v51  ;;  %v44_v49 = vld [vmem:[%s3894_s0 + $0xf0] sm:$0xff] }
  0x8f   :  { %1867 = vmatpush1.bf16.msra.mxu1 %v2760_v52  ;;  %v2849_v47 = vld [vmem:[%s3893_s1 + $0x714] ss:$8 sps:$4 sm:$0xff]   ;;  %v2227_v51 = vcombine.high %v36_v48, %v44_v49  ;;  %v2844_v52 = vld [vmem:[%s3893_s1 + $0x310] ss:$8 sps:$4 sm:$0xff]  }
  0x90   :  { %2079 = vmatpush1.bf16.msra.mxu0 %v2763_v53  ;;  %1868 = vmatprep.subr.bf16.mxu1 %v2768_v54  ;;  %v2847_v53 = vld [vmem:[%s3893_s1 + $0x710] ss:$8 sps:$4 sm:$0xff]   ;;  %v2852_v54 = vld [vmem:[%s3893_s1 + $0x324] ss:$8 sps:$4 sm:$0xff]  }
  0x91   :  { %2080 = vmatprep.subr.bf16.mxu0 %v2771_v55  ;;  %v2855_v55 = vld [vmem:[%s3893_s1 + $0x724] ss:$8 sps:$4 sm:$0xff]  }
  0x93   :  { %1869 = vmatpush1.bf16.msra.mxu1 %v2766_v56  ;;  %v3667_v56 = vld [vmem:[%s3894_s0 + $0x18] sm:$0xff] }
  0x94   :  { %2081 = vmatpush1.bf16.msra.mxu0 %v2769_v57  ;;  %1870 = vmatprep.subr.bf16.mxu1 %v2774_v58  ;;  %v2218_v57 = vcombine.low %v32_v40, %v40_v44  ;;  %v2226_v58 = vcombine.low %v36_v48, %v44_v49  ;;  %v2910_v40 = vld [vmem:[%s3893_s1 + $0x3c0] ss:$8 sps:$4 sm:$0xff]   ;;  %v2921_v44 = vld [vmem:[%s3893_s1 + $0x7d4] ss:$8 sps:$4 sm:$0xff]   ;;  %v2916_v48 = vld [vmem:[%s3893_s1 + $0x3d0] ss:$8 sps:$4 sm:$0xff]  }
  0x95   :  { %2082 = vmatprep.subr.bf16.mxu0 %v2777_v59  ;;  %v3672_v59 = vld [vmem:[%s3894_s0 + $0x58] sm:$0xff] }
  0x96   :  { %v2919_v49 = vld [vmem:[%s3893_s1 + $0x7d0] ss:$8 sps:$4 sm:$0xff]  }
  0x97   :  { %1871 = vmatpush1.bf16.msra.mxu1 %v2772_v60  ;;  %v3677_v60 = vld [vmem:[%s3894_s0 + $0x38] sm:$0xff] }
  0x98   :  { %2083 = vmatpush1.bf16.msra.mxu0 %v2775_v61  ;;  %1872 = vmatprep.subr.bf16.mxu1 %v2780_v62  ;;  %v3682_v61 = vld [vmem:[%s3894_s0 + $0x78] sm:$0xff]  ;;  %v2850_v62 = vld [vmem:[%s3893_s1 + $0x320] ss:$8 sps:$4 sm:$0xff]  }
  0x99   :  { %2084 = vmatprep.subr.bf16.mxu0 %v2783_v63  ;;  %v2853_v63 = vld [vmem:[%s3893_s1 + $0x720] ss:$8 sps:$4 sm:$0xff]  }
  0x9b   :  { %1873 = vmatpush1.bf16.msra.mxu1 %v2778_v0  ;;  %v2858_v0 = vld [vmem:[%s3893_s1 + $0x334] ss:$8 sps:$4 sm:$0xff]  }
  0x9c   :  { %2085 = vmatpush1.bf16.msra.mxu0 %v2781_v1  ;;  %1874 = vmatprep.subr.bf16.mxu1 %v2786_v2  ;;  %v2861_v1 = vld [vmem:[%s3893_s1 + $0x734] ss:$8 sps:$4 sm:$0xff]   ;;  %v2205_v2 = vcombine.high %v3667_v56, %v3672_v59 }
  0x9d   :  { %2086 = vmatprep.subr.bf16.mxu0 %v2789_v3  ;;  %v2213_v3 = vcombine.high %v3677_v60, %v3682_v61 }
  0x9f   :  { %1875 = vmatpush1.bf16.msra.mxu1 %v2784_v4  ;;  %v2856_v4 = vld [vmem:[%s3893_s1 + $0x330] ss:$8 sps:$4 sm:$0xff]  }
  0xa0   :  { %2087 = vmatpush1.bf16.msra.mxu0 %v2787_v5  ;;  %1876 = vmatprep.subr.bf16.mxu1 %v2792_v6  ;;  %v2859_v5 = vld [vmem:[%s3893_s1 + $0x730] ss:$8 sps:$4 sm:$0xff]   ;;  %v2864_v6 = vld [vmem:[%s3893_s1 + $0x344] ss:$8 sps:$4 sm:$0xff]  }
  0xa1   :  { %2088 = vmatprep.subr.bf16.mxu0 %v2795_v7  ;;  %v2867_v7 = vld [vmem:[%s3893_s1 + $0x744] ss:$8 sps:$4 sm:$0xff]  }
  0xa3   :  { %1877 = vmatpush1.bf16.msra.mxu1 %v2790_v8  ;;  %v2862_v8 = vld [vmem:[%s3893_s1 + $0x340] ss:$8 sps:$4 sm:$0xff]  }
  0xa4   :  { %2089 = vmatpush1.bf16.msra.mxu0 %v2793_v9  ;;  %1878 = vmatprep.subr.bf16.mxu1 %v2798_v10  ;;  %v2865_v9 = vld [vmem:[%s3893_s1 + $0x740] ss:$8 sps:$4 sm:$0xff]   ;;  %v2870_v10 = vld [vmem:[%s3893_s1 + $0x354] ss:$8 sps:$4 sm:$0xff]  }
  0xa5   :  { %2090 = vmatprep.subr.bf16.mxu0 %v2801_v11  ;;  %v2873_v11 = vld [vmem:[%s3893_s1 + $0x754] ss:$8 sps:$4 sm:$0xff]  }
  0xa7   :  { %1879 = vmatpush1.bf16.msra.mxu1 %v2796_v12  ;;  %v2868_v12 = vld [vmem:[%s3893_s1 + $0x350] ss:$8 sps:$4 sm:$0xff]  }
  0xa8   :  { %2091 = vmatpush1.bf16.msra.mxu0 %v2799_v13  ;;  %1880 = vmatprep.subr.bf16.mxu1 %v2804_v14  ;;  %v2871_v13 = vld [vmem:[%s3893_s1 + $0x750] ss:$8 sps:$4 sm:$0xff]   ;;  %v2876_v14 = vld [vmem:[%s3893_s1 + $0x364] ss:$8 sps:$4 sm:$0xff]  }
  0xa9   :  { %2092 = vmatprep.subr.bf16.mxu0 %v2807_v15  ;;  %v2879_v15 = vld [vmem:[%s3893_s1 + $0x764] ss:$8 sps:$4 sm:$0xff]  }
  0xab   :  { %1881 = vmatpush1.bf16.msra.mxu1 %v2802_v16  ;;  %v2874_v16 = vld [vmem:[%s3893_s1 + $0x360] ss:$8 sps:$4 sm:$0xff]  }
  0xac   :  { %2093 = vmatpush1.bf16.msra.mxu0 %v2805_v17  ;;  %1882 = vmatprep.subr.bf16.mxu1 %v2810_v18  ;;  %v2877_v17 = vld [vmem:[%s3893_s1 + $0x760] ss:$8 sps:$4 sm:$0xff]   ;;  %v2882_v18 = vld [vmem:[%s3893_s1 + $0x374] ss:$8 sps:$4 sm:$0xff]  }
  0xad   :  { %2094 = vmatprep.subr.bf16.mxu0 %v2813_v19  ;;  %v2885_v19 = vld [vmem:[%s3893_s1 + $0x774] ss:$8 sps:$4 sm:$0xff]  }
  0xaf   :  { %1883 = vmatpush1.bf16.msra.mxu1 %v2808_v20  ;;  %v2880_v20 = vld [vmem:[%s3893_s1 + $0x370] ss:$8 sps:$4 sm:$0xff]  }
  0xb0   :  { %2095 = vmatpush1.bf16.msra.mxu0 %v2811_v21  ;;  %1884 = vmatprep.subr.bf16.mxu1 %v2816_v22  ;;  %v2883_v21 = vld [vmem:[%s3893_s1 + $0x770] ss:$8 sps:$4 sm:$0xff]   ;;  %v2888_v22 = vld [vmem:[%s3893_s1 + $0x384] ss:$8 sps:$4 sm:$0xff]  }
  0xb1   :  { %2096 = vmatprep.subr.bf16.mxu0 %v2819_v23  ;;  %v2891_v23 = vld [vmem:[%s3893_s1 + $0x784] ss:$8 sps:$4 sm:$0xff]  }
  0xb3   :  { %1885 = vmatpush1.bf16.msra.mxu1 %v2814_v24  ;;  %v2886_v24 = vld [vmem:[%s3893_s1 + $0x380] ss:$8 sps:$4 sm:$0xff]  }
  0xb4   :  { %2097 = vmatpush1.bf16.msra.mxu0 %v2817_v25  ;;  %1886 = vmatprep.subr.bf16.mxu1 %v2822_v26  ;;  %v2889_v25 = vld [vmem:[%s3893_s1 + $0x780] ss:$8 sps:$4 sm:$0xff]   ;;  %v2894_v26 = vld [vmem:[%s3893_s1 + $0x394] ss:$8 sps:$4 sm:$0xff]  }
  0xb5   :  { %2098 = vmatprep.subr.bf16.mxu0 %v2825_v27  ;;  %v2897_v27 = vld [vmem:[%s3893_s1 + $0x794] ss:$8 sps:$4 sm:$0xff]  }
  0xb7   :  { %1887 = vmatpush1.bf16.msra.mxu1 %v2820_v28  ;;  %v2892_v28 = vld [vmem:[%s3893_s1 + $0x390] ss:$8 sps:$4 sm:$0xff]  }
  0xb8   :  { %2099 = vmatpush1.bf16.msra.mxu0 %v2823_v29  ;;  %1888 = vmatprep.subr.bf16.mxu1 %v2828_v30  ;;  %v2895_v29 = vld [vmem:[%s3893_s1 + $0x790] ss:$8 sps:$4 sm:$0xff]   ;;  %v2900_v30 = vld [vmem:[%s3893_s1 + $0x3a4] ss:$8 sps:$4 sm:$0xff]  }
  0xb9   :  { %2100 = vmatprep.subr.bf16.mxu0 %v2831_v31  ;;  %v2903_v31 = vld [vmem:[%s3893_s1 + $0x7a4] ss:$8 sps:$4 sm:$0xff]  }
  0xbb   :  { %1889 = vmatpush1.bf16.msra.mxu1 %v2826_v32  ;;  %v2898_v32 = vld [vmem:[%s3893_s1 + $0x3a0] ss:$8 sps:$4 sm:$0xff]  }
  0xbc   :  { %2101 = vmatpush1.bf16.msra.mxu0 %v2829_v33  ;;  %1890 = vmatprep.subr.bf16.mxu1 %v2834_v34  ;;  %v2901_v33 = vld [vmem:[%s3893_s1 + $0x7a0] ss:$8 sps:$4 sm:$0xff]   ;;  %v2906_v34 = vld [vmem:[%s3893_s1 + $0x3b4] ss:$8 sps:$4 sm:$0xff]  }
  0xbd   :  { %2102 = vmatprep.subr.bf16.mxu0 %v2837_v35  ;;  %v2909_v35 = vld [vmem:[%s3893_s1 + $0x7b4] ss:$8 sps:$4 sm:$0xff]  }
  0xbf   :  { %1891 = vmatpush1.bf16.msra.mxu1 %v2832_v36  ;;  %v2904_v36 = vld [vmem:[%s3893_s1 + $0x3b0] ss:$8 sps:$4 sm:$0xff]  }
  0xc0   :  { %2103 = vmatpush1.bf16.msra.mxu0 %v2835_v37  ;;  %1913 = vmatprep.subr.bf16.mxu1 %v2840_v38  ;;  %v2907_v37 = vld [vmem:[%s3893_s1 + $0x7b0] ss:$8 sps:$4 sm:$0xff]   ;;  %v2912_v38 = vld [vmem:[%s3893_s1 + $0x3c4] ss:$8 sps:$4 sm:$0xff]  }
  0xc1   :  { %2125 = vmatprep.subr.bf16.mxu0 %v2843_v39  ;;  %v2915_v39 = vld [vmem:[%s3893_s1 + $0x7c4] ss:$8 sps:$4 sm:$0xff]  }
  0xc2   :  { %1893 = vmatmul.mubr.bf16.vlgmr.msra.gmra.mrb[0].mxu1 %v2202_v41  ;;  %v2913_v41 = vld [vmem:[%s3893_s1 + $0x7c0] ss:$8 sps:$4 sm:$0xff]  }
  0xc3   :  { %2105 = vmatmul.mubr.bf16.vlgmr.msra.gmra.mrb[0].mxu0 %v2210_v43  ;;  %1914 = vmatpush1.bf16.msra.mxu1 %v2838_v42  ;;  %v2918_v43 = vld [vmem:[%s3893_s1 + $0x3d4] ss:$8 sps:$4 sm:$0xff]   ;;  %v2924_v42 = vld [vmem:[%s3893_s1 + $0x3e4] ss:$8 sps:$4 sm:$0xff]  }
  0xc4   :  { %2126 = vmatpush1.bf16.msra.mxu0 %v2841_v45  ;;  %1915 = vmatprep.subr.bf16.mxu1 %v2846_v46  ;;  %v2927_v45 = vld [vmem:[%s3893_s1 + $0x7e4] ss:$8 sps:$4 sm:$0xff]   ;;  %v2922_v46 = vld [vmem:[%s3893_s1 + $0x3e0] ss:$8 sps:$4 sm:$0xff]  }
  0xc5   :  { %2127 = vmatprep.subr.bf16.mxu0 %v2849_v47  ;;  %1902 = vmatprep.mubr.bf16.mxu1 %v2219_v50  ;;  %v2925_v47 = vld [vmem:[%s3893_s1 + $0x7e0] ss:$8 sps:$4 sm:$0xff]   ;;  %v2930_v50 = vld [vmem:[%s3893_s1 + $0x3f4] ss:$8 sps:$4 sm:$0xff]  }
  0xc6   :  { %2114 = vmatprep.mubr.bf16.mxu0 %v2227_v51  ;;  %v2933_v51 = vld [vmem:[%s3893_s1 + $0x7f4] ss:$8 sps:$4 sm:$0xff]  }
  0xc7   :  { %1916 = vmatpush1.bf16.msra.mxu1 %v2844_v52  ;;  %v2928_v52 = vld [vmem:[%s3893_s1 + $0x3f0] ss:$8 sps:$4 sm:$0xff]  }
  0xc8   :  { %2128 = vmatpush1.bf16.msra.mxu0 %v2847_v53  ;;  %1917 = vmatprep.subr.bf16.mxu1 %v2852_v54  ;;  %v2931_v53 = vld [vmem:[%s3893_s1 + $0x7f0] ss:$8 sps:$4 sm:$0xff]  }
  0xc9   :  { %2129 = vmatprep.subr.bf16.mxu0 %v2855_v55  ;;  %v33_v54 = vld [vmem:[%s3894_s0 + $0x98] sm:$0xff] }
  0xca   :  { %1903 = vmatmul.mubr.bf16.gmra.mrb[4].mxu1 %v2218_v57  ;;  %v41_v55 = vld [vmem:[%s3894_s0 + $0xd8] sm:$0xff] }
  0xcb   :  { %2115 = vmatmul.mubr.bf16.gmra.mrb[4].mxu0 %v2226_v58  ;;  %1918 = vmatpush1.bf16.msra.mxu1 %v2850_v62  ;;  %v37_v57 = vld [vmem:[%s3894_s0 + $0xb8] sm:$0xff]  ;;  %v2204_v62 = vcombine.low %v3667_v56, %v3672_v59  ;;  %v302_v56 = vld [vmem:[%s3895_s2] sm:$0x3] }
  0xcc   :  { %2130 = vmatpush1.bf16.msra.mxu0 %v2853_v63  ;;  %1919 = vmatprep.subr.bf16.mxu1 %v2858_v0  ;;  %v45_v58 = vld [vmem:[%s3894_s0 + $0xf8] sm:$0xff]  ;;  %v2212_v63 = vcombine.low %v3677_v60, %v3682_v61  ;;  %v2221_v0 = vcombine.high %v33_v54, %v41_v55 }
  0xcd   :  { %2131 = vmatprep.subr.bf16.mxu0 %v2861_v1  ;;  %1945 = vmatprep.mubr.bf16.mxu1 %v2205_v2  ;;  %v2229_v1 = vcombine.high %v37_v57, %v45_v58  ;;  %v2220_v2 = vcombine.low %v33_v54, %v41_v55 }
  0xce   :  { %2157 = vmatprep.mubr.bf16.mxu0 %v2213_v3  ;;  %v2228_v3 = vcombine.low %v37_v57, %v45_v58 }
  0xcf   :  { %1920 = vmatpush1.bf16.msra.mxu1 %v2856_v4  ;;  %v304_v4 = vlaneseq }
  0xd0   :  { %2132 = vmatpush1.bf16.msra.mxu0 %v2859_v5  ;;  %1921 = vmatprep.subr.bf16.mxu1 %v2864_v6 }
  0xd1   :  { %2133 = vmatprep.subr.bf16.mxu0 %v2867_v7  ;;  %v305_v5 = vshrl.u32 %v304_v4, 7 }
  0xd3   :  { %1922 = vmatpush1.bf16.msra.mxu1 %v2862_v8  ;;  %v306_v6 = vsub.s32 0, %v305_v5  ;;  %v310_v59 = vsub.s32 1, %v305_v5 }
  0xd4   :  { %2134 = vmatpush1.bf16.msra.mxu0 %v2865_v9  ;;  %1923 = vmatprep.subr.bf16.mxu1 %v2870_v10 }
  0xd5   :  { %2135 = vmatprep.subr.bf16.mxu0 %v2873_v11  ;;  %v307_v60 = vrot.slane %v302_v56, %v306_v6  ;;  %v311_v61 = vrot.slane %v302_v56, %v310_v59 }
  0xd7   :  { %1924 = vmatpush1.bf16.msra.mxu1 %v2868_v12 }
  0xd8   :  { %2136 = vmatpush1.bf16.msra.mxu0 %v2871_v13  ;;  %1925 = vmatprep.subr.bf16.mxu1 %v2876_v14 }
  0xd9   :  { %2137 = vmatprep.subr.bf16.mxu0 %v2879_v15 }
  0xdb   :  { %1926 = vmatpush1.bf16.msra.mxu1 %v2874_v16 }
  0xdc   :  { %2138 = vmatpush1.bf16.msra.mxu0 %v2877_v17  ;;  %1927 = vmatprep.subr.bf16.mxu1 %v2882_v18 }
  0xdd   :  { %2139 = vmatprep.subr.bf16.mxu0 %v2885_v19 }
  0xdf   :  { %1928 = vmatpush1.bf16.msra.mxu1 %v2880_v20 }
  0xe0   :  { %2140 = vmatpush1.bf16.msra.mxu0 %v2883_v21  ;;  %1929 = vmatprep.subr.bf16.mxu1 %v2888_v22 }
  0xe1   :  { %2141 = vmatprep.subr.bf16.mxu0 %v2891_v23 }
  0xe3   :  { %1930 = vmatpush1.bf16.msra.mxu1 %v2886_v24 }
  0xe4   :  { %2142 = vmatpush1.bf16.msra.mxu0 %v2889_v25  ;;  %1931 = vmatprep.subr.bf16.mxu1 %v2894_v26 }
  0xe5   :  { %2143 = vmatprep.subr.bf16.mxu0 %v2897_v27 }
  0xe7   :  { %1932 = vmatpush1.bf16.msra.mxu1 %v2892_v28 }
  0xe8   :  { %2144 = vmatpush1.bf16.msra.mxu0 %v2895_v29  ;;  %1933 = vmatprep.subr.bf16.mxu1 %v2900_v30 }
  0xe9   :  { %2145 = vmatprep.subr.bf16.mxu0 %v2903_v31 }
  0xeb   :  { %1934 = vmatpush1.bf16.msra.mxu1 %v2898_v32 }
  0xec   :  { %2146 = vmatpush1.bf16.msra.mxu0 %v2901_v33  ;;  %1935 = vmatprep.subr.bf16.mxu1 %v2906_v34 }
  0xed   :  { %2147 = vmatprep.subr.bf16.mxu0 %v2909_v35 }
  0xef   :  { %1936 = vmatpush1.bf16.msra.mxu1 %v2904_v36 }
  0xf0   :  { %2148 = vmatpush1.bf16.msra.mxu0 %v2907_v37  ;;  %1937 = vmatprep.subr.bf16.mxu1 %v2912_v38 }
  0xf1   :  { %2149 = vmatprep.subr.bf16.mxu0 %v2915_v39 }
  0xf3   :  { %1938 = vmatpush1.bf16.msra.mxu1 %v2910_v40 }
  0xf4   :  { %2150 = vmatpush1.bf16.msra.mxu0 %v2913_v41  ;;  %1939 = vmatprep.subr.bf16.mxu1 %v2918_v43 }
  0xf5   :  { %2151 = vmatprep.subr.bf16.mxu0 %v2921_v44 }
  0xf7   :  { %1940 = vmatpush1.bf16.msra.mxu1 %v2916_v48 }
  0xf8   :  { %2152 = vmatpush1.bf16.msra.mxu0 %v2919_v49  ;;  %1941 = vmatprep.subr.bf16.mxu1 %v2924_v42 }
  0xf9   :  { %2153 = vmatprep.subr.bf16.mxu0 %v2927_v45 }
  0xfb   :  { %1942 = vmatpush1.bf16.msra.mxu1 %v2922_v46 }
  0xfc   :  { %2154 = vmatpush1.bf16.msra.mxu0 %v2925_v47  ;;  %1943 = vmatprep.subr.bf16.mxu1 %v2930_v50 }
  0xfd   :  { %2155 = vmatprep.subr.bf16.mxu0 %v2933_v51 }
  0xff   :  { %1944 = vmatpush1.bf16.msra.mxu1 %v2928_v52 }
 0x100   :  { %2156 = vmatpush1.bf16.msra.mxu0 %v2931_v53 }
 0x102   :  { %1946 = vmatmul.mubr.bf16.vlgmr.msra.gmra.mrb[0].mxu1 %v2204_v62 }
 0x103   :  { %2158 = vmatmul.mubr.bf16.vlgmr.msra.gmra.mrb[0].mxu0 %v2212_v63  ;;  %1955 = vmatprep.mubr.bf16.mxu1 %v2221_v0 }
 0x104   :  { %2167 = vmatprep.mubr.bf16.mxu0 %v2229_v1 }
 0x10a   :  { %1956 = vmatmul.mubr.bf16.gmra.mrb[4].mxu1 %v2220_v2 }
 0x10b   :  { %2168 = vmatmul.mubr.bf16.gmra.mrb[4].mxu0 %v2228_v3 }
 0x1d5   :  { %v1947_v7 = vpop.f32.mrb[0].mxu1 }
 0x1d6   :  { %v2159_v8 = vpop.f32.mrb[0].mxu0  ;;  %v2486_v9 = vadd.f32 %v1947_v7, %v307_v60  ;;  %v1949_v10 = vpop.f32.mrb[1].mxu1 }
 0x1d7   :  { %v2161_v11 = vpop.f32.mrb[1].mxu0  ;;  %v2488_v12 = vadd.f32 %v1949_v10, %v311_v61  ;;  %v1951_v13 = vpop.f32.mrb[2].mxu1 }
 0x1d8   :  { %v2163_v14 = vpop.f32.mrb[2].mxu0  ;;  %v2487_v15 = vadd.f32 %v2486_v9, %v2159_v8  ;;  %v2490_v16 = vadd.f32 %v1951_v13, %v307_v60  ;;  %v1953_v17 = vpop.f32.mrb[3].mxu1 }
 0x1d9   :  { %v2165_v18 = vpop.f32.mrb[3].mxu0  ;;  %v2489_v19 = vadd.f32 %v2488_v12, %v2161_v11  ;;  %v2492_v20 = vadd.f32 %v1953_v17, %v311_v61 }
 0x1da   :  { %v2178_v21 = vmax.f32 %v2487_v15, 0.0  ;;  %v2491_v22 = vadd.f32 %v2490_v16, %v2163_v14 }
 0x1db   :  { %v2179_v23 = vmax.f32 %v2489_v19, 0.0  ;;  %v2493_v24 = vadd.f32 %v2492_v20, %v2165_v18 }
 0x1dc   :  { %2186 = vst [vmem:[%s3896_s3] sm:$0xff] %v2178_v21  ;;  %v2180_v25 = vmax.f32 %v2491_v22, 0.0 }
 0x1dd   :  { %2187 = vst [vmem:[%s3896_s3 + $0x8] sm:$0xff] %v2179_v23  ;;  %v2181_v26 = vmax.f32 %v2493_v24, 0.0  ;;  %v1957_v27 = vpop.f32.mrb[4].mxu1 }
 0x1de   :  { %v2169_v28 = vpop.f32.mrb[4].mxu0  ;;  %2188 = vst [vmem:[%s3896_s3 + $0x10] sm:$0xff] %v2180_v25  ;;  %v2494_v29 = vadd.f32 %v1957_v27, %v307_v60  ;;  %v1959_v30 = vpop.f32.mrb[5].mxu1 }
 0x1df   :  { %v2171_v31 = vpop.f32.mrb[5].mxu0  ;;  %2189 = vst [vmem:[%s3896_s3 + $0x18] sm:$0xff] %v2181_v26  ;;  %v2496_v32 = vadd.f32 %v1959_v30, %v311_v61  ;;  %v1961_v33 = vpop.f32.mrb[6].mxu1 }
 0x1e0   :  { %v2173_v34 = vpop.f32.mrb[6].mxu0  ;;  %v2495_v35 = vadd.f32 %v2494_v29, %v2169_v28  ;;  %v2498_v36 = vadd.f32 %v1961_v33, %v307_v60  ;;  %v1963_v37 = vpop.f32.mrb[7].mxu1 }
 0x1e1   :  { %v2175_v38 = vpop.f32.mrb[7].mxu0  ;;  %v2497_v39 = vadd.f32 %v2496_v32, %v2171_v31  ;;  %v2500_v40 = vadd.f32 %v1963_v37, %v311_v61 }
 0x1e2   :  { %v2182_v41 = vmax.f32 %v2495_v35, 0.0  ;;  %v2499_v43 = vadd.f32 %v2498_v36, %v2173_v34 }
 0x1e3   :  { %v2183_v44 = vmax.f32 %v2497_v39, 0.0  ;;  %v2501_v48 = vadd.f32 %v2500_v40, %v2175_v38 }
 0x1e4   :  { %2190 = vst [vmem:[%s3896_s3 + $0x20] sm:$0xff] %v2182_v41  ;;  %v2184_v49 = vmax.f32 %v2499_v43, 0.0 }
 0x1e5   :  { %2191 = vst [vmem:[%s3896_s3 + $0x28] sm:$0xff] %v2183_v44  ;;  %v2185_v42 = vmax.f32 %v2501_v48, 0.0 }
 0x1e6   :  { %2192 = vst [vmem:[%s3896_s3 + $0x30] sm:$0xff] %v2184_v49 }
 0x1e7   :  { %2193 = vst [vmem:[%s3896_s3 + $0x38] sm:$0xff] %v2185_v42 }

// kernel: vae_forward.16
= control target key start
LH: loop header
LB: loop body
LE: loop exit
PB: predicated region body
PF: predicated region fallthrough
CT: control target
= control target key end

     0   :  { %s773_s12 = smov 0   ;;  %s775_s13 = smov 0   ;;  %s874_s0 = inlined_call_operand.vmem [shape: bf16[16,128], index: 0, kind: input, shape index: {}]   ;;  %s875_s1 = inlined_call_operand.vmem [shape: bf16[128,2304], index: 1, kind: input, shape index: {}]   ;;  %s876_s2 = inlined_call_operand.vmem [shape: f32[1,2304], index: 2, kind: input, shape index: {}]   ;;  %s877_s3 = inlined_call_operand.vmem [shape: f32[16,2304], index: 3, kind: output, shape index: {}]  }
   0x1   :  { %s777_s14 = smov 0   ;;  %s779_s15 = smov 0  }
   0x2   :  { %s781_s16 = smov 0  }
   0x3 LB: > { %s22_s17 = sadd.s32 1, %s746_s15  ;;  %s610_s18 = sadd.s32 4294967295, %s750_s16   ;;  %s750_s16 = sphi %s781_s16, %s13_s16   ;;  %s746_s15 = sphi %s779_s15, %s882_s15   ;;  %s742_s14 = sphi %s777_s14, %s881_s14   ;;  %s738_s13 = sphi %s775_s13, %s880_s13   ;;  %s734_s12 = sphi %s773_s12, %s879_s12  }
   0x4   : > { %p23_p0 = scmp.ge.s32.totalorder %s22_s17, 9  ;;  %p65_p1 = scmp.ne.s32.totalorder %s738_s13, %s734_s12 }
   0x5   : > { %p66_p2 = scmp.eq.s32.totalorder %s750_s16, 0  ;;  %p123_p4 = scmp.eq.s32.totalorder %s610_s18, 8 }
   0x6   : > { %s884_s17 = smov (%p23_p0, %s22_s17), 0  ;;  %s58_s20 = sadd.s32 1, %s738_s13 }
   0x7   : > { %p67_p3 = por %p66_p2, %p65_p1  ;;  %s55_s19 = ssub.s32 %s746_s15, %s884_s17 }
   0x8   : > { %p56_p5 = scmp.eq.s32.totalorder %s55_s19, 0  ;;  %p808_p6 = por %p123_p4, %p65_p1 }
   0x9   : > { %p614_p7 = scmp.ge.s32.totalorder %s750_s16, 9 }
   0xa   : > { %s813_s22 = scalar_select %p56_p5, %s738_s13, %s58_s20  }
   0xb   : > { %154 = sbr.rel (%p614_p7) target bundleno = 30 (0x1e), region = 20 }
  0x12   : > { %157 = sbr.rel (!%p67_p3) target bundleno = 30 (0x1e), region = 24  ;;  %s159_s23 = sand.u32 (%p67_p3), 1, %s738_s13  }
  0x13   : > { %s644_s24 = sshll.u32 (%p67_p3), %s746_s15, 3  ;;  %s615_s25 = sshll.u32 (%p67_p3), %s159_s23, 7 }
  0x14   : > { %s821_s28 = scalar_lea.vmem (%p67_p3), %s875_s1, %s644_s24  ;;  %s161_s29 = scalar_lea.vmem (%p67_p3), [#allocation2], %s615_s25 }
  0x15   : > { %v222_v0 = vld [vmem:[%s821_s28] sm:$0xff] (%p67_p3)  ;;  %v224_v1 = vld [vmem:[%s821_s28 + $0x48] sm:$0xff] (%p67_p3)  ;;  %v226_v2 = vld [vmem:[%s821_s28 + $0x90] sm:$0xff] (%p67_p3) }
  0x16   : > { %223 = vst [vmem:[%s161_s29] sm:$0xff] (%p67_p3), %v222_v0  ;;  %225 = vst [vmem:[%s161_s29 + $0x8] sm:$0xff] (%p67_p3), %v224_v1  ;;  %v228_v3 = vld [vmem:[%s821_s28 + $0xd8] sm:$0xff] (%p67_p3)  ;;  %v230_v4 = vld [vmem:[%s821_s28 + $0x120] sm:$0xff] (%p67_p3) }
  0x17   : > { %227 = vst [vmem:[%s161_s29 + $0x10] sm:$0xff] (%p67_p3), %v226_v2  ;;  %v232_v5 = vld [vmem:[%s821_s28 + $0x168] sm:$0xff] (%p67_p3)  ;;  %229 = vst [vmem:[%s161_s29 + $0x18] sm:$0xff] (%p67_p3), %v228_v3  ;;  %v234_v6 = vld [vmem:[%s821_s28 + $0x1b0] sm:$0xff] (%p67_p3) }
  0x18   : > { %231 = vst [vmem:[%s161_s29 + $0x20] sm:$0xff] (%p67_p3), %v230_v4  ;;  %233 = vst [vmem:[%s161_s29 + $0x28] sm:$0xff] (%p67_p3), %v232_v5  ;;  %v236_v7 = vld [vmem:[%s821_s28 + $0x1f8] sm:$0xff] (%p67_p3)  ;;  %v238_v8 = vld [vmem:[%s821_s28 + $0x240] sm:$0xff] (%p67_p3) }
  0x19   : > { %235 = vst [vmem:[%s161_s29 + $0x30] sm:$0xff] %v234_v6  ;;  %237 = vst [vmem:[%s161_s29 + $0x38] sm:$0xff] %v236_v7  ;;  %v240_v9 = vld [vmem:[%s821_s28 + $0x288] sm:$0xff]  ;;  %v242_v10 = vld [vmem:[%s821_s28 + $0x2d0] sm:$0xff] }
  0x1a   : > { %239 = vst [vmem:[%s161_s29 + $0x40] sm:$0xff] %v238_v8  ;;  %v244_v11 = vld [vmem:[%s821_s28 + $0x318] sm:$0xff]  ;;  %241 = vst [vmem:[%s161_s29 + $0x48] sm:$0xff] %v240_v9  ;;  %v246_v12 = vld [vmem:[%s821_s28 + $0x360] sm:$0xff] }
  0x1b   : > { %243 = vst [vmem:[%s161_s29 + $0x50] sm:$0xff] %v242_v10  ;;  %245 = vst [vmem:[%s161_s29 + $0x58] sm:$0xff] %v244_v11  ;;  %v248_v13 = vld [vmem:[%s821_s28 + $0x3a8] sm:$0xff]  ;;  %v250_v14 = vld [vmem:[%s821_s28 + $0x3f0] sm:$0xff] }
  0x1c   : > { %247 = vst [vmem:[%s161_s29 + $0x60] sm:$0xff] %v246_v12  ;;  %249 = vst [vmem:[%s161_s29 + $0x68] sm:$0xff] %v248_v13  ;;  %v252_v15 = vld [vmem:[%s821_s28 + $0x438] sm:$0xff] }
  0x1d   : > { %251 = vst [vmem:[%s161_s29 + $0x70] sm:$0xff] %v250_v14  ;;  %253 = vst [vmem:[%s161_s29 + $0x78] sm:$0xff] %v252_v15 }
  0x1e PF: > { %p618_p8 = scmp.ge.s32.totalorder %s750_s16, 1  ;;  %p266_p9 = scmp.lt.s32.totalorder %s750_s16, 10 }
  0x20   : > { %p267_p10 = pnand %p618_p8, %p266_p9 }
  0x21   : > { %s273_s30 = sand.u32 (!%p267_p10), 1, %s734_s12   ;;  %v752_v16 = vmov (!%p267_p10), 0   ;;  %v711_v33 = vld [vmem:[%s874_s0] sm:$0xff] (!%p267_p10)   ;;  %s621_s8 = sshll.u32 (!%p267_p10), %s742_s14, 1  ;;  %v339_v34 = vlaneseq (!%p267_p10) }
  0x22   : > { %270 = sbr.rel (%p267_p10) target bundleno = 295 (0x127), region = 66  ;;  %s619_s4 = sshll.u32 (!%p267_p10), %s273_s30, 7  ;;  %467 = vmatprep.mubr.bf16.mxu0 (!%p267_p10), %v752_v16 }
  0x23   : > { %s275_s5 = scalar_lea.vmem (!%p267_p10), [#allocation2], %s619_s4  ;;  %p312_p11 = scmp.lt.s32.totalorder (!%p267_p10), %s621_s8, 17  ;;  %v340_v35 = vshrl.u32 (!%p267_p10), %v339_v34, 7 }
  0x24   : > { %v687_v17 = vld [vmem:[%s275_s5 + $0x4] ss:$8 sps:$4 sm:$0xff] (!%p267_p10)   ;;  %v689_v18 = vld [vmem:[%s275_s5] ss:$8 sps:$4 sm:$0xff] (!%p267_p10)   ;;  %v690_v19 = vld [vmem:[%s275_s5 + $0x14] ss:$8 sps:$4 sm:$0xff] (!%p267_p10)  }
  0x25   : > { %435 = vmatprep.subr.bf16.mxu0 (!%p267_p10), %v687_v17  ;;  %v692_v20 = vld [vmem:[%s275_s5 + $0x10] ss:$8 sps:$4 sm:$0xff] (!%p267_p10)   ;;  %v693_v21 = vld [vmem:[%s275_s5 + $0x24] ss:$8 sps:$4 sm:$0xff] (!%p267_p10)   ;;  %v695_v22 = vld [vmem:[%s275_s5 + $0x20] ss:$8 sps:$4 sm:$0xff] (!%p267_p10)  }
  0x26   : > { %436 = vmatpush1.bf16.msra.mxu0 (!%p267_p10), %v689_v18  ;;  %v696_v23 = vld [vmem:[%s275_s5 + $0x34] ss:$8 sps:$4 sm:$0xff] (!%p267_p10)   ;;  %v698_v24 = vld [vmem:[%s275_s5 + $0x30] ss:$8 sps:$4 sm:$0xff] (!%p267_p10)   ;;  %v699_v25 = vld [vmem:[%s275_s5 + $0x44] ss:$8 sps:$4 sm:$0xff] (!%p267_p10)  }
  0x27   : > { %437 = vmatprep.subr.bf16.mxu0 (!%p267_p10), %v690_v19  ;;  %v701_v26 = vld [vmem:[%s275_s5 + $0x40] ss:$8 sps:$4 sm:$0xff] (!%p267_p10)   ;;  %v702_v27 = vld [vmem:[%s275_s5 + $0x54] ss:$8 sps:$4 sm:$0xff] (!%p267_p10)   ;;  %v704_v28 = vld [vmem:[%s275_s5 + $0x50] ss:$8 sps:$4 sm:$0xff] (!%p267_p10)  }
  0x28   : > { %v705_v29 = vld [vmem:[%s275_s5 + $0x64] ss:$8 sps:$4 sm:$0xff] (!%p267_p10)   ;;  %v707_v30 = vld [vmem:[%s275_s5 + $0x60] ss:$8 sps:$4 sm:$0xff] (!%p267_p10)   ;;  %v708_v31 = vld [vmem:[%s275_s5 + $0x74] ss:$8 sps:$4 sm:$0xff] (!%p267_p10)  }
  0x29   : > { %v710_v32 = vld [vmem:[%s275_s5 + $0x70] ss:$8 sps:$4 sm:$0xff]   ;;  %s886_s8 = smov (!%p312_p11, %s621_s8), 17  ;;  %v341_v36 = vsub.s32 0, %v340_v35  ;;  %v345_v38 = vsub.s32 1, %v340_v35  ;;  %s620_s18 = sshll.u32 %s273_s30, 5 }
  0x2a   : > { %438 = vmatpush1.bf16.msra.mxu0 %v692_v20  ;;  %s314_s11 = scalar_lea.vmem %s876_s2, %s886_s8  ;;  %s303_s19 = scalar_lea.vmem [#allocation3], %s620_s18 }
  0x2b   : > { %439 = vmatprep.subr.bf16.mxu0 %v693_v21  ;;  %v337_v37 = vld [vmem:[%s314_s11] sm:$0x3]  ;;  %s645_s12 = sshll.u32 (%p808_p6), %s742_s14, 4 }
  0x2c   : > { %v342_v39 = vrot.slane %v337_v37, %v341_v36  ;;  %v346_v40 = vrot.slane %v337_v37, %v345_v38  ;;  %s494_s24 = scalar_lea.vmem (%p808_p6), %s877_s3, %s645_s12 }
  0x2e   : > { %440 = vmatpush1.bf16.msra.mxu0 %v695_v22 }
  0x2f   : > { %441 = vmatprep.subr.bf16.mxu0 %v696_v23 }
  0x32   : > { %442 = vmatpush1.bf16.msra.mxu0 %v698_v24 }
  0x33   : > { %443 = vmatprep.subr.bf16.mxu0 %v699_v25 }
  0x36   : > { %444 = vmatpush1.bf16.msra.mxu0 %v701_v26 }
  0x37   : > { %445 = vmatprep.subr.bf16.mxu0 %v702_v27 }
  0x3a   : > { %446 = vmatpush1.bf16.msra.mxu0 %v704_v28 }
  0x3b   : > { %447 = vmatprep.subr.bf16.mxu0 %v705_v29 }
  0x3e   : > { %448 = vmatpush1.bf16.msra.mxu0 %v707_v30 }
  0x3f   : > { %449 = vmatprep.subr.bf16.mxu0 %v708_v31 }
  0x42   : > { %450 = vmatpush1.bf16.msra.mxu0 %v710_v32 }
  0x45   : > { %468 = vmatmul.mubr.bf16.vlgmr.msra.gmra.mrb[0].mxu0 %v711_v33 }
 0x118   : > { %v469_v41 = vpop.f32.mrb[0].mxu0  ;;  %488 = sbr.rel (!%p808_p6) target bundleno = 295 (0x127), region = 74 }
 0x119   : > { %v470_v42 = vadd.f32 %v469_v41, %v342_v39  ;;  %v471_v43 = vpop.f32.mrb[1].mxu0 }
 0x11a   : > { %v472_v44 = vadd.f32 %v471_v43, %v346_v40  ;;  %v473_v45 = vpop.f32.mrb[2].mxu0 }
 0x11b   : > { %478 = vst [vmem:[%s303_s19] sm:$0xff] %v470_v42  ;;  %v474_v46 = vadd.f32 %v473_v45, %v342_v39  ;;  %v475_v47 = vpop.f32.mrb[3].mxu0 }
 0x11c   : > { %479 = vst [vmem:[%s303_s19 + $0x8] sm:$0xff] %v472_v44  ;;  %v476_v48 = vadd.f32 %v475_v47, %v346_v40 }
 0x11d   : > { %480 = vst [vmem:[%s303_s19 + $0x10] sm:$0xff] %v474_v46 }
 0x11e   : > { %481 = vst [vmem:[%s303_s19 + $0x18] sm:$0xff] %v476_v48 }
 0x122   : > { %v507_v49 = vld [vmem:[%s303_s19] sm:$0xff] }
 0x123   : > { %v509_v50 = vld [vmem:[%s303_s19 + $0x8] sm:$0xff]  ;;  %508 = vst [vmem:[%s494_s24] sm:$0xff] %v507_v49 }
 0x124   : > { %v511_v51 = vld [vmem:[%s303_s19 + $0x10] sm:$0xff]  ;;  %510 = vst [vmem:[%s494_s24 + $0x8] sm:$0xff] %v509_v50 }
 0x125   : > { %v513_v52 = vld [vmem:[%s303_s19 + $0x18] sm:$0xff]  ;;  %512 = vst [vmem:[%s494_s24 + $0x90] sm:$0xff] %v511_v51 }
 0x126   : > { %514 = vst [vmem:[%s494_s24 + $0x98] sm:$0xff] %v513_v52 }
 0x127 PF: > { %s13_s16 = sadd.s32 1, %s750_s16   ;;  %s879_s12 = smov %s738_s13 }
 0x128   : > { %p10_p12 = scmp.ge.s32.totalorder %s13_s16, 11   ;;  %s880_s13 = smov %s813_s22 }
 0x129   : > { %s881_s14 = smov %s746_s15  ;;  %s882_s15 = smov %s884_s17 }
 0x12a   :  { %12 = sbr.rel (!%p10_p12) target bundleno = 3 (0x3), region = 134 }

// kernel: vae_forward.15
= control target key start
LH: loop header
LB: loop body
LE: loop exit
PB: predicated region body
PF: predicated region fallthrough
CT: control target
= control target key end

     0   :  { %s2704_s1 = inlined_call_operand.vmem [shape: bf16[2304,128], index: 1, kind: input, shape index: {}]   ;;  %s2705_s0 = inlined_call_operand.vmem [shape: bf16[16,2304], index: 0, kind: input, shape index: {}]   ;;  %s2706_s2 = inlined_call_operand.vmem [shape: f32[1,128], index: 2, kind: input, shape index: {}]   ;;  %s2707_s3 = inlined_call_operand.vmem [shape: f32[16,128], index: 3, kind: output, shape index: {}]  }
   0x1   :  { %v2018_v0 = vld [vmem:[%s2704_s1 + $0x40] sm:$0xff]   ;;  %v2022_v4 = vld [vmem:[%s2704_s1 + $0x48] sm:$0xff]   ;;  %v2026_v8 = vld [vmem:[%s2704_s1 + $0x50] sm:$0xff]  }
   0x2   :  { %v2019_v1 = vld [vmem:[%s2704_s1] sm:$0xff]   ;;  %1820 = vmatprep.subr.bf16.mxu0 %v2018_v0  ;;  %v2023_v5 = vld [vmem:[%s2704_s1 + $0x8] sm:$0xff]   ;;  %v2027_v9 = vld [vmem:[%s2704_s1 + $0x10] sm:$0xff]  }
   0x3   :  { %v2020_v2 = vld [vmem:[%s2704_s1 + $0xc0] sm:$0xff]   ;;  %1821 = vmatpush3.bf16.msra.mxu0 %v2019_v1  ;;  %v2024_v6 = vld [vmem:[%s2704_s1 + $0xc8] sm:$0xff]   ;;  %v2028_v10 = vld [vmem:[%s2704_s1 + $0xd0] sm:$0xff]  }
   0x4   :  { %v2021_v3 = vld [vmem:[%s2704_s1 + $0x80] sm:$0xff]   ;;  %1842 = vmatprep.subr.bf16.mxu1 %v2020_v2  ;;  %1822 = vmatprep.subr.bf16.mxu0 %v2022_v4  ;;  %v2025_v7 = vld [vmem:[%s2704_s1 + $0x88] sm:$0xff]   ;;  %v2029_v11 = vld [vmem:[%s2704_s1 + $0x90] sm:$0xff]  }
   0x5   :  { %1843 = vmatpush3.bf16.msra.mxu1 %v2021_v3  ;;  %v2030_v12 = vld [vmem:[%s2704_s1 + $0x58] sm:$0xff]   ;;  %v2034_v16 = vld [vmem:[%s2704_s1 + $0x60] sm:$0xff]   ;;  %v2038_v20 = vld [vmem:[%s2704_s1 + $0x68] sm:$0xff]  }
   0x6   :  { %1844 = vmatprep.subr.bf16.mxu1 %v2024_v6  ;;  %v2031_v13 = vld [vmem:[%s2704_s1 + $0x18] sm:$0xff]   ;;  %v2035_v17 = vld [vmem:[%s2704_s1 + $0x20] sm:$0xff]   ;;  %v2039_v21 = vld [vmem:[%s2704_s1 + $0x28] sm:$0xff]  }
   0x7   :  { %1823 = vmatpush3.bf16.msra.mxu0 %v2023_v5  ;;  %v2032_v14 = vld [vmem:[%s2704_s1 + $0xd8] sm:$0xff]   ;;  %v2036_v18 = vld [vmem:[%s2704_s1 + $0xe0] sm:$0xff]   ;;  %v2040_v22 = vld [vmem:[%s2704_s1 + $0xe8] sm:$0xff]  }
   0x8   :  { %1824 = vmatprep.subr.bf16.mxu0 %v2026_v8  ;;  %v2033_v15 = vld [vmem:[%s2704_s1 + $0x98] sm:$0xff]   ;;  %v2037_v19 = vld [vmem:[%s2704_s1 + $0xa0] sm:$0xff]   ;;  %v2041_v23 = vld [vmem:[%s2704_s1 + $0xa8] sm:$0xff]  }
   0x9   :  { %1845 = vmatpush3.bf16.msra.mxu1 %v2025_v7  ;;  %v2042_v24 = vld [vmem:[%s2704_s1 + $0x70] sm:$0xff]   ;;  %v2046_v28 = vld [vmem:[%s2704_s1 + $0x78] sm:$0xff]   ;;  %v2049_v31 = vld [vmem:[%s2705_s0] ss:$72 sps:$4 sm:$0xff]  }
   0xa   :  { %1846 = vmatprep.subr.bf16.mxu1 %v2028_v10  ;;  %v2043_v25 = vld [vmem:[%s2704_s1 + $0x30] sm:$0xff]   ;;  %v2047_v29 = vld [vmem:[%s2704_s1 + $0x38] sm:$0xff]   ;;  %v2051_v32 = vld [vmem:[%s2705_s0 + $0x4] ss:$72 sps:$4 sm:$0xff]  }
   0xb   :  { %1825 = vmatpush3.bf16.msra.mxu0 %v2027_v9  ;;  %v2044_v26 = vld [vmem:[%s2704_s1 + $0xf0] sm:$0xff]   ;;  %v2048_v30 = vld [vmem:[%s2704_s1 + $0xf8] sm:$0xff]   ;;  %1314 = vmatprep.mubr.bf16.mxu0 %v2051_v32  ;;  %v2053_v34 = vld [vmem:[%s2704_s1 + $0x140] sm:$0xff]  }
   0xc   :  { %1826 = vmatprep.subr.bf16.mxu0 %v2030_v12  ;;  %v2045_v27 = vld [vmem:[%s2704_s1 + $0xb0] sm:$0xff]   ;;  %v2052_v33 = vld [vmem:[%s2704_s1 + $0xb8] sm:$0xff]   ;;  %v2057_v37 = vld [vmem:[%s2704_s1 + $0x100] sm:$0xff]  }
   0xd   :  { %1847 = vmatpush3.bf16.msra.mxu1 %v2029_v11  ;;  %v2054_v35 = vld [vmem:[%s2705_s0 + $0x8] ss:$72 sps:$4 sm:$0xff]   ;;  %v2056_v36 = vld [vmem:[%s2705_s0 + $0xc] ss:$72 sps:$4 sm:$0xff]   ;;  %v2058_v38 = vld [vmem:[%s2704_s1 + $0x1c0] sm:$0xff]  }
   0xe   :  { %1848 = vmatprep.subr.bf16.mxu1 %v2032_v14  ;;  %1355 = vmatprep.mubr.bf16.mxu1 %v2056_v36  ;;  %v2059_v39 = vld [vmem:[%s2704_s1 + $0x180] sm:$0xff]   ;;  %v2060_v40 = vld [vmem:[%s2704_s1 + $0x148] sm:$0xff]   ;;  %v2064_v44 = vld [vmem:[%s2704_s1 + $0x150] sm:$0xff]  }
   0xf   :  { %1827 = vmatpush3.bf16.msra.mxu0 %v2031_v13  ;;  %v2061_v41 = vld [vmem:[%s2704_s1 + $0x108] sm:$0xff]   ;;  %v2065_v45 = vld [vmem:[%s2704_s1 + $0x110] sm:$0xff]   ;;  %v2068_v48 = vld [vmem:[%s2704_s1 + $0x158] sm:$0xff]  }
  0x10   :  { %1828 = vmatprep.subr.bf16.mxu0 %v2034_v16  ;;  %v2062_v42 = vld [vmem:[%s2704_s1 + $0x1c8] sm:$0xff]   ;;  %v2066_v46 = vld [vmem:[%s2704_s1 + $0x1d0] sm:$0xff]   ;;  %v2069_v49 = vld [vmem:[%s2704_s1 + $0x118] sm:$0xff]  }
  0x11   :  { %1849 = vmatpush3.bf16.msra.mxu1 %v2033_v15  ;;  %v2063_v43 = vld [vmem:[%s2704_s1 + $0x188] sm:$0xff]   ;;  %v2067_v47 = vld [vmem:[%s2704_s1 + $0x190] sm:$0xff]   ;;  %v2070_v50 = vld [vmem:[%s2704_s1 + $0x1d8] sm:$0xff]  }
  0x12   :  { %1850 = vmatprep.subr.bf16.mxu1 %v2036_v18  ;;  %v2071_v51 = vld [vmem:[%s2704_s1 + $0x198] sm:$0xff]   ;;  %v2072_v52 = vld [vmem:[%s2704_s1 + $0x160] sm:$0xff]   ;;  %v2076_v56 = vld [vmem:[%s2704_s1 + $0x168] sm:$0xff]  }
  0x13   :  { %1829 = vmatpush3.bf16.msra.mxu0 %v2035_v17  ;;  %v2073_v53 = vld [vmem:[%s2704_s1 + $0x120] sm:$0xff]   ;;  %v2077_v57 = vld [vmem:[%s2704_s1 + $0x128] sm:$0xff]   ;;  %v2080_v60 = vld [vmem:[%s2704_s1 + $0x170] sm:$0xff]  }
  0x14   :  { %1830 = vmatprep.subr.bf16.mxu0 %v2038_v20  ;;  %v2074_v54 = vld [vmem:[%s2704_s1 + $0x1e0] sm:$0xff]   ;;  %v2078_v58 = vld [vmem:[%s2704_s1 + $0x1e8] sm:$0xff]   ;;  %v2081_v61 = vld [vmem:[%s2704_s1 + $0x130] sm:$0xff]  }
  0x15   :  { %1851 = vmatpush3.bf16.msra.mxu1 %v2037_v19  ;;  %v2075_v55 = vld [vmem:[%s2704_s1 + $0x1a0] sm:$0xff]   ;;  %v2079_v59 = vld [vmem:[%s2704_s1 + $0x1a8] sm:$0xff]   ;;  %v2082_v62 = vld [vmem:[%s2704_s1 + $0x1f0] sm:$0xff]  }
  0x16   :  { %1852 = vmatprep.subr.bf16.mxu1 %v2040_v22  ;;  %v2083_v63 = vld [vmem:[%s2704_s1 + $0x1b0] sm:$0xff]   ;;  %v2084_v0 = vld [vmem:[%s2704_s1 + $0x178] sm:$0xff]   ;;  %v2091_v6 = vld [vmem:[%s2704_s1 + $0x240] sm:$0xff]  }
  0x17   :  { %1831 = vmatpush3.bf16.msra.mxu0 %v2039_v21  ;;  %v2085_v1 = vld [vmem:[%s2704_s1 + $0x138] sm:$0xff]   ;;  %v2095_v9 = vld [vmem:[%s2704_s1 + $0x200] sm:$0xff]   ;;  %v2098_v12 = vld [vmem:[%s2704_s1 + $0x248] sm:$0xff]  }
  0x18   :  { %1832 = vmatprep.subr.bf16.mxu0 %v2042_v24  ;;  %v2086_v2 = vld [vmem:[%s2704_s1 + $0x1f8] sm:$0xff]   ;;  %v2096_v10 = vld [vmem:[%s2704_s1 + $0x2c0] sm:$0xff]   ;;  %v2099_v13 = vld [vmem:[%s2704_s1 + $0x208] sm:$0xff]  }
  0x19   :  { %1853 = vmatpush3.bf16.msra.mxu1 %v2041_v23  ;;  %v2087_v3 = vld [vmem:[%s2705_s0 + $0x10] ss:$72 sps:$4 sm:$0xff]   ;;  %v2089_v4 = vld [vmem:[%s2705_s0 + $0x14] ss:$72 sps:$4 sm:$0xff]   ;;  %v2097_v11 = vld [vmem:[%s2704_s1 + $0x280] sm:$0xff]  }
  0x1a   :  { %1854 = vmatprep.subr.bf16.mxu1 %v2044_v26  ;;  %v2090_v5 = vld [vmem:[%s2704_s1 + $0x1b8] sm:$0xff]   ;;  %v2100_v14 = vld [vmem:[%s2704_s1 + $0x2c8] sm:$0xff]   ;;  %v2102_v16 = vld [vmem:[%s2704_s1 + $0x250] sm:$0xff]  }
  0x1b   :  { %1833 = vmatpush3.bf16.msra.mxu0 %v2043_v25  ;;  %v2092_v7 = vld [vmem:[%s2705_s0 + $0x18] ss:$72 sps:$4 sm:$0xff]   ;;  %v2094_v8 = vld [vmem:[%s2705_s0 + $0x1c] ss:$72 sps:$4 sm:$0xff]   ;;  %v2101_v15 = vld [vmem:[%s2704_s1 + $0x288] sm:$0xff]  }
  0x1c   :  { %1834 = vmatprep.subr.bf16.mxu0 %v2046_v28  ;;  %v2103_v17 = vld [vmem:[%s2704_s1 + $0x210] sm:$0xff]   ;;  %v2106_v20 = vld [vmem:[%s2704_s1 + $0x258] sm:$0xff]   ;;  %v2110_v24 = vld [vmem:[%s2704_s1 + $0x260] sm:$0xff]  }
  0x1d   :  { %1855 = vmatpush3.bf16.msra.mxu1 %v2045_v27  ;;  %v2104_v18 = vld [vmem:[%s2704_s1 + $0x2d0] sm:$0xff]   ;;  %v2107_v21 = vld [vmem:[%s2704_s1 + $0x218] sm:$0xff]   ;;  %v2111_v25 = vld [vmem:[%s2704_s1 + $0x220] sm:$0xff]  }
  0x1e   :  { %1856 = vmatprep.subr.bf16.mxu1 %v2048_v30  ;;  %v2105_v19 = vld [vmem:[%s2704_s1 + $0x290] sm:$0xff]   ;;  %v2108_v22 = vld [vmem:[%s2704_s1 + $0x2d8] sm:$0xff]   ;;  %v2112_v26 = vld [vmem:[%s2704_s1 + $0x2e0] sm:$0xff]  }
  0x1f   :  { %1835 = vmatpush3.bf16.msra.mxu0 %v2047_v29  ;;  %v2109_v23 = vld [vmem:[%s2704_s1 + $0x298] sm:$0xff]   ;;  %v2113_v27 = vld [vmem:[%s2704_s1 + $0x2a0] sm:$0xff]   ;;  %v2114_v28 = vld [vmem:[%s2704_s1 + $0x268] sm:$0xff]  }
  0x20   :  { %1864 = vmatprep.subr.bf16.mxu0 %v2053_v34  ;;  %v2115_v29 = vld [vmem:[%s2704_s1 + $0x228] sm:$0xff]   ;;  %v2118_v32 = vld [vmem:[%s2704_s1 + $0x270] sm:$0xff]   ;;  %v2122_v36 = vld [vmem:[%s2704_s1 + $0x278] sm:$0xff]  }
  0x21   :  { %1857 = vmatpush3.bf16.msra.mxu1 %v2052_v33  ;;  %v2116_v30 = vld [vmem:[%s2704_s1 + $0x2e8] sm:$0xff]   ;;  %v2119_v33 = vld [vmem:[%s2704_s1 + $0x230] sm:$0xff]  }
  0x22   :  { %1315 = vmatmul.mubr.bf16.vlgmr.msra.gmra.mrb[0].mxu0 %v2049_v31  ;;  %1886 = vmatprep.subr.bf16.mxu1 %v2058_v38  ;;  %v2117_v31 = vld [vmem:[%s2704_s1 + $0x2a8] sm:$0xff]   ;;  %v2120_v34 = vld [vmem:[%s2704_s1 + $0x2f0] sm:$0xff]   ;;  %v2124_v38 = vld [vmem:[%s2704_s1 + $0x2f8] sm:$0xff]  }
  0x23   :  { %1865 = vmatpush3.bf16.msra.mxu0 %v2057_v37  ;;  %1396 = vmatprep.mubr.bf16.mxu0 %v2089_v4  ;;  %v2123_v37 = vld [vmem:[%s2704_s1 + $0x238] sm:$0xff]   ;;  %v2156_v4 = vld [vmem:[%s2704_s1 + $0x370] sm:$0xff]  }
  0x24   :  { %1356 = vmatmul.mubr.bf16.vlgmr.msra.gmra.mrb[0].mxu1 %v2054_v35  ;;  %1866 = vmatprep.subr.bf16.mxu0 %v2060_v40  ;;  %v2121_v35 = vld [vmem:[%s2704_s1 + $0x2b0] sm:$0xff]   ;;  %v2127_v40 = vld [vmem:[%s2705_s0 + $0x24] ss:$72 sps:$4 sm:$0xff]  }
  0x25   :  { %1887 = vmatpush3.bf16.msra.mxu1 %v2059_v39  ;;  %1437 = vmatprep.mubr.bf16.mxu1 %v2094_v8  ;;  %v2125_v39 = vld [vmem:[%s2705_s0 + $0x20] ss:$72 sps:$4 sm:$0xff]   ;;  %v2160_v8 = vld [vmem:[%s2704_s1 + $0x378] sm:$0xff]  }
  0x26   :  { %1888 = vmatprep.subr.bf16.mxu1 %v2062_v42  ;;  %v2129_v42 = vld [vmem:[%s2704_s1 + $0x340] sm:$0xff]  }
  0x27   :  { %1867 = vmatpush3.bf16.msra.mxu0 %v2061_v41  ;;  %v2128_v41 = vld [vmem:[%s2704_s1 + $0x2b8] sm:$0xff]  }
  0x28   :  { %1868 = vmatprep.subr.bf16.mxu0 %v2064_v44  ;;  %v2132_v44 = vld [vmem:[%s2705_s0 + $0x2c] ss:$72 sps:$4 sm:$0xff]  }
  0x29   :  { %1889 = vmatpush3.bf16.msra.mxu1 %v2063_v43  ;;  %v2130_v43 = vld [vmem:[%s2705_s0 + $0x28] ss:$72 sps:$4 sm:$0xff]  }
  0x2a   :  { %1890 = vmatprep.subr.bf16.mxu1 %v2066_v46  ;;  %v2134_v46 = vld [vmem:[%s2704_s1 + $0x3c0] sm:$0xff]  }
  0x2b   :  { %1869 = vmatpush3.bf16.msra.mxu0 %v2065_v45  ;;  %v2133_v45 = vld [vmem:[%s2704_s1 + $0x300] sm:$0xff]  }
  0x2c   :  { %1870 = vmatprep.subr.bf16.mxu0 %v2068_v48  ;;  %v2136_v48 = vld [vmem:[%s2704_s1 + $0x348] sm:$0xff]  }
  0x2d   :  { %1891 = vmatpush3.bf16.msra.mxu1 %v2067_v47  ;;  %v2135_v47 = vld [vmem:[%s2704_s1 + $0x380] sm:$0xff]  }
  0x2e   :  { %1892 = vmatprep.subr.bf16.mxu1 %v2070_v50  ;;  %v2138_v50 = vld [vmem:[%s2704_s1 + $0x3c8] sm:$0xff]  }
  0x2f   :  { %1871 = vmatpush3.bf16.msra.mxu0 %v2069_v49  ;;  %v2137_v49 = vld [vmem:[%s2704_s1 + $0x308] sm:$0xff]  }
  0x30   :  { %1872 = vmatprep.subr.bf16.mxu0 %v2072_v52  ;;  %v2140_v52 = vld [vmem:[%s2704_s1 + $0x350] sm:$0xff]  }
  0x31   :  { %1893 = vmatpush3.bf16.msra.mxu1 %v2071_v51  ;;  %v2139_v51 = vld [vmem:[%s2704_s1 + $0x388] sm:$0xff]  }
  0x32   :  { %1894 = vmatprep.subr.bf16.mxu1 %v2074_v54  ;;  %v2142_v54 = vld [vmem:[%s2704_s1 + $0x3d0] sm:$0xff]  }
  0x33   :  { %1873 = vmatpush3.bf16.msra.mxu0 %v2073_v53  ;;  %v2141_v53 = vld [vmem:[%s2704_s1 + $0x310] sm:$0xff]  }
  0x34   :  { %1874 = vmatprep.subr.bf16.mxu0 %v2076_v56  ;;  %v2144_v56 = vld [vmem:[%s2704_s1 + $0x358] sm:$0xff]  }
  0x35   :  { %1895 = vmatpush3.bf16.msra.mxu1 %v2075_v55  ;;  %v2143_v55 = vld [vmem:[%s2704_s1 + $0x390] sm:$0xff]  }
  0x36   :  { %1896 = vmatprep.subr.bf16.mxu1 %v2078_v58  ;;  %v2146_v58 = vld [vmem:[%s2704_s1 + $0x3d8] sm:$0xff]  }
  0x37   :  { %1875 = vmatpush3.bf16.msra.mxu0 %v2077_v57  ;;  %v2145_v57 = vld [vmem:[%s2704_s1 + $0x318] sm:$0xff]  }
  0x38   :  { %1876 = vmatprep.subr.bf16.mxu0 %v2080_v60  ;;  %v2148_v60 = vld [vmem:[%s2704_s1 + $0x360] sm:$0xff]  }
  0x39   :  { %1897 = vmatpush3.bf16.msra.mxu1 %v2079_v59  ;;  %v2147_v59 = vld [vmem:[%s2704_s1 + $0x398] sm:$0xff]  }
  0x3a   :  { %1898 = vmatprep.subr.bf16.mxu1 %v2082_v62  ;;  %v2150_v62 = vld [vmem:[%s2704_s1 + $0x3e0] sm:$0xff]  }
  0x3b   :  { %1877 = vmatpush3.bf16.msra.mxu0 %v2081_v61  ;;  %v2149_v61 = vld [vmem:[%s2704_s1 + $0x320] sm:$0xff]  }
  0x3c   :  { %1878 = vmatprep.subr.bf16.mxu0 %v2084_v0  ;;  %v2152_v0 = vld [vmem:[%s2704_s1 + $0x368] sm:$0xff]  }
  0x3d   :  { %1899 = vmatpush3.bf16.msra.mxu1 %v2083_v63  ;;  %v2151_v63 = vld [vmem:[%s2704_s1 + $0x3a0] sm:$0xff]  }
  0x3e   :  { %1900 = vmatprep.subr.bf16.mxu1 %v2086_v2  ;;  %v2154_v2 = vld [vmem:[%s2704_s1 + $0x3e8] sm:$0xff]  }
  0x3f   :  { %1879 = vmatpush3.bf16.msra.mxu0 %v2085_v1  ;;  %v2153_v1 = vld [vmem:[%s2704_s1 + $0x328] sm:$0xff]  }
  0x40   :  { %1908 = vmatprep.subr.bf16.mxu0 %v2091_v6  ;;  %v2158_v6 = vld [vmem:[%s2704_s1 + $0x3f0] sm:$0xff]  }
  0x41   :  { %1901 = vmatpush3.bf16.msra.mxu1 %v2090_v5  ;;  %v2157_v5 = vld [vmem:[%s2704_s1 + $0x330] sm:$0xff]  }
  0x42   :  { %1397 = vmatmul.mubr.bf16.vlgmr.msra.gmra.mrb[4].mxu0 %v2087_v3  ;;  %1930 = vmatprep.subr.bf16.mxu1 %v2096_v10  ;;  %v2155_v3 = vld [vmem:[%s2704_s1 + $0x3a8] sm:$0xff]   ;;  %v2162_v10 = vld [vmem:[%s2704_s1 + $0x3f8] sm:$0xff]  }
  0x43   :  { %1909 = vmatpush3.bf16.msra.mxu0 %v2095_v9  ;;  %1478 = vmatprep.mubr.bf16.mxu0 %v2127_v40  ;;  %v2161_v9 = vld [vmem:[%s2704_s1 + $0x338] sm:$0xff]  }
  0x44   :  { %1438 = vmatmul.mubr.bf16.vlgmr.msra.gmra.mrb[4].mxu1 %v2092_v7  ;;  %1910 = vmatprep.subr.bf16.mxu0 %v2098_v12  ;;  %v2159_v7 = vld [vmem:[%s2704_s1 + $0x3b0] sm:$0xff]  }
  0x45   :  { %1931 = vmatpush3.bf16.msra.mxu1 %v2097_v11  ;;  %1519 = vmatprep.mubr.bf16.mxu1 %v2132_v44  ;;  %v2163_v11 = vld [vmem:[%s2705_s0 + $0x30] ss:$72 sps:$4 sm:$0xff]   ;;  %v2165_v12 = vld [vmem:[%s2705_s0 + $0x34] ss:$72 sps:$4 sm:$0xff]  }
  0x46   :  { %1932 = vmatprep.subr.bf16.mxu1 %v2100_v14  ;;  %v2167_v14 = vld [vmem:[%s2704_s1 + $0x440] sm:$0xff]  }
  0x47   :  { %1911 = vmatpush3.bf16.msra.mxu0 %v2099_v13  ;;  %v2166_v13 = vld [vmem:[%s2704_s1 + $0x3b8] sm:$0xff]  }
  0x48   :  { %1912 = vmatprep.subr.bf16.mxu0 %v2102_v16  ;;  %v2170_v16 = vld [vmem:[%s2705_s0 + $0x3c] ss:$72 sps:$4 sm:$0xff]  }
  0x49   :  { %1933 = vmatpush3.bf16.msra.mxu1 %v2101_v15  ;;  %v2168_v15 = vld [vmem:[%s2705_s0 + $0x38] ss:$72 sps:$4 sm:$0xff]  }
  0x4a   :  { %1934 = vmatprep.subr.bf16.mxu1 %v2104_v18  ;;  %v2172_v18 = vld [vmem:[%s2704_s1 + $0x448] sm:$0xff]  }
  0x4b   :  { %1913 = vmatpush3.bf16.msra.mxu0 %v2103_v17  ;;  %v2171_v17 = vld [vmem:[%s2704_s1 + $0x400] sm:$0xff]  }
  0x4c   :  { %1914 = vmatprep.subr.bf16.mxu0 %v2106_v20  ;;  %v2174_v20 = vld [vmem:[%s2704_s1 + $0x450] sm:$0xff]  }
  0x4d   :  { %1935 = vmatpush3.bf16.msra.mxu1 %v2105_v19  ;;  %v2173_v19 = vld [vmem:[%s2704_s1 + $0x408] sm:$0xff]  }
  0x4e   :  { %1936 = vmatprep.subr.bf16.mxu1 %v2108_v22  ;;  %v2176_v22 = vld [vmem:[%s2704_s1 + $0x458] sm:$0xff]  }
  0x4f   :  { %1915 = vmatpush3.bf16.msra.mxu0 %v2107_v21  ;;  %v2175_v21 = vld [vmem:[%s2704_s1 + $0x410] sm:$0xff]  }
  0x50   :  { %1916 = vmatprep.subr.bf16.mxu0 %v2110_v24  ;;  %v2178_v24 = vld [vmem:[%s2704_s1 + $0x460] sm:$0xff]  }
  0x51   :  { %1937 = vmatpush3.bf16.msra.mxu1 %v2109_v23  ;;  %v2177_v23 = vld [vmem:[%s2704_s1 + $0x418] sm:$0xff]  }
  0x52   :  { %1938 = vmatprep.subr.bf16.mxu1 %v2112_v26  ;;  %v2180_v26 = vld [vmem:[%s2704_s1 + $0x468] sm:$0xff]  }
  0x53   :  { %1917 = vmatpush3.bf16.msra.mxu0 %v2111_v25  ;;  %v2179_v25 = vld [vmem:[%s2704_s1 + $0x420] sm:$0xff]  }
  0x54   :  { %1918 = vmatprep.subr.bf16.mxu0 %v2114_v28  ;;  %v2181_v28 = vld [vmem:[%s2704_s1 + $0x428] sm:$0xff]  }
  0x55   :  { %1939 = vmatpush3.bf16.msra.mxu1 %v2113_v27  ;;  %v2188_v27 = vld [vmem:[%s2705_s0 + $0x44] ss:$72 sps:$4 sm:$0xff]  }
  0x56   :  { %1940 = vmatprep.subr.bf16.mxu1 %v2116_v30  ;;  %v2183_v30 = vld [vmem:[%s2704_s1 + $0x430] sm:$0xff]  }
  0x57   :  { %1919 = vmatpush3.bf16.msra.mxu0 %v2115_v29  ;;  %v2182_v29 = vld [vmem:[%s2704_s1 + $0x470] sm:$0xff]  }
  0x58   :  { %1920 = vmatprep.subr.bf16.mxu0 %v2118_v32  ;;  %v2185_v32 = vld [vmem:[%s2704_s1 + $0x438] sm:$0xff]  }
  0x59   :  { %1941 = vmatpush3.bf16.msra.mxu1 %v2117_v31  ;;  %v2184_v31 = vld [vmem:[%s2704_s1 + $0x478] sm:$0xff]  }
  0x5a   :  { %1942 = vmatprep.subr.bf16.mxu1 %v2120_v34 }
  0x5b   :  { %1921 = vmatpush3.bf16.msra.mxu0 %v2119_v33  ;;  %v2186_v33 = vld [vmem:[%s2705_s0 + $0x40] ss:$72 sps:$4 sm:$0xff]  }
  0x5c   :  { %1922 = vmatprep.subr.bf16.mxu0 %v2122_v36 }
  0x5d   :  { %1943 = vmatpush3.bf16.msra.mxu1 %v2121_v35  ;;  %v1657_v35 = vld [vmem:[%s2706_s2] ss:$0 sm:$0xff] }
  0x5e   :  { %1944 = vmatprep.subr.bf16.mxu1 %v2124_v38 }
  0x5f   :  { %1923 = vmatpush3.bf16.msra.mxu0 %v2123_v37 }
  0x60   :  { %1952 = vmatprep.subr.bf16.mxu0 %v2129_v42 }
  0x61   :  { %1945 = vmatpush3.bf16.msra.mxu1 %v2128_v41 }
  0x62   :  { %1479 = vmatmul.mubr.bf16.vlgmr.msra.gmra.mrb[8].mxu0 %v2125_v39  ;;  %1974 = vmatprep.subr.bf16.mxu1 %v2134_v46 }
  0x63   :  { %1953 = vmatpush3.bf16.msra.mxu0 %v2133_v45  ;;  %1560 = vmatprep.mubr.bf16.mxu0 %v2165_v12 }
  0x64   :  { %1520 = vmatmul.mubr.bf16.vlgmr.msra.gmra.mrb[8].mxu1 %v2130_v43  ;;  %1954 = vmatprep.subr.bf16.mxu0 %v2136_v48 }
  0x65   :  { %1975 = vmatpush3.bf16.msra.mxu1 %v2135_v47  ;;  %1601 = vmatprep.mubr.bf16.mxu1 %v2170_v16 }
  0x66   :  { %1976 = vmatprep.subr.bf16.mxu1 %v2138_v50 }
  0x67   :  { %1955 = vmatpush3.bf16.msra.mxu0 %v2137_v49 }
  0x68   :  { %1956 = vmatprep.subr.bf16.mxu0 %v2140_v52 }
  0x69   :  { %1977 = vmatpush3.bf16.msra.mxu1 %v2139_v51 }
  0x6a   :  { %1978 = vmatprep.subr.bf16.mxu1 %v2142_v54 }
  0x6b   :  { %1957 = vmatpush3.bf16.msra.mxu0 %v2141_v53 }
  0x6c   :  { %1958 = vmatprep.subr.bf16.mxu0 %v2144_v56 }
  0x6d   :  { %1979 = vmatpush3.bf16.msra.mxu1 %v2143_v55 }
  0x6e   :  { %1980 = vmatprep.subr.bf16.mxu1 %v2146_v58 }
  0x6f   :  { %1959 = vmatpush3.bf16.msra.mxu0 %v2145_v57 }
  0x70   :  { %1960 = vmatprep.subr.bf16.mxu0 %v2148_v60 }
  0x71   :  { %1981 = vmatpush3.bf16.msra.mxu1 %v2147_v59 }
  0x72   :  { %1982 = vmatprep.subr.bf16.mxu1 %v2150_v62 }
  0x73   :  { %1961 = vmatpush3.bf16.msra.mxu0 %v2149_v61 }
  0x74   :  { %1962 = vmatprep.subr.bf16.mxu0 %v2152_v0 }
  0x75   :  { %1983 = vmatpush3.bf16.msra.mxu1 %v2151_v63 }
  0x76   :  { %1984 = vmatprep.subr.bf16.mxu1 %v2154_v2 }
  0x77   :  { %1963 = vmatpush3.bf16.msra.mxu0 %v2153_v1 }
  0x78   :  { %1964 = vmatprep.subr.bf16.mxu0 %v2156_v4 }
  0x79   :  { %1985 = vmatpush3.bf16.msra.mxu1 %v2155_v3 }
  0x7a   :  { %1986 = vmatprep.subr.bf16.mxu1 %v2158_v6 }
  0x7b   :  { %1965 = vmatpush3.bf16.msra.mxu0 %v2157_v5 }
  0x7c   :  { %1966 = vmatprep.subr.bf16.mxu0 %v2160_v8 }
  0x7d   :  { %1987 = vmatpush3.bf16.msra.mxu1 %v2159_v7 }
  0x7e   :  { %1988 = vmatprep.subr.bf16.mxu1 %v2162_v10 }
  0x7f   :  { %1967 = vmatpush3.bf16.msra.mxu0 %v2161_v9 }
  0x80   :  { %1996 = vmatprep.subr.bf16.mxu0 %v2167_v14 }
  0x81   :  { %1989 = vmatpush3.bf16.msra.mxu1 %v2166_v13 }
  0x82   :  { %1561 = vmatmul.mubr.bf16.vlgmr.msra.gmra.mrb[12].mxu0 %v2163_v11 }
  0x83   :  { %1997 = vmatpush3.bf16.msra.mxu0 %v2171_v17  ;;  %1642 = vmatprep.mubr.bf16.mxu0 %v2188_v27 }
  0x84   :  { %1602 = vmatmul.mubr.bf16.vlgmr.msra.gmra.mrb[12].mxu1 %v2168_v15  ;;  %1998 = vmatprep.subr.bf16.mxu0 %v2172_v18 }
  0x87   :  { %1999 = vmatpush3.bf16.msra.mxu0 %v2173_v19 }
  0x88   :  { %2000 = vmatprep.subr.bf16.mxu0 %v2174_v20 }
  0x8b   :  { %2001 = vmatpush3.bf16.msra.mxu0 %v2175_v21 }
  0x8c   :  { %2002 = vmatprep.subr.bf16.mxu0 %v2176_v22 }
  0x8f   :  { %2003 = vmatpush3.bf16.msra.mxu0 %v2177_v23 }
  0x90   :  { %2004 = vmatprep.subr.bf16.mxu0 %v2178_v24 }
  0x93   :  { %2005 = vmatpush3.bf16.msra.mxu0 %v2179_v25 }
  0x94   :  { %2006 = vmatprep.subr.bf16.mxu0 %v2180_v26 }
  0x97   :  { %2007 = vmatpush3.bf16.msra.mxu0 %v2181_v28 }
  0x98   :  { %2008 = vmatprep.subr.bf16.mxu0 %v2182_v29 }
  0x9b   :  { %2009 = vmatpush3.bf16.msra.mxu0 %v2183_v30 }
  0x9c   :  { %2010 = vmatprep.subr.bf16.mxu0 %v2184_v31 }
  0x9f   :  { %2011 = vmatpush3.bf16.msra.mxu0 %v2185_v32 }
  0xa2   :  { %1643 = vmatmul.mubr.bf16.vlgmr.msra.gmra.mrb[16].mxu0 %v2186_v33 }
  0xf5   :  { %v1836_v34 = vpop.f32.mrb[0].mxu0 }
  0xf6   :  { %v1837_v36 = vpop.f32.mrb[1].mxu0 }
  0xf7   :  { %v1838_v37 = vadd.f32 %v1837_v36, %v1836_v34  ;;  %v1839_v38 = vpop.f32.mrb[2].mxu0  ;;  %v1858_v39 = vpop.f32.mrb[0].mxu1 }
  0xf8   :  { %v1840_v40 = vpop.f32.mrb[3].mxu0  ;;  %v1859_v43 = vpop.f32.mrb[1].mxu1 }
  0xf9   :  { %v1317_v41 = vadd.f32 %v1838_v37, %v1657_v35  ;;  %v1841_v42 = vadd.f32 %v1840_v40, %v1839_v38  ;;  %v1860_v44 = vadd.f32 %v1859_v43, %v1858_v39  ;;  %v1861_v45 = vpop.f32.mrb[2].mxu1 }
  0xfa   :  { %v1862_v47 = vpop.f32.mrb[3].mxu1 }
  0xfb   :  { %v1320_v46 = vadd.f32 %v1841_v42, %v1657_v35  ;;  %v1358_v48 = vadd.f32 %v1860_v44, %v1317_v41  ;;  %v1863_v49 = vadd.f32 %v1862_v47, %v1861_v45 }
  0xfd   :  { %v1361_v50 = vadd.f32 %v1863_v49, %v1320_v46 }
 0x115   :  { %v1880_v51 = vpop.f32.mrb[4].mxu0 }
 0x116   :  { %v1881_v52 = vpop.f32.mrb[5].mxu0 }
 0x117   :  { %v1882_v53 = vadd.f32 %v1881_v52, %v1880_v51  ;;  %v1883_v54 = vpop.f32.mrb[6].mxu0  ;;  %v1902_v57 = vpop.f32.mrb[4].mxu1 }
 0x118   :  { %v1884_v55 = vpop.f32.mrb[7].mxu0  ;;  %v1903_v59 = vpop.f32.mrb[5].mxu1 }
 0x119   :  { %v1399_v56 = vadd.f32 %v1882_v53, %v1358_v48  ;;  %v1885_v58 = vadd.f32 %v1884_v55, %v1883_v54  ;;  %v1904_v61 = vadd.f32 %v1903_v59, %v1902_v57  ;;  %v1905_v62 = vpop.f32.mrb[6].mxu1 }
 0x11a   :  { %v1906_v63 = vpop.f32.mrb[7].mxu1 }
 0x11b   :  { %v1402_v60 = vadd.f32 %v1885_v58, %v1361_v50  ;;  %v1440_v0 = vadd.f32 %v1904_v61, %v1399_v56  ;;  %v1907_v1 = vadd.f32 %v1906_v63, %v1905_v62 }
 0x11d   :  { %v1443_v2 = vadd.f32 %v1907_v1, %v1402_v60 }
 0x135   :  { %v1924_v3 = vpop.f32.mrb[8].mxu0 }
 0x136   :  { %v1925_v4 = vpop.f32.mrb[9].mxu0 }
 0x137   :  { %v1926_v5 = vadd.f32 %v1925_v4, %v1924_v3  ;;  %v1927_v6 = vpop.f32.mrb[10].mxu0  ;;  %v1946_v7 = vpop.f32.mrb[8].mxu1 }
 0x138   :  { %v1928_v8 = vpop.f32.mrb[11].mxu0  ;;  %v1947_v11 = vpop.f32.mrb[9].mxu1 }
 0x139   :  { %v1481_v9 = vadd.f32 %v1926_v5, %v1440_v0  ;;  %v1929_v10 = vadd.f32 %v1928_v8, %v1927_v6  ;;  %v1948_v12 = vadd.f32 %v1947_v11, %v1946_v7  ;;  %v1949_v13 = vpop.f32.mrb[10].mxu1 }
 0x13a   :  { %v1950_v15 = vpop.f32.mrb[11].mxu1 }
 0x13b   :  { %v1484_v14 = vadd.f32 %v1929_v10, %v1443_v2  ;;  %v1522_v16 = vadd.f32 %v1948_v12, %v1481_v9  ;;  %v1951_v17 = vadd.f32 %v1950_v15, %v1949_v13 }
 0x13d   :  { %v1525_v18 = vadd.f32 %v1951_v17, %v1484_v14 }
 0x155   :  { %v1968_v19 = vpop.f32.mrb[12].mxu0 }
 0x156   :  { %v1969_v20 = vpop.f32.mrb[13].mxu0 }
 0x157   :  { %v1970_v21 = vadd.f32 %v1969_v20, %v1968_v19  ;;  %v1971_v22 = vpop.f32.mrb[14].mxu0  ;;  %v1990_v23 = vpop.f32.mrb[12].mxu1 }
 0x158   :  { %v1972_v24 = vpop.f32.mrb[15].mxu0  ;;  %v1991_v27 = vpop.f32.mrb[13].mxu1 }
 0x159   :  { %v1563_v25 = vadd.f32 %v1970_v21, %v1522_v16  ;;  %v1973_v26 = vadd.f32 %v1972_v24, %v1971_v22  ;;  %v1992_v28 = vadd.f32 %v1991_v27, %v1990_v23  ;;  %v1993_v29 = vpop.f32.mrb[14].mxu1 }
 0x15a   :  { %v1994_v31 = vpop.f32.mrb[15].mxu1 }
 0x15b   :  { %v1566_v30 = vadd.f32 %v1973_v26, %v1525_v18  ;;  %v1604_v32 = vadd.f32 %v1992_v28, %v1563_v25  ;;  %v1995_v33 = vadd.f32 %v1994_v31, %v1993_v29 }
 0x15d   :  { %v1607_v34 = vadd.f32 %v1995_v33, %v1566_v30 }
 0x175   :  { %v2012_v35 = vpop.f32.mrb[16].mxu0 }
 0x176   :  { %v2013_v36 = vpop.f32.mrb[17].mxu0 }
 0x177   :  { %v2014_v37 = vadd.f32 %v2013_v36, %v2012_v35  ;;  %v2015_v38 = vpop.f32.mrb[18].mxu0 }
 0x178   :  { %v2016_v39 = vpop.f32.mrb[19].mxu0 }
 0x179   :  { %v1645_v40 = vadd.f32 %v2014_v37, %v1604_v32  ;;  %v2017_v41 = vadd.f32 %v2016_v39, %v2015_v38 }
 0x17b   :  { %1651 = vst [vmem:[%s2707_s3] sm:$0xff] %v1645_v40  ;;  %v1648_v42 = vadd.f32 %v2017_v41, %v1607_v34 }
 0x17d   :  { %1652 = vst [vmem:[%s2707_s3 + $0x8] sm:$0xff] %v1648_v42 }

// kernel: vae_forward.18
= control target key start
LH: loop header
LB: loop body
LE: loop exit
PB: predicated region body
PF: predicated region fallthrough
CT: control target
= control target key end

     0   :  { %s1051_s12 = smov 0   ;;  %s1053_s13 = smov 0   ;;  %s1263_s0 = inlined_call_operand.vmem [shape: bf16[32,256], index: 0, kind: input, shape index: {}]   ;;  %s1264_s1 = inlined_call_operand.vmem [shape: bf16[256,2048], index: 1, kind: input, shape index: {}]   ;;  %s1265_s2 = inlined_call_operand.vmem [shape: f32[1,2048], index: 2, kind: input, shape index: {}]   ;;  %s1266_s3 = inlined_call_operand.vmem [shape: f32[32,2048], index: 3, kind: output, shape index: {}]  }
   0x1   :  { %s1055_s14 = smov 0   ;;  %s1057_s15 = smov 0  }
   0x2   :  { %s1059_s16 = smov 0  }
   0x3 LB: > { %s22_s17 = sadd.s32 1, %s1025_s15  ;;  %s810_s18 = sadd.s32 4294967295, %s1029_s16   ;;  %s1029_s16 = sphi %s1059_s16, %s13_s16   ;;  %s1025_s15 = sphi %s1057_s15, %s1271_s15   ;;  %s1021_s14 = sphi %s1055_s14, %s1270_s14   ;;  %s1017_s13 = sphi %s1053_s13, %s1269_s13   ;;  %s1013_s12 = sphi %s1051_s12, %s1268_s12  }
   0x4   : > { %p23_p0 = scmp.ge.s32.totalorder %s22_s17, 8  ;;  %p65_p1 = scmp.ne.s32.totalorder %s1017_s13, %s1013_s12 }
   0x5   : > { %p66_p2 = scmp.eq.s32.totalorder %s1029_s16, 0  ;;  %p123_p4 = scmp.eq.s32.totalorder %s810_s18, 7 }
   0x6   : > { %s1273_s17 = smov (%p23_p0, %s22_s17), 0  ;;  %s58_s20 = sadd.s32 1, %s1017_s13 }
   0x7   : > { %p67_p3 = por %p66_p2, %p65_p1  ;;  %s55_s19 = ssub.s32 %s1025_s15, %s1273_s17 }
   0x8   : > { %p56_p5 = scmp.eq.s32.totalorder %s55_s19, 0  ;;  %p1086_p6 = por %p123_p4, %p65_p1 }
   0x9   : > { %p814_p7 = scmp.ge.s32.totalorder %s1029_s16, 8 }
   0xa   : > { %s1091_s22 = scalar_select %p56_p5, %s1017_s13, %s58_s20  }
   0xb   : > { %155 = sbr.rel (%p814_p7) target bundleno = 54 (0x36), region = 20 }
  0x12   : > { %158 = sbr.rel (!%p67_p3) target bundleno = 54 (0x36), region = 24  ;;  %s160_s23 = sand.u32 (%p67_p3), 1, %s1017_s13  }
  0x13   : > { %s863_s24 = sshll.u32 (%p67_p3), %s1025_s15, 3  ;;  %s815_s25 = sshll.u32 (%p67_p3), %s160_s23, 8 }
  0x14   : > { %s1099_s28 = scalar_lea.vmem (%p67_p3), %s1264_s1, %s863_s24  ;;  %s1104_s29 = scalar_lea.vmem (%p67_p3), [#allocation2], %s815_s25 }
  0x15   : > { %v255_v0 = vld [vmem:[%s1099_s28] sm:$0xff] (%p67_p3) }
  0x16   : > { %v257_v1 = vld [vmem:[%s1099_s28 + $0x40] sm:$0xff] (%p67_p3)  ;;  %256 = vst [vmem:[%s1104_s29] sm:$0xff] (%p67_p3), %v255_v0 }
  0x17   : > { %v259_v2 = vld [vmem:[%s1099_s28 + $0x80] sm:$0xff] (%p67_p3)  ;;  %258 = vst [vmem:[%s1104_s29 + $0x8] sm:$0xff] (%p67_p3), %v257_v1 }
  0x18   : > { %260 = vst [vmem:[%s1104_s29 + $0x10] sm:$0xff] (%p67_p3), %v259_v2  ;;  %v261_v3 = vld [vmem:[%s1099_s28 + $0xc0] sm:$0xff] (%p67_p3) }
  0x19   : > { %v263_v4 = vld [vmem:[%s1099_s28 + $0x100] sm:$0xff]  ;;  %262 = vst [vmem:[%s1104_s29 + $0x18] sm:$0xff] %v261_v3 }
  0x1a   : > { %v265_v5 = vld [vmem:[%s1099_s28 + $0x140] sm:$0xff]  ;;  %264 = vst [vmem:[%s1104_s29 + $0x20] sm:$0xff] %v263_v4 }
  0x1b   : > { %266 = vst [vmem:[%s1104_s29 + $0x28] sm:$0xff] %v265_v5  ;;  %v267_v6 = vld [vmem:[%s1099_s28 + $0x180] sm:$0xff] }
  0x1c   : > { %v269_v7 = vld [vmem:[%s1099_s28 + $0x1c0] sm:$0xff]  ;;  %268 = vst [vmem:[%s1104_s29 + $0x30] sm:$0xff] %v267_v6 }
  0x1d   : > { %v271_v8 = vld [vmem:[%s1099_s28 + $0x200] sm:$0xff]  ;;  %270 = vst [vmem:[%s1104_s29 + $0x38] sm:$0xff] %v269_v7 }
  0x1e   : > { %272 = vst [vmem:[%s1104_s29 + $0x40] sm:$0xff] %v271_v8  ;;  %v273_v9 = vld [vmem:[%s1099_s28 + $0x240] sm:$0xff] }
  0x1f   : > { %v275_v10 = vld [vmem:[%s1099_s28 + $0x280] sm:$0xff]  ;;  %274 = vst [vmem:[%s1104_s29 + $0x48] sm:$0xff] %v273_v9 }
  0x20   : > { %v277_v11 = vld [vmem:[%s1099_s28 + $0x2c0] sm:$0xff]  ;;  %276 = vst [vmem:[%s1104_s29 + $0x50] sm:$0xff] %v275_v10 }
  0x21   : > { %278 = vst [vmem:[%s1104_s29 + $0x58] sm:$0xff] %v277_v11  ;;  %v279_v12 = vld [vmem:[%s1099_s28 + $0x300] sm:$0xff] }
  0x22   : > { %v281_v13 = vld [vmem:[%s1099_s28 + $0x340] sm:$0xff]  ;;  %280 = vst [vmem:[%s1104_s29 + $0x60] sm:$0xff] %v279_v12 }
  0x23   : > { %v283_v14 = vld [vmem:[%s1099_s28 + $0x380] sm:$0xff]  ;;  %282 = vst [vmem:[%s1104_s29 + $0x68] sm:$0xff] %v281_v13 }
  0x24   : > { %284 = vst [vmem:[%s1104_s29 + $0x70] sm:$0xff] %v283_v14  ;;  %v285_v15 = vld [vmem:[%s1099_s28 + $0x3c0] sm:$0xff] }
  0x25   : > { %v287_v16 = vld [vmem:[%s1099_s28 + $0x400] sm:$0xff]  ;;  %286 = vst [vmem:[%s1104_s29 + $0x78] sm:$0xff] %v285_v15 }
  0x26   : > { %v289_v17 = vld [vmem:[%s1099_s28 + $0x440] sm:$0xff]  ;;  %288 = vst [vmem:[%s1104_s29 + $0x80] sm:$0xff] %v287_v16 }
  0x27   : > { %290 = vst [vmem:[%s1104_s29 + $0x88] sm:$0xff] %v289_v17  ;;  %v291_v18 = vld [vmem:[%s1099_s28 + $0x480] sm:$0xff] }
  0x28   : > { %v293_v19 = vld [vmem:[%s1099_s28 + $0x4c0] sm:$0xff]  ;;  %292 = vst [vmem:[%s1104_s29 + $0x90] sm:$0xff] %v291_v18 }
  0x29   : > { %v295_v20 = vld [vmem:[%s1099_s28 + $0x500] sm:$0xff]  ;;  %294 = vst [vmem:[%s1104_s29 + $0x98] sm:$0xff] %v293_v19 }
  0x2a   : > { %296 = vst [vmem:[%s1104_s29 + $0xa0] sm:$0xff] %v295_v20  ;;  %v297_v21 = vld [vmem:[%s1099_s28 + $0x540] sm:$0xff] }
  0x2b   : > { %v299_v22 = vld [vmem:[%s1099_s28 + $0x580] sm:$0xff]  ;;  %298 = vst [vmem:[%s1104_s29 + $0xa8] sm:$0xff] %v297_v21 }
  0x2c   : > { %v301_v23 = vld [vmem:[%s1099_s28 + $0x5c0] sm:$0xff]  ;;  %300 = vst [vmem:[%s1104_s29 + $0xb0] sm:$0xff] %v299_v22 }
  0x2d   : > { %302 = vst [vmem:[%s1104_s29 + $0xb8] sm:$0xff] %v301_v23  ;;  %v303_v24 = vld [vmem:[%s1099_s28 + $0x600] sm:$0xff] }
  0x2e   : > { %v305_v25 = vld [vmem:[%s1099_s28 + $0x640] sm:$0xff]  ;;  %304 = vst [vmem:[%s1104_s29 + $0xc0] sm:$0xff] %v303_v24 }
  0x2f   : > { %v307_v26 = vld [vmem:[%s1099_s28 + $0x680] sm:$0xff]  ;;  %306 = vst [vmem:[%s1104_s29 + $0xc8] sm:$0xff] %v305_v25 }
  0x30   : > { %308 = vst [vmem:[%s1104_s29 + $0xd0] sm:$0xff] %v307_v26  ;;  %v309_v27 = vld [vmem:[%s1099_s28 + $0x6c0] sm:$0xff] }
  0x31   : > { %v311_v28 = vld [vmem:[%s1099_s28 + $0x700] sm:$0xff]  ;;  %310 = vst [vmem:[%s1104_s29 + $0xd8] sm:$0xff] %v309_v27 }
  0x32   : > { %v313_v29 = vld [vmem:[%s1099_s28 + $0x740] sm:$0xff]  ;;  %312 = vst [vmem:[%s1104_s29 + $0xe0] sm:$0xff] %v311_v28 }
  0x33   : > { %314 = vst [vmem:[%s1104_s29 + $0xe8] sm:$0xff] %v313_v29  ;;  %v315_v30 = vld [vmem:[%s1099_s28 + $0x780] sm:$0xff] }
  0x34   : > { %v317_v31 = vld [vmem:[%s1099_s28 + $0x7c0] sm:$0xff]  ;;  %316 = vst [vmem:[%s1104_s29 + $0xf0] sm:$0xff] %v315_v30 }
  0x35   : > { %318 = vst [vmem:[%s1104_s29 + $0xf8] sm:$0xff] %v317_v31 }
  0x36 PF: > { %p818_p8 = scmp.ge.s32.totalorder %s1029_s16, 1  ;;  %p331_p9 = scmp.lt.s32.totalorder %s1029_s16, 9 }
  0x38   : > { %p332_p10 = pnand %p818_p8, %p331_p9 }
  0x39   : > { %s338_s30 = sand.u32 (!%p332_p10), 1, %s1013_s12   ;;  %v987_v32 = vld [vmem:[%s1263_s0 + $0x4] ss:$8 sps:$4 sm:$0xff] (!%p332_p10)   ;;  %v990_v33 = vld [vmem:[%s1263_s0 + $0x14] ss:$8 sps:$4 sm:$0xff] (!%p332_p10)   ;;  %s821_s20 = sshll.u32 (!%p332_p10), %s1021_s14, 1  ;;  %v423_v4 = vlaneseq (!%p332_p10) }
  0x3a   : > { %335 = sbr.rel (%p332_p10) target bundleno = 352 (0x160), region = 66  ;;  %s819_s4 = sshll.u32 (!%p332_p10), %s338_s30, 8  ;;  %645 = vmatprep.mubr.bf16.mxu0 (!%p332_p10), %v987_v32  ;;  %655 = vmatprep.mubr.bf16.mxu1 (!%p332_p10), %v990_v33  ;;  %v985_v2 = vld [vmem:[%s1263_s0] ss:$8 sps:$4 sm:$0xff] (!%p332_p10)   ;;  %v988_v3 = vld [vmem:[%s1263_s0 + $0x10] ss:$8 sps:$4 sm:$0xff] (!%p332_p10)  }
  0x3b   : > { %s1178_s9 = scalar_lea.vmem (!%p332_p10), [#allocation2], %s819_s4  ;;  %p379_p11 = scmp.lt.s32.totalorder (!%p332_p10), %s821_s20, 15  ;;  %v424_v5 = vshrl.u32 (!%p332_p10), %v423_v4, 7 }
  0x3c   : > { %v937_v34 = vld [vmem:[%s1178_s9 + $0x4] ss:$8 sps:$4 sm:$0xff] (!%p332_p10)   ;;  %v939_v35 = vld [vmem:[%s1178_s9] ss:$8 sps:$4 sm:$0xff] (!%p332_p10)   ;;  %v940_v36 = vld [vmem:[%s1178_s9 + $0x14] ss:$8 sps:$4 sm:$0xff] (!%p332_p10)  }
  0x3d   : > { %613 = vmatprep.subr.bf16.mxu0 (!%p332_p10), %v937_v34  ;;  %865 = vmatprep.subr.bf16.mxu1 (!%p332_p10), %v937_v34  ;;  %v942_v37 = vld [vmem:[%s1178_s9 + $0x10] ss:$8 sps:$4 sm:$0xff] (!%p332_p10)   ;;  %v943_v38 = vld [vmem:[%s1178_s9 + $0x24] ss:$8 sps:$4 sm:$0xff] (!%p332_p10)   ;;  %v945_v39 = vld [vmem:[%s1178_s9 + $0x20] ss:$8 sps:$4 sm:$0xff] (!%p332_p10)  }
  0x3e   : > { %614 = vmatpush1.bf16.msra.mxu0 (!%p332_p10), %v939_v35  ;;  %881 = vmatpush1.bf16.msra.mxu1 (!%p332_p10), %v939_v35  ;;  %v946_v40 = vld [vmem:[%s1178_s9 + $0x34] ss:$8 sps:$4 sm:$0xff] (!%p332_p10)   ;;  %v948_v41 = vld [vmem:[%s1178_s9 + $0x30] ss:$8 sps:$4 sm:$0xff] (!%p332_p10)   ;;  %v949_v42 = vld [vmem:[%s1178_s9 + $0x44] ss:$8 sps:$4 sm:$0xff] (!%p332_p10)  }
  0x3f   : > { %615 = vmatprep.subr.bf16.mxu0 (!%p332_p10), %v940_v36  ;;  %866 = vmatprep.subr.bf16.mxu1 (!%p332_p10), %v940_v36  ;;  %v951_v43 = vld [vmem:[%s1178_s9 + $0x40] ss:$8 sps:$4 sm:$0xff] (!%p332_p10)   ;;  %v952_v44 = vld [vmem:[%s1178_s9 + $0x54] ss:$8 sps:$4 sm:$0xff] (!%p332_p10)   ;;  %v954_v45 = vld [vmem:[%s1178_s9 + $0x50] ss:$8 sps:$4 sm:$0xff] (!%p332_p10)  }
  0x40   : > { %v955_v46 = vld [vmem:[%s1178_s9 + $0x64] ss:$8 sps:$4 sm:$0xff] (!%p332_p10)   ;;  %v957_v47 = vld [vmem:[%s1178_s9 + $0x60] ss:$8 sps:$4 sm:$0xff] (!%p332_p10)   ;;  %v958_v48 = vld [vmem:[%s1178_s9 + $0x74] ss:$8 sps:$4 sm:$0xff] (!%p332_p10)  }
  0x41   : > { %v960_v49 = vld [vmem:[%s1178_s9 + $0x70] ss:$8 sps:$4 sm:$0xff]   ;;  %v961_v50 = vld [vmem:[%s1178_s9 + $0x84] ss:$8 sps:$4 sm:$0xff]   ;;  %v963_v51 = vld [vmem:[%s1178_s9 + $0x80] ss:$8 sps:$4 sm:$0xff]  }
  0x42   : > { %616 = vmatpush1.bf16.msra.mxu0 %v942_v37  ;;  %882 = vmatpush1.bf16.msra.mxu1 %v942_v37  ;;  %v964_v52 = vld [vmem:[%s1178_s9 + $0x94] ss:$8 sps:$4 sm:$0xff]   ;;  %v966_v53 = vld [vmem:[%s1178_s9 + $0x90] ss:$8 sps:$4 sm:$0xff]   ;;  %v967_v54 = vld [vmem:[%s1178_s9 + $0xa4] ss:$8 sps:$4 sm:$0xff]  }
  0x43   : > { %617 = vmatprep.subr.bf16.mxu0 %v943_v38  ;;  %867 = vmatprep.subr.bf16.mxu1 %v943_v38  ;;  %v969_v55 = vld [vmem:[%s1178_s9 + $0xa0] ss:$8 sps:$4 sm:$0xff]   ;;  %v970_v56 = vld [vmem:[%s1178_s9 + $0xb4] ss:$8 sps:$4 sm:$0xff]   ;;  %v972_v57 = vld [vmem:[%s1178_s9 + $0xb0] ss:$8 sps:$4 sm:$0xff]  }
  0x44   : > { %v973_v58 = vld [vmem:[%s1178_s9 + $0xc4] ss:$8 sps:$4 sm:$0xff]   ;;  %v975_v59 = vld [vmem:[%s1178_s9 + $0xc0] ss:$8 sps:$4 sm:$0xff]   ;;  %v976_v60 = vld [vmem:[%s1178_s9 + $0xd4] ss:$8 sps:$4 sm:$0xff]  }
  0x45   : > { %v978_v61 = vld [vmem:[%s1178_s9 + $0xd0] ss:$8 sps:$4 sm:$0xff]   ;;  %v979_v62 = vld [vmem:[%s1178_s9 + $0xe4] ss:$8 sps:$4 sm:$0xff]   ;;  %v981_v63 = vld [vmem:[%s1178_s9 + $0xe0] ss:$8 sps:$4 sm:$0xff]  }
  0x46   : > { %618 = vmatpush1.bf16.msra.mxu0 %v945_v39  ;;  %883 = vmatpush1.bf16.msra.mxu1 %v945_v39  ;;  %v982_v0 = vld [vmem:[%s1178_s9 + $0xf4] ss:$8 sps:$4 sm:$0xff]   ;;  %v984_v1 = vld [vmem:[%s1178_s9 + $0xf0] ss:$8 sps:$4 sm:$0xff]   ;;  %s1275_s20 = smov (!%p379_p11, %s821_s20), 15  ;;  %v425_v6 = vsub.s32 0, %v424_v5 }
  0x47   : > { %619 = vmatprep.subr.bf16.mxu0 %v946_v40  ;;  %868 = vmatprep.subr.bf16.mxu1 %v946_v40  ;;  %s381_s25 = scalar_lea.vmem %s1265_s2, %s1275_s20  ;;  %v429_v8 = vsub.s32 1, %v424_v5  ;;  %s820_s26 = sshll.u32 %s338_s30, 6 }
  0x48   : > { %v421_v7 = vld [vmem:[%s381_s25] sm:$0x3]  ;;  %s1224_s27 = scalar_lea.vmem [#allocation3], %s820_s26  ;;  %s864_s12 = sshll.u32 (%p1086_p6), %s1021_s14, 4 }
  0x49   : > { %v426_v9 = vrot.slane %v421_v7, %v425_v6  ;;  %v430_v10 = vrot.slane %v421_v7, %v429_v8  ;;  %s686_s30 = scalar_lea.vmem (%p1086_p6), %s1266_s3, %s864_s12 }
  0x4a   : > { %620 = vmatpush1.bf16.msra.mxu0 %v948_v41  ;;  %884 = vmatpush1.bf16.msra.mxu1 %v948_v41 }
  0x4b   : > { %621 = vmatprep.subr.bf16.mxu0 %v949_v42  ;;  %869 = vmatprep.subr.bf16.mxu1 %v949_v42 }
  0x4e   : > { %622 = vmatpush1.bf16.msra.mxu0 %v951_v43  ;;  %885 = vmatpush1.bf16.msra.mxu1 %v951_v43 }
  0x4f   : > { %623 = vmatprep.subr.bf16.mxu0 %v952_v44  ;;  %870 = vmatprep.subr.bf16.mxu1 %v952_v44 }
  0x52   : > { %624 = vmatpush1.bf16.msra.mxu0 %v954_v45  ;;  %886 = vmatpush1.bf16.msra.mxu1 %v954_v45 }
  0x53   : > { %625 = vmatprep.subr.bf16.mxu0 %v955_v46  ;;  %871 = vmatprep.subr.bf16.mxu1 %v955_v46 }
  0x56   : > { %626 = vmatpush1.bf16.msra.mxu0 %v957_v47  ;;  %887 = vmatpush1.bf16.msra.mxu1 %v957_v47 }
  0x57   : > { %627 = vmatprep.subr.bf16.mxu0 %v958_v48  ;;  %872 = vmatprep.subr.bf16.mxu1 %v958_v48 }
  0x5a   : > { %628 = vmatpush1.bf16.msra.mxu0 %v960_v49  ;;  %888 = vmatpush1.bf16.msra.mxu1 %v960_v49 }
  0x5b   : > { %629 = vmatprep.subr.bf16.mxu0 %v961_v50  ;;  %873 = vmatprep.subr.bf16.mxu1 %v961_v50 }
  0x5e   : > { %630 = vmatpush1.bf16.msra.mxu0 %v963_v51  ;;  %889 = vmatpush1.bf16.msra.mxu1 %v963_v51 }
  0x5f   : > { %631 = vmatprep.subr.bf16.mxu0 %v964_v52  ;;  %874 = vmatprep.subr.bf16.mxu1 %v964_v52 }
  0x62   : > { %632 = vmatpush1.bf16.msra.mxu0 %v966_v53  ;;  %890 = vmatpush1.bf16.msra.mxu1 %v966_v53 }
  0x63   : > { %633 = vmatprep.subr.bf16.mxu0 %v967_v54  ;;  %875 = vmatprep.subr.bf16.mxu1 %v967_v54 }
  0x66   : > { %634 = vmatpush1.bf16.msra.mxu0 %v969_v55  ;;  %891 = vmatpush1.bf16.msra.mxu1 %v969_v55 }
  0x67   : > { %635 = vmatprep.subr.bf16.mxu0 %v970_v56  ;;  %876 = vmatprep.subr.bf16.mxu1 %v970_v56 }
  0x6a   : > { %636 = vmatpush1.bf16.msra.mxu0 %v972_v57  ;;  %892 = vmatpush1.bf16.msra.mxu1 %v972_v57 }
  0x6b   : > { %637 = vmatprep.subr.bf16.mxu0 %v973_v58  ;;  %877 = vmatprep.subr.bf16.mxu1 %v973_v58 }
  0x6e   : > { %638 = vmatpush1.bf16.msra.mxu0 %v975_v59  ;;  %893 = vmatpush1.bf16.msra.mxu1 %v975_v59 }
  0x6f   : > { %639 = vmatprep.subr.bf16.mxu0 %v976_v60  ;;  %878 = vmatprep.subr.bf16.mxu1 %v976_v60 }
  0x72   : > { %640 = vmatpush1.bf16.msra.mxu0 %v978_v61  ;;  %894 = vmatpush1.bf16.msra.mxu1 %v978_v61 }
  0x73   : > { %641 = vmatprep.subr.bf16.mxu0 %v979_v62  ;;  %879 = vmatprep.subr.bf16.mxu1 %v979_v62 }
  0x76   : > { %642 = vmatpush1.bf16.msra.mxu0 %v981_v63  ;;  %895 = vmatpush1.bf16.msra.mxu1 %v981_v63 }
  0x77   : > { %643 = vmatprep.subr.bf16.mxu0 %v982_v0  ;;  %880 = vmatprep.subr.bf16.mxu1 %v982_v0 }
  0x7a   : > { %644 = vmatpush1.bf16.msra.mxu0 %v984_v1  ;;  %896 = vmatpush1.bf16.msra.mxu1 %v984_v1 }
  0x7d   : > { %646 = vmatmul.mubr.bf16.vlgmr.msra.gmra.mrb[0].mxu0 %v985_v2  ;;  %656 = vmatmul.mubr.bf16.vlgmr.msra.gmra.mrb[0].mxu1 %v988_v3 }
 0x150   : > { %v647_v11 = vpop.f32.mrb[0].mxu0  ;;  %v657_v12 = vpop.f32.mrb[0].mxu1  ;;  %680 = sbr.rel (!%p1086_p6) target bundleno = 352 (0x160), region = 74 }
 0x151   : > { %v648_v13 = vadd.f32 %v647_v11, %v426_v9  ;;  %v658_v14 = vadd.f32 %v657_v12, %v426_v9  ;;  %v649_v15 = vpop.f32.mrb[1].mxu0  ;;  %v659_v16 = vpop.f32.mrb[1].mxu1 }
 0x152   : > { %v650_v17 = vadd.f32 %v649_v15, %v430_v10  ;;  %v660_v18 = vadd.f32 %v659_v16, %v430_v10  ;;  %v651_v19 = vpop.f32.mrb[2].mxu0  ;;  %v661_v20 = vpop.f32.mrb[2].mxu1 }
 0x153   : > { %666 = vst [vmem:[%s1224_s27] sm:$0xff] %v648_v13  ;;  %670 = vst [vmem:[%s1224_s27 + $0x20] sm:$0xff] %v658_v14  ;;  %v652_v21 = vadd.f32 %v651_v19, %v426_v9  ;;  %v662_v22 = vadd.f32 %v661_v20, %v426_v9  ;;  %v653_v23 = vpop.f32.mrb[3].mxu0  ;;  %v663_v24 = vpop.f32.mrb[3].mxu1 }
 0x154   : > { %667 = vst [vmem:[%s1224_s27 + $0x8] sm:$0xff] %v650_v17  ;;  %671 = vst [vmem:[%s1224_s27 + $0x28] sm:$0xff] %v660_v18  ;;  %v654_v25 = vadd.f32 %v653_v23, %v430_v10  ;;  %v664_v26 = vadd.f32 %v663_v24, %v430_v10 }
 0x155   : > { %668 = vst [vmem:[%s1224_s27 + $0x10] sm:$0xff] %v652_v21  ;;  %672 = vst [vmem:[%s1224_s27 + $0x30] sm:$0xff] %v662_v22 }
 0x156   : > { %669 = vst [vmem:[%s1224_s27 + $0x18] sm:$0xff] %v654_v25  ;;  %673 = vst [vmem:[%s1224_s27 + $0x38] sm:$0xff] %v664_v26 }
 0x15a   : > { %v699_v27 = vld [vmem:[%s1224_s27] sm:$0xff] }
 0x15b   : > { %v701_v28 = vld [vmem:[%s1224_s27 + $0x8] sm:$0xff]  ;;  %v707_v31 = vld [vmem:[%s1224_s27 + $0x20] sm:$0xff]  ;;  %700 = vst [vmem:[%s686_s30] sm:$0xff] %v699_v27 }
 0x15c   : > { %v703_v29 = vld [vmem:[%s1224_s27 + $0x10] sm:$0xff]  ;;  %v709_v32 = vld [vmem:[%s1224_s27 + $0x28] sm:$0xff]  ;;  %702 = vst [vmem:[%s686_s30 + $0x8] sm:$0xff] %v701_v28  ;;  %708 = vst [vmem:[%s686_s30 + $0x100] sm:$0xff] %v707_v31 }
 0x15d   : > { %v705_v30 = vld [vmem:[%s1224_s27 + $0x18] sm:$0xff]  ;;  %704 = vst [vmem:[%s686_s30 + $0x80] sm:$0xff] %v703_v29  ;;  %710 = vst [vmem:[%s686_s30 + $0x108] sm:$0xff] %v709_v32  ;;  %v711_v33 = vld [vmem:[%s1224_s27 + $0x30] sm:$0xff] }
 0x15e   : > { %706 = vst [vmem:[%s686_s30 + $0x88] sm:$0xff] %v705_v30  ;;  %v713_v34 = vld [vmem:[%s1224_s27 + $0x38] sm:$0xff]  ;;  %712 = vst [vmem:[%s686_s30 + $0x180] sm:$0xff] %v711_v33 }
 0x15f   : > { %714 = vst [vmem:[%s686_s30 + $0x188] sm:$0xff] %v713_v34 }
 0x160 PF: > { %s13_s16 = sadd.s32 1, %s1029_s16   ;;  %s1268_s12 = smov %s1017_s13 }
 0x161   : > { %p10_p12 = scmp.ge.s32.totalorder %s13_s16, 10   ;;  %s1269_s13 = smov %s1091_s22 }
 0x162   : > { %s1270_s14 = smov %s1025_s15  ;;  %s1271_s15 = smov %s1273_s17 }
 0x163   :  { %12 = sbr.rel (!%p10_p12) target bundleno = 3 (0x3), region = 134 }

// kernel: vae_forward.17
= control target key start
LH: loop header
LB: loop body
LE: loop exit
PB: predicated region body
PF: predicated region fallthrough
CT: control target
= control target key end

     0   :  { %s4700_s12 = smov 0   ;;  %s4702_s13 = smov 0   ;;  %s5704_s0 = inlined_call_operand.vmem [shape: bf16[16,2304], index: 0, kind: input, shape index: {}]   ;;  %s5705_s1 = inlined_call_operand.vmem [shape: bf16[2304,2304], index: 1, kind: input, shape index: {}]   ;;  %s5706_s2 = inlined_call_operand.vmem [shape: f32[1,2304], index: 2, kind: input, shape index: {}]   ;;  %s5707_s3 = inlined_call_operand.vmem [shape: f32[16,2304], index: 3, kind: output, shape index: {}]  }
   0x1   :  { %s4704_s14 = smov 0   ;;  %s4706_s15 = smov 0  }
   0x2   :  { %s4708_s16 = smov 0  }
   0x3 LB: > { %s22_s17 = sadd.s32 1, %s4674_s15  ;;  %s3780_s18 = sadd.s32 4294967295, %s4678_s16   ;;  %s4678_s16 = sphi %s4708_s16, %s13_s16   ;;  %s4674_s15 = sphi %s4706_s15, %s5712_s15   ;;  %s4670_s14 = sphi %s4704_s14, %s5711_s14   ;;  %s4666_s13 = sphi %s4702_s13, %s5710_s13   ;;  %s4662_s12 = sphi %s4700_s12, %s5709_s12  }
   0x4   : > { %p23_p0 = scmp.ge.s32.totalorder %s22_s17, 9  ;;  %p65_p1 = scmp.ne.s32.totalorder %s4666_s13, %s4662_s12 }
   0x5   : > { %p66_p2 = scmp.eq.s32.totalorder %s4678_s16, 0  ;;  %p123_p4 = scmp.eq.s32.totalorder %s3780_s18, 8 }
   0x6   : > { %s5714_s17 = smov (%p23_p0, %s22_s17), 0  ;;  %s58_s20 = sadd.s32 1, %s4666_s13 }
   0x7   : > { %p67_p3 = por %p66_p2, %p65_p1  ;;  %s55_s19 = ssub.s32 %s4674_s15, %s5714_s17 }
   0x8   : > { %p56_p5 = scmp.eq.s32.totalorder %s55_s19, 0  ;;  %p4735_p6 = por %p123_p4, %p65_p1 }
   0x9   : > { %p3784_p7 = scmp.ge.s32.totalorder %s4678_s16, 9 }
   0xa   : > { %s4740_s22 = scalar_select %p56_p5, %s4666_s13, %s58_s20  }
   0xb   : > { %155 = sbr.rel (%p3784_p7) target bundleno = 167 (0xa7), region = 20 }
  0x12   : > { %158 = sbr.rel (!%p67_p3) target bundleno = 167 (0xa7), region = 24  ;;  %s160_s23 = sand.u32 (%p67_p3), 1, %s4666_s13  }
  0x13   : > { %s4101_s24 = sshll.u32 (%p67_p3), %s4674_s15, 3  ;;  %s4139_s25 = smul.u32 (%p67_p3), 2304, %s160_s23 }
  0x14   : > { %s4748_s28 = scalar_lea.vmem (%p67_p3), %s5705_s1, %s4101_s24 }
  0x15   : > { %v767_v0 = vld [vmem:[%s4748_s28] sm:$0xff] (%p67_p3)  ;;  %v769_v1 = vld [vmem:[%s4748_s28 + $0x48] sm:$0xff] (%p67_p3)  ;;  %v771_v2 = vld [vmem:[%s4748_s28 + $0x90] sm:$0xff] (%p67_p3)  ;;  %s4756_s29 = scalar_lea.vmem (%p67_p3), [#allocation2], %s4139_s25 }
  0x16   : > { %v773_v3 = vld [vmem:[%s4748_s28 + $0xd8] sm:$0xff] (%p67_p3)  ;;  %v775_v4 = vld [vmem:[%s4748_s28 + $0x120] sm:$0xff] (%p67_p3)  ;;  %v777_v5 = vld [vmem:[%s4748_s28 + $0x168] sm:$0xff] (%p67_p3)  ;;  %768 = vst [vmem:[%s4756_s29] sm:$0xff] (%p67_p3), %v767_v0 }
  0x17   : > { %770 = vst [vmem:[%s4756_s29 + $0x8] sm:$0xff] (%p67_p3), %v769_v1  ;;  %772 = vst [vmem:[%s4756_s29 + $0x10] sm:$0xff] (%p67_p3), %v771_v2  ;;  %v779_v6 = vld [vmem:[%s4748_s28 + $0x1b0] sm:$0xff] (%p67_p3)  ;;  %v781_v7 = vld [vmem:[%s4748_s28 + $0x1f8] sm:$0xff] (%p67_p3) }
  0x18   : > { %774 = vst [vmem:[%s4756_s29 + $0x18] sm:$0xff] (%p67_p3), %v773_v3  ;;  %776 = vst [vmem:[%s4756_s29 + $0x20] sm:$0xff] (%p67_p3), %v775_v4  ;;  %v783_v8 = vld [vmem:[%s4748_s28 + $0x240] sm:$0xff] (%p67_p3)  ;;  %v785_v9 = vld [vmem:[%s4748_s28 + $0x288] sm:$0xff] (%p67_p3) }
  0x19   : > { %778 = vst [vmem:[%s4756_s29 + $0x28] sm:$0xff] %v777_v5  ;;  %780 = vst [vmem:[%s4756_s29 + $0x30] sm:$0xff] %v779_v6  ;;  %v787_v10 = vld [vmem:[%s4748_s28 + $0x2d0] sm:$0xff]  ;;  %v789_v11 = vld [vmem:[%s4748_s28 + $0x318] sm:$0xff] }
  0x1a   : > { %782 = vst [vmem:[%s4756_s29 + $0x38] sm:$0xff] %v781_v7  ;;  %784 = vst [vmem:[%s4756_s29 + $0x40] sm:$0xff] %v783_v8  ;;  %v791_v12 = vld [vmem:[%s4748_s28 + $0x360] sm:$0xff]  ;;  %v793_v13 = vld [vmem:[%s4748_s28 + $0x3a8] sm:$0xff] }
  0x1b   : > { %786 = vst [vmem:[%s4756_s29 + $0x48] sm:$0xff] %v785_v9  ;;  %788 = vst [vmem:[%s4756_s29 + $0x50] sm:$0xff] %v787_v10  ;;  %v795_v14 = vld [vmem:[%s4748_s28 + $0x3f0] sm:$0xff]  ;;  %v797_v15 = vld [vmem:[%s4748_s28 + $0x438] sm:$0xff] }
  0x1c   : > { %790 = vst [vmem:[%s4756_s29 + $0x58] sm:$0xff] %v789_v11  ;;  %792 = vst [vmem:[%s4756_s29 + $0x60] sm:$0xff] %v791_v12  ;;  %v799_v16 = vld [vmem:[%s4748_s28 + $0x480] sm:$0xff]  ;;  %v801_v17 = vld [vmem:[%s4748_s28 + $0x4c8] sm:$0xff] }
  0x1d   : > { %794 = vst [vmem:[%s4756_s29 + $0x68] sm:$0xff] %v793_v13  ;;  %796 = vst [vmem:[%s4756_s29 + $0x70] sm:$0xff] %v795_v14  ;;  %v803_v18 = vld [vmem:[%s4748_s28 + $0x510] sm:$0xff]  ;;  %v805_v19 = vld [vmem:[%s4748_s28 + $0x558] sm:$0xff] }
  0x1e   : > { %798 = vst [vmem:[%s4756_s29 + $0x78] sm:$0xff] %v797_v15  ;;  %800 = vst [vmem:[%s4756_s29 + $0x80] sm:$0xff] %v799_v16  ;;  %v807_v20 = vld [vmem:[%s4748_s28 + $0x5a0] sm:$0xff]  ;;  %v809_v21 = vld [vmem:[%s4748_s28 + $0x5e8] sm:$0xff] }
  0x1f   : > { %802 = vst [vmem:[%s4756_s29 + $0x88] sm:$0xff] %v801_v17  ;;  %804 = vst [vmem:[%s4756_s29 + $0x90] sm:$0xff] %v803_v18  ;;  %v811_v22 = vld [vmem:[%s4748_s28 + $0x630] sm:$0xff]  ;;  %v813_v23 = vld [vmem:[%s4748_s28 + $0x678] sm:$0xff] }
  0x20   : > { %806 = vst [vmem:[%s4756_s29 + $0x98] sm:$0xff] %v805_v19  ;;  %808 = vst [vmem:[%s4756_s29 + $0xa0] sm:$0xff] %v807_v20  ;;  %v815_v24 = vld [vmem:[%s4748_s28 + $0x6c0] sm:$0xff]  ;;  %v817_v25 = vld [vmem:[%s4748_s28 + $0x708] sm:$0xff] }
  0x21   : > { %810 = vst [vmem:[%s4756_s29 + $0xa8] sm:$0xff] %v809_v21  ;;  %812 = vst [vmem:[%s4756_s29 + $0xb0] sm:$0xff] %v811_v22  ;;  %v819_v26 = vld [vmem:[%s4748_s28 + $0x750] sm:$0xff]  ;;  %v821_v27 = vld [vmem:[%s4748_s28 + $0x798] sm:$0xff] }
  0x22   : > { %814 = vst [vmem:[%s4756_s29 + $0xb8] sm:$0xff] %v813_v23  ;;  %816 = vst [vmem:[%s4756_s29 + $0xc0] sm:$0xff] %v815_v24  ;;  %v823_v28 = vld [vmem:[%s4748_s28 + $0x7e0] sm:$0xff]  ;;  %v825_v29 = vld [vmem:[%s4748_s28 + $0x828] sm:$0xff] }
  0x23   : > { %818 = vst [vmem:[%s4756_s29 + $0xc8] sm:$0xff] %v817_v25  ;;  %820 = vst [vmem:[%s4756_s29 + $0xd0] sm:$0xff] %v819_v26  ;;  %v827_v30 = vld [vmem:[%s4748_s28 + $0x870] sm:$0xff]  ;;  %v829_v31 = vld [vmem:[%s4748_s28 + $0x8b8] sm:$0xff] }
  0x24   : > { %822 = vst [vmem:[%s4756_s29 + $0xd8] sm:$0xff] %v821_v27  ;;  %824 = vst [vmem:[%s4756_s29 + $0xe0] sm:$0xff] %v823_v28  ;;  %v831_v32 = vld [vmem:[%s4748_s28 + $0x900] sm:$0xff]  ;;  %v833_v33 = vld [vmem:[%s4748_s28 + $0x948] sm:$0xff] }
  0x25   : > { %826 = vst [vmem:[%s4756_s29 + $0xe8] sm:$0xff] %v825_v29  ;;  %828 = vst [vmem:[%s4756_s29 + $0xf0] sm:$0xff] %v827_v30  ;;  %v835_v34 = vld [vmem:[%s4748_s28 + $0x990] sm:$0xff]  ;;  %v837_v35 = vld [vmem:[%s4748_s28 + $0x9d8] sm:$0xff] }
  0x26   : > { %830 = vst [vmem:[%s4756_s29 + $0xf8] sm:$0xff] %v829_v31  ;;  %832 = vst [vmem:[%s4756_s29 + $0x100] sm:$0xff] %v831_v32  ;;  %v839_v36 = vld [vmem:[%s4748_s28 + $0xa20] sm:$0xff]  ;;  %v841_v37 = vld [vmem:[%s4748_s28 + $0xa68] sm:$0xff] }
  0x27   : > { %834 = vst [vmem:[%s4756_s29 + $0x108] sm:$0xff] %v833_v33  ;;  %836 = vst [vmem:[%s4756_s29 + $0x110] sm:$0xff] %v835_v34  ;;  %v843_v38 = vld [vmem:[%s4748_s28 + $0xab0] sm:$0xff]  ;;  %v845_v39 = vld [vmem:[%s4748_s28 + $0xaf8] sm:$0xff] }
  0x28   : > { %838 = vst [vmem:[%s4756_s29 + $0x118] sm:$0xff] %v837_v35  ;;  %840 = vst [vmem:[%s4756_s29 + $0x120] sm:$0xff] %v839_v36  ;;  %v847_v40 = vld [vmem:[%s4748_s28 + $0xb40] sm:$0xff]  ;;  %v849_v41 = vld [vmem:[%s4748_s28 + $0xb88] sm:$0xff] }
  0x29   : > { %842 = vst [vmem:[%s4756_s29 + $0x128] sm:$0xff] %v841_v37  ;;  %844 = vst [vmem:[%s4756_s29 + $0x130] sm:$0xff] %v843_v38  ;;  %v851_v42 = vld [vmem:[%s4748_s28 + $0xbd0] sm:$0xff]  ;;  %v853_v43 = vld [vmem:[%s4748_s28 + $0xc18] sm:$0xff] }
  0x2a   : > { %846 = vst [vmem:[%s4756_s29 + $0x138] sm:$0xff] %v845_v39  ;;  %848 = vst [vmem:[%s4756_s29 + $0x140] sm:$0xff] %v847_v40  ;;  %v855_v44 = vld [vmem:[%s4748_s28 + $0xc60] sm:$0xff]  ;;  %v857_v45 = vld [vmem:[%s4748_s28 + $0xca8] sm:$0xff] }
  0x2b   : > { %850 = vst [vmem:[%s4756_s29 + $0x148] sm:$0xff] %v849_v41  ;;  %852 = vst [vmem:[%s4756_s29 + $0x150] sm:$0xff] %v851_v42  ;;  %v859_v46 = vld [vmem:[%s4748_s28 + $0xcf0] sm:$0xff]  ;;  %v861_v47 = vld [vmem:[%s4748_s28 + $0xd38] sm:$0xff] }
  0x2c   : > { %854 = vst [vmem:[%s4756_s29 + $0x158] sm:$0xff] %v853_v43  ;;  %856 = vst [vmem:[%s4756_s29 + $0x160] sm:$0xff] %v855_v44  ;;  %v863_v48 = vld [vmem:[%s4748_s28 + $0xd80] sm:$0xff]  ;;  %v865_v49 = vld [vmem:[%s4748_s28 + $0xdc8] sm:$0xff] }
  0x2d   : > { %858 = vst [vmem:[%s4756_s29 + $0x168] sm:$0xff] %v857_v45  ;;  %860 = vst [vmem:[%s4756_s29 + $0x170] sm:$0xff] %v859_v46  ;;  %v867_v50 = vld [vmem:[%s4748_s28 + $0xe10] sm:$0xff]  ;;  %v869_v51 = vld [vmem:[%s4748_s28 + $0xe58] sm:$0xff] }
  0x2e   : > { %862 = vst [vmem:[%s4756_s29 + $0x178] sm:$0xff] %v861_v47  ;;  %864 = vst [vmem:[%s4756_s29 + $0x180] sm:$0xff] %v863_v48  ;;  %v871_v52 = vld [vmem:[%s4748_s28 + $0xea0] sm:$0xff]  ;;  %v873_v53 = vld [vmem:[%s4748_s28 + $0xee8] sm:$0xff] }
  0x2f   : > { %866 = vst [vmem:[%s4756_s29 + $0x188] sm:$0xff] %v865_v49  ;;  %868 = vst [vmem:[%s4756_s29 + $0x190] sm:$0xff] %v867_v50  ;;  %v875_v54 = vld [vmem:[%s4748_s28 + $0xf30] sm:$0xff]  ;;  %v877_v55 = vld [vmem:[%s4748_s28 + $0xf78] sm:$0xff] }
  0x30   : > { %870 = vst [vmem:[%s4756_s29 + $0x198] sm:$0xff] %v869_v51  ;;  %872 = vst [vmem:[%s4756_s29 + $0x1a0] sm:$0xff] %v871_v52  ;;  %v879_v56 = vld [vmem:[%s4748_s28 + $0xfc0] sm:$0xff]  ;;  %v881_v57 = vld [vmem:[%s4748_s28 + $0x1008] sm:$0xff] }
  0x31   : > { %874 = vst [vmem:[%s4756_s29 + $0x1a8] sm:$0xff] %v873_v53  ;;  %876 = vst [vmem:[%s4756_s29 + $0x1b0] sm:$0xff] %v875_v54  ;;  %v883_v58 = vld [vmem:[%s4748_s28 + $0x1050] sm:$0xff]  ;;  %v885_v59 = vld [vmem:[%s4748_s28 + $0x1098] sm:$0xff] }
  0x32   : > { %878 = vst [vmem:[%s4756_s29 + $0x1b8] sm:$0xff] %v877_v55  ;;  %880 = vst [vmem:[%s4756_s29 + $0x1c0] sm:$0xff] %v879_v56  ;;  %v887_v60 = vld [vmem:[%s4748_s28 + $0x10e0] sm:$0xff]  ;;  %v889_v61 = vld [vmem:[%s4748_s28 + $0x1128] sm:$0xff] }
  0x33   : > { %882 = vst [vmem:[%s4756_s29 + $0x1c8] sm:$0xff] %v881_v57  ;;  %884 = vst [vmem:[%s4756_s29 + $0x1d0] sm:$0xff] %v883_v58  ;;  %v891_v62 = vld [vmem:[%s4748_s28 + $0x1170] sm:$0xff]  ;;  %v893_v63 = vld [vmem:[%s4748_s28 + $0x11b8] sm:$0xff] }
  0x34   : > { %886 = vst [vmem:[%s4756_s29 + $0x1d8] sm:$0xff] %v885_v59  ;;  %888 = vst [vmem:[%s4756_s29 + $0x1e0] sm:$0xff] %v887_v60  ;;  %v895_v0 = vld [vmem:[%s4748_s28 + $0x1200] sm:$0xff]  ;;  %v897_v1 = vld [vmem:[%s4748_s28 + $0x1248] sm:$0xff] }
  0x35   : > { %890 = vst [vmem:[%s4756_s29 + $0x1e8] sm:$0xff] %v889_v61  ;;  %892 = vst [vmem:[%s4756_s29 + $0x1f0] sm:$0xff] %v891_v62  ;;  %v899_v2 = vld [vmem:[%s4748_s28 + $0x1290] sm:$0xff]  ;;  %v901_v3 = vld [vmem:[%s4748_s28 + $0x12d8] sm:$0xff] }
  0x36   : > { %894 = vst [vmem:[%s4756_s29 + $0x1f8] sm:$0xff] %v893_v63  ;;  %896 = vst [vmem:[%s4756_s29 + $0x200] sm:$0xff] %v895_v0  ;;  %v903_v4 = vld [vmem:[%s4748_s28 + $0x1320] sm:$0xff]  ;;  %v905_v5 = vld [vmem:[%s4748_s28 + $0x1368] sm:$0xff] }
  0x37   : > { %898 = vst [vmem:[%s4756_s29 + $0x208] sm:$0xff] %v897_v1  ;;  %900 = vst [vmem:[%s4756_s29 + $0x210] sm:$0xff] %v899_v2  ;;  %v907_v6 = vld [vmem:[%s4748_s28 + $0x13b0] sm:$0xff]  ;;  %v909_v7 = vld [vmem:[%s4748_s28 + $0x13f8] sm:$0xff] }
  0x38   : > { %902 = vst [vmem:[%s4756_s29 + $0x218] sm:$0xff] %v901_v3  ;;  %904 = vst [vmem:[%s4756_s29 + $0x220] sm:$0xff] %v903_v4  ;;  %v911_v8 = vld [vmem:[%s4748_s28 + $0x1440] sm:$0xff]  ;;  %v913_v9 = vld [vmem:[%s4748_s28 + $0x1488] sm:$0xff] }
  0x39   : > { %906 = vst [vmem:[%s4756_s29 + $0x228] sm:$0xff] %v905_v5  ;;  %908 = vst [vmem:[%s4756_s29 + $0x230] sm:$0xff] %v907_v6  ;;  %v915_v10 = vld [vmem:[%s4748_s28 + $0x14d0] sm:$0xff]  ;;  %v917_v11 = vld [vmem:[%s4748_s28 + $0x1518] sm:$0xff] }
  0x3a   : > { %910 = vst [vmem:[%s4756_s29 + $0x238] sm:$0xff] %v909_v7  ;;  %912 = vst [vmem:[%s4756_s29 + $0x240] sm:$0xff] %v911_v8  ;;  %v919_v12 = vld [vmem:[%s4748_s28 + $0x1560] sm:$0xff]  ;;  %v921_v13 = vld [vmem:[%s4748_s28 + $0x15a8] sm:$0xff] }
  0x3b   : > { %914 = vst [vmem:[%s4756_s29 + $0x248] sm:$0xff] %v913_v9  ;;  %916 = vst [vmem:[%s4756_s29 + $0x250] sm:$0xff] %v915_v10  ;;  %v923_v14 = vld [vmem:[%s4748_s28 + $0x15f0] sm:$0xff]  ;;  %v925_v15 = vld [vmem:[%s4748_s28 + $0x1638] sm:$0xff] }
  0x3c   : > { %918 = vst [vmem:[%s4756_s29 + $0x258] sm:$0xff] %v917_v11  ;;  %920 = vst [vmem:[%s4756_s29 + $0x260] sm:$0xff] %v919_v12  ;;  %v927_v16 = vld [vmem:[%s4748_s28 + $0x1680] sm:$0xff]  ;;  %v929_v17 = vld [vmem:[%s4748_s28 + $0x16c8] sm:$0xff] }
  0x3d   : > { %922 = vst [vmem:[%s4756_s29 + $0x268] sm:$0xff] %v921_v13  ;;  %924 = vst [vmem:[%s4756_s29 + $0x270] sm:$0xff] %v923_v14  ;;  %v931_v18 = vld [vmem:[%s4748_s28 + $0x1710] sm:$0xff]  ;;  %v933_v19 = vld [vmem:[%s4748_s28 + $0x1758] sm:$0xff] }
  0x3e   : > { %926 = vst [vmem:[%s4756_s29 + $0x278] sm:$0xff] %v925_v15  ;;  %928 = vst [vmem:[%s4756_s29 + $0x280] sm:$0xff] %v927_v16  ;;  %v935_v20 = vld [vmem:[%s4748_s28 + $0x17a0] sm:$0xff]  ;;  %v937_v21 = vld [vmem:[%s4748_s28 + $0x17e8] sm:$0xff] }
  0x3f   : > { %930 = vst [vmem:[%s4756_s29 + $0x288] sm:$0xff] %v929_v17  ;;  %932 = vst [vmem:[%s4756_s29 + $0x290] sm:$0xff] %v931_v18  ;;  %v939_v22 = vld [vmem:[%s4748_s28 + $0x1830] sm:$0xff]  ;;  %v941_v23 = vld [vmem:[%s4748_s28 + $0x1878] sm:$0xff] }
  0x40   : > { %934 = vst [vmem:[%s4756_s29 + $0x298] sm:$0xff] %v933_v19  ;;  %936 = vst [vmem:[%s4756_s29 + $0x2a0] sm:$0xff] %v935_v20  ;;  %v943_v24 = vld [vmem:[%s4748_s28 + $0x18c0] sm:$0xff]  ;;  %v945_v25 = vld [vmem:[%s4748_s28 + $0x1908] sm:$0xff] }
  0x41   : > { %938 = vst [vmem:[%s4756_s29 + $0x2a8] sm:$0xff] %v937_v21  ;;  %940 = vst [vmem:[%s4756_s29 + $0x2b0] sm:$0xff] %v939_v22  ;;  %v947_v26 = vld [vmem:[%s4748_s28 + $0x1950] sm:$0xff]  ;;  %v949_v27 = vld [vmem:[%s4748_s28 + $0x1998] sm:$0xff] }
  0x42   : > { %942 = vst [vmem:[%s4756_s29 + $0x2b8] sm:$0xff] %v941_v23  ;;  %944 = vst [vmem:[%s4756_s29 + $0x2c0] sm:$0xff] %v943_v24  ;;  %v951_v28 = vld [vmem:[%s4748_s28 + $0x19e0] sm:$0xff]  ;;  %v953_v29 = vld [vmem:[%s4748_s28 + $0x1a28] sm:$0xff] }
  0x43   : > { %946 = vst [vmem:[%s4756_s29 + $0x2c8] sm:$0xff] %v945_v25  ;;  %948 = vst [vmem:[%s4756_s29 + $0x2d0] sm:$0xff] %v947_v26  ;;  %v955_v30 = vld [vmem:[%s4748_s28 + $0x1a70] sm:$0xff]  ;;  %v957_v31 = vld [vmem:[%s4748_s28 + $0x1ab8] sm:$0xff] }
  0x44   : > { %950 = vst [vmem:[%s4756_s29 + $0x2d8] sm:$0xff] %v949_v27  ;;  %952 = vst [vmem:[%s4756_s29 + $0x2e0] sm:$0xff] %v951_v28  ;;  %v959_v32 = vld [vmem:[%s4748_s28 + $0x1b00] sm:$0xff]  ;;  %v961_v33 = vld [vmem:[%s4748_s28 + $0x1b48] sm:$0xff] }
  0x45   : > { %954 = vst [vmem:[%s4756_s29 + $0x2e8] sm:$0xff] %v953_v29  ;;  %956 = vst [vmem:[%s4756_s29 + $0x2f0] sm:$0xff] %v955_v30  ;;  %v963_v34 = vld [vmem:[%s4748_s28 + $0x1b90] sm:$0xff]  ;;  %v965_v35 = vld [vmem:[%s4748_s28 + $0x1bd8] sm:$0xff] }
  0x46   : > { %958 = vst [vmem:[%s4756_s29 + $0x2f8] sm:$0xff] %v957_v31  ;;  %960 = vst [vmem:[%s4756_s29 + $0x300] sm:$0xff] %v959_v32  ;;  %v967_v36 = vld [vmem:[%s4748_s28 + $0x1c20] sm:$0xff]  ;;  %v969_v37 = vld [vmem:[%s4748_s28 + $0x1c68] sm:$0xff] }
  0x47   : > { %962 = vst [vmem:[%s4756_s29 + $0x308] sm:$0xff] %v961_v33  ;;  %964 = vst [vmem:[%s4756_s29 + $0x310] sm:$0xff] %v963_v34  ;;  %v971_v38 = vld [vmem:[%s4748_s28 + $0x1cb0] sm:$0xff]  ;;  %v973_v39 = vld [vmem:[%s4748_s28 + $0x1cf8] sm:$0xff] }
  0x48   : > { %966 = vst [vmem:[%s4756_s29 + $0x318] sm:$0xff] %v965_v35  ;;  %968 = vst [vmem:[%s4756_s29 + $0x320] sm:$0xff] %v967_v36  ;;  %v975_v40 = vld [vmem:[%s4748_s28 + $0x1d40] sm:$0xff]  ;;  %v977_v41 = vld [vmem:[%s4748_s28 + $0x1d88] sm:$0xff] }
  0x49   : > { %970 = vst [vmem:[%s4756_s29 + $0x328] sm:$0xff] %v969_v37  ;;  %972 = vst [vmem:[%s4756_s29 + $0x330] sm:$0xff] %v971_v38  ;;  %v979_v42 = vld [vmem:[%s4748_s28 + $0x1dd0] sm:$0xff]  ;;  %v981_v43 = vld [vmem:[%s4748_s28 + $0x1e18] sm:$0xff] }
  0x4a   : > { %974 = vst [vmem:[%s4756_s29 + $0x338] sm:$0xff] %v973_v39  ;;  %976 = vst [vmem:[%s4756_s29 + $0x340] sm:$0xff] %v975_v40  ;;  %v983_v44 = vld [vmem:[%s4748_s28 + $0x1e60] sm:$0xff]  ;;  %v985_v45 = vld [vmem:[%s4748_s28 + $0x1ea8] sm:$0xff] }
  0x4b   : > { %978 = vst [vmem:[%s4756_s29 + $0x348] sm:$0xff] %v977_v41  ;;  %980 = vst [vmem:[%s4756_s29 + $0x350] sm:$0xff] %v979_v42  ;;  %v987_v46 = vld [vmem:[%s4748_s28 + $0x1ef0] sm:$0xff]  ;;  %v989_v47 = vld [vmem:[%s4748_s28 + $0x1f38] sm:$0xff] }
  0x4c   : > { %982 = vst [vmem:[%s4756_s29 + $0x358] sm:$0xff] %v981_v43  ;;  %984 = vst [vmem:[%s4756_s29 + $0x360] sm:$0xff] %v983_v44  ;;  %v991_v48 = vld [vmem:[%s4748_s28 + $0x1f80] sm:$0xff]  ;;  %v993_v49 = vld [vmem:[%s4748_s28 + $0x1fc8] sm:$0xff] }
  0x4d   : > { %986 = vst [vmem:[%s4756_s29 + $0x368] sm:$0xff] %v985_v45  ;;  %988 = vst [vmem:[%s4756_s29 + $0x370] sm:$0xff] %v987_v46  ;;  %v995_v50 = vld [vmem:[%s4748_s28 + $0x2010] sm:$0xff]  ;;  %v997_v51 = vld [vmem:[%s4748_s28 + $0x2058] sm:$0xff] }
  0x4e   : > { %990 = vst [vmem:[%s4756_s29 + $0x378] sm:$0xff] %v989_v47  ;;  %992 = vst [vmem:[%s4756_s29 + $0x380] sm:$0xff] %v991_v48  ;;  %v999_v52 = vld [vmem:[%s4748_s28 + $0x20a0] sm:$0xff]  ;;  %v1001_v53 = vld [vmem:[%s4748_s28 + $0x20e8] sm:$0xff] }
  0x4f   : > { %994 = vst [vmem:[%s4756_s29 + $0x388] sm:$0xff] %v993_v49  ;;  %996 = vst [vmem:[%s4756_s29 + $0x390] sm:$0xff] %v995_v50  ;;  %v1003_v54 = vld [vmem:[%s4748_s28 + $0x2130] sm:$0xff]  ;;  %v1005_v55 = vld [vmem:[%s4748_s28 + $0x2178] sm:$0xff] }
  0x50   : > { %998 = vst [vmem:[%s4756_s29 + $0x398] sm:$0xff] %v997_v51  ;;  %1000 = vst [vmem:[%s4756_s29 + $0x3a0] sm:$0xff] %v999_v52  ;;  %v1007_v56 = vld [vmem:[%s4748_s28 + $0x21c0] sm:$0xff]  ;;  %v1009_v57 = vld [vmem:[%s4748_s28 + $0x2208] sm:$0xff] }
  0x51   : > { %1002 = vst [vmem:[%s4756_s29 + $0x3a8] sm:$0xff] %v1001_v53  ;;  %1004 = vst [vmem:[%s4756_s29 + $0x3b0] sm:$0xff] %v1003_v54  ;;  %v1011_v58 = vld [vmem:[%s4748_s28 + $0x2250] sm:$0xff]  ;;  %v1013_v59 = vld [vmem:[%s4748_s28 + $0x2298] sm:$0xff] }
  0x52   : > { %1006 = vst [vmem:[%s4756_s29 + $0x3b8] sm:$0xff] %v1005_v55  ;;  %1008 = vst [vmem:[%s4756_s29 + $0x3c0] sm:$0xff] %v1007_v56  ;;  %v1015_v60 = vld [vmem:[%s4748_s28 + $0x22e0] sm:$0xff]  ;;  %v1017_v61 = vld [vmem:[%s4748_s28 + $0x2328] sm:$0xff] }
  0x53   : > { %1010 = vst [vmem:[%s4756_s29 + $0x3c8] sm:$0xff] %v1009_v57  ;;  %1012 = vst [vmem:[%s4756_s29 + $0x3d0] sm:$0xff] %v1011_v58  ;;  %v1019_v62 = vld [vmem:[%s4748_s28 + $0x2370] sm:$0xff]  ;;  %v1021_v63 = vld [vmem:[%s4748_s28 + $0x23b8] sm:$0xff] }
  0x54   : > { %1014 = vst [vmem:[%s4756_s29 + $0x3d8] sm:$0xff] %v1013_v59  ;;  %1016 = vst [vmem:[%s4756_s29 + $0x3e0] sm:$0xff] %v1015_v60  ;;  %v1023_v0 = vld [vmem:[%s4748_s28 + $0x2400] sm:$0xff]  ;;  %v1025_v1 = vld [vmem:[%s4748_s28 + $0x2448] sm:$0xff] }
  0x55   : > { %1018 = vst [vmem:[%s4756_s29 + $0x3e8] sm:$0xff] %v1017_v61  ;;  %1020 = vst [vmem:[%s4756_s29 + $0x3f0] sm:$0xff] %v1019_v62  ;;  %v1027_v2 = vld [vmem:[%s4748_s28 + $0x2490] sm:$0xff]  ;;  %v1029_v3 = vld [vmem:[%s4748_s28 + $0x24d8] sm:$0xff] }
  0x56   : > { %1022 = vst [vmem:[%s4756_s29 + $0x3f8] sm:$0xff] %v1021_v63  ;;  %1024 = vst [vmem:[%s4756_s29 + $0x400] sm:$0xff] %v1023_v0  ;;  %v1031_v4 = vld [vmem:[%s4748_s28 + $0x2520] sm:$0xff]  ;;  %v1033_v5 = vld [vmem:[%s4748_s28 + $0x2568] sm:$0xff] }
  0x57   : > { %1026 = vst [vmem:[%s4756_s29 + $0x408] sm:$0xff] %v1025_v1  ;;  %1028 = vst [vmem:[%s4756_s29 + $0x410] sm:$0xff] %v1027_v2  ;;  %v1035_v6 = vld [vmem:[%s4748_s28 + $0x25b0] sm:$0xff]  ;;  %v1037_v7 = vld [vmem:[%s4748_s28 + $0x25f8] sm:$0xff] }
  0x58   : > { %1030 = vst [vmem:[%s4756_s29 + $0x418] sm:$0xff] %v1029_v3  ;;  %1032 = vst [vmem:[%s4756_s29 + $0x420] sm:$0xff] %v1031_v4  ;;  %v1039_v8 = vld [vmem:[%s4748_s28 + $0x2640] sm:$0xff]  ;;  %v1041_v9 = vld [vmem:[%s4748_s28 + $0x2688] sm:$0xff] }
  0x59   : > { %1034 = vst [vmem:[%s4756_s29 + $0x428] sm:$0xff] %v1033_v5  ;;  %1036 = vst [vmem:[%s4756_s29 + $0x430] sm:$0xff] %v1035_v6  ;;  %v1043_v10 = vld [vmem:[%s4748_s28 + $0x26d0] sm:$0xff]  ;;  %v1045_v11 = vld [vmem:[%s4748_s28 + $0x2718] sm:$0xff] }
  0x5a   : > { %1038 = vst [vmem:[%s4756_s29 + $0x438] sm:$0xff] %v1037_v7  ;;  %1040 = vst [vmem:[%s4756_s29 + $0x440] sm:$0xff] %v1039_v8  ;;  %v1047_v12 = vld [vmem:[%s4748_s28 + $0x2760] sm:$0xff]  ;;  %v1049_v13 = vld [vmem:[%s4748_s28 + $0x27a8] sm:$0xff] }
  0x5b   : > { %1042 = vst [vmem:[%s4756_s29 + $0x448] sm:$0xff] %v1041_v9  ;;  %1044 = vst [vmem:[%s4756_s29 + $0x450] sm:$0xff] %v1043_v10  ;;  %v1051_v14 = vld [vmem:[%s4748_s28 + $0x27f0] sm:$0xff]  ;;  %v1053_v15 = vld [vmem:[%s4748_s28 + $0x2838] sm:$0xff] }
  0x5c   : > { %1046 = vst [vmem:[%s4756_s29 + $0x458] sm:$0xff] %v1045_v11  ;;  %1048 = vst [vmem:[%s4756_s29 + $0x460] sm:$0xff] %v1047_v12  ;;  %v1055_v16 = vld [vmem:[%s4748_s28 + $0x2880] sm:$0xff]  ;;  %v1057_v17 = vld [vmem:[%s4748_s28 + $0x28c8] sm:$0xff] }
  0x5d   : > { %1050 = vst [vmem:[%s4756_s29 + $0x468] sm:$0xff] %v1049_v13  ;;  %1052 = vst [vmem:[%s4756_s29 + $0x470] sm:$0xff] %v1051_v14  ;;  %v1059_v18 = vld [vmem:[%s4748_s28 + $0x2910] sm:$0xff]  ;;  %v1061_v19 = vld [vmem:[%s4748_s28 + $0x2958] sm:$0xff] }
  0x5e   : > { %1054 = vst [vmem:[%s4756_s29 + $0x478] sm:$0xff] %v1053_v15  ;;  %1056 = vst [vmem:[%s4756_s29 + $0x480] sm:$0xff] %v1055_v16  ;;  %v1063_v20 = vld [vmem:[%s4748_s28 + $0x29a0] sm:$0xff]  ;;  %v1065_v21 = vld [vmem:[%s4748_s28 + $0x29e8] sm:$0xff] }
  0x5f   : > { %1058 = vst [vmem:[%s4756_s29 + $0x488] sm:$0xff] %v1057_v17  ;;  %1060 = vst [vmem:[%s4756_s29 + $0x490] sm:$0xff] %v1059_v18  ;;  %v1067_v22 = vld [vmem:[%s4748_s28 + $0x2a30] sm:$0xff]  ;;  %v1069_v23 = vld [vmem:[%s4748_s28 + $0x2a78] sm:$0xff] }
  0x60   : > { %1062 = vst [vmem:[%s4756_s29 + $0x498] sm:$0xff] %v1061_v19  ;;  %1064 = vst [vmem:[%s4756_s29 + $0x4a0] sm:$0xff] %v1063_v20  ;;  %v1071_v24 = vld [vmem:[%s4748_s28 + $0x2ac0] sm:$0xff]  ;;  %v1073_v25 = vld [vmem:[%s4748_s28 + $0x2b08] sm:$0xff] }
  0x61   : > { %1066 = vst [vmem:[%s4756_s29 + $0x4a8] sm:$0xff] %v1065_v21  ;;  %1068 = vst [vmem:[%s4756_s29 + $0x4b0] sm:$0xff] %v1067_v22  ;;  %v1075_v26 = vld [vmem:[%s4748_s28 + $0x2b50] sm:$0xff]  ;;  %v1077_v27 = vld [vmem:[%s4748_s28 + $0x2b98] sm:$0xff] }
  0x62   : > { %1070 = vst [vmem:[%s4756_s29 + $0x4b8] sm:$0xff] %v1069_v23  ;;  %1072 = vst [vmem:[%s4756_s29 + $0x4c0] sm:$0xff] %v1071_v24  ;;  %v1079_v28 = vld [vmem:[%s4748_s28 + $0x2be0] sm:$0xff]  ;;  %v1081_v29 = vld [vmem:[%s4748_s28 + $0x2c28] sm:$0xff] }
  0x63   : > { %1074 = vst [vmem:[%s4756_s29 + $0x4c8] sm:$0xff] %v1073_v25  ;;  %1076 = vst [vmem:[%s4756_s29 + $0x4d0] sm:$0xff] %v1075_v26  ;;  %v1083_v30 = vld [vmem:[%s4748_s28 + $0x2c70] sm:$0xff]  ;;  %v1085_v31 = vld [vmem:[%s4748_s28 + $0x2cb8] sm:$0xff] }
  0x64   : > { %1078 = vst [vmem:[%s4756_s29 + $0x4d8] sm:$0xff] %v1077_v27  ;;  %1080 = vst [vmem:[%s4756_s29 + $0x4e0] sm:$0xff] %v1079_v28  ;;  %v1087_v32 = vld [vmem:[%s4748_s28 + $0x2d00] sm:$0xff]  ;;  %v1089_v33 = vld [vmem:[%s4748_s28 + $0x2d48] sm:$0xff] }
  0x65   : > { %1082 = vst [vmem:[%s4756_s29 + $0x4e8] sm:$0xff] %v1081_v29  ;;  %1084 = vst [vmem:[%s4756_s29 + $0x4f0] sm:$0xff] %v1083_v30  ;;  %v1091_v34 = vld [vmem:[%s4748_s28 + $0x2d90] sm:$0xff]  ;;  %v1093_v35 = vld [vmem:[%s4748_s28 + $0x2dd8] sm:$0xff] }
  0x66   : > { %1086 = vst [vmem:[%s4756_s29 + $0x4f8] sm:$0xff] %v1085_v31  ;;  %1088 = vst [vmem:[%s4756_s29 + $0x500] sm:$0xff] %v1087_v32  ;;  %v1095_v36 = vld [vmem:[%s4748_s28 + $0x2e20] sm:$0xff]  ;;  %v1097_v37 = vld [vmem:[%s4748_s28 + $0x2e68] sm:$0xff] }
  0x67   : > { %1090 = vst [vmem:[%s4756_s29 + $0x508] sm:$0xff] %v1089_v33  ;;  %1092 = vst [vmem:[%s4756_s29 + $0x510] sm:$0xff] %v1091_v34  ;;  %v1099_v38 = vld [vmem:[%s4748_s28 + $0x2eb0] sm:$0xff]  ;;  %v1101_v39 = vld [vmem:[%s4748_s28 + $0x2ef8] sm:$0xff] }
  0x68   : > { %1094 = vst [vmem:[%s4756_s29 + $0x518] sm:$0xff] %v1093_v35  ;;  %1096 = vst [vmem:[%s4756_s29 + $0x520] sm:$0xff] %v1095_v36  ;;  %v1103_v40 = vld [vmem:[%s4748_s28 + $0x2f40] sm:$0xff]  ;;  %v1105_v41 = vld [vmem:[%s4748_s28 + $0x2f88] sm:$0xff] }
  0x69   : > { %1098 = vst [vmem:[%s4756_s29 + $0x528] sm:$0xff] %v1097_v37  ;;  %1100 = vst [vmem:[%s4756_s29 + $0x530] sm:$0xff] %v1099_v38  ;;  %v1107_v42 = vld [vmem:[%s4748_s28 + $0x2fd0] sm:$0xff]  ;;  %v1109_v43 = vld [vmem:[%s4748_s28 + $0x3018] sm:$0xff] }
  0x6a   : > { %1102 = vst [vmem:[%s4756_s29 + $0x538] sm:$0xff] %v1101_v39  ;;  %1104 = vst [vmem:[%s4756_s29 + $0x540] sm:$0xff] %v1103_v40  ;;  %v1111_v44 = vld [vmem:[%s4748_s28 + $0x3060] sm:$0xff]  ;;  %v1113_v45 = vld [vmem:[%s4748_s28 + $0x30a8] sm:$0xff] }
  0x6b   : > { %1106 = vst [vmem:[%s4756_s29 + $0x548] sm:$0xff] %v1105_v41  ;;  %1108 = vst [vmem:[%s4756_s29 + $0x550] sm:$0xff] %v1107_v42  ;;  %v1115_v46 = vld [vmem:[%s4748_s28 + $0x30f0] sm:$0xff]  ;;  %v1117_v47 = vld [vmem:[%s4748_s28 + $0x3138] sm:$0xff] }
  0x6c   : > { %1110 = vst [vmem:[%s4756_s29 + $0x558] sm:$0xff] %v1109_v43  ;;  %1112 = vst [vmem:[%s4756_s29 + $0x560] sm:$0xff] %v1111_v44  ;;  %v1119_v48 = vld [vmem:[%s4748_s28 + $0x3180] sm:$0xff]  ;;  %v1121_v49 = vld [vmem:[%s4748_s28 + $0x31c8] sm:$0xff] }
  0x6d   : > { %1114 = vst [vmem:[%s4756_s29 + $0x568] sm:$0xff] %v1113_v45  ;;  %1116 = vst [vmem:[%s4756_s29 + $0x570] sm:$0xff] %v1115_v46  ;;  %v1123_v50 = vld [vmem:[%s4748_s28 + $0x3210] sm:$0xff]  ;;  %v1125_v51 = vld [vmem:[%s4748_s28 + $0x3258] sm:$0xff] }
  0x6e   : > { %1118 = vst [vmem:[%s4756_s29 + $0x578] sm:$0xff] %v1117_v47  ;;  %1120 = vst [vmem:[%s4756_s29 + $0x580] sm:$0xff] %v1119_v48  ;;  %v1127_v52 = vld [vmem:[%s4748_s28 + $0x32a0] sm:$0xff]  ;;  %v1129_v53 = vld [vmem:[%s4748_s28 + $0x32e8] sm:$0xff] }
  0x6f   : > { %1122 = vst [vmem:[%s4756_s29 + $0x588] sm:$0xff] %v1121_v49  ;;  %1124 = vst [vmem:[%s4756_s29 + $0x590] sm:$0xff] %v1123_v50  ;;  %v1131_v54 = vld [vmem:[%s4748_s28 + $0x3330] sm:$0xff]  ;;  %v1133_v55 = vld [vmem:[%s4748_s28 + $0x3378] sm:$0xff] }
  0x70   : > { %1126 = vst [vmem:[%s4756_s29 + $0x598] sm:$0xff] %v1125_v51  ;;  %1128 = vst [vmem:[%s4756_s29 + $0x5a0] sm:$0xff] %v1127_v52  ;;  %v1135_v56 = vld [vmem:[%s4748_s28 + $0x33c0] sm:$0xff]  ;;  %v1137_v57 = vld [vmem:[%s4748_s28 + $0x3408] sm:$0xff] }
  0x71   : > { %1130 = vst [vmem:[%s4756_s29 + $0x5a8] sm:$0xff] %v1129_v53  ;;  %1132 = vst [vmem:[%s4756_s29 + $0x5b0] sm:$0xff] %v1131_v54  ;;  %v1139_v58 = vld [vmem:[%s4748_s28 + $0x3450] sm:$0xff]  ;;  %v1141_v59 = vld [vmem:[%s4748_s28 + $0x3498] sm:$0xff] }
  0x72   : > { %1134 = vst [vmem:[%s4756_s29 + $0x5b8] sm:$0xff] %v1133_v55  ;;  %1136 = vst [vmem:[%s4756_s29 + $0x5c0] sm:$0xff] %v1135_v56  ;;  %v1143_v60 = vld [vmem:[%s4748_s28 + $0x34e0] sm:$0xff]  ;;  %v1145_v61 = vld [vmem:[%s4748_s28 + $0x3528] sm:$0xff] }
  0x73   : > { %1138 = vst [vmem:[%s4756_s29 + $0x5c8] sm:$0xff] %v1137_v57  ;;  %1140 = vst [vmem:[%s4756_s29 + $0x5d0] sm:$0xff] %v1139_v58  ;;  %v1147_v62 = vld [vmem:[%s4748_s28 + $0x3570] sm:$0xff]  ;;  %v1149_v63 = vld [vmem:[%s4748_s28 + $0x35b8] sm:$0xff] }
  0x74   : > { %1142 = vst [vmem:[%s4756_s29 + $0x5d8] sm:$0xff] %v1141_v59  ;;  %1144 = vst [vmem:[%s4756_s29 + $0x5e0] sm:$0xff] %v1143_v60  ;;  %v1151_v0 = vld [vmem:[%s4748_s28 + $0x3600] sm:$0xff]  ;;  %v1153_v1 = vld [vmem:[%s4748_s28 + $0x3648] sm:$0xff] }
  0x75   : > { %1146 = vst [vmem:[%s4756_s29 + $0x5e8] sm:$0xff] %v1145_v61  ;;  %1148 = vst [vmem:[%s4756_s29 + $0x5f0] sm:$0xff] %v1147_v62  ;;  %v1155_v2 = vld [vmem:[%s4748_s28 + $0x3690] sm:$0xff]  ;;  %v1157_v3 = vld [vmem:[%s4748_s28 + $0x36d8] sm:$0xff] }
  0x76   : > { %1150 = vst [vmem:[%s4756_s29 + $0x5f8] sm:$0xff] %v1149_v63  ;;  %1152 = vst [vmem:[%s4756_s29 + $0x600] sm:$0xff] %v1151_v0  ;;  %v1159_v4 = vld [vmem:[%s4748_s28 + $0x3720] sm:$0xff]  ;;  %v1161_v5 = vld [vmem:[%s4748_s28 + $0x3768] sm:$0xff] }
  0x77   : > { %1154 = vst [vmem:[%s4756_s29 + $0x608] sm:$0xff] %v1153_v1  ;;  %1156 = vst [vmem:[%s4756_s29 + $0x610] sm:$0xff] %v1155_v2  ;;  %v1163_v6 = vld [vmem:[%s4748_s28 + $0x37b0] sm:$0xff]  ;;  %v1165_v7 = vld [vmem:[%s4748_s28 + $0x37f8] sm:$0xff] }
  0x78   : > { %1158 = vst [vmem:[%s4756_s29 + $0x618] sm:$0xff] %v1157_v3  ;;  %1160 = vst [vmem:[%s4756_s29 + $0x620] sm:$0xff] %v1159_v4  ;;  %v1167_v8 = vld [vmem:[%s4748_s28 + $0x3840] sm:$0xff]  ;;  %v1169_v9 = vld [vmem:[%s4748_s28 + $0x3888] sm:$0xff] }
  0x79   : > { %1162 = vst [vmem:[%s4756_s29 + $0x628] sm:$0xff] %v1161_v5  ;;  %1164 = vst [vmem:[%s4756_s29 + $0x630] sm:$0xff] %v1163_v6  ;;  %v1171_v10 = vld [vmem:[%s4748_s28 + $0x38d0] sm:$0xff]  ;;  %v1173_v11 = vld [vmem:[%s4748_s28 + $0x3918] sm:$0xff] }
  0x7a   : > { %1166 = vst [vmem:[%s4756_s29 + $0x638] sm:$0xff] %v1165_v7  ;;  %1168 = vst [vmem:[%s4756_s29 + $0x640] sm:$0xff] %v1167_v8  ;;  %v1175_v12 = vld [vmem:[%s4748_s28 + $0x3960] sm:$0xff]  ;;  %v1177_v13 = vld [vmem:[%s4748_s28 + $0x39a8] sm:$0xff] }
  0x7b   : > { %1170 = vst [vmem:[%s4756_s29 + $0x648] sm:$0xff] %v1169_v9  ;;  %1172 = vst [vmem:[%s4756_s29 + $0x650] sm:$0xff] %v1171_v10  ;;  %v1179_v14 = vld [vmem:[%s4748_s28 + $0x39f0] sm:$0xff]  ;;  %v1181_v15 = vld [vmem:[%s4748_s28 + $0x3a38] sm:$0xff] }
  0x7c   : > { %1174 = vst [vmem:[%s4756_s29 + $0x658] sm:$0xff] %v1173_v11  ;;  %1176 = vst [vmem:[%s4756_s29 + $0x660] sm:$0xff] %v1175_v12  ;;  %v1183_v16 = vld [vmem:[%s4748_s28 + $0x3a80] sm:$0xff]  ;;  %v1185_v17 = vld [vmem:[%s4748_s28 + $0x3ac8] sm:$0xff] }
  0x7d   : > { %1178 = vst [vmem:[%s4756_s29 + $0x668] sm:$0xff] %v1177_v13  ;;  %1180 = vst [vmem:[%s4756_s29 + $0x670] sm:$0xff] %v1179_v14  ;;  %v1187_v18 = vld [vmem:[%s4748_s28 + $0x3b10] sm:$0xff]  ;;  %v1189_v19 = vld [vmem:[%s4748_s28 + $0x3b58] sm:$0xff] }
  0x7e   : > { %1182 = vst [vmem:[%s4756_s29 + $0x678] sm:$0xff] %v1181_v15  ;;  %1184 = vst [vmem:[%s4756_s29 + $0x680] sm:$0xff] %v1183_v16  ;;  %v1191_v20 = vld [vmem:[%s4748_s28 + $0x3ba0] sm:$0xff]  ;;  %v1193_v21 = vld [vmem:[%s4748_s28 + $0x3be8] sm:$0xff] }
  0x7f   : > { %1186 = vst [vmem:[%s4756_s29 + $0x688] sm:$0xff] %v1185_v17  ;;  %1188 = vst [vmem:[%s4756_s29 + $0x690] sm:$0xff] %v1187_v18  ;;  %v1195_v22 = vld [vmem:[%s4748_s28 + $0x3c30] sm:$0xff]  ;;  %v1197_v23 = vld [vmem:[%s4748_s28 + $0x3c78] sm:$0xff] }
  0x80   : > { %1190 = vst [vmem:[%s4756_s29 + $0x698] sm:$0xff] %v1189_v19  ;;  %1192 = vst [vmem:[%s4756_s29 + $0x6a0] sm:$0xff] %v1191_v20  ;;  %v1199_v24 = vld [vmem:[%s4748_s28 + $0x3cc0] sm:$0xff]  ;;  %v1201_v25 = vld [vmem:[%s4748_s28 + $0x3d08] sm:$0xff] }
  0x81   : > { %1194 = vst [vmem:[%s4756_s29 + $0x6a8] sm:$0xff] %v1193_v21  ;;  %1196 = vst [vmem:[%s4756_s29 + $0x6b0] sm:$0xff] %v1195_v22  ;;  %v1203_v26 = vld [vmem:[%s4748_s28 + $0x3d50] sm:$0xff]  ;;  %v1205_v27 = vld [vmem:[%s4748_s28 + $0x3d98] sm:$0xff] }
  0x82   : > { %1198 = vst [vmem:[%s4756_s29 + $0x6b8] sm:$0xff] %v1197_v23  ;;  %1200 = vst [vmem:[%s4756_s29 + $0x6c0] sm:$0xff] %v1199_v24  ;;  %v1207_v28 = vld [vmem:[%s4748_s28 + $0x3de0] sm:$0xff]  ;;  %v1209_v29 = vld [vmem:[%s4748_s28 + $0x3e28] sm:$0xff] }
  0x83   : > { %1202 = vst [vmem:[%s4756_s29 + $0x6c8] sm:$0xff] %v1201_v25  ;;  %1204 = vst [vmem:[%s4756_s29 + $0x6d0] sm:$0xff] %v1203_v26  ;;  %v1211_v30 = vld [vmem:[%s4748_s28 + $0x3e70] sm:$0xff]  ;;  %v1213_v31 = vld [vmem:[%s4748_s28 + $0x3eb8] sm:$0xff] }
  0x84   : > { %1206 = vst [vmem:[%s4756_s29 + $0x6d8] sm:$0xff] %v1205_v27  ;;  %1208 = vst [vmem:[%s4756_s29 + $0x6e0] sm:$0xff] %v1207_v28  ;;  %v1215_v32 = vld [vmem:[%s4748_s28 + $0x3f00] sm:$0xff]  ;;  %v1217_v33 = vld [vmem:[%s4748_s28 + $0x3f48] sm:$0xff] }
  0x85   : > { %1210 = vst [vmem:[%s4756_s29 + $0x6e8] sm:$0xff] %v1209_v29  ;;  %1212 = vst [vmem:[%s4756_s29 + $0x6f0] sm:$0xff] %v1211_v30  ;;  %v1219_v34 = vld [vmem:[%s4748_s28 + $0x3f90] sm:$0xff]  ;;  %v1221_v35 = vld [vmem:[%s4748_s28 + $0x3fd8] sm:$0xff] }
  0x86   : > { %1214 = vst [vmem:[%s4756_s29 + $0x6f8] sm:$0xff] %v1213_v31  ;;  %1216 = vst [vmem:[%s4756_s29 + $0x700] sm:$0xff] %v1215_v32  ;;  %v1223_v36 = vld [vmem:[%s4748_s28 + $0x4020] sm:$0xff]  ;;  %v1225_v37 = vld [vmem:[%s4748_s28 + $0x4068] sm:$0xff] }
  0x87   : > { %1218 = vst [vmem:[%s4756_s29 + $0x708] sm:$0xff] %v1217_v33  ;;  %1220 = vst [vmem:[%s4756_s29 + $0x710] sm:$0xff] %v1219_v34  ;;  %v1227_v38 = vld [vmem:[%s4748_s28 + $0x40b0] sm:$0xff]  ;;  %v1229_v39 = vld [vmem:[%s4748_s28 + $0x40f8] sm:$0xff] }
  0x88   : > { %1222 = vst [vmem:[%s4756_s29 + $0x718] sm:$0xff] %v1221_v35  ;;  %1224 = vst [vmem:[%s4756_s29 + $0x720] sm:$0xff] %v1223_v36  ;;  %v1231_v40 = vld [vmem:[%s4748_s28 + $0x4140] sm:$0xff]  ;;  %v1233_v41 = vld [vmem:[%s4748_s28 + $0x4188] sm:$0xff] }
  0x89   : > { %1226 = vst [vmem:[%s4756_s29 + $0x728] sm:$0xff] %v1225_v37  ;;  %1228 = vst [vmem:[%s4756_s29 + $0x730] sm:$0xff] %v1227_v38  ;;  %v1235_v42 = vld [vmem:[%s4748_s28 + $0x41d0] sm:$0xff]  ;;  %v1237_v43 = vld [vmem:[%s4748_s28 + $0x4218] sm:$0xff] }
  0x8a   : > { %1230 = vst [vmem:[%s4756_s29 + $0x738] sm:$0xff] %v1229_v39  ;;  %1232 = vst [vmem:[%s4756_s29 + $0x740] sm:$0xff] %v1231_v40  ;;  %v1239_v44 = vld [vmem:[%s4748_s28 + $0x4260] sm:$0xff]  ;;  %v1241_v45 = vld [vmem:[%s4748_s28 + $0x42a8] sm:$0xff] }
  0x8b   : > { %1234 = vst [vmem:[%s4756_s29 + $0x748] sm:$0xff] %v1233_v41  ;;  %1236 = vst [vmem:[%s4756_s29 + $0x750] sm:$0xff] %v1235_v42  ;;  %v1243_v46 = vld [vmem:[%s4748_s28 + $0x42f0] sm:$0xff]  ;;  %v1245_v47 = vld [vmem:[%s4748_s28 + $0x4338] sm:$0xff] }
  0x8c   : > { %1238 = vst [vmem:[%s4756_s29 + $0x758] sm:$0xff] %v1237_v43  ;;  %1240 = vst [vmem:[%s4756_s29 + $0x760] sm:$0xff] %v1239_v44  ;;  %v1247_v48 = vld [vmem:[%s4748_s28 + $0x4380] sm:$0xff]  ;;  %v1249_v49 = vld [vmem:[%s4748_s28 + $0x43c8] sm:$0xff] }
  0x8d   : > { %1242 = vst [vmem:[%s4756_s29 + $0x768] sm:$0xff] %v1241_v45  ;;  %1244 = vst [vmem:[%s4756_s29 + $0x770] sm:$0xff] %v1243_v46  ;;  %v1251_v50 = vld [vmem:[%s4748_s28 + $0x4410] sm:$0xff]  ;;  %v1253_v51 = vld [vmem:[%s4748_s28 + $0x4458] sm:$0xff] }
  0x8e   : > { %1246 = vst [vmem:[%s4756_s29 + $0x778] sm:$0xff] %v1245_v47  ;;  %1248 = vst [vmem:[%s4756_s29 + $0x780] sm:$0xff] %v1247_v48  ;;  %v1255_v52 = vld [vmem:[%s4748_s28 + $0x44a0] sm:$0xff]  ;;  %v1257_v53 = vld [vmem:[%s4748_s28 + $0x44e8] sm:$0xff] }
  0x8f   : > { %1250 = vst [vmem:[%s4756_s29 + $0x788] sm:$0xff] %v1249_v49  ;;  %1252 = vst [vmem:[%s4756_s29 + $0x790] sm:$0xff] %v1251_v50  ;;  %v1259_v54 = vld [vmem:[%s4748_s28 + $0x4530] sm:$0xff]  ;;  %v1261_v55 = vld [vmem:[%s4748_s28 + $0x4578] sm:$0xff] }
  0x90   : > { %1254 = vst [vmem:[%s4756_s29 + $0x798] sm:$0xff] %v1253_v51  ;;  %1256 = vst [vmem:[%s4756_s29 + $0x7a0] sm:$0xff] %v1255_v52  ;;  %v1263_v56 = vld [vmem:[%s4748_s28 + $0x45c0] sm:$0xff]  ;;  %v1265_v57 = vld [vmem:[%s4748_s28 + $0x4608] sm:$0xff] }
  0x91   : > { %1258 = vst [vmem:[%s4756_s29 + $0x7a8] sm:$0xff] %v1257_v53  ;;  %1260 = vst [vmem:[%s4756_s29 + $0x7b0] sm:$0xff] %v1259_v54  ;;  %v1267_v58 = vld [vmem:[%s4748_s28 + $0x4650] sm:$0xff]  ;;  %v1269_v59 = vld [vmem:[%s4748_s28 + $0x4698] sm:$0xff] }
  0x92   : > { %1262 = vst [vmem:[%s4756_s29 + $0x7b8] sm:$0xff] %v1261_v55  ;;  %1264 = vst [vmem:[%s4756_s29 + $0x7c0] sm:$0xff] %v1263_v56  ;;  %v1271_v60 = vld [vmem:[%s4748_s28 + $0x46e0] sm:$0xff]  ;;  %v1273_v61 = vld [vmem:[%s4748_s28 + $0x4728] sm:$0xff] }
  0x93   : > { %1266 = vst [vmem:[%s4756_s29 + $0x7c8] sm:$0xff] %v1265_v57  ;;  %1268 = vst [vmem:[%s4756_s29 + $0x7d0] sm:$0xff] %v1267_v58  ;;  %v1275_v62 = vld [vmem:[%s4748_s28 + $0x4770] sm:$0xff]  ;;  %v1277_v63 = vld [vmem:[%s4748_s28 + $0x47b8] sm:$0xff] }
  0x94   : > { %1270 = vst [vmem:[%s4756_s29 + $0x7d8] sm:$0xff] %v1269_v59  ;;  %1272 = vst [vmem:[%s4756_s29 + $0x7e0] sm:$0xff] %v1271_v60  ;;  %v1279_v0 = vld [vmem:[%s4748_s28 + $0x4800] sm:$0xff]  ;;  %v1281_v1 = vld [vmem:[%s4748_s28 + $0x4848] sm:$0xff] }
  0x95   : > { %1274 = vst [vmem:[%s4756_s29 + $0x7e8] sm:$0xff] %v1273_v61  ;;  %1276 = vst [vmem:[%s4756_s29 + $0x7f0] sm:$0xff] %v1275_v62  ;;  %v1283_v2 = vld [vmem:[%s4748_s28 + $0x4890] sm:$0xff]  ;;  %v1285_v3 = vld [vmem:[%s4748_s28 + $0x48d8] sm:$0xff] }
  0x96   : > { %1278 = vst [vmem:[%s4756_s29 + $0x7f8] sm:$0xff] %v1277_v63  ;;  %1280 = vst [vmem:[%s4756_s29 + $0x800] sm:$0xff] %v1279_v0  ;;  %v1287_v4 = vld [vmem:[%s4748_s28 + $0x4920] sm:$0xff]  ;;  %v1289_v5 = vld [vmem:[%s4748_s28 + $0x4968] sm:$0xff] }
  0x97   : > { %1282 = vst [vmem:[%s4756_s29 + $0x808] sm:$0xff] %v1281_v1  ;;  %1284 = vst [vmem:[%s4756_s29 + $0x810] sm:$0xff] %v1283_v2  ;;  %v1291_v6 = vld [vmem:[%s4748_s28 + $0x49b0] sm:$0xff]  ;;  %v1293_v7 = vld [vmem:[%s4748_s28 + $0x49f8] sm:$0xff] }
  0x98   : > { %1286 = vst [vmem:[%s4756_s29 + $0x818] sm:$0xff] %v1285_v3  ;;  %1288 = vst [vmem:[%s4756_s29 + $0x820] sm:$0xff] %v1287_v4  ;;  %v1295_v8 = vld [vmem:[%s4748_s28 + $0x4a40] sm:$0xff]  ;;  %v1297_v9 = vld [vmem:[%s4748_s28 + $0x4a88] sm:$0xff] }
  0x99   : > { %1290 = vst [vmem:[%s4756_s29 + $0x828] sm:$0xff] %v1289_v5  ;;  %1292 = vst [vmem:[%s4756_s29 + $0x830] sm:$0xff] %v1291_v6  ;;  %v1299_v10 = vld [vmem:[%s4748_s28 + $0x4ad0] sm:$0xff]  ;;  %v1301_v11 = vld [vmem:[%s4748_s28 + $0x4b18] sm:$0xff] }
  0x9a   : > { %1294 = vst [vmem:[%s4756_s29 + $0x838] sm:$0xff] %v1293_v7  ;;  %1296 = vst [vmem:[%s4756_s29 + $0x840] sm:$0xff] %v1295_v8  ;;  %v1303_v12 = vld [vmem:[%s4748_s28 + $0x4b60] sm:$0xff]  ;;  %v1305_v13 = vld [vmem:[%s4748_s28 + $0x4ba8] sm:$0xff] }
  0x9b   : > { %1298 = vst [vmem:[%s4756_s29 + $0x848] sm:$0xff] %v1297_v9  ;;  %1300 = vst [vmem:[%s4756_s29 + $0x850] sm:$0xff] %v1299_v10  ;;  %v1307_v14 = vld [vmem:[%s4748_s28 + $0x4bf0] sm:$0xff]  ;;  %v1309_v15 = vld [vmem:[%s4748_s28 + $0x4c38] sm:$0xff] }
  0x9c   : > { %1302 = vst [vmem:[%s4756_s29 + $0x858] sm:$0xff] %v1301_v11  ;;  %1304 = vst [vmem:[%s4756_s29 + $0x860] sm:$0xff] %v1303_v12  ;;  %v1311_v16 = vld [vmem:[%s4748_s28 + $0x4c80] sm:$0xff]  ;;  %v1313_v17 = vld [vmem:[%s4748_s28 + $0x4cc8] sm:$0xff] }
  0x9d   : > { %1306 = vst [vmem:[%s4756_s29 + $0x868] sm:$0xff] %v1305_v13  ;;  %1308 = vst [vmem:[%s4756_s29 + $0x870] sm:$0xff] %v1307_v14  ;;  %v1315_v18 = vld [vmem:[%s4748_s28 + $0x4d10] sm:$0xff]  ;;  %v1317_v19 = vld [vmem:[%s4748_s28 + $0x4d58] sm:$0xff] }
  0x9e   : > { %1310 = vst [vmem:[%s4756_s29 + $0x878] sm:$0xff] %v1309_v15  ;;  %1312 = vst [vmem:[%s4756_s29 + $0x880] sm:$0xff] %v1311_v16  ;;  %v1319_v20 = vld [vmem:[%s4748_s28 + $0x4da0] sm:$0xff]  ;;  %v1321_v21 = vld [vmem:[%s4748_s28 + $0x4de8] sm:$0xff] }
  0x9f   : > { %1314 = vst [vmem:[%s4756_s29 + $0x888] sm:$0xff] %v1313_v17  ;;  %1316 = vst [vmem:[%s4756_s29 + $0x890] sm:$0xff] %v1315_v18  ;;  %v1323_v22 = vld [vmem:[%s4748_s28 + $0x4e30] sm:$0xff]  ;;  %v1325_v23 = vld [vmem:[%s4748_s28 + $0x4e78] sm:$0xff] }
  0xa0   : > { %1318 = vst [vmem:[%s4756_s29 + $0x898] sm:$0xff] %v1317_v19  ;;  %1320 = vst [vmem:[%s4756_s29 + $0x8a0] sm:$0xff] %v1319_v20  ;;  %v1327_v24 = vld [vmem:[%s4748_s28 + $0x4ec0] sm:$0xff]  ;;  %v1329_v25 = vld [vmem:[%s4748_s28 + $0x4f08] sm:$0xff] }
  0xa1   : > { %1322 = vst [vmem:[%s4756_s29 + $0x8a8] sm:$0xff] %v1321_v21  ;;  %1324 = vst [vmem:[%s4756_s29 + $0x8b0] sm:$0xff] %v1323_v22  ;;  %v1331_v26 = vld [vmem:[%s4748_s28 + $0x4f50] sm:$0xff]  ;;  %v1333_v27 = vld [vmem:[%s4748_s28 + $0x4f98] sm:$0xff] }
  0xa2   : > { %1326 = vst [vmem:[%s4756_s29 + $0x8b8] sm:$0xff] %v1325_v23  ;;  %1328 = vst [vmem:[%s4756_s29 + $0x8c0] sm:$0xff] %v1327_v24  ;;  %v1335_v28 = vld [vmem:[%s4748_s28 + $0x4fe0] sm:$0xff]  ;;  %v1337_v29 = vld [vmem:[%s4748_s28 + $0x5028] sm:$0xff] }
  0xa3   : > { %1330 = vst [vmem:[%s4756_s29 + $0x8c8] sm:$0xff] %v1329_v25  ;;  %1332 = vst [vmem:[%s4756_s29 + $0x8d0] sm:$0xff] %v1331_v26  ;;  %v1339_v30 = vld [vmem:[%s4748_s28 + $0x5070] sm:$0xff]  ;;  %v1341_v31 = vld [vmem:[%s4748_s28 + $0x50b8] sm:$0xff] }
  0xa4   : > { %1334 = vst [vmem:[%s4756_s29 + $0x8d8] sm:$0xff] %v1333_v27  ;;  %1336 = vst [vmem:[%s4756_s29 + $0x8e0] sm:$0xff] %v1335_v28 }
  0xa5   : > { %1338 = vst [vmem:[%s4756_s29 + $0x8e8] sm:$0xff] %v1337_v29  ;;  %1340 = vst [vmem:[%s4756_s29 + $0x8f0] sm:$0xff] %v1339_v30 }
  0xa6   : > { %1342 = vst [vmem:[%s4756_s29 + $0x8f8] sm:$0xff] %v1341_v31 }
  0xa7 PF: > { %p3787_p8 = scmp.ge.s32.totalorder %s4678_s16, 1  ;;  %p1355_p9 = scmp.lt.s32.totalorder %s4678_s16, 10 }
  0xa9   : > { %p1356_p10 = pnand %p3787_p8, %p1355_p9 }
  0xaa   : > { %s1362_s30 = sand.u32 (!%p1356_p10), 1, %s4662_s12   ;;  %v4279_v32 = vld [vmem:[%s5704_s0 + $0x4] ss:$72 sps:$4 sm:$0xff] (!%p1356_p10)   ;;  %s3789_s7 = sshll.u32 (!%p1356_p10), %s4670_s14, 1 }
  0xab   : > { %1359 = sbr.rel (%p1356_p10) target bundleno = 725 (0x2d5), region = 66  ;;  %v4285_v33 = vld [vmem:[%s5704_s0 + $0x24] ss:$72 sps:$4 sm:$0xff] (!%p1356_p10)   ;;  %3289 = vmatprep.mubr.bf16.mxu1 (!%p1356_p10), %v4279_v32  ;;  %p1403_p11 = scmp.lt.s32.totalorder (!%p1356_p10), %s3789_s7, 17 }
  0xac   : > { %s4140_s4 = smul.u32 (!%p1356_p10), 2304, %s1362_s30  ;;  %3461 = vmatprep.mubr.bf16.mxu0 (!%p1356_p10), %v4285_v33  ;;  %s3788_s11 = sshll.u32 (!%p1356_p10), %s1362_s30, 5 }
  0xad   : > { %s1393_s18 = scalar_lea.vmem (!%p1356_p10), [#allocation3], %s3788_s11 }
  0xae   : > { %s5339_s9 = scalar_lea.vmem (!%p1356_p10), [#allocation2], %s4140_s4 }
  0xaf   : > { %v4181_v34 = vld [vmem:[%s5339_s9 + $0x4] ss:$8 sps:$4 sm:$0xff] (!%p1356_p10)   ;;  %v4185_v36 = vld [vmem:[%s5339_s9] ss:$8 sps:$4 sm:$0xff] (!%p1356_p10)   ;;  %v4187_v38 = vld [vmem:[%s5339_s9 + $0x14] ss:$8 sps:$4 sm:$0xff] (!%p1356_p10)  }
  0xb0   : > { %v4183_v35 = vld [vmem:[%s5339_s9 + $0x404] ss:$8 sps:$4 sm:$0xff] (!%p1356_p10)   ;;  %3257 = vmatprep.subr.bf16.mxu1 (!%p1356_p10), %v4181_v34  ;;  %v4186_v37 = vld [vmem:[%s5339_s9 + $0x400] ss:$8 sps:$4 sm:$0xff] (!%p1356_p10)   ;;  %v4189_v39 = vld [vmem:[%s5339_s9 + $0x414] ss:$8 sps:$4 sm:$0xff] (!%p1356_p10)  }
  0xb1   : > { %3429 = vmatprep.subr.bf16.mxu0 (!%p1356_p10), %v4183_v35  ;;  %3258 = vmatpush1.bf16.msra.mxu1 (!%p1356_p10), %v4185_v36  ;;  %v4191_v40 = vld [vmem:[%s5339_s9 + $0x10] ss:$8 sps:$4 sm:$0xff] (!%p1356_p10)   ;;  %v4193_v42 = vld [vmem:[%s5339_s9 + $0x24] ss:$8 sps:$4 sm:$0xff] (!%p1356_p10)   ;;  %v4197_v44 = vld [vmem:[%s5339_s9 + $0x20] ss:$8 sps:$4 sm:$0xff] (!%p1356_p10)  }
  0xb2   : > { %3430 = vmatpush1.bf16.msra.mxu0 %v4186_v37  ;;  %3259 = vmatprep.subr.bf16.mxu1 %v4187_v38  ;;  %v4192_v41 = vld [vmem:[%s5339_s9 + $0x410] ss:$8 sps:$4 sm:$0xff]   ;;  %v4195_v43 = vld [vmem:[%s5339_s9 + $0x424] ss:$8 sps:$4 sm:$0xff]   ;;  %v4198_v45 = vld [vmem:[%s5339_s9 + $0x420] ss:$8 sps:$4 sm:$0xff]  }
  0xb3   : > { %3431 = vmatprep.subr.bf16.mxu0 %v4189_v39  ;;  %v4199_v46 = vld [vmem:[%s5339_s9 + $0x34] ss:$8 sps:$4 sm:$0xff]   ;;  %v4203_v48 = vld [vmem:[%s5339_s9 + $0x30] ss:$8 sps:$4 sm:$0xff]   ;;  %v4205_v50 = vld [vmem:[%s5339_s9 + $0x44] ss:$8 sps:$4 sm:$0xff]  }
  0xb4   : > { %v4201_v47 = vld [vmem:[%s5339_s9 + $0x434] ss:$8 sps:$4 sm:$0xff]   ;;  %v4204_v49 = vld [vmem:[%s5339_s9 + $0x430] ss:$8 sps:$4 sm:$0xff]   ;;  %v4207_v51 = vld [vmem:[%s5339_s9 + $0x444] ss:$8 sps:$4 sm:$0xff]  }
  0xb5   : > { %3260 = vmatpush1.bf16.msra.mxu1 %v4191_v40  ;;  %v4209_v52 = vld [vmem:[%s5339_s9 + $0x40] ss:$8 sps:$4 sm:$0xff]   ;;  %v4211_v54 = vld [vmem:[%s5339_s9 + $0x54] ss:$8 sps:$4 sm:$0xff]   ;;  %v4215_v56 = vld [vmem:[%s5339_s9 + $0x50] ss:$8 sps:$4 sm:$0xff]  }
  0xb6   : > { %3432 = vmatpush1.bf16.msra.mxu0 %v4192_v41  ;;  %3261 = vmatprep.subr.bf16.mxu1 %v4193_v42  ;;  %v4210_v53 = vld [vmem:[%s5339_s9 + $0x440] ss:$8 sps:$4 sm:$0xff]   ;;  %v4213_v55 = vld [vmem:[%s5339_s9 + $0x454] ss:$8 sps:$4 sm:$0xff]   ;;  %v4216_v57 = vld [vmem:[%s5339_s9 + $0x450] ss:$8 sps:$4 sm:$0xff]  }
  0xb7   : > { %3433 = vmatprep.subr.bf16.mxu0 %v4195_v43  ;;  %v4217_v58 = vld [vmem:[%s5339_s9 + $0x64] ss:$8 sps:$4 sm:$0xff]   ;;  %v4221_v60 = vld [vmem:[%s5339_s9 + $0x60] ss:$8 sps:$4 sm:$0xff]   ;;  %v4223_v62 = vld [vmem:[%s5339_s9 + $0x74] ss:$8 sps:$4 sm:$0xff]  }
  0xb8   : > { %v4219_v59 = vld [vmem:[%s5339_s9 + $0x464] ss:$8 sps:$4 sm:$0xff]   ;;  %v4222_v61 = vld [vmem:[%s5339_s9 + $0x460] ss:$8 sps:$4 sm:$0xff]   ;;  %v4225_v63 = vld [vmem:[%s5339_s9 + $0x474] ss:$8 sps:$4 sm:$0xff]  }
  0xb9   : > { %3262 = vmatpush1.bf16.msra.mxu1 %v4197_v44  ;;  %v4227_v0 = vld [vmem:[%s5339_s9 + $0x70] ss:$8 sps:$4 sm:$0xff]   ;;  %v4229_v2 = vld [vmem:[%s5339_s9 + $0x84] ss:$8 sps:$4 sm:$0xff]   ;;  %v4233_v4 = vld [vmem:[%s5339_s9 + $0x80] ss:$8 sps:$4 sm:$0xff]  }
  0xba   : > { %3434 = vmatpush1.bf16.msra.mxu0 %v4198_v45  ;;  %3263 = vmatprep.subr.bf16.mxu1 %v4199_v46  ;;  %v4228_v1 = vld [vmem:[%s5339_s9 + $0x470] ss:$8 sps:$4 sm:$0xff]   ;;  %v4231_v3 = vld [vmem:[%s5339_s9 + $0x484] ss:$8 sps:$4 sm:$0xff]   ;;  %v4234_v5 = vld [vmem:[%s5339_s9 + $0x480] ss:$8 sps:$4 sm:$0xff]  }
  0xbb   : > { %3435 = vmatprep.subr.bf16.mxu0 %v4201_v47  ;;  %v4235_v6 = vld [vmem:[%s5339_s9 + $0x94] ss:$8 sps:$4 sm:$0xff]   ;;  %v4239_v8 = vld [vmem:[%s5339_s9 + $0x90] ss:$8 sps:$4 sm:$0xff]   ;;  %v4241_v10 = vld [vmem:[%s5339_s9 + $0xa4] ss:$8 sps:$4 sm:$0xff]  }
  0xbc   : > { %v4237_v7 = vld [vmem:[%s5339_s9 + $0x494] ss:$8 sps:$4 sm:$0xff]   ;;  %v4240_v9 = vld [vmem:[%s5339_s9 + $0x490] ss:$8 sps:$4 sm:$0xff]   ;;  %v4243_v11 = vld [vmem:[%s5339_s9 + $0x4a4] ss:$8 sps:$4 sm:$0xff]  }
  0xbd   : > { %3264 = vmatpush1.bf16.msra.mxu1 %v4203_v48  ;;  %v4245_v12 = vld [vmem:[%s5339_s9 + $0xa0] ss:$8 sps:$4 sm:$0xff]   ;;  %v4247_v14 = vld [vmem:[%s5339_s9 + $0xb4] ss:$8 sps:$4 sm:$0xff]   ;;  %v4251_v16 = vld [vmem:[%s5339_s9 + $0xb0] ss:$8 sps:$4 sm:$0xff]  }
  0xbe   : > { %3436 = vmatpush1.bf16.msra.mxu0 %v4204_v49  ;;  %3265 = vmatprep.subr.bf16.mxu1 %v4205_v50  ;;  %v4246_v13 = vld [vmem:[%s5339_s9 + $0x4a0] ss:$8 sps:$4 sm:$0xff]   ;;  %v4249_v15 = vld [vmem:[%s5339_s9 + $0x4b4] ss:$8 sps:$4 sm:$0xff]   ;;  %v4252_v17 = vld [vmem:[%s5339_s9 + $0x4b0] ss:$8 sps:$4 sm:$0xff]  }
  0xbf   : > { %3437 = vmatprep.subr.bf16.mxu0 %v4207_v51  ;;  %v4253_v18 = vld [vmem:[%s5339_s9 + $0xc4] ss:$8 sps:$4 sm:$0xff]   ;;  %v4257_v20 = vld [vmem:[%s5339_s9 + $0xc0] ss:$8 sps:$4 sm:$0xff]   ;;  %v4259_v22 = vld [vmem:[%s5339_s9 + $0xd4] ss:$8 sps:$4 sm:$0xff]  }
  0xc0   : > { %v4255_v19 = vld [vmem:[%s5339_s9 + $0x4c4] ss:$8 sps:$4 sm:$0xff]   ;;  %v4258_v21 = vld [vmem:[%s5339_s9 + $0x4c0] ss:$8 sps:$4 sm:$0xff]   ;;  %v4261_v23 = vld [vmem:[%s5339_s9 + $0x4d4] ss:$8 sps:$4 sm:$0xff]  }
  0xc1   : > { %3266 = vmatpush1.bf16.msra.mxu1 %v4209_v52  ;;  %v4263_v24 = vld [vmem:[%s5339_s9 + $0xd0] ss:$8 sps:$4 sm:$0xff]   ;;  %v4265_v26 = vld [vmem:[%s5339_s9 + $0xe4] ss:$8 sps:$4 sm:$0xff]   ;;  %v4269_v28 = vld [vmem:[%s5339_s9 + $0xe0] ss:$8 sps:$4 sm:$0xff]  }
  0xc2   : > { %3438 = vmatpush1.bf16.msra.mxu0 %v4210_v53  ;;  %3267 = vmatprep.subr.bf16.mxu1 %v4211_v54  ;;  %v4264_v25 = vld [vmem:[%s5339_s9 + $0x4d0] ss:$8 sps:$4 sm:$0xff]   ;;  %v4267_v27 = vld [vmem:[%s5339_s9 + $0x4e4] ss:$8 sps:$4 sm:$0xff]   ;;  %v4270_v29 = vld [vmem:[%s5339_s9 + $0x4e0] ss:$8 sps:$4 sm:$0xff]  }
  0xc3   : > { %3439 = vmatprep.subr.bf16.mxu0 %v4213_v55  ;;  %v4271_v30 = vld [vmem:[%s5339_s9 + $0xf4] ss:$8 sps:$4 sm:$0xff]   ;;  %v4275_v32 = vld [vmem:[%s5339_s9 + $0xf0] ss:$8 sps:$4 sm:$0xff]   ;;  %v4282_v34 = vld [vmem:[%s5339_s9 + $0x104] ss:$8 sps:$4 sm:$0xff]  }
  0xc4   : > { %v4273_v31 = vld [vmem:[%s5339_s9 + $0x4f4] ss:$8 sps:$4 sm:$0xff]   ;;  %v4276_v33 = vld [vmem:[%s5339_s9 + $0x4f0] ss:$8 sps:$4 sm:$0xff]   ;;  %v4288_v35 = vld [vmem:[%s5339_s9 + $0x504] ss:$8 sps:$4 sm:$0xff]  }
  0xc5   : > { %3268 = vmatpush1.bf16.msra.mxu1 %v4215_v56  ;;  %v4277_v36 = vld [vmem:[%s5704_s0] ss:$72 sps:$4 sm:$0xff]   ;;  %v4291_v40 = vld [vmem:[%s5339_s9 + $0x114] ss:$8 sps:$4 sm:$0xff]   ;;  %v4289_v42 = vld [vmem:[%s5339_s9 + $0x110] ss:$8 sps:$4 sm:$0xff]  }
  0xc6   : > { %3440 = vmatpush1.bf16.msra.mxu0 %v4216_v57  ;;  %3269 = vmatprep.subr.bf16.mxu1 %v4217_v58  ;;  %v4283_v37 = vld [vmem:[%s5704_s0 + $0x20] ss:$72 sps:$4 sm:$0xff]   ;;  %v4294_v41 = vld [vmem:[%s5339_s9 + $0x514] ss:$8 sps:$4 sm:$0xff]   ;;  %v4292_v43 = vld [vmem:[%s5339_s9 + $0x510] ss:$8 sps:$4 sm:$0xff]  }
  0xc7   : > { %3441 = vmatprep.subr.bf16.mxu0 %v4219_v59  ;;  %v4280_v38 = vld [vmem:[%s5339_s9 + $0x100] ss:$8 sps:$4 sm:$0xff]   ;;  %v4297_v44 = vld [vmem:[%s5339_s9 + $0x124] ss:$8 sps:$4 sm:$0xff]   ;;  %v4303_v48 = vld [vmem:[%s5339_s9 + $0x134] ss:$8 sps:$4 sm:$0xff]  }
  0xc8   : > { %v4286_v39 = vld [vmem:[%s5339_s9 + $0x500] ss:$8 sps:$4 sm:$0xff]   ;;  %v4300_v45 = vld [vmem:[%s5339_s9 + $0x524] ss:$8 sps:$4 sm:$0xff]   ;;  %v4306_v49 = vld [vmem:[%s5339_s9 + $0x534] ss:$8 sps:$4 sm:$0xff]  }
  0xc9   : > { %3270 = vmatpush1.bf16.msra.mxu1 %v4221_v60  ;;  %v4295_v46 = vld [vmem:[%s5339_s9 + $0x120] ss:$8 sps:$4 sm:$0xff]   ;;  %v4301_v50 = vld [vmem:[%s5339_s9 + $0x130] ss:$8 sps:$4 sm:$0xff]   ;;  %v4309_v52 = vld [vmem:[%s5339_s9 + $0x144] ss:$8 sps:$4 sm:$0xff]  }
  0xca   : > { %3442 = vmatpush1.bf16.msra.mxu0 %v4222_v61  ;;  %3271 = vmatprep.subr.bf16.mxu1 %v4223_v62  ;;  %v4298_v47 = vld [vmem:[%s5339_s9 + $0x520] ss:$8 sps:$4 sm:$0xff]   ;;  %v4304_v51 = vld [vmem:[%s5339_s9 + $0x530] ss:$8 sps:$4 sm:$0xff]   ;;  %v4312_v53 = vld [vmem:[%s5339_s9 + $0x544] ss:$8 sps:$4 sm:$0xff]  }
  0xcb   : > { %3443 = vmatprep.subr.bf16.mxu0 %v4225_v63  ;;  %v4307_v54 = vld [vmem:[%s5339_s9 + $0x140] ss:$8 sps:$4 sm:$0xff]   ;;  %v4315_v56 = vld [vmem:[%s5339_s9 + $0x154] ss:$8 sps:$4 sm:$0xff]   ;;  %v4313_v58 = vld [vmem:[%s5339_s9 + $0x150] ss:$8 sps:$4 sm:$0xff]  }
  0xcc   : > { %v4310_v55 = vld [vmem:[%s5339_s9 + $0x540] ss:$8 sps:$4 sm:$0xff]   ;;  %v4318_v57 = vld [vmem:[%s5339_s9 + $0x554] ss:$8 sps:$4 sm:$0xff]   ;;  %v4316_v59 = vld [vmem:[%s5339_s9 + $0x550] ss:$8 sps:$4 sm:$0xff]  }
  0xcd   : > { %3272 = vmatpush1.bf16.msra.mxu1 %v4227_v0  ;;  %v4321_v60 = vld [vmem:[%s5339_s9 + $0x164] ss:$8 sps:$4 sm:$0xff]   ;;  %v4319_v63 = vld [vmem:[%s5339_s9 + $0x160] ss:$8 sps:$4 sm:$0xff]   ;;  %s5716_s7 = smov (!%p1403_p11, %s3789_s7), 17  ;;  %s4102_s12 = sshll.u32 (%p4735_p6), %s4670_s14, 4 }
  0xce   : > { %3444 = vmatpush1.bf16.msra.mxu0 %v4228_v1  ;;  %3273 = vmatprep.subr.bf16.mxu1 %v4229_v2  ;;  %v4324_v61 = vld [vmem:[%s5339_s9 + $0x564] ss:$8 sps:$4 sm:$0xff]   ;;  %v4322_v0 = vld [vmem:[%s5339_s9 + $0x560] ss:$8 sps:$4 sm:$0xff]   ;;  %v4327_v2 = vld [vmem:[%s5339_s9 + $0x174] ss:$8 sps:$4 sm:$0xff]   ;;  %s3664_s20 = scalar_lea.vmem (%p4735_p6), %s5707_s3, %s4102_s12 }
  0xcf   : > { %3445 = vmatprep.subr.bf16.mxu0 %v4231_v3  ;;  %v4381_v62 = vld [vmem:[%s5704_s0 + $0xc] ss:$72 sps:$4 sm:$0xff]  }
  0xd0   : > { %v4387_v1 = vld [vmem:[%s5704_s0 + $0x2c] ss:$72 sps:$4 sm:$0xff]  }
  0xd1   : > { %3274 = vmatpush1.bf16.msra.mxu1 %v4233_v4  ;;  %v4330_v3 = vld [vmem:[%s5339_s9 + $0x574] ss:$8 sps:$4 sm:$0xff]   ;;  %v4325_v4 = vld [vmem:[%s5339_s9 + $0x170] ss:$8 sps:$4 sm:$0xff]  }
  0xd2   : > { %3446 = vmatpush1.bf16.msra.mxu0 %v4234_v5  ;;  %3275 = vmatprep.subr.bf16.mxu1 %v4235_v6  ;;  %v4328_v5 = vld [vmem:[%s5339_s9 + $0x570] ss:$8 sps:$4 sm:$0xff]   ;;  %v4333_v6 = vld [vmem:[%s5339_s9 + $0x184] ss:$8 sps:$4 sm:$0xff]  }
  0xd3   : > { %3447 = vmatprep.subr.bf16.mxu0 %v4237_v7  ;;  %v4336_v7 = vld [vmem:[%s5339_s9 + $0x584] ss:$8 sps:$4 sm:$0xff]  }
  0xd5   : > { %3276 = vmatpush1.bf16.msra.mxu1 %v4239_v8  ;;  %v4331_v8 = vld [vmem:[%s5339_s9 + $0x180] ss:$8 sps:$4 sm:$0xff]  }
  0xd6   : > { %3448 = vmatpush1.bf16.msra.mxu0 %v4240_v9  ;;  %3277 = vmatprep.subr.bf16.mxu1 %v4241_v10  ;;  %v4334_v9 = vld [vmem:[%s5339_s9 + $0x580] ss:$8 sps:$4 sm:$0xff]   ;;  %v4339_v10 = vld [vmem:[%s5339_s9 + $0x194] ss:$8 sps:$4 sm:$0xff]  }
  0xd7   : > { %3449 = vmatprep.subr.bf16.mxu0 %v4243_v11  ;;  %v4342_v11 = vld [vmem:[%s5339_s9 + $0x594] ss:$8 sps:$4 sm:$0xff]  }
  0xd9   : > { %3278 = vmatpush1.bf16.msra.mxu1 %v4245_v12  ;;  %v4337_v12 = vld [vmem:[%s5339_s9 + $0x190] ss:$8 sps:$4 sm:$0xff]  }
  0xda   : > { %3450 = vmatpush1.bf16.msra.mxu0 %v4246_v13  ;;  %3279 = vmatprep.subr.bf16.mxu1 %v4247_v14  ;;  %v4340_v13 = vld [vmem:[%s5339_s9 + $0x590] ss:$8 sps:$4 sm:$0xff]   ;;  %v4345_v14 = vld [vmem:[%s5339_s9 + $0x1a4] ss:$8 sps:$4 sm:$0xff]  }
  0xdb   : > { %3451 = vmatprep.subr.bf16.mxu0 %v4249_v15  ;;  %v4348_v15 = vld [vmem:[%s5339_s9 + $0x5a4] ss:$8 sps:$4 sm:$0xff]  }
  0xdd   : > { %3280 = vmatpush1.bf16.msra.mxu1 %v4251_v16  ;;  %v4343_v16 = vld [vmem:[%s5339_s9 + $0x1a0] ss:$8 sps:$4 sm:$0xff]  }
  0xde   : > { %3452 = vmatpush1.bf16.msra.mxu0 %v4252_v17  ;;  %3281 = vmatprep.subr.bf16.mxu1 %v4253_v18  ;;  %v4346_v17 = vld [vmem:[%s5339_s9 + $0x5a0] ss:$8 sps:$4 sm:$0xff]   ;;  %v4351_v18 = vld [vmem:[%s5339_s9 + $0x1b4] ss:$8 sps:$4 sm:$0xff]  }
  0xdf   : > { %3453 = vmatprep.subr.bf16.mxu0 %v4255_v19  ;;  %v4354_v19 = vld [vmem:[%s5339_s9 + $0x5b4] ss:$8 sps:$4 sm:$0xff]  }
  0xe1   : > { %3282 = vmatpush1.bf16.msra.mxu1 %v4257_v20  ;;  %v4349_v20 = vld [vmem:[%s5339_s9 + $0x1b0] ss:$8 sps:$4 sm:$0xff]  }
  0xe2   : > { %3454 = vmatpush1.bf16.msra.mxu0 %v4258_v21  ;;  %3283 = vmatprep.subr.bf16.mxu1 %v4259_v22  ;;  %v4352_v21 = vld [vmem:[%s5339_s9 + $0x5b0] ss:$8 sps:$4 sm:$0xff]   ;;  %v4357_v22 = vld [vmem:[%s5339_s9 + $0x1c4] ss:$8 sps:$4 sm:$0xff]  }
  0xe3   : > { %3455 = vmatprep.subr.bf16.mxu0 %v4261_v23  ;;  %v4360_v23 = vld [vmem:[%s5339_s9 + $0x5c4] ss:$8 sps:$4 sm:$0xff]  }
  0xe5   : > { %3284 = vmatpush1.bf16.msra.mxu1 %v4263_v24  ;;  %v4355_v24 = vld [vmem:[%s5339_s9 + $0x1c0] ss:$8 sps:$4 sm:$0xff]  }
  0xe6   : > { %3456 = vmatpush1.bf16.msra.mxu0 %v4264_v25  ;;  %3285 = vmatprep.subr.bf16.mxu1 %v4265_v26  ;;  %v4358_v25 = vld [vmem:[%s5339_s9 + $0x5c0] ss:$8 sps:$4 sm:$0xff]   ;;  %v4363_v26 = vld [vmem:[%s5339_s9 + $0x1d4] ss:$8 sps:$4 sm:$0xff]  }
  0xe7   : > { %3457 = vmatprep.subr.bf16.mxu0 %v4267_v27  ;;  %v4366_v27 = vld [vmem:[%s5339_s9 + $0x5d4] ss:$8 sps:$4 sm:$0xff]  }
  0xe9   : > { %3286 = vmatpush1.bf16.msra.mxu1 %v4269_v28  ;;  %v4361_v28 = vld [vmem:[%s5339_s9 + $0x1d0] ss:$8 sps:$4 sm:$0xff]  }
  0xea   : > { %3458 = vmatpush1.bf16.msra.mxu0 %v4270_v29  ;;  %3287 = vmatprep.subr.bf16.mxu1 %v4271_v30  ;;  %v4364_v29 = vld [vmem:[%s5339_s9 + $0x5d0] ss:$8 sps:$4 sm:$0xff]   ;;  %v4369_v30 = vld [vmem:[%s5339_s9 + $0x1e4] ss:$8 sps:$4 sm:$0xff]  }
  0xeb   : > { %3459 = vmatprep.subr.bf16.mxu0 %v4273_v31  ;;  %v4372_v31 = vld [vmem:[%s5339_s9 + $0x5e4] ss:$8 sps:$4 sm:$0xff]  }
  0xed   : > { %3288 = vmatpush1.bf16.msra.mxu1 %v4275_v32  ;;  %v4367_v32 = vld [vmem:[%s5339_s9 + $0x1e0] ss:$8 sps:$4 sm:$0xff]  }
  0xee   : > { %3460 = vmatpush1.bf16.msra.mxu0 %v4276_v33  ;;  %3300 = vmatprep.subr.bf16.mxu1 %v4282_v34  ;;  %v4370_v33 = vld [vmem:[%s5339_s9 + $0x5e0] ss:$8 sps:$4 sm:$0xff]   ;;  %v4375_v34 = vld [vmem:[%s5339_s9 + $0x1f4] ss:$8 sps:$4 sm:$0xff]  }
  0xef   : > { %3472 = vmatprep.subr.bf16.mxu0 %v4288_v35  ;;  %v4378_v35 = vld [vmem:[%s5339_s9 + $0x5f4] ss:$8 sps:$4 sm:$0xff]  }
  0xf0   : > { %3290 = vmatmul.mubr.bf16.vlgmr.msra.gmra.mrb[0].mxu1 %v4277_v36  ;;  %v4373_v36 = vld [vmem:[%s5339_s9 + $0x1f0] ss:$8 sps:$4 sm:$0xff]  }
  0xf1   : > { %3462 = vmatmul.mubr.bf16.vlgmr.msra.gmra.mrb[0].mxu0 %v4283_v37  ;;  %3301 = vmatpush1.bf16.msra.mxu1 %v4280_v38  ;;  %v4376_v37 = vld [vmem:[%s5339_s9 + $0x5f0] ss:$8 sps:$4 sm:$0xff]   ;;  %v4384_v38 = vld [vmem:[%s5339_s9 + $0x204] ss:$8 sps:$4 sm:$0xff]  }
  0xf2   : > { %3473 = vmatpush1.bf16.msra.mxu0 %v4286_v39  ;;  %3302 = vmatprep.subr.bf16.mxu1 %v4291_v40  ;;  %v4390_v39 = vld [vmem:[%s5339_s9 + $0x604] ss:$8 sps:$4 sm:$0xff]   ;;  %v4379_v40 = vld [vmem:[%s5704_s0 + $0x8] ss:$72 sps:$4 sm:$0xff]  }
  0xf3   : > { %3474 = vmatprep.subr.bf16.mxu0 %v4294_v41  ;;  %3332 = vmatprep.mubr.bf16.mxu1 %v4381_v62  ;;  %v4382_v41 = vld [vmem:[%s5339_s9 + $0x200] ss:$8 sps:$4 sm:$0xff]   ;;  %v4417_v62 = vld [vmem:[%s5339_s9 + $0x254] ss:$8 sps:$4 sm:$0xff]  }
  0xf4   : > { %3504 = vmatprep.mubr.bf16.mxu0 %v4387_v1  ;;  %v4418_v1 = vld [vmem:[%s5339_s9 + $0x650] ss:$8 sps:$4 sm:$0xff]  }
  0xf5   : > { %3303 = vmatpush1.bf16.msra.mxu1 %v4289_v42  ;;  %v4385_v42 = vld [vmem:[%s5704_s0 + $0x28] ss:$72 sps:$4 sm:$0xff]  }
  0xf6   : > { %3475 = vmatpush1.bf16.msra.mxu0 %v4292_v43  ;;  %3304 = vmatprep.subr.bf16.mxu1 %v4297_v44  ;;  %v4388_v43 = vld [vmem:[%s5339_s9 + $0x600] ss:$8 sps:$4 sm:$0xff]   ;;  %v4393_v44 = vld [vmem:[%s5339_s9 + $0x214] ss:$8 sps:$4 sm:$0xff]  }
  0xf7   : > { %3476 = vmatprep.subr.bf16.mxu0 %v4300_v45  ;;  %v4396_v45 = vld [vmem:[%s5339_s9 + $0x614] ss:$8 sps:$4 sm:$0xff]  }
  0xf9   : > { %3305 = vmatpush1.bf16.msra.mxu1 %v4295_v46  ;;  %v4391_v46 = vld [vmem:[%s5339_s9 + $0x210] ss:$8 sps:$4 sm:$0xff]  }
  0xfa   : > { %3477 = vmatpush1.bf16.msra.mxu0 %v4298_v47  ;;  %3306 = vmatprep.subr.bf16.mxu1 %v4303_v48  ;;  %v4483_v47 = vld [vmem:[%s5704_s0 + $0x14] ss:$72 sps:$4 sm:$0xff]   ;;  %v4394_v48 = vld [vmem:[%s5339_s9 + $0x610] ss:$8 sps:$4 sm:$0xff]  }
  0xfb   : > { %3478 = vmatprep.subr.bf16.mxu0 %v4306_v49  ;;  %v4399_v49 = vld [vmem:[%s5339_s9 + $0x224] ss:$8 sps:$4 sm:$0xff]  }
  0xfd   : > { %3307 = vmatpush1.bf16.msra.mxu1 %v4301_v50  ;;  %v4402_v50 = vld [vmem:[%s5339_s9 + $0x624] ss:$8 sps:$4 sm:$0xff]  }
  0xfe   : > { %3479 = vmatpush1.bf16.msra.mxu0 %v4304_v51  ;;  %3308 = vmatprep.subr.bf16.mxu1 %v4309_v52  ;;  %v4489_v51 = vld [vmem:[%s5704_s0 + $0x34] ss:$72 sps:$4 sm:$0xff]   ;;  %v4397_v52 = vld [vmem:[%s5339_s9 + $0x220] ss:$8 sps:$4 sm:$0xff]  }
  0xff   : > { %3480 = vmatprep.subr.bf16.mxu0 %v4312_v53  ;;  %v4400_v53 = vld [vmem:[%s5339_s9 + $0x620] ss:$8 sps:$4 sm:$0xff]  }
 0x101   : > { %3309 = vmatpush1.bf16.msra.mxu1 %v4307_v54  ;;  %v4405_v54 = vld [vmem:[%s5339_s9 + $0x234] ss:$8 sps:$4 sm:$0xff]  }
 0x102   : > { %3481 = vmatpush1.bf16.msra.mxu0 %v4310_v55  ;;  %3310 = vmatprep.subr.bf16.mxu1 %v4315_v56  ;;  %v4408_v55 = vld [vmem:[%s5339_s9 + $0x634] ss:$8 sps:$4 sm:$0xff]   ;;  %v4403_v56 = vld [vmem:[%s5339_s9 + $0x230] ss:$8 sps:$4 sm:$0xff]  }
 0x103   : > { %3482 = vmatprep.subr.bf16.mxu0 %v4318_v57  ;;  %v4406_v57 = vld [vmem:[%s5339_s9 + $0x630] ss:$8 sps:$4 sm:$0xff]  }
 0x105   : > { %3311 = vmatpush1.bf16.msra.mxu1 %v4313_v58  ;;  %v4411_v58 = vld [vmem:[%s5339_s9 + $0x244] ss:$8 sps:$4 sm:$0xff]  }
 0x106   : > { %3483 = vmatpush1.bf16.msra.mxu0 %v4316_v59  ;;  %3312 = vmatprep.subr.bf16.mxu1 %v4321_v60  ;;  %v4414_v59 = vld [vmem:[%s5339_s9 + $0x644] ss:$8 sps:$4 sm:$0xff]   ;;  %v4409_v60 = vld [vmem:[%s5339_s9 + $0x240] ss:$8 sps:$4 sm:$0xff]  }
 0x107   : > { %3484 = vmatprep.subr.bf16.mxu0 %v4324_v61  ;;  %v4412_v61 = vld [vmem:[%s5339_s9 + $0x640] ss:$8 sps:$4 sm:$0xff]  }
 0x109   : > { %3313 = vmatpush1.bf16.msra.mxu1 %v4319_v63  ;;  %v4420_v63 = vld [vmem:[%s5339_s9 + $0x654] ss:$8 sps:$4 sm:$0xff]  }
 0x10a   : > { %3485 = vmatpush1.bf16.msra.mxu0 %v4322_v0  ;;  %3314 = vmatprep.subr.bf16.mxu1 %v4327_v2  ;;  %v4415_v0 = vld [vmem:[%s5339_s9 + $0x250] ss:$8 sps:$4 sm:$0xff]   ;;  %v4423_v2 = vld [vmem:[%s5339_s9 + $0x264] ss:$8 sps:$4 sm:$0xff]  }
 0x10b   : > { %3486 = vmatprep.subr.bf16.mxu0 %v4330_v3  ;;  %v4426_v3 = vld [vmem:[%s5339_s9 + $0x664] ss:$8 sps:$4 sm:$0xff]  }
 0x10d   : > { %3315 = vmatpush1.bf16.msra.mxu1 %v4325_v4  ;;  %v4421_v4 = vld [vmem:[%s5339_s9 + $0x260] ss:$8 sps:$4 sm:$0xff]  }
 0x10e   : > { %3487 = vmatpush1.bf16.msra.mxu0 %v4328_v5  ;;  %3316 = vmatprep.subr.bf16.mxu1 %v4333_v6  ;;  %v4424_v5 = vld [vmem:[%s5339_s9 + $0x660] ss:$8 sps:$4 sm:$0xff]   ;;  %v4429_v6 = vld [vmem:[%s5339_s9 + $0x274] ss:$8 sps:$4 sm:$0xff]  }
 0x10f   : > { %3488 = vmatprep.subr.bf16.mxu0 %v4336_v7  ;;  %v4432_v7 = vld [vmem:[%s5339_s9 + $0x674] ss:$8 sps:$4 sm:$0xff]  }
 0x111   : > { %3317 = vmatpush1.bf16.msra.mxu1 %v4331_v8  ;;  %v4427_v8 = vld [vmem:[%s5339_s9 + $0x270] ss:$8 sps:$4 sm:$0xff]  }
 0x112   : > { %3489 = vmatpush1.bf16.msra.mxu0 %v4334_v9  ;;  %3318 = vmatprep.subr.bf16.mxu1 %v4339_v10  ;;  %v4430_v9 = vld [vmem:[%s5339_s9 + $0x670] ss:$8 sps:$4 sm:$0xff]   ;;  %v4435_v10 = vld [vmem:[%s5339_s9 + $0x284] ss:$8 sps:$4 sm:$0xff]  }
 0x113   : > { %3490 = vmatprep.subr.bf16.mxu0 %v4342_v11  ;;  %v4438_v11 = vld [vmem:[%s5339_s9 + $0x684] ss:$8 sps:$4 sm:$0xff]  }
 0x115   : > { %3319 = vmatpush1.bf16.msra.mxu1 %v4337_v12  ;;  %v4433_v12 = vld [vmem:[%s5339_s9 + $0x280] ss:$8 sps:$4 sm:$0xff]  }
 0x116   : > { %3491 = vmatpush1.bf16.msra.mxu0 %v4340_v13  ;;  %3320 = vmatprep.subr.bf16.mxu1 %v4345_v14  ;;  %v4436_v13 = vld [vmem:[%s5339_s9 + $0x680] ss:$8 sps:$4 sm:$0xff]   ;;  %v4441_v14 = vld [vmem:[%s5339_s9 + $0x294] ss:$8 sps:$4 sm:$0xff]  }
 0x117   : > { %3492 = vmatprep.subr.bf16.mxu0 %v4348_v15  ;;  %v4444_v15 = vld [vmem:[%s5339_s9 + $0x694] ss:$8 sps:$4 sm:$0xff]  }
 0x119   : > { %3321 = vmatpush1.bf16.msra.mxu1 %v4343_v16  ;;  %v4439_v16 = vld [vmem:[%s5339_s9 + $0x290] ss:$8 sps:$4 sm:$0xff]  }
 0x11a   : > { %3493 = vmatpush1.bf16.msra.mxu0 %v4346_v17  ;;  %3322 = vmatprep.subr.bf16.mxu1 %v4351_v18  ;;  %v4442_v17 = vld [vmem:[%s5339_s9 + $0x690] ss:$8 sps:$4 sm:$0xff]   ;;  %v4447_v18 = vld [vmem:[%s5339_s9 + $0x2a4] ss:$8 sps:$4 sm:$0xff]  }
 0x11b   : > { %3494 = vmatprep.subr.bf16.mxu0 %v4354_v19  ;;  %v4450_v19 = vld [vmem:[%s5339_s9 + $0x6a4] ss:$8 sps:$4 sm:$0xff]  }
 0x11d   : > { %3323 = vmatpush1.bf16.msra.mxu1 %v4349_v20  ;;  %v4445_v20 = vld [vmem:[%s5339_s9 + $0x2a0] ss:$8 sps:$4 sm:$0xff]  }
 0x11e   : > { %3495 = vmatpush1.bf16.msra.mxu0 %v4352_v21  ;;  %3324 = vmatprep.subr.bf16.mxu1 %v4357_v22  ;;  %v4448_v21 = vld [vmem:[%s5339_s9 + $0x6a0] ss:$8 sps:$4 sm:$0xff]   ;;  %v4453_v22 = vld [vmem:[%s5339_s9 + $0x2b4] ss:$8 sps:$4 sm:$0xff]  }
 0x11f   : > { %3496 = vmatprep.subr.bf16.mxu0 %v4360_v23  ;;  %v4456_v23 = vld [vmem:[%s5339_s9 + $0x6b4] ss:$8 sps:$4 sm:$0xff]  }
 0x121   : > { %3325 = vmatpush1.bf16.msra.mxu1 %v4355_v24  ;;  %v4451_v24 = vld [vmem:[%s5339_s9 + $0x2b0] ss:$8 sps:$4 sm:$0xff]  }
 0x122   : > { %3497 = vmatpush1.bf16.msra.mxu0 %v4358_v25  ;;  %3326 = vmatprep.subr.bf16.mxu1 %v4363_v26  ;;  %v4454_v25 = vld [vmem:[%s5339_s9 + $0x6b0] ss:$8 sps:$4 sm:$0xff]   ;;  %v4459_v26 = vld [vmem:[%s5339_s9 + $0x2c4] ss:$8 sps:$4 sm:$0xff]  }
 0x123   : > { %3498 = vmatprep.subr.bf16.mxu0 %v4366_v27  ;;  %v4462_v27 = vld [vmem:[%s5339_s9 + $0x6c4] ss:$8 sps:$4 sm:$0xff]  }
 0x125   : > { %3327 = vmatpush1.bf16.msra.mxu1 %v4361_v28  ;;  %v4457_v28 = vld [vmem:[%s5339_s9 + $0x2c0] ss:$8 sps:$4 sm:$0xff]  }
 0x126   : > { %3499 = vmatpush1.bf16.msra.mxu0 %v4364_v29  ;;  %3328 = vmatprep.subr.bf16.mxu1 %v4369_v30  ;;  %v4460_v29 = vld [vmem:[%s5339_s9 + $0x6c0] ss:$8 sps:$4 sm:$0xff]   ;;  %v4465_v30 = vld [vmem:[%s5339_s9 + $0x2d4] ss:$8 sps:$4 sm:$0xff]  }
 0x127   : > { %3500 = vmatprep.subr.bf16.mxu0 %v4372_v31  ;;  %v4468_v31 = vld [vmem:[%s5339_s9 + $0x6d4] ss:$8 sps:$4 sm:$0xff]  }
 0x129   : > { %3329 = vmatpush1.bf16.msra.mxu1 %v4367_v32  ;;  %v4463_v32 = vld [vmem:[%s5339_s9 + $0x2d0] ss:$8 sps:$4 sm:$0xff]  }
 0x12a   : > { %3501 = vmatpush1.bf16.msra.mxu0 %v4370_v33  ;;  %3330 = vmatprep.subr.bf16.mxu1 %v4375_v34  ;;  %v4466_v33 = vld [vmem:[%s5339_s9 + $0x6d0] ss:$8 sps:$4 sm:$0xff]   ;;  %v4471_v34 = vld [vmem:[%s5339_s9 + $0x2e4] ss:$8 sps:$4 sm:$0xff]  }
 0x12b   : > { %3502 = vmatprep.subr.bf16.mxu0 %v4378_v35  ;;  %v4474_v35 = vld [vmem:[%s5339_s9 + $0x6e4] ss:$8 sps:$4 sm:$0xff]  }
 0x12d   : > { %3331 = vmatpush1.bf16.msra.mxu1 %v4373_v36  ;;  %v4469_v36 = vld [vmem:[%s5339_s9 + $0x2e0] ss:$8 sps:$4 sm:$0xff]  }
 0x12e   : > { %3503 = vmatpush1.bf16.msra.mxu0 %v4376_v37  ;;  %3343 = vmatprep.subr.bf16.mxu1 %v4384_v38  ;;  %v4472_v37 = vld [vmem:[%s5339_s9 + $0x6e0] ss:$8 sps:$4 sm:$0xff]   ;;  %v4477_v38 = vld [vmem:[%s5339_s9 + $0x2f4] ss:$8 sps:$4 sm:$0xff]  }
 0x12f   : > { %3515 = vmatprep.subr.bf16.mxu0 %v4390_v39  ;;  %v4480_v39 = vld [vmem:[%s5339_s9 + $0x6f4] ss:$8 sps:$4 sm:$0xff]  }
 0x130   : > { %3333 = vmatmul.mubr.bf16.vlgmr.msra.gmra.mrb[0].mxu1 %v4379_v40  ;;  %v4475_v40 = vld [vmem:[%s5339_s9 + $0x2f0] ss:$8 sps:$4 sm:$0xff]  }
 0x131   : > { %3505 = vmatmul.mubr.bf16.vlgmr.msra.gmra.mrb[0].mxu0 %v4385_v42  ;;  %3344 = vmatpush1.bf16.msra.mxu1 %v4382_v41  ;;  %v4478_v41 = vld [vmem:[%s5339_s9 + $0x6f0] ss:$8 sps:$4 sm:$0xff]   ;;  %v4486_v42 = vld [vmem:[%s5339_s9 + $0x304] ss:$8 sps:$4 sm:$0xff]  }
 0x132   : > { %3516 = vmatpush1.bf16.msra.mxu0 %v4388_v43  ;;  %3345 = vmatprep.subr.bf16.mxu1 %v4393_v44  ;;  %v4492_v43 = vld [vmem:[%s5339_s9 + $0x704] ss:$8 sps:$4 sm:$0xff]   ;;  %v4481_v44 = vld [vmem:[%s5704_s0 + $0x10] ss:$72 sps:$4 sm:$0xff]  }
 0x133   : > { %3517 = vmatprep.subr.bf16.mxu0 %v4396_v45  ;;  %3375 = vmatprep.mubr.bf16.mxu1 %v4483_v47  ;;  %v4484_v45 = vld [vmem:[%s5339_s9 + $0x300] ss:$8 sps:$4 sm:$0xff]  }
 0x134   : > { %3547 = vmatprep.mubr.bf16.mxu0 %v4489_v51  ;;  %v4490_v47 = vld [vmem:[%s5339_s9 + $0x700] ss:$8 sps:$4 sm:$0xff]   ;;  %v4588_v51 = vld [vmem:[%s5704_s0 + $0x3c] ss:$72 sps:$4 sm:$0xff]  }
 0x135   : > { %3346 = vmatpush1.bf16.msra.mxu1 %v4391_v46  ;;  %v4487_v46 = vld [vmem:[%s5704_s0 + $0x30] ss:$72 sps:$4 sm:$0xff]  }
 0x136   : > { %3518 = vmatpush1.bf16.msra.mxu0 %v4394_v48  ;;  %3347 = vmatprep.subr.bf16.mxu1 %v4399_v49  ;;  %v4495_v48 = vld [vmem:[%s5339_s9 + $0x314] ss:$8 sps:$4 sm:$0xff]  }
 0x137   : > { %3519 = vmatprep.subr.bf16.mxu0 %v4402_v50  ;;  %v4498_v49 = vld [vmem:[%s5339_s9 + $0x714] ss:$8 sps:$4 sm:$0xff]  }
 0x138   : > { %v4585_v50 = vld [vmem:[%s5704_s0 + $0x1c] ss:$72 sps:$4 sm:$0xff]  }
 0x139   : > { %3348 = vmatpush1.bf16.msra.mxu1 %v4397_v52  ;;  %v4493_v52 = vld [vmem:[%s5339_s9 + $0x310] ss:$8 sps:$4 sm:$0xff]  }
 0x13a   : > { %3520 = vmatpush1.bf16.msra.mxu0 %v4400_v53  ;;  %3349 = vmatprep.subr.bf16.mxu1 %v4405_v54  ;;  %v4496_v53 = vld [vmem:[%s5339_s9 + $0x710] ss:$8 sps:$4 sm:$0xff]   ;;  %v4501_v54 = vld [vmem:[%s5339_s9 + $0x324] ss:$8 sps:$4 sm:$0xff]  }
 0x13b   : > { %3521 = vmatprep.subr.bf16.mxu0 %v4408_v55  ;;  %v4504_v55 = vld [vmem:[%s5339_s9 + $0x724] ss:$8 sps:$4 sm:$0xff]  }
 0x13d   : > { %3350 = vmatpush1.bf16.msra.mxu1 %v4403_v56  ;;  %v4499_v56 = vld [vmem:[%s5339_s9 + $0x320] ss:$8 sps:$4 sm:$0xff]  }
 0x13e   : > { %3522 = vmatpush1.bf16.msra.mxu0 %v4406_v57  ;;  %3351 = vmatprep.subr.bf16.mxu1 %v4411_v58  ;;  %v4502_v57 = vld [vmem:[%s5339_s9 + $0x720] ss:$8 sps:$4 sm:$0xff]   ;;  %v4507_v58 = vld [vmem:[%s5339_s9 + $0x334] ss:$8 sps:$4 sm:$0xff]  }
 0x13f   : > { %3523 = vmatprep.subr.bf16.mxu0 %v4414_v59  ;;  %v4510_v59 = vld [vmem:[%s5339_s9 + $0x734] ss:$8 sps:$4 sm:$0xff]  }
 0x141   : > { %3352 = vmatpush1.bf16.msra.mxu1 %v4409_v60  ;;  %v4505_v60 = vld [vmem:[%s5339_s9 + $0x330] ss:$8 sps:$4 sm:$0xff]  }
 0x142   : > { %3524 = vmatpush1.bf16.msra.mxu0 %v4412_v61  ;;  %3353 = vmatprep.subr.bf16.mxu1 %v4417_v62  ;;  %v4508_v61 = vld [vmem:[%s5339_s9 + $0x730] ss:$8 sps:$4 sm:$0xff]   ;;  %v4513_v62 = vld [vmem:[%s5339_s9 + $0x344] ss:$8 sps:$4 sm:$0xff]  }
 0x143   : > { %3525 = vmatprep.subr.bf16.mxu0 %v4420_v63  ;;  %v4516_v63 = vld [vmem:[%s5339_s9 + $0x744] ss:$8 sps:$4 sm:$0xff]  }
 0x145   : > { %3354 = vmatpush1.bf16.msra.mxu1 %v4415_v0  ;;  %v4511_v0 = vld [vmem:[%s5339_s9 + $0x340] ss:$8 sps:$4 sm:$0xff]  }
 0x146   : > { %3526 = vmatpush1.bf16.msra.mxu0 %v4418_v1  ;;  %3355 = vmatprep.subr.bf16.mxu1 %v4423_v2  ;;  %v4514_v1 = vld [vmem:[%s5339_s9 + $0x740] ss:$8 sps:$4 sm:$0xff]   ;;  %v4519_v2 = vld [vmem:[%s5339_s9 + $0x354] ss:$8 sps:$4 sm:$0xff]  }
 0x147   : > { %3527 = vmatprep.subr.bf16.mxu0 %v4426_v3  ;;  %v4522_v3 = vld [vmem:[%s5339_s9 + $0x754] ss:$8 sps:$4 sm:$0xff]  }
 0x149   : > { %3356 = vmatpush1.bf16.msra.mxu1 %v4421_v4  ;;  %v4517_v4 = vld [vmem:[%s5339_s9 + $0x350] ss:$8 sps:$4 sm:$0xff]  }
 0x14a   : > { %3528 = vmatpush1.bf16.msra.mxu0 %v4424_v5  ;;  %3357 = vmatprep.subr.bf16.mxu1 %v4429_v6  ;;  %v4520_v5 = vld [vmem:[%s5339_s9 + $0x750] ss:$8 sps:$4 sm:$0xff]   ;;  %v4525_v6 = vld [vmem:[%s5339_s9 + $0x364] ss:$8 sps:$4 sm:$0xff]  }
 0x14b   : > { %3529 = vmatprep.subr.bf16.mxu0 %v4432_v7  ;;  %v4528_v7 = vld [vmem:[%s5339_s9 + $0x764] ss:$8 sps:$4 sm:$0xff]  }
 0x14d   : > { %3358 = vmatpush1.bf16.msra.mxu1 %v4427_v8  ;;  %v4523_v8 = vld [vmem:[%s5339_s9 + $0x360] ss:$8 sps:$4 sm:$0xff]  }
 0x14e   : > { %3530 = vmatpush1.bf16.msra.mxu0 %v4430_v9  ;;  %3359 = vmatprep.subr.bf16.mxu1 %v4435_v10  ;;  %v4526_v9 = vld [vmem:[%s5339_s9 + $0x760] ss:$8 sps:$4 sm:$0xff]   ;;  %v4531_v10 = vld [vmem:[%s5339_s9 + $0x374] ss:$8 sps:$4 sm:$0xff]  }
 0x14f   : > { %3531 = vmatprep.subr.bf16.mxu0 %v4438_v11  ;;  %v4534_v11 = vld [vmem:[%s5339_s9 + $0x774] ss:$8 sps:$4 sm:$0xff]  }
 0x151   : > { %3360 = vmatpush1.bf16.msra.mxu1 %v4433_v12  ;;  %v4529_v12 = vld [vmem:[%s5339_s9 + $0x370] ss:$8 sps:$4 sm:$0xff]  }
 0x152   : > { %3532 = vmatpush1.bf16.msra.mxu0 %v4436_v13  ;;  %3361 = vmatprep.subr.bf16.mxu1 %v4441_v14  ;;  %v4532_v13 = vld [vmem:[%s5339_s9 + $0x770] ss:$8 sps:$4 sm:$0xff]   ;;  %v4537_v14 = vld [vmem:[%s5339_s9 + $0x384] ss:$8 sps:$4 sm:$0xff]  }
 0x153   : > { %3533 = vmatprep.subr.bf16.mxu0 %v4444_v15  ;;  %v4540_v15 = vld [vmem:[%s5339_s9 + $0x784] ss:$8 sps:$4 sm:$0xff]  }
 0x155   : > { %3362 = vmatpush1.bf16.msra.mxu1 %v4439_v16  ;;  %v4535_v16 = vld [vmem:[%s5339_s9 + $0x380] ss:$8 sps:$4 sm:$0xff]  }
 0x156   : > { %3534 = vmatpush1.bf16.msra.mxu0 %v4442_v17  ;;  %3363 = vmatprep.subr.bf16.mxu1 %v4447_v18  ;;  %v4538_v17 = vld [vmem:[%s5339_s9 + $0x780] ss:$8 sps:$4 sm:$0xff]   ;;  %v4543_v18 = vld [vmem:[%s5339_s9 + $0x394] ss:$8 sps:$4 sm:$0xff]  }
 0x157   : > { %3535 = vmatprep.subr.bf16.mxu0 %v4450_v19  ;;  %v4546_v19 = vld [vmem:[%s5339_s9 + $0x794] ss:$8 sps:$4 sm:$0xff]  }
 0x159   : > { %3364 = vmatpush1.bf16.msra.mxu1 %v4445_v20  ;;  %v4541_v20 = vld [vmem:[%s5339_s9 + $0x390] ss:$8 sps:$4 sm:$0xff]  }
 0x15a   : > { %3536 = vmatpush1.bf16.msra.mxu0 %v4448_v21  ;;  %3365 = vmatprep.subr.bf16.mxu1 %v4453_v22  ;;  %v4544_v21 = vld [vmem:[%s5339_s9 + $0x790] ss:$8 sps:$4 sm:$0xff]   ;;  %v4549_v22 = vld [vmem:[%s5339_s9 + $0x3a4] ss:$8 sps:$4 sm:$0xff]  }
 0x15b   : > { %3537 = vmatprep.subr.bf16.mxu0 %v4456_v23  ;;  %v4552_v23 = vld [vmem:[%s5339_s9 + $0x7a4] ss:$8 sps:$4 sm:$0xff]  }
 0x15d   : > { %3366 = vmatpush1.bf16.msra.mxu1 %v4451_v24  ;;  %v4547_v24 = vld [vmem:[%s5339_s9 + $0x3a0] ss:$8 sps:$4 sm:$0xff]  }
 0x15e   : > { %3538 = vmatpush1.bf16.msra.mxu0 %v4454_v25  ;;  %3367 = vmatprep.subr.bf16.mxu1 %v4459_v26  ;;  %v4550_v25 = vld [vmem:[%s5339_s9 + $0x7a0] ss:$8 sps:$4 sm:$0xff]   ;;  %v4555_v26 = vld [vmem:[%s5339_s9 + $0x3b4] ss:$8 sps:$4 sm:$0xff]  }
 0x15f   : > { %3539 = vmatprep.subr.bf16.mxu0 %v4462_v27  ;;  %v4558_v27 = vld [vmem:[%s5339_s9 + $0x7b4] ss:$8 sps:$4 sm:$0xff]  }
 0x161   : > { %3368 = vmatpush1.bf16.msra.mxu1 %v4457_v28  ;;  %v4553_v28 = vld [vmem:[%s5339_s9 + $0x3b0] ss:$8 sps:$4 sm:$0xff]  }
 0x162   : > { %3540 = vmatpush1.bf16.msra.mxu0 %v4460_v29  ;;  %3369 = vmatprep.subr.bf16.mxu1 %v4465_v30  ;;  %v4556_v29 = vld [vmem:[%s5339_s9 + $0x7b0] ss:$8 sps:$4 sm:$0xff]   ;;  %v4561_v30 = vld [vmem:[%s5339_s9 + $0x3c4] ss:$8 sps:$4 sm:$0xff]  }
 0x163   : > { %3541 = vmatprep.subr.bf16.mxu0 %v4468_v31  ;;  %v4564_v31 = vld [vmem:[%s5339_s9 + $0x7c4] ss:$8 sps:$4 sm:$0xff]  }
 0x165   : > { %3370 = vmatpush1.bf16.msra.mxu1 %v4463_v32  ;;  %v4559_v32 = vld [vmem:[%s5339_s9 + $0x3c0] ss:$8 sps:$4 sm:$0xff]  }
 0x166   : > { %3542 = vmatpush1.bf16.msra.mxu0 %v4466_v33  ;;  %3371 = vmatprep.subr.bf16.mxu1 %v4471_v34  ;;  %v4562_v33 = vld [vmem:[%s5339_s9 + $0x7c0] ss:$8 sps:$4 sm:$0xff]   ;;  %v4567_v34 = vld [vmem:[%s5339_s9 + $0x3d4] ss:$8 sps:$4 sm:$0xff]  }
 0x167   : > { %3543 = vmatprep.subr.bf16.mxu0 %v4474_v35  ;;  %v4570_v35 = vld [vmem:[%s5339_s9 + $0x7d4] ss:$8 sps:$4 sm:$0xff]  }
 0x169   : > { %3372 = vmatpush1.bf16.msra.mxu1 %v4469_v36  ;;  %v4565_v36 = vld [vmem:[%s5339_s9 + $0x3d0] ss:$8 sps:$4 sm:$0xff]  }
 0x16a   : > { %3544 = vmatpush1.bf16.msra.mxu0 %v4472_v37  ;;  %3373 = vmatprep.subr.bf16.mxu1 %v4477_v38  ;;  %v4568_v37 = vld [vmem:[%s5339_s9 + $0x7d0] ss:$8 sps:$4 sm:$0xff]   ;;  %v4573_v38 = vld [vmem:[%s5339_s9 + $0x3e4] ss:$8 sps:$4 sm:$0xff]  }
 0x16b   : > { %3545 = vmatprep.subr.bf16.mxu0 %v4480_v39  ;;  %v4576_v39 = vld [vmem:[%s5339_s9 + $0x7e4] ss:$8 sps:$4 sm:$0xff]  }
 0x16d   : > { %3374 = vmatpush1.bf16.msra.mxu1 %v4475_v40  ;;  %v4571_v40 = vld [vmem:[%s5339_s9 + $0x3e0] ss:$8 sps:$4 sm:$0xff]  }
 0x16e   : > { %3546 = vmatpush1.bf16.msra.mxu0 %v4478_v41  ;;  %3386 = vmatprep.subr.bf16.mxu1 %v4486_v42  ;;  %v4574_v41 = vld [vmem:[%s5339_s9 + $0x7e0] ss:$8 sps:$4 sm:$0xff]   ;;  %v4579_v42 = vld [vmem:[%s5339_s9 + $0x3f4] ss:$8 sps:$4 sm:$0xff]  }
 0x16f   : > { %3558 = vmatprep.subr.bf16.mxu0 %v4492_v43  ;;  %v4582_v43 = vld [vmem:[%s5339_s9 + $0x7f4] ss:$8 sps:$4 sm:$0xff]  }
 0x170   : > { %3376 = vmatmul.mubr.bf16.vlgmr.msra.gmra.mrb[0].mxu1 %v4481_v44  ;;  %v4577_v44 = vld [vmem:[%s5339_s9 + $0x3f0] ss:$8 sps:$4 sm:$0xff]  }
 0x171   : > { %3548 = vmatmul.mubr.bf16.vlgmr.msra.gmra.mrb[0].mxu0 %v4487_v46  ;;  %3387 = vmatpush1.bf16.msra.mxu1 %v4484_v45  ;;  %v4580_v45 = vld [vmem:[%s5339_s9 + $0x7f0] ss:$8 sps:$4 sm:$0xff]   ;;  %v4591_v46 = vld [vmem:[%s5339_s9 + $0x804] ss:$8 sps:$4 sm:$0xff]  }
 0x172   : > { %3559 = vmatpush1.bf16.msra.mxu0 %v4490_v47  ;;  %3388 = vmatprep.subr.bf16.mxu1 %v4495_v48  ;;  %v4583_v47 = vld [vmem:[%s5704_s0 + $0x18] ss:$72 sps:$4 sm:$0xff]  }
 0x173   : > { %3560 = vmatprep.subr.bf16.mxu0 %v4498_v49  ;;  %3418 = vmatprep.mubr.bf16.mxu1 %v4585_v50  ;;  %v4586_v48 = vld [vmem:[%s5704_s0 + $0x38] ss:$72 sps:$4 sm:$0xff]   ;;  %v4639_v50 = vld [vmem:[%s5704_s0 + $0x44] ss:$72 sps:$4 sm:$0xff]  }
 0x174   : > { %3590 = vmatprep.mubr.bf16.mxu0 %v4588_v51  ;;  %v4589_v49 = vld [vmem:[%s5339_s9 + $0x800] ss:$8 sps:$4 sm:$0xff]   ;;  %v4594_v51 = vld [vmem:[%s5339_s9 + $0x814] ss:$8 sps:$4 sm:$0xff]  }
 0x175   : > { %3389 = vmatpush1.bf16.msra.mxu1 %v4493_v52  ;;  %v4592_v52 = vld [vmem:[%s5339_s9 + $0x810] ss:$8 sps:$4 sm:$0xff]  }
 0x176   : > { %3561 = vmatpush1.bf16.msra.mxu0 %v4496_v53  ;;  %3390 = vmatprep.subr.bf16.mxu1 %v4501_v54  ;;  %v4597_v53 = vld [vmem:[%s5339_s9 + $0x824] ss:$8 sps:$4 sm:$0xff]   ;;  %v4595_v54 = vld [vmem:[%s5339_s9 + $0x820] ss:$8 sps:$4 sm:$0xff]  }
 0x177   : > { %3562 = vmatprep.subr.bf16.mxu0 %v4504_v55  ;;  %v4600_v55 = vld [vmem:[%s5339_s9 + $0x834] ss:$8 sps:$4 sm:$0xff]  }
 0x179   : > { %3391 = vmatpush1.bf16.msra.mxu1 %v4499_v56  ;;  %v4598_v56 = vld [vmem:[%s5339_s9 + $0x830] ss:$8 sps:$4 sm:$0xff]  }
 0x17a   : > { %3563 = vmatpush1.bf16.msra.mxu0 %v4502_v57  ;;  %3392 = vmatprep.subr.bf16.mxu1 %v4507_v58  ;;  %v4603_v57 = vld [vmem:[%s5339_s9 + $0x844] ss:$8 sps:$4 sm:$0xff]   ;;  %v4601_v58 = vld [vmem:[%s5339_s9 + $0x840] ss:$8 sps:$4 sm:$0xff]  }
 0x17b   : > { %3564 = vmatprep.subr.bf16.mxu0 %v4510_v59  ;;  %v4606_v59 = vld [vmem:[%s5339_s9 + $0x854] ss:$8 sps:$4 sm:$0xff]  }
 0x17d   : > { %3393 = vmatpush1.bf16.msra.mxu1 %v4505_v60  ;;  %v4604_v60 = vld [vmem:[%s5339_s9 + $0x850] ss:$8 sps:$4 sm:$0xff]  }
 0x17e   : > { %3565 = vmatpush1.bf16.msra.mxu0 %v4508_v61  ;;  %3394 = vmatprep.subr.bf16.mxu1 %v4513_v62  ;;  %v4609_v61 = vld [vmem:[%s5339_s9 + $0x864] ss:$8 sps:$4 sm:$0xff]   ;;  %v4607_v62 = vld [vmem:[%s5339_s9 + $0x860] ss:$8 sps:$4 sm:$0xff]  }
 0x17f   : > { %3566 = vmatprep.subr.bf16.mxu0 %v4516_v63  ;;  %v4612_v63 = vld [vmem:[%s5339_s9 + $0x874] ss:$8 sps:$4 sm:$0xff]  }
 0x181   : > { %3395 = vmatpush1.bf16.msra.mxu1 %v4511_v0  ;;  %v4610_v0 = vld [vmem:[%s5339_s9 + $0x870] ss:$8 sps:$4 sm:$0xff]  }
 0x182   : > { %3567 = vmatpush1.bf16.msra.mxu0 %v4514_v1  ;;  %3396 = vmatprep.subr.bf16.mxu1 %v4519_v2  ;;  %v4615_v1 = vld [vmem:[%s5339_s9 + $0x884] ss:$8 sps:$4 sm:$0xff]   ;;  %v4613_v2 = vld [vmem:[%s5339_s9 + $0x880] ss:$8 sps:$4 sm:$0xff]  }
 0x183   : > { %3568 = vmatprep.subr.bf16.mxu0 %v4522_v3  ;;  %v4618_v3 = vld [vmem:[%s5339_s9 + $0x894] ss:$8 sps:$4 sm:$0xff]  }
 0x185   : > { %3397 = vmatpush1.bf16.msra.mxu1 %v4517_v4  ;;  %v4616_v4 = vld [vmem:[%s5339_s9 + $0x890] ss:$8 sps:$4 sm:$0xff]  }
 0x186   : > { %3569 = vmatpush1.bf16.msra.mxu0 %v4520_v5  ;;  %3398 = vmatprep.subr.bf16.mxu1 %v4525_v6  ;;  %v4621_v5 = vld [vmem:[%s5339_s9 + $0x8a4] ss:$8 sps:$4 sm:$0xff]   ;;  %v4619_v6 = vld [vmem:[%s5339_s9 + $0x8a0] ss:$8 sps:$4 sm:$0xff]  }
 0x187   : > { %3570 = vmatprep.subr.bf16.mxu0 %v4528_v7  ;;  %v4624_v7 = vld [vmem:[%s5339_s9 + $0x8b4] ss:$8 sps:$4 sm:$0xff]  }
 0x189   : > { %3399 = vmatpush1.bf16.msra.mxu1 %v4523_v8  ;;  %v4622_v8 = vld [vmem:[%s5339_s9 + $0x8b0] ss:$8 sps:$4 sm:$0xff]  }
 0x18a   : > { %3571 = vmatpush1.bf16.msra.mxu0 %v4526_v9  ;;  %3400 = vmatprep.subr.bf16.mxu1 %v4531_v10  ;;  %v4627_v9 = vld [vmem:[%s5339_s9 + $0x8c4] ss:$8 sps:$4 sm:$0xff]   ;;  %v4625_v10 = vld [vmem:[%s5339_s9 + $0x8c0] ss:$8 sps:$4 sm:$0xff]  }
 0x18b   : > { %3572 = vmatprep.subr.bf16.mxu0 %v4534_v11  ;;  %v4630_v11 = vld [vmem:[%s5339_s9 + $0x8d4] ss:$8 sps:$4 sm:$0xff]  }
 0x18d   : > { %3401 = vmatpush1.bf16.msra.mxu1 %v4529_v12  ;;  %v4628_v12 = vld [vmem:[%s5339_s9 + $0x8d0] ss:$8 sps:$4 sm:$0xff]  }
 0x18e   : > { %3573 = vmatpush1.bf16.msra.mxu0 %v4532_v13  ;;  %3402 = vmatprep.subr.bf16.mxu1 %v4537_v14  ;;  %v4633_v13 = vld [vmem:[%s5339_s9 + $0x8e4] ss:$8 sps:$4 sm:$0xff]   ;;  %v4631_v14 = vld [vmem:[%s5339_s9 + $0x8e0] ss:$8 sps:$4 sm:$0xff]  }
 0x18f   : > { %3574 = vmatprep.subr.bf16.mxu0 %v4540_v15  ;;  %v4636_v15 = vld [vmem:[%s5339_s9 + $0x8f4] ss:$8 sps:$4 sm:$0xff]  }
 0x191   : > { %3403 = vmatpush1.bf16.msra.mxu1 %v4535_v16  ;;  %v4634_v16 = vld [vmem:[%s5339_s9 + $0x8f0] ss:$8 sps:$4 sm:$0xff]   ;;  %s1405_s9 = scalar_lea.vmem %s5706_s2, %s5716_s7 }
 0x192   : > { %3575 = vmatpush1.bf16.msra.mxu0 %v4538_v17  ;;  %3404 = vmatprep.subr.bf16.mxu1 %v4543_v18  ;;  %v4637_v17 = vld [vmem:[%s5704_s0 + $0x40] ss:$72 sps:$4 sm:$0xff]  }
 0x193   : > { %3576 = vmatprep.subr.bf16.mxu0 %v4546_v19 }
 0x195   : > { %3405 = vmatpush1.bf16.msra.mxu1 %v4541_v20 }
 0x196   : > { %3577 = vmatpush1.bf16.msra.mxu0 %v4544_v21  ;;  %3406 = vmatprep.subr.bf16.mxu1 %v4549_v22  ;;  %v1717_v22 = vlaneseq }
 0x197   : > { %3578 = vmatprep.subr.bf16.mxu0 %v4552_v23 }
 0x198   : > { %v1718_v23 = vshrl.u32 %v1717_v22, 7 }
 0x199   : > { %3407 = vmatpush1.bf16.msra.mxu1 %v4547_v24 }
 0x19a   : > { %3579 = vmatpush1.bf16.msra.mxu0 %v4550_v25  ;;  %3408 = vmatprep.subr.bf16.mxu1 %v4555_v26  ;;  %v1719_v24 = vsub.s32 0, %v1718_v23  ;;  %v1715_v25 = vld [vmem:[%s1405_s9] sm:$0x3]  ;;  %v1723_v26 = vsub.s32 1, %v1718_v23 }
 0x19b   : > { %3580 = vmatprep.subr.bf16.mxu0 %v4558_v27 }
 0x19c   : > { %v1720_v27 = vrot.slane %v1715_v25, %v1719_v24 }
 0x19d   : > { %3409 = vmatpush1.bf16.msra.mxu1 %v4553_v28  ;;  %v1724_v28 = vrot.slane %v1715_v25, %v1723_v26 }
 0x19e   : > { %3581 = vmatpush1.bf16.msra.mxu0 %v4556_v29  ;;  %3410 = vmatprep.subr.bf16.mxu1 %v4561_v30 }
 0x19f   : > { %3582 = vmatprep.subr.bf16.mxu0 %v4564_v31 }
 0x1a1   : > { %3411 = vmatpush1.bf16.msra.mxu1 %v4559_v32 }
 0x1a2   : > { %3583 = vmatpush1.bf16.msra.mxu0 %v4562_v33  ;;  %3412 = vmatprep.subr.bf16.mxu1 %v4567_v34 }
 0x1a3   : > { %3584 = vmatprep.subr.bf16.mxu0 %v4570_v35 }
 0x1a5   : > { %3413 = vmatpush1.bf16.msra.mxu1 %v4565_v36 }
 0x1a6   : > { %3585 = vmatpush1.bf16.msra.mxu0 %v4568_v37  ;;  %3414 = vmatprep.subr.bf16.mxu1 %v4573_v38 }
 0x1a7   : > { %3586 = vmatprep.subr.bf16.mxu0 %v4576_v39 }
 0x1a9   : > { %3415 = vmatpush1.bf16.msra.mxu1 %v4571_v40 }
 0x1aa   : > { %3587 = vmatpush1.bf16.msra.mxu0 %v4574_v41  ;;  %3416 = vmatprep.subr.bf16.mxu1 %v4579_v42 }
 0x1ab   : > { %3588 = vmatprep.subr.bf16.mxu0 %v4582_v43 }
 0x1ad   : > { %3417 = vmatpush1.bf16.msra.mxu1 %v4577_v44 }
 0x1ae   : > { %3589 = vmatpush1.bf16.msra.mxu0 %v4580_v45 }
 0x1af   : > { %3601 = vmatprep.subr.bf16.mxu0 %v4591_v46 }
 0x1b0   : > { %3419 = vmatmul.mubr.bf16.vlgmr.msra.gmra.mrb[0].mxu1 %v4583_v47 }
 0x1b1   : > { %3591 = vmatmul.mubr.bf16.vlgmr.msra.gmra.mrb[0].mxu0 %v4586_v48 }
 0x1b2   : > { %3602 = vmatpush1.bf16.msra.mxu0 %v4589_v49  ;;  %3633 = vmatprep.mubr.bf16.mxu0 %v4639_v50 }
 0x1b3   : > { %3603 = vmatprep.subr.bf16.mxu0 %v4594_v51 }
 0x1b6   : > { %3604 = vmatpush1.bf16.msra.mxu0 %v4592_v52 }
 0x1b7   : > { %3605 = vmatprep.subr.bf16.mxu0 %v4597_v53 }
 0x1ba   : > { %3606 = vmatpush1.bf16.msra.mxu0 %v4595_v54 }
 0x1bb   : > { %3607 = vmatprep.subr.bf16.mxu0 %v4600_v55 }
 0x1be   : > { %3608 = vmatpush1.bf16.msra.mxu0 %v4598_v56 }
 0x1bf   : > { %3609 = vmatprep.subr.bf16.mxu0 %v4603_v57 }
 0x1c2   : > { %3610 = vmatpush1.bf16.msra.mxu0 %v4601_v58 }
 0x1c3   : > { %3611 = vmatprep.subr.bf16.mxu0 %v4606_v59 }
 0x1c6   : > { %3612 = vmatpush1.bf16.msra.mxu0 %v4604_v60 }
 0x1c7   : > { %3613 = vmatprep.subr.bf16.mxu0 %v4609_v61 }
 0x1ca   : > { %3614 = vmatpush1.bf16.msra.mxu0 %v4607_v62 }
 0x1cb   : > { %3615 = vmatprep.subr.bf16.mxu0 %v4612_v63 }
 0x1ce   : > { %3616 = vmatpush1.bf16.msra.mxu0 %v4610_v0 }
 0x1cf   : > { %3617 = vmatprep.subr.bf16.mxu0 %v4615_v1 }
 0x1d2   : > { %3618 = vmatpush1.bf16.msra.mxu0 %v4613_v2 }
 0x1d3   : > { %3619 = vmatprep.subr.bf16.mxu0 %v4618_v3 }
 0x1d6   : > { %3620 = vmatpush1.bf16.msra.mxu0 %v4616_v4 }
 0x1d7   : > { %3621 = vmatprep.subr.bf16.mxu0 %v4621_v5 }
 0x1da   : > { %3622 = vmatpush1.bf16.msra.mxu0 %v4619_v6 }
 0x1db   : > { %3623 = vmatprep.subr.bf16.mxu0 %v4624_v7 }
 0x1de   : > { %3624 = vmatpush1.bf16.msra.mxu0 %v4622_v8 }
 0x1df   : > { %3625 = vmatprep.subr.bf16.mxu0 %v4627_v9 }
 0x1e2   : > { %3626 = vmatpush1.bf16.msra.mxu0 %v4625_v10 }
 0x1e3   : > { %3627 = vmatprep.subr.bf16.mxu0 %v4630_v11 }
 0x1e6   : > { %3628 = vmatpush1.bf16.msra.mxu0 %v4628_v12 }
 0x1e7   : > { %3629 = vmatprep.subr.bf16.mxu0 %v4633_v13 }
 0x1ea   : > { %3630 = vmatpush1.bf16.msra.mxu0 %v4631_v14 }
 0x1eb   : > { %3631 = vmatprep.subr.bf16.mxu0 %v4636_v15 }
 0x1ee   : > { %3632 = vmatpush1.bf16.msra.mxu0 %v4634_v16 }
 0x1f1   : > { %3634 = vmatmul.mubr.bf16.vlgmr.msra.gmra.mrb[0].mxu0 %v4637_v17 }
 0x283   : > { %v3420_v18 = vpop.f32.mrb[0].mxu1 }
 0x284   : > { %v3422_v19 = vpop.f32.mrb[1].mxu1  ;;  %v4103_v29 = vadd.f32 %v3420_v18, %v1720_v27 }
 0x285   : > { %v3424_v20 = vpop.f32.mrb[2].mxu1  ;;  %v4105_v30 = vadd.f32 %v3422_v19, %v1724_v28 }
 0x286   : > { %v3426_v21 = vpop.f32.mrb[3].mxu1  ;;  %v4107_v32 = vadd.f32 %v3424_v20, %v1720_v27 }
 0x287   : > { %v4109_v35 = vadd.f32 %v3426_v21, %v1724_v28 }
 0x2c4   : > { %v3635_v31 = vpop.f32.mrb[0].mxu0 }
 0x2c5   : > { %v4104_v33 = vadd.f32 %v4103_v29, %v3635_v31  ;;  %v3637_v34 = vpop.f32.mrb[1].mxu0 }
 0x2c6   : > { %v4106_v36 = vadd.f32 %v4105_v30, %v3637_v34  ;;  %v3639_v37 = vpop.f32.mrb[2].mxu0  ;;  %3658 = sbr.rel (!%p4735_p6) target bundleno = 725 (0x2d5), region = 74 }
 0x2c7   : > { %v3644_v38 = vmax.f32 %v4104_v33, 0.0  ;;  %v4108_v39 = vadd.f32 %v4107_v32, %v3639_v37  ;;  %v3641_v40 = vpop.f32.mrb[3].mxu0 }
 0x2c8   : > { %v3645_v41 = vmax.f32 %v4106_v36, 0.0  ;;  %v4110_v42 = vadd.f32 %v4109_v35, %v3641_v40 }
 0x2c9   : > { %3648 = vst [vmem:[%s1393_s18] sm:$0xff] %v3644_v38  ;;  %v3646_v43 = vmax.f32 %v4108_v39, 0.0 }
 0x2ca   : > { %3649 = vst [vmem:[%s1393_s18 + $0x8] sm:$0xff] %v3645_v41  ;;  %v3647_v44 = vmax.f32 %v4110_v42, 0.0 }
 0x2cb   : > { %3650 = vst [vmem:[%s1393_s18 + $0x10] sm:$0xff] %v3646_v43 }
 0x2cc   : > { %3651 = vst [vmem:[%s1393_s18 + $0x18] sm:$0xff] %v3647_v44 }
 0x2d0   : > { %v3677_v45 = vld [vmem:[%s1393_s18] sm:$0xff] }
 0x2d1   : > { %v3679_v46 = vld [vmem:[%s1393_s18 + $0x8] sm:$0xff]  ;;  %3678 = vst [vmem:[%s3664_s20] sm:$0xff] %v3677_v45 }
 0x2d2   : > { %v3681_v47 = vld [vmem:[%s1393_s18 + $0x10] sm:$0xff]  ;;  %3680 = vst [vmem:[%s3664_s20 + $0x8] sm:$0xff] %v3679_v46 }
 0x2d3   : > { %v3683_v48 = vld [vmem:[%s1393_s18 + $0x18] sm:$0xff]  ;;  %3682 = vst [vmem:[%s3664_s20 + $0x90] sm:$0xff] %v3681_v47 }
 0x2d4   : > { %3684 = vst [vmem:[%s3664_s20 + $0x98] sm:$0xff] %v3683_v48 }
 0x2d5 PF: > { %s13_s16 = sadd.s32 1, %s4678_s16   ;;  %s5709_s12 = smov %s4666_s13 }
 0x2d6   : > { %p10_p12 = scmp.ge.s32.totalorder %s13_s16, 11   ;;  %s5710_s13 = smov %s4740_s22 }
 0x2d7   : > { %s5711_s14 = smov %s4674_s15  ;;  %s5712_s15 = smov %s5714_s17 }
 0x2d8   :  { %12 = sbr.rel (!%p10_p12) target bundleno = 3 (0x3), region = 134 }

// kernel: vae_forward.19
= control target key start
LH: loop header
LB: loop body
LE: loop exit
PB: predicated region body
PF: predicated region fallthrough
CT: control target
= control target key end

     0   :  { %s1013_s12 = smov 0   ;;  %s1015_s13 = smov 0   ;;  %s1297_s0 = inlined_call_operand.vmem [shape: bf16[128,128], index: 0, kind: input, shape index: {}]   ;;  %s1298_s1 = inlined_call_operand.vmem [shape: bf16[128,1024], index: 1, kind: input, shape index: {}]   ;;  %s1299_s2 = inlined_call_operand.vmem [shape: f32[1,1024], index: 2, kind: input, shape index: {}]   ;;  %s1300_s3 = inlined_call_operand.vmem [shape: f32[128,1024], index: 3, kind: output, shape index: {}]  }
   0x1   :  { %s1017_s14 = smov 0   ;;  %s1019_s15 = smov 0  }
   0x2   :  { %s1021_s16 = smov 0  }
   0x3 LB: > { %s22_s17 = sadd.s32 1, %s986_s15  ;;  %s820_s18 = sadd.s32 4294967295, %s990_s16   ;;  %s990_s16 = sphi %s1021_s16, %s13_s16   ;;  %s986_s15 = sphi %s1019_s15, %s1305_s15   ;;  %s982_s14 = sphi %s1017_s14, %s1304_s14   ;;  %s978_s13 = sphi %s1015_s13, %s1303_s13   ;;  %s974_s12 = sphi %s1013_s12, %s1302_s12  }
   0x4   : > { %p23_p0 = scmp.ge.s32.totalorder %s22_s17, 4  ;;  %p65_p1 = scmp.ne.s32.totalorder %s978_s13, %s974_s12 }
   0x5   : > { %p66_p2 = scmp.eq.s32.totalorder %s990_s16, 0  ;;  %p123_p4 = scmp.eq.s32.totalorder %s820_s18, 3 }
   0x6   : > { %s1307_s17 = smov (%p23_p0, %s22_s17), 0  ;;  %s58_s20 = sadd.s32 1, %s978_s13 }
   0x7   : > { %p67_p3 = por %p66_p2, %p65_p1  ;;  %s55_s19 = ssub.s32 %s986_s15, %s1307_s17 }
   0x8   : > { %p56_p5 = scmp.eq.s32.totalorder %s55_s19, 0  ;;  %p1048_p6 = por %p123_p4, %p65_p1 }
   0x9   : > { %p824_p7 = scmp.ge.s32.totalorder %s990_s16, 4 }
   0xa   : > { %s1053_s22 = scalar_select %p56_p5, %s978_s13, %s58_s20  }
   0xb   : > { %154 = sbr.rel (%p824_p7) target bundleno = 38 (0x26), region = 20 }
  0x12   : > { %157 = sbr.rel (!%p67_p3) target bundleno = 38 (0x26), region = 24  ;;  %s159_s23 = sand.u32 (%p67_p3), 1, %s978_s13  }
  0x13   : > { %s861_s24 = sshll.u32 (%p67_p3), %s986_s15, 3  ;;  %s825_s25 = sshll.u32 (%p67_p3), %s159_s23, 7 }
  0x14   : > { %s1061_s28 = scalar_lea.vmem (%p67_p3), %s1298_s1, %s861_s24  ;;  %s161_s29 = scalar_lea.vmem (%p67_p3), [#allocation2], %s825_s25 }
  0x15   : > { %v222_v0 = vld [vmem:[%s1061_s28] sm:$0xff] (%p67_p3) }
  0x16   : > { %v224_v1 = vld [vmem:[%s1061_s28 + $0x20] sm:$0xff] (%p67_p3)  ;;  %223 = vst [vmem:[%s161_s29] sm:$0xff] (%p67_p3), %v222_v0 }
  0x17   : > { %v226_v2 = vld [vmem:[%s1061_s28 + $0x40] sm:$0xff] (%p67_p3)  ;;  %225 = vst [vmem:[%s161_s29 + $0x8] sm:$0xff] (%p67_p3), %v224_v1 }
  0x18   : > { %227 = vst [vmem:[%s161_s29 + $0x10] sm:$0xff] (%p67_p3), %v226_v2  ;;  %v228_v3 = vld [vmem:[%s1061_s28 + $0x60] sm:$0xff] (%p67_p3) }
  0x19   : > { %v230_v4 = vld [vmem:[%s1061_s28 + $0x80] sm:$0xff]  ;;  %229 = vst [vmem:[%s161_s29 + $0x18] sm:$0xff] %v228_v3 }
  0x1a   : > { %v232_v5 = vld [vmem:[%s1061_s28 + $0xa0] sm:$0xff]  ;;  %231 = vst [vmem:[%s161_s29 + $0x20] sm:$0xff] %v230_v4 }
  0x1b   : > { %233 = vst [vmem:[%s161_s29 + $0x28] sm:$0xff] %v232_v5  ;;  %v234_v6 = vld [vmem:[%s1061_s28 + $0xc0] sm:$0xff] }
  0x1c   : > { %v236_v7 = vld [vmem:[%s1061_s28 + $0xe0] sm:$0xff]  ;;  %235 = vst [vmem:[%s161_s29 + $0x30] sm:$0xff] %v234_v6 }
  0x1d   : > { %v238_v8 = vld [vmem:[%s1061_s28 + $0x100] sm:$0xff]  ;;  %237 = vst [vmem:[%s161_s29 + $0x38] sm:$0xff] %v236_v7 }
  0x1e   : > { %239 = vst [vmem:[%s161_s29 + $0x40] sm:$0xff] %v238_v8  ;;  %v240_v9 = vld [vmem:[%s1061_s28 + $0x120] sm:$0xff] }
  0x1f   : > { %v242_v10 = vld [vmem:[%s1061_s28 + $0x140] sm:$0xff]  ;;  %241 = vst [vmem:[%s161_s29 + $0x48] sm:$0xff] %v240_v9 }
  0x20   : > { %v244_v11 = vld [vmem:[%s1061_s28 + $0x160] sm:$0xff]  ;;  %243 = vst [vmem:[%s161_s29 + $0x50] sm:$0xff] %v242_v10 }
  0x21   : > { %245 = vst [vmem:[%s161_s29 + $0x58] sm:$0xff] %v244_v11  ;;  %v246_v12 = vld [vmem:[%s1061_s28 + $0x180] sm:$0xff] }
  0x22   : > { %v248_v13 = vld [vmem:[%s1061_s28 + $0x1a0] sm:$0xff]  ;;  %247 = vst [vmem:[%s161_s29 + $0x60] sm:$0xff] %v246_v12 }
  0x23   : > { %v250_v14 = vld [vmem:[%s1061_s28 + $0x1c0] sm:$0xff]  ;;  %249 = vst [vmem:[%s161_s29 + $0x68] sm:$0xff] %v248_v13 }
  0x24   : > { %251 = vst [vmem:[%s161_s29 + $0x70] sm:$0xff] %v250_v14  ;;  %v252_v15 = vld [vmem:[%s1061_s28 + $0x1e0] sm:$0xff] }
  0x25   : > { %253 = vst [vmem:[%s161_s29 + $0x78] sm:$0xff] %v252_v15 }
  0x26 PF: > { %p828_p8 = scmp.ge.s32.totalorder %s990_s16, 1  ;;  %p266_p9 = scmp.lt.s32.totalorder %s990_s16, 5 }
  0x28   : > { %p267_p10 = pnand %p828_p8, %p266_p9 }
  0x29   : > { %s273_s30 = sand.u32 (!%p267_p10), 1, %s974_s12   ;;  %v992_v16 = vmov (!%p267_p10), 0   ;;  %v944_v33 = vld [vmem:[%s1297_s0] sm:$0xff] (!%p267_p10)   ;;  %v946_v35 = vld [vmem:[%s1297_s0 + $0x8] sm:$0xff] (!%p267_p10)   ;;  %v948_v37 = vld [vmem:[%s1297_s0 + $0x10] sm:$0xff] (!%p267_p10)   ;;  %v353_v41 = vlaneseq (!%p267_p10) }
  0x2a   : > { %270 = sbr.rel (%p267_p10) target bundleno = 328 (0x148), region = 66  ;;  %s829_s4 = sshll.u32 (!%p267_p10), %s273_s30, 7  ;;  %523 = vmatprep.mubr.bf16.mxu0 (!%p267_p10), %v992_v16  ;;  %563 = vmatprep.mubr.bf16.mxu1 (!%p267_p10), %v992_v16  ;;  %v945_v34 = vld [vmem:[%s1297_s0 + $0x20] sm:$0xff] (!%p267_p10)   ;;  %v947_v36 = vld [vmem:[%s1297_s0 + $0x28] sm:$0xff] (!%p267_p10)   ;;  %v949_v38 = vld [vmem:[%s1297_s0 + $0x30] sm:$0xff] (!%p267_p10)  }
  0x2b   : > { %s1086_s5 = scalar_lea.vmem (!%p267_p10), [#allocation2], %s829_s4  ;;  %v950_v39 = vld [vmem:[%s1297_s0 + $0x18] sm:$0xff] (!%p267_p10)   ;;  %s831_s4 = sshll.u32 (!%p267_p10), %s982_s14, 1  ;;  %v354_v42 = vshrl.u32 (!%p267_p10), %v353_v41, 7 }
  0x2c   : > { %v920_v17 = vld [vmem:[%s1086_s5 + $0x4] ss:$8 sps:$4 sm:$0xff] (!%p267_p10)   ;;  %v922_v18 = vld [vmem:[%s1086_s5] ss:$8 sps:$4 sm:$0xff] (!%p267_p10)   ;;  %v923_v19 = vld [vmem:[%s1086_s5 + $0x14] ss:$8 sps:$4 sm:$0xff] (!%p267_p10)  }
  0x2d   : > { %491 = vmatprep.subr.bf16.mxu0 (!%p267_p10), %v920_v17  ;;  %863 = vmatprep.subr.bf16.mxu1 (!%p267_p10), %v920_v17  ;;  %v925_v20 = vld [vmem:[%s1086_s5 + $0x10] ss:$8 sps:$4 sm:$0xff] (!%p267_p10)   ;;  %v926_v21 = vld [vmem:[%s1086_s5 + $0x24] ss:$8 sps:$4 sm:$0xff] (!%p267_p10)   ;;  %v928_v22 = vld [vmem:[%s1086_s5 + $0x20] ss:$8 sps:$4 sm:$0xff] (!%p267_p10)  }
  0x2e   : > { %492 = vmatpush1.bf16.msra.mxu0 (!%p267_p10), %v922_v18  ;;  %871 = vmatpush1.bf16.msra.mxu1 (!%p267_p10), %v922_v18  ;;  %v929_v23 = vld [vmem:[%s1086_s5 + $0x34] ss:$8 sps:$4 sm:$0xff] (!%p267_p10)   ;;  %v931_v24 = vld [vmem:[%s1086_s5 + $0x30] ss:$8 sps:$4 sm:$0xff] (!%p267_p10)   ;;  %v932_v25 = vld [vmem:[%s1086_s5 + $0x44] ss:$8 sps:$4 sm:$0xff] (!%p267_p10)  }
  0x2f   : > { %493 = vmatprep.subr.bf16.mxu0 (!%p267_p10), %v923_v19  ;;  %864 = vmatprep.subr.bf16.mxu1 (!%p267_p10), %v923_v19  ;;  %v934_v26 = vld [vmem:[%s1086_s5 + $0x40] ss:$8 sps:$4 sm:$0xff] (!%p267_p10)   ;;  %v935_v27 = vld [vmem:[%s1086_s5 + $0x54] ss:$8 sps:$4 sm:$0xff] (!%p267_p10)   ;;  %v937_v28 = vld [vmem:[%s1086_s5 + $0x50] ss:$8 sps:$4 sm:$0xff] (!%p267_p10)  }
  0x30   : > { %v938_v29 = vld [vmem:[%s1086_s5 + $0x64] ss:$8 sps:$4 sm:$0xff] (!%p267_p10)   ;;  %v940_v30 = vld [vmem:[%s1086_s5 + $0x60] ss:$8 sps:$4 sm:$0xff] (!%p267_p10)   ;;  %v941_v31 = vld [vmem:[%s1086_s5 + $0x74] ss:$8 sps:$4 sm:$0xff] (!%p267_p10)  }
  0x31   : > { %v943_v32 = vld [vmem:[%s1086_s5 + $0x70] ss:$8 sps:$4 sm:$0xff]   ;;  %p312_p11 = scmp.lt.s32.totalorder %s831_s4, 7  ;;  %v355_v43 = vsub.s32 0, %v354_v42  ;;  %v359_v45 = vsub.s32 1, %v354_v42  ;;  %s830_s8 = sshll.u32 %s273_s30, 8 }
  0x32   : > { %494 = vmatpush1.bf16.msra.mxu0 %v925_v20  ;;  %872 = vmatpush1.bf16.msra.mxu1 %v925_v20  ;;  %v951_v40 = vld [vmem:[%s1297_s0 + $0x38] sm:$0xff]   ;;  %s1148_s12 = scalar_lea.vmem [#allocation3], %s830_s8  ;;  %s862_s30 = sshll.u32 (%p1048_p6), %s982_s14, 4 }
  0x33   : > { %495 = vmatprep.subr.bf16.mxu0 %v926_v21  ;;  %865 = vmatprep.subr.bf16.mxu1 %v926_v21  ;;  %s1309_s4 = smov (!%p312_p11, %s831_s4), 7  ;;  %s1219_s11 = scalar_lea.vmem (%p1048_p6), %s1300_s3, %s862_s30 }
  0x34   : > { %s314_s7 = scalar_lea.vmem %s1299_s2, %s1309_s4 }
  0x35   : > { %v351_v44 = vld [vmem:[%s314_s7] sm:$0x3] }
  0x36   : > { %496 = vmatpush1.bf16.msra.mxu0 %v928_v22  ;;  %873 = vmatpush1.bf16.msra.mxu1 %v928_v22  ;;  %v1140_v46 = vrot.slane %v351_v44, %v355_v43  ;;  %v1142_v47 = vrot.slane %v351_v44, %v359_v45 }
  0x37   : > { %497 = vmatprep.subr.bf16.mxu0 %v929_v23  ;;  %866 = vmatprep.subr.bf16.mxu1 %v929_v23 }
  0x3a   : > { %498 = vmatpush1.bf16.msra.mxu0 %v931_v24  ;;  %874 = vmatpush1.bf16.msra.mxu1 %v931_v24 }
  0x3b   : > { %499 = vmatprep.subr.bf16.mxu0 %v932_v25  ;;  %867 = vmatprep.subr.bf16.mxu1 %v932_v25 }
  0x3e   : > { %500 = vmatpush1.bf16.msra.mxu0 %v934_v26  ;;  %875 = vmatpush1.bf16.msra.mxu1 %v934_v26 }
  0x3f   : > { %501 = vmatprep.subr.bf16.mxu0 %v935_v27  ;;  %868 = vmatprep.subr.bf16.mxu1 %v935_v27 }
  0x42   : > { %502 = vmatpush1.bf16.msra.mxu0 %v937_v28  ;;  %876 = vmatpush1.bf16.msra.mxu1 %v937_v28 }
  0x43   : > { %503 = vmatprep.subr.bf16.mxu0 %v938_v29  ;;  %869 = vmatprep.subr.bf16.mxu1 %v938_v29 }
  0x46   : > { %504 = vmatpush1.bf16.msra.mxu0 %v940_v30  ;;  %877 = vmatpush1.bf16.msra.mxu1 %v940_v30 }
  0x47   : > { %505 = vmatprep.subr.bf16.mxu0 %v941_v31  ;;  %870 = vmatprep.subr.bf16.mxu1 %v941_v31 }
  0x4a   : > { %506 = vmatpush1.bf16.msra.mxu0 %v943_v32  ;;  %878 = vmatpush1.bf16.msra.mxu1 %v943_v32 }
  0x4d   : > { %524 = vmatmul.mubr.bf16.vlgmr.msra.gmra.mrb[0].mxu0 %v944_v33  ;;  %564 = vmatmul.mubr.bf16.vlgmr.msra.gmra.mrb[0].mxu1 %v945_v34 }
  0x4e   : > { %533 = vmatprep.mubr.bf16.mxu0 %v992_v16  ;;  %573 = vmatprep.mubr.bf16.mxu1 %v992_v16 }
  0x55   : > { %534 = vmatmul.mubr.bf16.gmra.mrb[4].mxu0 %v946_v35  ;;  %574 = vmatmul.mubr.bf16.gmra.mrb[4].mxu1 %v947_v36 }
  0x56   : > { %543 = vmatprep.mubr.bf16.mxu0 %v992_v16  ;;  %583 = vmatprep.mubr.bf16.mxu1 %v992_v16 }
  0x5d   : > { %544 = vmatmul.mubr.bf16.gmra.mrb[8].mxu0 %v948_v37  ;;  %584 = vmatmul.mubr.bf16.gmra.mrb[8].mxu1 %v949_v38 }
  0x5e   : > { %553 = vmatprep.mubr.bf16.mxu0 %v992_v16  ;;  %593 = vmatprep.mubr.bf16.mxu1 %v992_v16 }
  0x65   : > { %554 = vmatmul.mubr.bf16.gmra.mrb[12].mxu0 %v950_v39  ;;  %594 = vmatmul.mubr.bf16.gmra.mrb[12].mxu1 %v951_v40 }
 0x120   : > { %v525_v48 = vpop.f32.mrb[0].mxu0  ;;  %v565_v49 = vpop.f32.mrb[0].mxu1 }
 0x121   : > { %v526_v50 = vadd.f32 %v525_v48, %v1140_v46  ;;  %v566_v51 = vadd.f32 %v565_v49, %v1140_v46  ;;  %v527_v52 = vpop.f32.mrb[1].mxu0  ;;  %v567_v53 = vpop.f32.mrb[1].mxu1 }
 0x122   : > { %v528_v54 = vadd.f32 %v527_v52, %v1142_v47  ;;  %v568_v55 = vadd.f32 %v567_v53, %v1142_v47  ;;  %v529_v56 = vpop.f32.mrb[2].mxu0  ;;  %v569_v57 = vpop.f32.mrb[2].mxu1 }
 0x123   : > { %604 = vst [vmem:[%s1148_s12] sm:$0xff] %v526_v50  ;;  %620 = vst [vmem:[%s1148_s12 + $0x80] sm:$0xff] %v566_v51  ;;  %v530_v58 = vadd.f32 %v529_v56, %v1140_v46  ;;  %v570_v59 = vadd.f32 %v569_v57, %v1140_v46  ;;  %v531_v60 = vpop.f32.mrb[3].mxu0  ;;  %v571_v61 = vpop.f32.mrb[3].mxu1 }
 0x124   : > { %605 = vst [vmem:[%s1148_s12 + $0x8] sm:$0xff] %v528_v54  ;;  %621 = vst [vmem:[%s1148_s12 + $0x88] sm:$0xff] %v568_v55  ;;  %v532_v62 = vadd.f32 %v531_v60, %v1142_v47  ;;  %v572_v63 = vadd.f32 %v571_v61, %v1142_v47 }
 0x125   : > { %606 = vst [vmem:[%s1148_s12 + $0x10] sm:$0xff] %v530_v58  ;;  %622 = vst [vmem:[%s1148_s12 + $0x90] sm:$0xff] %v570_v59 }
 0x126   : > { %607 = vst [vmem:[%s1148_s12 + $0x18] sm:$0xff] %v532_v62  ;;  %623 = vst [vmem:[%s1148_s12 + $0x98] sm:$0xff] %v572_v63 }
 0x128   : > { %v535_v0 = vpop.f32.mrb[4].mxu0  ;;  %v575_v1 = vpop.f32.mrb[4].mxu1 }
 0x129   : > { %v536_v2 = vadd.f32 %v535_v0, %v1140_v46  ;;  %v576_v3 = vadd.f32 %v575_v1, %v1140_v46  ;;  %v537_v4 = vpop.f32.mrb[5].mxu0  ;;  %v577_v5 = vpop.f32.mrb[5].mxu1 }
 0x12a   : > { %v538_v6 = vadd.f32 %v537_v4, %v1142_v47  ;;  %v578_v7 = vadd.f32 %v577_v5, %v1142_v47  ;;  %v539_v8 = vpop.f32.mrb[6].mxu0  ;;  %v579_v9 = vpop.f32.mrb[6].mxu1  ;;  %v693_v0 = vld [vmem:[%s1148_s12 + $0x80] sm:$0xff] (%p1048_p6) }
 0x12b   : > { %608 = vst [vmem:[%s1148_s12 + $0x20] sm:$0xff] %v536_v2  ;;  %624 = vst [vmem:[%s1148_s12 + $0xa0] sm:$0xff] %v576_v3  ;;  %v540_v10 = vadd.f32 %v539_v8, %v1140_v46  ;;  %v580_v11 = vadd.f32 %v579_v9, %v1140_v46  ;;  %v541_v12 = vpop.f32.mrb[7].mxu0  ;;  %v581_v13 = vpop.f32.mrb[7].mxu1  ;;  %v695_v1 = vld [vmem:[%s1148_s12 + $0x88] sm:$0xff] (%p1048_p6) }
 0x12c   : > { %609 = vst [vmem:[%s1148_s12 + $0x28] sm:$0xff] %v538_v6  ;;  %625 = vst [vmem:[%s1148_s12 + $0xa8] sm:$0xff] %v578_v7  ;;  %v542_v14 = vadd.f32 %v541_v12, %v1142_v47  ;;  %v582_v15 = vadd.f32 %v581_v13, %v1142_v47  ;;  %v665_v50 = vld [vmem:[%s1148_s12 + $0x10] sm:$0xff] (%p1048_p6) }
 0x12d   : > { %610 = vst [vmem:[%s1148_s12 + $0x30] sm:$0xff] %v540_v10  ;;  %626 = vst [vmem:[%s1148_s12 + $0xb0] sm:$0xff] %v580_v11  ;;  %v667_v51 = vld [vmem:[%s1148_s12 + $0x18] sm:$0xff] (%p1048_p6)  ;;  %v697_v2 = vld [vmem:[%s1148_s12 + $0x90] sm:$0xff] (%p1048_p6) }
 0x12e   : > { %611 = vst [vmem:[%s1148_s12 + $0x38] sm:$0xff] %v542_v14  ;;  %627 = vst [vmem:[%s1148_s12 + $0xb8] sm:$0xff] %v582_v15  ;;  %v699_v3 = vld [vmem:[%s1148_s12 + $0x98] sm:$0xff] (%p1048_p6) }
 0x12f   : > { %666 = vst [vmem:[%s1219_s11 + $0x40] sm:$0xff] (%p1048_p6), %v665_v50  ;;  %668 = vst [vmem:[%s1219_s11 + $0x48] sm:$0xff] (%p1048_p6), %v667_v51 }
 0x130   : > { %v545_v16 = vpop.f32.mrb[8].mxu0  ;;  %v585_v17 = vpop.f32.mrb[8].mxu1  ;;  %694 = vst [vmem:[%s1219_s11 + $0x200] sm:$0xff] (%p1048_p6), %v693_v0  ;;  %696 = vst [vmem:[%s1219_s11 + $0x208] sm:$0xff] (%p1048_p6), %v695_v1 }
 0x131   : > { %v546_v18 = vadd.f32 %v545_v16, %v1140_v46  ;;  %v586_v19 = vadd.f32 %v585_v17, %v1140_v46  ;;  %v547_v20 = vpop.f32.mrb[9].mxu0  ;;  %v587_v21 = vpop.f32.mrb[9].mxu1  ;;  %698 = vst [vmem:[%s1219_s11 + $0x240] sm:$0xff] (%p1048_p6), %v697_v2  ;;  %700 = vst [vmem:[%s1219_s11 + $0x248] sm:$0xff] (%p1048_p6), %v699_v3 }
 0x132   : > { %v548_v22 = vadd.f32 %v547_v20, %v1142_v47  ;;  %v588_v23 = vadd.f32 %v587_v21, %v1142_v47  ;;  %v549_v24 = vpop.f32.mrb[10].mxu0  ;;  %v589_v25 = vpop.f32.mrb[10].mxu1  ;;  %v669_v52 = vld [vmem:[%s1148_s12 + $0x20] sm:$0xff] (%p1048_p6) }
 0x133   : > { %612 = vst [vmem:[%s1148_s12 + $0x40] sm:$0xff] %v546_v18  ;;  %628 = vst [vmem:[%s1148_s12 + $0xc0] sm:$0xff] %v586_v19  ;;  %v550_v26 = vadd.f32 %v549_v24, %v1140_v46  ;;  %v590_v27 = vadd.f32 %v589_v25, %v1140_v46  ;;  %v551_v28 = vpop.f32.mrb[11].mxu0  ;;  %v591_v29 = vpop.f32.mrb[11].mxu1  ;;  %v671_v53 = vld [vmem:[%s1148_s12 + $0x28] sm:$0xff] (%p1048_p6)  ;;  %v701_v4 = vld [vmem:[%s1148_s12 + $0xa0] sm:$0xff] (%p1048_p6) }
 0x134   : > { %613 = vst [vmem:[%s1148_s12 + $0x48] sm:$0xff] %v548_v22  ;;  %629 = vst [vmem:[%s1148_s12 + $0xc8] sm:$0xff] %v588_v23  ;;  %v552_v30 = vadd.f32 %v551_v28, %v1142_v47  ;;  %v592_v31 = vadd.f32 %v591_v29, %v1142_v47  ;;  %v673_v54 = vld [vmem:[%s1148_s12 + $0x30] sm:$0xff] (%p1048_p6)  ;;  %v703_v5 = vld [vmem:[%s1148_s12 + $0xa8] sm:$0xff] (%p1048_p6) }
 0x135   : > { %614 = vst [vmem:[%s1148_s12 + $0x50] sm:$0xff] %v550_v26  ;;  %630 = vst [vmem:[%s1148_s12 + $0xd0] sm:$0xff] %v590_v27  ;;  %v675_v55 = vld [vmem:[%s1148_s12 + $0x38] sm:$0xff] (%p1048_p6)  ;;  %v705_v6 = vld [vmem:[%s1148_s12 + $0xb0] sm:$0xff] (%p1048_p6) }
 0x136   : > { %615 = vst [vmem:[%s1148_s12 + $0x58] sm:$0xff] %v552_v30  ;;  %631 = vst [vmem:[%s1148_s12 + $0xd8] sm:$0xff] %v592_v31  ;;  %v707_v7 = vld [vmem:[%s1148_s12 + $0xb8] sm:$0xff] (%p1048_p6) }
 0x137   : > { %670 = vst [vmem:[%s1219_s11 + $0x80] sm:$0xff] (%p1048_p6), %v669_v52  ;;  %672 = vst [vmem:[%s1219_s11 + $0x88] sm:$0xff] (%p1048_p6), %v671_v53 }
 0x138   : > { %v555_v32 = vpop.f32.mrb[12].mxu0  ;;  %v595_v33 = vpop.f32.mrb[12].mxu1  ;;  %642 = sbr.rel (!%p1048_p6) target bundleno = 328 (0x148), region = 74  ;;  %674 = vst [vmem:[%s1219_s11 + $0xc0] sm:$0xff] (%p1048_p6), %v673_v54  ;;  %676 = vst [vmem:[%s1219_s11 + $0xc8] sm:$0xff] (%p1048_p6), %v675_v55 }
 0x139   : > { %v556_v34 = vadd.f32 %v555_v32, %v1140_v46  ;;  %v596_v35 = vadd.f32 %v595_v33, %v1140_v46  ;;  %v557_v36 = vpop.f32.mrb[13].mxu0  ;;  %v597_v37 = vpop.f32.mrb[13].mxu1  ;;  %702 = vst [vmem:[%s1219_s11 + $0x280] sm:$0xff] (%p1048_p6), %v701_v4  ;;  %704 = vst [vmem:[%s1219_s11 + $0x288] sm:$0xff] (%p1048_p6), %v703_v5 }
 0x13a   : > { %v558_v38 = vadd.f32 %v557_v36, %v1142_v47  ;;  %v598_v39 = vadd.f32 %v597_v37, %v1142_v47  ;;  %v559_v40 = vpop.f32.mrb[14].mxu0  ;;  %v599_v41 = vpop.f32.mrb[14].mxu1  ;;  %v677_v56 = vld [vmem:[%s1148_s12 + $0x40] sm:$0xff] (%p1048_p6)  ;;  %706 = vst [vmem:[%s1219_s11 + $0x2c0] sm:$0xff] (%p1048_p6), %v705_v6  ;;  %708 = vst [vmem:[%s1219_s11 + $0x2c8] sm:$0xff] (%p1048_p6), %v707_v7 }
 0x13b   : > { %616 = vst [vmem:[%s1148_s12 + $0x60] sm:$0xff] %v556_v34  ;;  %632 = vst [vmem:[%s1148_s12 + $0xe0] sm:$0xff] %v596_v35  ;;  %v560_v42 = vadd.f32 %v559_v40, %v1140_v46  ;;  %v600_v43 = vadd.f32 %v599_v41, %v1140_v46  ;;  %v561_v44 = vpop.f32.mrb[15].mxu0  ;;  %v601_v45 = vpop.f32.mrb[15].mxu1  ;;  %v661_v46 = vld [vmem:[%s1148_s12] sm:$0xff] (%p1048_p6)  ;;  %v679_v57 = vld [vmem:[%s1148_s12 + $0x48] sm:$0xff] (%p1048_p6) }
 0x13c   : > { %617 = vst [vmem:[%s1148_s12 + $0x68] sm:$0xff] %v558_v38  ;;  %633 = vst [vmem:[%s1148_s12 + $0xe8] sm:$0xff] %v598_v39  ;;  %v562_v48 = vadd.f32 %v561_v44, %v1142_v47  ;;  %v602_v49 = vadd.f32 %v601_v45, %v1142_v47  ;;  %v663_v47 = vld [vmem:[%s1148_s12 + $0x8] sm:$0xff] (%p1048_p6)  ;;  %v681_v58 = vld [vmem:[%s1148_s12 + $0x50] sm:$0xff] (%p1048_p6) }
 0x13d   : > { %618 = vst [vmem:[%s1148_s12 + $0x70] sm:$0xff] %v560_v42  ;;  %634 = vst [vmem:[%s1148_s12 + $0xf0] sm:$0xff] %v600_v43  ;;  %v683_v59 = vld [vmem:[%s1148_s12 + $0x58] sm:$0xff] (%p1048_p6)  ;;  %v709_v8 = vld [vmem:[%s1148_s12 + $0xc0] sm:$0xff] (%p1048_p6) }
 0x13e   : > { %619 = vst [vmem:[%s1148_s12 + $0x78] sm:$0xff] %v562_v48  ;;  %635 = vst [vmem:[%s1148_s12 + $0xf8] sm:$0xff] %v602_v49  ;;  %v711_v9 = vld [vmem:[%s1148_s12 + $0xc8] sm:$0xff] (%p1048_p6)  ;;  %v713_v10 = vld [vmem:[%s1148_s12 + $0xd0] sm:$0xff] (%p1048_p6) }
 0x13f   : > { %662 = vst [vmem:[%s1219_s11] sm:$0xff] %v661_v46  ;;  %664 = vst [vmem:[%s1219_s11 + $0x8] sm:$0xff] %v663_v47  ;;  %v715_v11 = vld [vmem:[%s1148_s12 + $0xd8] sm:$0xff] }
 0x140   : > { %678 = vst [vmem:[%s1219_s11 + $0x100] sm:$0xff] %v677_v56  ;;  %680 = vst [vmem:[%s1219_s11 + $0x108] sm:$0xff] %v679_v57 }
 0x141   : > { %682 = vst [vmem:[%s1219_s11 + $0x140] sm:$0xff] %v681_v58  ;;  %684 = vst [vmem:[%s1219_s11 + $0x148] sm:$0xff] %v683_v59 }
 0x142   : > { %v685_v60 = vld [vmem:[%s1148_s12 + $0x60] sm:$0xff]  ;;  %710 = vst [vmem:[%s1219_s11 + $0x300] sm:$0xff] %v709_v8  ;;  %712 = vst [vmem:[%s1219_s11 + $0x308] sm:$0xff] %v711_v9 }
 0x143   : > { %v687_v61 = vld [vmem:[%s1148_s12 + $0x68] sm:$0xff]  ;;  %686 = vst [vmem:[%s1219_s11 + $0x180] sm:$0xff] %v685_v60  ;;  %714 = vst [vmem:[%s1219_s11 + $0x340] sm:$0xff] %v713_v10  ;;  %v717_v12 = vld [vmem:[%s1148_s12 + $0xe0] sm:$0xff] }
 0x144   : > { %v689_v62 = vld [vmem:[%s1148_s12 + $0x70] sm:$0xff]  ;;  %688 = vst [vmem:[%s1219_s11 + $0x188] sm:$0xff] %v687_v61  ;;  %v719_v13 = vld [vmem:[%s1148_s12 + $0xe8] sm:$0xff]  ;;  %716 = vst [vmem:[%s1219_s11 + $0x348] sm:$0xff] %v715_v11 }
 0x145   : > { %690 = vst [vmem:[%s1219_s11 + $0x1c0] sm:$0xff] %v689_v62  ;;  %v691_v63 = vld [vmem:[%s1148_s12 + $0x78] sm:$0xff]  ;;  %718 = vst [vmem:[%s1219_s11 + $0x380] sm:$0xff] %v717_v12  ;;  %v721_v14 = vld [vmem:[%s1148_s12 + $0xf0] sm:$0xff] }
 0x146   : > { %692 = vst [vmem:[%s1219_s11 + $0x1c8] sm:$0xff] %v691_v63  ;;  %720 = vst [vmem:[%s1219_s11 + $0x388] sm:$0xff] %v719_v13  ;;  %v723_v15 = vld [vmem:[%s1148_s12 + $0xf8] sm:$0xff] }
 0x147   : > { %722 = vst [vmem:[%s1219_s11 + $0x3c0] sm:$0xff] %v721_v14  ;;  %724 = vst [vmem:[%s1219_s11 + $0x3c8] sm:$0xff] %v723_v15 }
 0x148 PF: > { %s13_s16 = sadd.s32 1, %s990_s16   ;;  %s1302_s12 = smov %s978_s13 }
 0x149   : > { %p10_p12 = scmp.ge.s32.totalorder %s13_s16, 6   ;;  %s1303_s13 = smov %s1053_s22 }
 0x14a   : > { %s1304_s14 = smov %s986_s15  ;;  %s1305_s15 = smov %s1307_s17 }
 0x14b   :  { %12 = sbr.rel (!%p10_p12) target bundleno = 3 (0x3), region = 134 }

// kernel: vae_forward.20
= control target key start
LH: loop header
LB: loop body
LE: loop exit
PB: predicated region body
PF: predicated region fallthrough
CT: control target
= control target key end

     0   :  { %s1288_s12 = smov 0   ;;  %s1290_s13 = smov 0   ;;  %s1595_s0 = inlined_call_operand.vmem [shape: bf16[768,128], index: 0, kind: input, shape index: {}]   ;;  %s1596_s1 = inlined_call_operand.vmem [shape: bf16[128,1152], index: 1, kind: input, shape index: {}]   ;;  %s1597_s2 = inlined_call_operand.vmem [shape: f32[1,1152], index: 2, kind: input, shape index: {}]   ;;  %s1598_s3 = inlined_call_operand.vmem [shape: f32[768,1152], index: 3, kind: output, shape index: {}]  }
   0x1   :  { %s1292_s14 = smov 0   ;;  %s1294_s15 = smov 0  }
   0x2   :  { %s1296_s16 = smov 0   ;;  %s1298_s17 = smov 0  }
   0x3   :  { %s1300_s18 = smov 0   ;;  %s1302_s19 = smov 0  }
   0x4   :  { %s1304_s20 = smov 0  }
   0x5 LB: > { %s969_s21 = sadd.s32 4294967295, %s1266_s20   ;;  %s22_s22 = sadd.s32 1, %s1258_s18  ;;  %s1266_s20 = sphi %s1304_s20, %s13_s20   ;;  %s1262_s19 = sphi %s1302_s19, %s1607_s19   ;;  %s1258_s18 = sphi %s1300_s18, %s1606_s18   ;;  %s1254_s17 = sphi %s1298_s17, %s1605_s17   ;;  %s1250_s16 = sphi %s1296_s16, %s1604_s16   ;;  %s1246_s15 = sphi %s1294_s15, %s1603_s15   ;;  %s1242_s14 = sphi %s1292_s14, %s1602_s14   ;;  %s1238_s13 = sphi %s1290_s13, %s1601_s13   ;;  %s1234_s12 = sphi %s1288_s12, %s1600_s12  }
   0x6   : > { %p23_p0 = scmp.ge.s32.totalorder %s22_s22, 9  ;;  %s25_s23 = sadd.s32 1, %s1262_s19 }
   0x7   : > { %s58_s24 = sadd.s32 1, %s1246_s15  ;;  %p65_p1 = scmp.ne.s32.totalorder %s1246_s15, %s1242_s14 }
   0x8   : > { %s1609_s22 = smov (%p23_p0, %s22_s22), 0  ;;  %s1611_s23 = smov (!%p23_p0, %s25_s23), %s1262_s19 }
   0x9   : > { %s55_s25 = ssub.s32 %s1258_s18, %s1609_s22  ;;  %p66_p2 = scmp.eq.s32.totalorder %s1266_s20, 0 }
   0xa   : > { %p27_p3 = scmp.ge.s32.totalorder %s1611_s23, 3  ;;  %p56_p4 = scmp.eq.s32.totalorder %s55_s25, 0 }
   0xb   : > { %p67_p5 = por %p66_p2, %p65_p1  ;;  %s112_s26 = sadd.s32 1, %s1238_s13 }
   0xc   : > { %s1613_s23 = smov (%p27_p3, %s1611_s23), 0  ;;  %p122_p6 = scmp.ne.s32.totalorder %s1238_s13, %s1234_s12 }
   0xd   : > { %s1349_s27 = scalar_select %p56_p4, %s1246_s15, %s58_s24  }
   0xe   : > { %s107_s28 = ssub.s32 %s1262_s19, %s1613_s23  ;;  %p123_p7 = scmp.eq.s32.totalorder %s969_s21, 26 }
   0xf   : > { %s109_s29 = sor.u32 %s107_s28, %s55_s25  ;;  %p972_p10 = scmp.ge.s32.totalorder %s1266_s20, 27 }
  0x10   : > { %p110_p8 = scmp.eq.s32.totalorder %s109_s29, 0  ;;  %p1355_p9 = por %p123_p7, %p122_p6 }
  0x11   : > { %145 = sbr.rel (%p972_p10) target bundleno = 38 (0x26), region = 16 }
  0x12   : > { %s1360_s4 = scalar_select %p110_p8, %s1238_s13, %s112_s26  }
  0x18   : > { %157 = sbr.rel (!%p67_p5) target bundleno = 38 (0x26), region = 24  ;;  %s159_s5 = sand.u32 (%p67_p5), 1, %s1246_s15  }
  0x19   : > { %s974_s6 = sshll.u32 (%p67_p5), %s1258_s18, 2  ;;  %s973_s7 = sshll.u32 (%p67_p5), %s159_s5, 6 }
  0x1a   : > { %s1368_s10 = scalar_lea.vmem (%p67_p5), %s1596_s1, %s974_s6  ;;  %s161_s11 = scalar_lea.vmem (%p67_p5), [#allocation2], %s973_s7 }
  0x1b   : > { %v179_v0 = vld [vmem:[%s1368_s10] sm:$0xf] (%p67_p5)  ;;  %v181_v1 = vld [vmem:[%s1368_s10 + $0x24] sm:$0xf] (%p67_p5)  ;;  %v183_v2 = vld [vmem:[%s1368_s10 + $0x48] sm:$0xf] (%p67_p5) }
  0x1c   : > { %180 = vst [vmem:[%s161_s11] sm:$0xf] (%p67_p5), %v179_v0  ;;  %182 = vst [vmem:[%s161_s11 + $0x4] sm:$0xf] (%p67_p5), %v181_v1  ;;  %v185_v3 = vld [vmem:[%s1368_s10 + $0x6c] sm:$0xf] (%p67_p5) }
  0x1d   : > { %v187_v4 = vld [vmem:[%s1368_s10 + $0x90] sm:$0xf] (%p67_p5)  ;;  %184 = vst [vmem:[%s161_s11 + $0x8] sm:$0xf] (%p67_p5), %v183_v2  ;;  %186 = vst [vmem:[%s161_s11 + $0xc] sm:$0xf] (%p67_p5), %v185_v3 }
  0x1e   : > { %188 = vst [vmem:[%s161_s11 + $0x10] sm:$0xf] (%p67_p5), %v187_v4  ;;  %v189_v5 = vld [vmem:[%s1368_s10 + $0xb4] sm:$0xf] (%p67_p5)  ;;  %v191_v6 = vld [vmem:[%s1368_s10 + $0xd8] sm:$0xf] (%p67_p5) }
  0x1f   : > { %v193_v7 = vld [vmem:[%s1368_s10 + $0xfc] sm:$0xf]  ;;  %190 = vst [vmem:[%s161_s11 + $0x14] sm:$0xf] %v189_v5  ;;  %192 = vst [vmem:[%s161_s11 + $0x18] sm:$0xf] %v191_v6 }
  0x20   : > { %194 = vst [vmem:[%s161_s11 + $0x1c] sm:$0xf] %v193_v7  ;;  %v195_v8 = vld [vmem:[%s1368_s10 + $0x120] sm:$0xf]  ;;  %v197_v9 = vld [vmem:[%s1368_s10 + $0x144] sm:$0xf] }
  0x21   : > { %v199_v10 = vld [vmem:[%s1368_s10 + $0x168] sm:$0xf]  ;;  %196 = vst [vmem:[%s161_s11 + $0x20] sm:$0xf] %v195_v8  ;;  %198 = vst [vmem:[%s161_s11 + $0x24] sm:$0xf] %v197_v9 }
  0x22   : > { %200 = vst [vmem:[%s161_s11 + $0x28] sm:$0xf] %v199_v10  ;;  %v201_v11 = vld [vmem:[%s1368_s10 + $0x18c] sm:$0xf]  ;;  %v203_v12 = vld [vmem:[%s1368_s10 + $0x1b0] sm:$0xf] }
  0x23   : > { %v205_v13 = vld [vmem:[%s1368_s10 + $0x1d4] sm:$0xf]  ;;  %202 = vst [vmem:[%s161_s11 + $0x2c] sm:$0xf] %v201_v11  ;;  %204 = vst [vmem:[%s161_s11 + $0x30] sm:$0xf] %v203_v12 }
  0x24   : > { %206 = vst [vmem:[%s161_s11 + $0x34] sm:$0xf] %v205_v13  ;;  %v207_v14 = vld [vmem:[%s1368_s10 + $0x1f8] sm:$0xf]  ;;  %v209_v15 = vld [vmem:[%s1368_s10 + $0x21c] sm:$0xf] }
  0x25   : > { %208 = vst [vmem:[%s161_s11 + $0x38] sm:$0xf] %v207_v14  ;;  %210 = vst [vmem:[%s161_s11 + $0x3c] sm:$0xf] %v209_v15 }
  0x26 PF: > { %p975_p11 = scmp.ge.s32.totalorder %s1266_s20, 1  ;;  %p270_p12 = scmp.lt.s32.totalorder %s1266_s20, 28 }
  0x28   : > { %p271_p13 = pnand %p975_p11, %p270_p12 }
  0x29   : > { %s277_s21 = sand.u32 (!%p271_p13), 1, %s1242_s14   ;;  %s978_s24 = sshll.u32 (!%p271_p13), %s1254_s17, 5 }
  0x2a   : > { %274 = sbr.rel (%p271_p13) target bundleno = 328 (0x148), region = 69  ;;  %s976_s25 = sshll.u32 (!%p271_p13), %s277_s21, 6 }
  0x2b   : > { %p308_p0 = scmp.lt.s32.totalorder (!%p271_p13), %s978_s24, 95  ;;  %s1390_s26 = scalar_lea.vmem (!%p271_p13), [#allocation2], %s976_s25 }
  0x2c   : > { %v1172_v16 = vld [vmem:[%s1390_s26] sm:$0xff] (!%p271_p13)   ;;  %v1173_v17 = vld [vmem:[%s1390_s26 + $0x8] sm:$0xff] (!%p271_p13)   ;;  %v1174_v18 = vld [vmem:[%s1390_s26 + $0x10] sm:$0xff] (!%p271_p13)   ;;  %p313_p1 = scmp.lt.s32.totalorder (!%p271_p13), %s1250_s16, 8  ;;  %s304_s7 = sand.u32 (!%p271_p13), 1, %s1234_s12  }
  0x2d   : > { %1035 = vmatprep.subr.bf16.mxu0 (!%p271_p13), %v1172_v16  ;;  %1083 = vmatprep.subr.bf16.mxu1 (!%p271_p13), %v1172_v16  ;;  %v1175_v19 = vld [vmem:[%s1390_s26 + $0x18] sm:$0xff] (!%p271_p13)   ;;  %v1176_v22 = vld [vmem:[%s1390_s26 + $0x20] sm:$0xff] (!%p271_p13)   ;;  %v1177_v23 = vld [vmem:[%s1390_s26 + $0x28] sm:$0xff] (!%p271_p13)   ;;  %s977_s11 = sshll.u32 (!%p271_p13), %s304_s7, 8 }
  0x2e   : > { %1036 = vmatpush3.bf16.msra.mxu0 (!%p271_p13), %v1172_v16  ;;  %1091 = vmatpush3.bf16.msra.mxu1 (!%p271_p13), %v1172_v16  ;;  %v1178_v24 = vld [vmem:[%s1390_s26 + $0x30] sm:$0xff] (!%p271_p13)   ;;  %v1179_v25 = vld [vmem:[%s1390_s26 + $0x38] sm:$0xff] (!%p271_p13)   ;;  %s1433_s12 = scalar_lea.vmem (!%p271_p13), [#allocation3], %s977_s11 }
  0x2f   : > { %1037 = vmatprep.subr.bf16.mxu0 (!%p271_p13), %v1173_v17  ;;  %1084 = vmatprep.subr.bf16.mxu1 (!%p271_p13), %v1173_v17 }
  0x31   : > { %s1615_s24 = smov (!%p308_p0, %s978_s24), 95  ;;  %s1099_s21 = smul.u32 (%p1355_p9), 288, %s1254_s17 }
  0x32   : > { %s979_s28 = sshll.u32 %s1615_s24, 2  ;;  %1038 = vmatpush3.bf16.msra.mxu0 %v1173_v17  ;;  %1092 = vmatpush3.bf16.msra.mxu1 %v1173_v17 }
  0x33   : > { %s1398_s5 = scalar_lea.vmem %s1595_s0, %s979_s28  ;;  %1039 = vmatprep.subr.bf16.mxu0 %v1174_v18  ;;  %1085 = vmatprep.subr.bf16.mxu1 %v1174_v18  ;;  %s719_s30 = sadd.s32 (%p1355_p9), %s1250_s16, %s1099_s21 }
  0x34   : > { %v1180_v20 = vld [vmem:[%s1398_s5] sm:$0xff]   ;;  %v1182_v26 = vld [vmem:[%s1398_s5 + $0x8] sm:$0xff]   ;;  %v1184_v28 = vld [vmem:[%s1398_s5 + $0x10] sm:$0xff]   ;;  %s314_s6 = scalar_select %p313_p1, %s1250_s16, 8 }
  0x35   : > { %v1181_v21 = vld [vmem:[%s1398_s5 + $0x40] sm:$0xff]   ;;  %1051 = vmatprep.mubr.bf16.mxu0 %v1180_v20  ;;  %v1183_v27 = vld [vmem:[%s1398_s5 + $0x48] sm:$0xff]   ;;  %v1185_v29 = vld [vmem:[%s1398_s5 + $0x50] sm:$0xff]   ;;  %s1008_s24 = sshll.u32 (%p1355_p9), %s719_s30, 3 }
  0x36   : > { %1040 = vmatpush3.bf16.msra.mxu0 %v1174_v18  ;;  %1093 = vmatpush3.bf16.msra.mxu1 %v1174_v18  ;;  %v1186_v30 = vld [vmem:[%s1398_s5 + $0x18] sm:$0xff]   ;;  %v1188_v32 = vld [vmem:[%s1398_s5 + $0x20] sm:$0xff]   ;;  %v1190_v34 = vld [vmem:[%s1398_s5 + $0x28] sm:$0xff]   ;;  %s315_s10 = scalar_lea.vmem %s1597_s2, %s314_s6  ;;  %s1514_s17 = scalar_lea.vmem (%p1355_p9), %s1598_s3, %s1008_s24 }
  0x37   : > { %1041 = vmatprep.subr.bf16.mxu0 %v1175_v19  ;;  %1086 = vmatprep.subr.bf16.mxu1 %v1175_v19  ;;  %v1187_v31 = vld [vmem:[%s1398_s5 + $0x58] sm:$0xff]   ;;  %v1189_v33 = vld [vmem:[%s1398_s5 + $0x60] sm:$0xff]   ;;  %v1191_v35 = vld [vmem:[%s1398_s5 + $0x68] sm:$0xff]  }
  0x38   : > { %1067 = vmatprep.mubr.bf16.mxu1 %v1181_v21  ;;  %v1192_v36 = vld [vmem:[%s1398_s5 + $0x30] sm:$0xff]   ;;  %v1194_v38 = vld [vmem:[%s1398_s5 + $0x38] sm:$0xff]   ;;  %v1427_v40 = vld [vmem:[%s315_s10] ss:$0 sm:$0xff] }
  0x39   : > { %v1193_v37 = vld [vmem:[%s1398_s5 + $0x70] sm:$0xff]   ;;  %v1195_v39 = vld [vmem:[%s1398_s5 + $0x78] sm:$0xff]  }
  0x3a   : > { %1042 = vmatpush3.bf16.msra.mxu0 %v1175_v19  ;;  %1094 = vmatpush3.bf16.msra.mxu1 %v1175_v19 }
  0x3b   : > { %1043 = vmatprep.subr.bf16.mxu0 %v1176_v22  ;;  %1087 = vmatprep.subr.bf16.mxu1 %v1176_v22 }
  0x3e   : > { %1044 = vmatpush3.bf16.msra.mxu0 %v1176_v22  ;;  %1095 = vmatpush3.bf16.msra.mxu1 %v1176_v22 }
  0x3f   : > { %1045 = vmatprep.subr.bf16.mxu0 %v1177_v23  ;;  %1088 = vmatprep.subr.bf16.mxu1 %v1177_v23 }
  0x42   : > { %1046 = vmatpush3.bf16.msra.mxu0 %v1177_v23  ;;  %1096 = vmatpush3.bf16.msra.mxu1 %v1177_v23 }
  0x43   : > { %1047 = vmatprep.subr.bf16.mxu0 %v1178_v24  ;;  %1089 = vmatprep.subr.bf16.mxu1 %v1178_v24 }
  0x46   : > { %1048 = vmatpush3.bf16.msra.mxu0 %v1178_v24  ;;  %1097 = vmatpush3.bf16.msra.mxu1 %v1178_v24 }
  0x47   : > { %1049 = vmatprep.subr.bf16.mxu0 %v1179_v25  ;;  %1090 = vmatprep.subr.bf16.mxu1 %v1179_v25 }
  0x4a   : > { %1050 = vmatpush3.bf16.msra.mxu0 %v1179_v25  ;;  %1098 = vmatpush3.bf16.msra.mxu1 %v1179_v25 }
  0x4d   : > { %1052 = vmatmul.mubr.bf16.vlgmr.msra.gmra.mrb[0].mxu0 %v1182_v26  ;;  %1068 = vmatmul.mubr.bf16.vlgmr.msra.gmra.mrb[0].mxu1 %v1183_v27 }
  0x4e   : > { %1055 = vmatprep.mubr.bf16.mxu0 %v1184_v28  ;;  %1071 = vmatprep.mubr.bf16.mxu1 %v1185_v29 }
  0x55   : > { %1056 = vmatmul.mubr.bf16.gmra.mrb[4].mxu0 %v1186_v30  ;;  %1072 = vmatmul.mubr.bf16.gmra.mrb[4].mxu1 %v1187_v31 }
  0x56   : > { %1059 = vmatprep.mubr.bf16.mxu0 %v1188_v32  ;;  %1075 = vmatprep.mubr.bf16.mxu1 %v1189_v33 }
  0x5d   : > { %1060 = vmatmul.mubr.bf16.gmra.mrb[8].mxu0 %v1190_v34  ;;  %1076 = vmatmul.mubr.bf16.gmra.mrb[8].mxu1 %v1191_v35 }
  0x5e   : > { %1063 = vmatprep.mubr.bf16.mxu0 %v1192_v36  ;;  %1079 = vmatprep.mubr.bf16.mxu1 %v1193_v37 }
  0x65   : > { %1064 = vmatmul.mubr.bf16.gmra.mrb[12].mxu0 %v1194_v38  ;;  %1080 = vmatmul.mubr.bf16.gmra.mrb[12].mxu1 %v1195_v39 }
 0x120   : > { %v1053_v41 = vpop.f32.mrb[0].mxu0  ;;  %v1069_v42 = vpop.f32.mrb[0].mxu1 }
 0x121   : > { %v560_v43 = vadd.f32 %v1053_v41, %v1427_v40  ;;  %v624_v44 = vadd.f32 %v1069_v42, %v1427_v40  ;;  %v551_v45 = vpop.f32.mrb[1].mxu0  ;;  %v615_v46 = vpop.f32.mrb[1].mxu1 }
 0x122   : > { %v552_v47 = vadd.f32 %v1427_v40, %v551_v45  ;;  %v616_v48 = vadd.f32 %v1427_v40, %v615_v46  ;;  %v1054_v49 = vpop.f32.mrb[2].mxu0  ;;  %v1070_v50 = vpop.f32.mrb[2].mxu1 }
 0x123   : > { %680 = vst [vmem:[%s1433_s12 + $0x10] sm:$0xff] %v560_v43  ;;  %696 = vst [vmem:[%s1433_s12 + $0x90] sm:$0xff] %v624_v44  ;;  %v563_v51 = vadd.f32 %v1054_v49, %v1427_v40  ;;  %v627_v52 = vadd.f32 %v1070_v50, %v1427_v40  ;;  %v554_v53 = vpop.f32.mrb[3].mxu0  ;;  %v618_v54 = vpop.f32.mrb[3].mxu1 }
 0x124   : > { %678 = vst [vmem:[%s1433_s12] sm:$0xff] %v552_v47  ;;  %694 = vst [vmem:[%s1433_s12 + $0x80] sm:$0xff] %v616_v48  ;;  %v555_v55 = vadd.f32 %v1427_v40, %v554_v53  ;;  %v619_v56 = vadd.f32 %v1427_v40, %v618_v54 }
 0x125   : > { %681 = vst [vmem:[%s1433_s12 + $0x18] sm:$0xff] %v563_v51  ;;  %697 = vst [vmem:[%s1433_s12 + $0x98] sm:$0xff] %v627_v52 }
 0x126   : > { %679 = vst [vmem:[%s1433_s12 + $0x8] sm:$0xff] %v555_v55  ;;  %695 = vst [vmem:[%s1433_s12 + $0x88] sm:$0xff] %v619_v56 }
 0x128   : > { %v1057_v57 = vpop.f32.mrb[4].mxu0  ;;  %v1073_v58 = vpop.f32.mrb[4].mxu1 }
 0x129   : > { %v576_v59 = vadd.f32 %v1057_v57, %v1427_v40  ;;  %v640_v60 = vadd.f32 %v1073_v58, %v1427_v40  ;;  %v567_v61 = vpop.f32.mrb[5].mxu0  ;;  %v631_v62 = vpop.f32.mrb[5].mxu1 }
 0x12a   : > { %v568_v63 = vadd.f32 %v1427_v40, %v567_v61  ;;  %v632_v0 = vadd.f32 %v1427_v40, %v631_v62  ;;  %v1058_v1 = vpop.f32.mrb[6].mxu0  ;;  %v1074_v2 = vpop.f32.mrb[6].mxu1  ;;  %v815_v43 = vld [vmem:[%s1433_s12 + $0x10] sm:$0xff] (%p1355_p9) }
 0x12b   : > { %684 = vst [vmem:[%s1433_s12 + $0x30] sm:$0xff] %v576_v59  ;;  %700 = vst [vmem:[%s1433_s12 + $0xb0] sm:$0xff] %v640_v60  ;;  %v579_v3 = vadd.f32 %v1058_v1, %v1427_v40  ;;  %v643_v4 = vadd.f32 %v1074_v2, %v1427_v40  ;;  %v570_v5 = vpop.f32.mrb[7].mxu0  ;;  %v634_v6 = vpop.f32.mrb[7].mxu1  ;;  %v843_v57 = vld [vmem:[%s1433_s12 + $0x80] sm:$0xff] (%p1355_p9)  ;;  %v847_v59 = vld [vmem:[%s1433_s12 + $0x90] sm:$0xff] (%p1355_p9) }
 0x12c   : > { %682 = vst [vmem:[%s1433_s12 + $0x20] sm:$0xff] %v568_v63  ;;  %698 = vst [vmem:[%s1433_s12 + $0xa0] sm:$0xff] %v632_v0  ;;  %v571_v7 = vadd.f32 %v1427_v40, %v570_v5  ;;  %v635_v8 = vadd.f32 %v1427_v40, %v634_v6  ;;  %v817_v44 = vld [vmem:[%s1433_s12 + $0x18] sm:$0xff] (%p1355_p9) }
 0x12d   : > { %685 = vst [vmem:[%s1433_s12 + $0x38] sm:$0xff] %v579_v3  ;;  %701 = vst [vmem:[%s1433_s12 + $0xb8] sm:$0xff] %v643_v4  ;;  %v813_v42 = vld [vmem:[%s1433_s12 + $0x8] sm:$0xff] (%p1355_p9)  ;;  %v849_v60 = vld [vmem:[%s1433_s12 + $0x98] sm:$0xff] (%p1355_p9) }
 0x12e   : > { %683 = vst [vmem:[%s1433_s12 + $0x28] sm:$0xff] %v571_v7  ;;  %699 = vst [vmem:[%s1433_s12 + $0xa8] sm:$0xff] %v635_v8  ;;  %v845_v58 = vld [vmem:[%s1433_s12 + $0x88] sm:$0xff] (%p1355_p9) }
 0x12f   : > { %814 = vst [vmem:[%s1514_s17 + $0x48] sm:$0xff] (%p1355_p9), %v813_v42  ;;  %816 = vst [vmem:[%s1514_s17 + $0x90] sm:$0xff] (%p1355_p9), %v815_v43 }
 0x130   : > { %v1061_v9 = vpop.f32.mrb[8].mxu0  ;;  %v1077_v10 = vpop.f32.mrb[8].mxu1  ;;  %818 = vst [vmem:[%s1514_s17 + $0xd8] sm:$0xff] (%p1355_p9), %v817_v44  ;;  %844 = vst [vmem:[%s1514_s17 + $0x480] sm:$0xff] (%p1355_p9), %v843_v57 }
 0x131   : > { %v592_v11 = vadd.f32 %v1061_v9, %v1427_v40  ;;  %v656_v12 = vadd.f32 %v1077_v10, %v1427_v40  ;;  %v583_v13 = vpop.f32.mrb[9].mxu0  ;;  %v647_v14 = vpop.f32.mrb[9].mxu1  ;;  %846 = vst [vmem:[%s1514_s17 + $0x4c8] sm:$0xff] (%p1355_p9), %v845_v58  ;;  %848 = vst [vmem:[%s1514_s17 + $0x510] sm:$0xff] (%p1355_p9), %v847_v59 }
 0x132   : > { %v584_v15 = vadd.f32 %v1427_v40, %v583_v13  ;;  %v648_v16 = vadd.f32 %v1427_v40, %v647_v14  ;;  %v1062_v17 = vpop.f32.mrb[10].mxu0  ;;  %v1078_v18 = vpop.f32.mrb[10].mxu1  ;;  %v823_v47 = vld [vmem:[%s1433_s12 + $0x30] sm:$0xff] (%p1355_p9)  ;;  %850 = vst [vmem:[%s1514_s17 + $0x558] sm:$0xff] (%p1355_p9), %v849_v60 }
 0x133   : > { %688 = vst [vmem:[%s1433_s12 + $0x50] sm:$0xff] %v592_v11  ;;  %704 = vst [vmem:[%s1433_s12 + $0xd0] sm:$0xff] %v656_v12  ;;  %v595_v19 = vadd.f32 %v1062_v17, %v1427_v40  ;;  %v659_v20 = vadd.f32 %v1078_v18, %v1427_v40  ;;  %v586_v21 = vpop.f32.mrb[11].mxu0  ;;  %v650_v22 = vpop.f32.mrb[11].mxu1  ;;  %v819_v45 = vld [vmem:[%s1433_s12 + $0x20] sm:$0xff] (%p1355_p9)  ;;  %v855_v63 = vld [vmem:[%s1433_s12 + $0xb0] sm:$0xff] (%p1355_p9) }
 0x134   : > { %686 = vst [vmem:[%s1433_s12 + $0x40] sm:$0xff] %v584_v15  ;;  %702 = vst [vmem:[%s1433_s12 + $0xc0] sm:$0xff] %v648_v16  ;;  %v587_v23 = vadd.f32 %v1427_v40, %v586_v21  ;;  %v651_v24 = vadd.f32 %v1427_v40, %v650_v22  ;;  %v825_v48 = vld [vmem:[%s1433_s12 + $0x38] sm:$0xff] (%p1355_p9)  ;;  %v851_v61 = vld [vmem:[%s1433_s12 + $0xa0] sm:$0xff] (%p1355_p9) }
 0x135   : > { %689 = vst [vmem:[%s1433_s12 + $0x58] sm:$0xff] %v595_v19  ;;  %705 = vst [vmem:[%s1433_s12 + $0xd8] sm:$0xff] %v659_v20  ;;  %v821_v46 = vld [vmem:[%s1433_s12 + $0x28] sm:$0xff] (%p1355_p9)  ;;  %v857_v0 = vld [vmem:[%s1433_s12 + $0xb8] sm:$0xff] (%p1355_p9) }
 0x136   : > { %687 = vst [vmem:[%s1433_s12 + $0x48] sm:$0xff] %v587_v23  ;;  %703 = vst [vmem:[%s1433_s12 + $0xc8] sm:$0xff] %v651_v24  ;;  %v853_v62 = vld [vmem:[%s1433_s12 + $0xa8] sm:$0xff] (%p1355_p9) }
 0x137   : > { %820 = vst [vmem:[%s1514_s17 + $0x120] sm:$0xff] (%p1355_p9), %v819_v45  ;;  %822 = vst [vmem:[%s1514_s17 + $0x168] sm:$0xff] (%p1355_p9), %v821_v46 }
 0x138   : > { %v1065_v25 = vpop.f32.mrb[12].mxu0  ;;  %v1081_v26 = vpop.f32.mrb[12].mxu1  ;;  %716 = sbr.rel (!%p1355_p9) target bundleno = 328 (0x148), region = 77  ;;  %824 = vst [vmem:[%s1514_s17 + $0x1b0] sm:$0xff] (%p1355_p9), %v823_v47  ;;  %826 = vst [vmem:[%s1514_s17 + $0x1f8] sm:$0xff] (%p1355_p9), %v825_v48 }
 0x139   : > { %v608_v27 = vadd.f32 %v1065_v25, %v1427_v40  ;;  %v672_v28 = vadd.f32 %v1081_v26, %v1427_v40  ;;  %v599_v29 = vpop.f32.mrb[13].mxu0  ;;  %v663_v30 = vpop.f32.mrb[13].mxu1  ;;  %852 = vst [vmem:[%s1514_s17 + $0x5a0] sm:$0xff] (%p1355_p9), %v851_v61  ;;  %854 = vst [vmem:[%s1514_s17 + $0x5e8] sm:$0xff] (%p1355_p9), %v853_v62 }
 0x13a   : > { %v600_v31 = vadd.f32 %v1427_v40, %v599_v29  ;;  %v664_v32 = vadd.f32 %v1427_v40, %v663_v30  ;;  %v1066_v33 = vpop.f32.mrb[14].mxu0  ;;  %v1082_v34 = vpop.f32.mrb[14].mxu1  ;;  %v831_v51 = vld [vmem:[%s1433_s12 + $0x50] sm:$0xff] (%p1355_p9)  ;;  %856 = vst [vmem:[%s1514_s17 + $0x630] sm:$0xff] (%p1355_p9), %v855_v63  ;;  %858 = vst [vmem:[%s1514_s17 + $0x678] sm:$0xff] (%p1355_p9), %v857_v0 }
 0x13b   : > { %692 = vst [vmem:[%s1433_s12 + $0x70] sm:$0xff] %v608_v27  ;;  %708 = vst [vmem:[%s1433_s12 + $0xf0] sm:$0xff] %v672_v28  ;;  %v611_v35 = vadd.f32 %v1066_v33, %v1427_v40  ;;  %v675_v36 = vadd.f32 %v1082_v34, %v1427_v40  ;;  %v602_v37 = vpop.f32.mrb[15].mxu0  ;;  %v666_v38 = vpop.f32.mrb[15].mxu1  ;;  %v827_v49 = vld [vmem:[%s1433_s12 + $0x40] sm:$0xff] (%p1355_p9)  ;;  %v863_v3 = vld [vmem:[%s1433_s12 + $0xd0] sm:$0xff] (%p1355_p9) }
 0x13c   : > { %690 = vst [vmem:[%s1433_s12 + $0x60] sm:$0xff] %v600_v31  ;;  %706 = vst [vmem:[%s1433_s12 + $0xe0] sm:$0xff] %v664_v32  ;;  %v603_v39 = vadd.f32 %v1427_v40, %v602_v37  ;;  %v667_v41 = vadd.f32 %v1427_v40, %v666_v38  ;;  %v811_v40 = vld [vmem:[%s1433_s12] sm:$0xff] (%p1355_p9)  ;;  %v833_v52 = vld [vmem:[%s1433_s12 + $0x58] sm:$0xff] (%p1355_p9) }
 0x13d   : > { %693 = vst [vmem:[%s1433_s12 + $0x78] sm:$0xff] %v611_v35  ;;  %709 = vst [vmem:[%s1433_s12 + $0xf8] sm:$0xff] %v675_v36  ;;  %v829_v50 = vld [vmem:[%s1433_s12 + $0x48] sm:$0xff] (%p1355_p9)  ;;  %v859_v1 = vld [vmem:[%s1433_s12 + $0xc0] sm:$0xff] (%p1355_p9) }
 0x13e   : > { %691 = vst [vmem:[%s1433_s12 + $0x68] sm:$0xff] %v603_v39  ;;  %707 = vst [vmem:[%s1433_s12 + $0xe8] sm:$0xff] %v667_v41  ;;  %v861_v2 = vld [vmem:[%s1433_s12 + $0xc8] sm:$0xff] (%p1355_p9)  ;;  %v865_v4 = vld [vmem:[%s1433_s12 + $0xd8] sm:$0xff] (%p1355_p9) }
 0x13f   : > { %812 = vst [vmem:[%s1514_s17] sm:$0xff] %v811_v40  ;;  %828 = vst [vmem:[%s1514_s17 + $0x240] sm:$0xff] %v827_v49 }
 0x140   : > { %830 = vst [vmem:[%s1514_s17 + $0x288] sm:$0xff] %v829_v50  ;;  %832 = vst [vmem:[%s1514_s17 + $0x2d0] sm:$0xff] %v831_v51 }
 0x141   : > { %834 = vst [vmem:[%s1514_s17 + $0x318] sm:$0xff] %v833_v52  ;;  %860 = vst [vmem:[%s1514_s17 + $0x6c0] sm:$0xff] %v859_v1 }
 0x142   : > { %v839_v55 = vld [vmem:[%s1433_s12 + $0x70] sm:$0xff]  ;;  %862 = vst [vmem:[%s1514_s17 + $0x708] sm:$0xff] %v861_v2  ;;  %864 = vst [vmem:[%s1514_s17 + $0x750] sm:$0xff] %v863_v3 }
 0x143   : > { %v835_v53 = vld [vmem:[%s1433_s12 + $0x60] sm:$0xff]  ;;  %840 = vst [vmem:[%s1514_s17 + $0x3f0] sm:$0xff] %v839_v55  ;;  %866 = vst [vmem:[%s1514_s17 + $0x798] sm:$0xff] %v865_v4  ;;  %v871_v7 = vld [vmem:[%s1433_s12 + $0xf0] sm:$0xff] }
 0x144   : > { %836 = vst [vmem:[%s1514_s17 + $0x360] sm:$0xff] %v835_v53  ;;  %v841_v56 = vld [vmem:[%s1433_s12 + $0x78] sm:$0xff]  ;;  %v867_v5 = vld [vmem:[%s1433_s12 + $0xe0] sm:$0xff]  ;;  %872 = vst [vmem:[%s1514_s17 + $0x870] sm:$0xff] %v871_v7 }
 0x145   : > { %v837_v54 = vld [vmem:[%s1433_s12 + $0x68] sm:$0xff]  ;;  %842 = vst [vmem:[%s1514_s17 + $0x438] sm:$0xff] %v841_v56  ;;  %868 = vst [vmem:[%s1514_s17 + $0x7e0] sm:$0xff] %v867_v5  ;;  %v873_v8 = vld [vmem:[%s1433_s12 + $0xf8] sm:$0xff] }
 0x146   : > { %838 = vst [vmem:[%s1514_s17 + $0x3a8] sm:$0xff] %v837_v54  ;;  %v869_v6 = vld [vmem:[%s1433_s12 + $0xe8] sm:$0xff]  ;;  %874 = vst [vmem:[%s1514_s17 + $0x8b8] sm:$0xff] %v873_v8 }
 0x147   : > { %870 = vst [vmem:[%s1514_s17 + $0x828] sm:$0xff] %v869_v6 }
 0x148 PF: > { %s13_s20 = sadd.s32 1, %s1266_s20   ;;  %s1600_s12 = smov %s1238_s13 }
 0x149   : > { %p10_p2 = scmp.ge.s32.totalorder %s13_s20, 29   ;;  %s1601_s13 = smov %s1360_s4 }
 0x14a   : > { %s1602_s14 = smov %s1246_s15  ;;  %s1603_s15 = smov %s1349_s27 }
 0x14b   : > { %s1604_s16 = smov %s1258_s18  ;;  %s1605_s17 = smov %s1262_s19 }
 0x14c   : > { %s1606_s18 = smov %s1609_s22  ;;  %s1607_s19 = smov %s1613_s23 }
 0x14d   :  { %12 = sbr.rel (!%p10_p2) target bundleno = 5 (0x5), region = 152 }

// kernel: vae_forward.21
= control target key start
LH: loop header
LB: loop body
LE: loop exit
PB: predicated region body
PF: predicated region fallthrough
CT: control target
= control target key end

     0   :  { %s938_s12 = smov 0   ;;  %s940_s13 = smov 0   ;;  %s1088_s0 = inlined_call_operand.vmem [shape: bf16[3328,128], index: 0, kind: input, shape index: {}]   ;;  %s1089_s1 = inlined_call_operand.vmem [shape: bf16[128,128], index: 1, kind: input, shape index: {}]   ;;  %s1090_s2 = inlined_call_operand.vmem [shape: f32[1,128], index: 2, kind: input, shape index: {}]   ;;  %s1091_s3 = inlined_call_operand.vmem [shape: f32[3328,128], index: 3, kind: output, shape index: {}]  }
   0x1   :  { %s942_s14 = smov 0  }
   0x2 LB: > { %s25_s15 = sadd.s32 1, %s912_s13  ;;  %p726_p0 = scmp.ge.s32.totalorder %s916_s14, 1  ;;  %s916_s14 = sphi %s942_s14, %s13_s14   ;;  %s912_s13 = sphi %s940_s13, %s1093_s13   ;;  %s908_s12 = sphi %s938_s12, %s1092_s12  }
   0x3   : > { %p27_p1 = scmp.ge.s32.totalorder %s25_s15, 13  ;;  %p169_p2 = scmp.lt.s32.totalorder %s916_s14, 14 }
   0x5   : > { %s1095_s15 = smov (%p27_p1, %s25_s15), 0  ;;  %p170_p3 = pnand %p726_p0, %p169_p2 }
   0x6   : > { %v870_v0 = vld [vmem:[%s1089_s1] sm:$0xff] (!%p170_p3)   ;;  %s727_s18 = sshll.u32 (!%p170_p3), %s908_s12, 5  ;;  %v871_v1 = vld [vmem:[%s1089_s1 + $0x8] sm:$0xff] (!%p170_p3)   ;;  %v872_v2 = vld [vmem:[%s1089_s1 + $0x10] sm:$0xff] (!%p170_p3)  }
   0x7   : > { %173 = sbr.rel (%p170_p3) target bundleno = 281 (0x119), region = 32  ;;  %p204_p4 = scmp.lt.s32.totalorder (!%p170_p3), %s727_s18, 415  ;;  %782 = vmatprep.subr.bf16.mxu0 (!%p170_p3), %v870_v0  ;;  %830 = vmatprep.subr.bf16.mxu1 (!%p170_p3), %v870_v0  ;;  %v873_v3 = vld [vmem:[%s1089_s1 + $0x18] sm:$0xff] (!%p170_p3)   ;;  %v874_v6 = vld [vmem:[%s1089_s1 + $0x20] sm:$0xff] (!%p170_p3)   ;;  %v875_v7 = vld [vmem:[%s1089_s1 + $0x28] sm:$0xff] (!%p170_p3)  }
   0x8   : > { %783 = vmatpush3.bf16.msra.mxu0 (!%p170_p3), %v870_v0  ;;  %838 = vmatpush3.bf16.msra.mxu1 (!%p170_p3), %v870_v0  ;;  %v876_v8 = vld [vmem:[%s1089_s1 + $0x30] sm:$0xff] (!%p170_p3)   ;;  %v877_v9 = vld [vmem:[%s1089_s1 + $0x38] sm:$0xff] (!%p170_p3)   ;;  %v1008_v24 = vld [vmem:[%s1090_s2] ss:$0 sm:$0xff] (!%p170_p3) }
   0x9   : > { %784 = vmatprep.subr.bf16.mxu0 (!%p170_p3), %v871_v1  ;;  %831 = vmatprep.subr.bf16.mxu1 (!%p170_p3), %v871_v1 }
   0xc   : > { %785 = vmatpush3.bf16.msra.mxu0 (!%p170_p3), %v871_v1  ;;  %839 = vmatpush3.bf16.msra.mxu1 (!%p170_p3), %v871_v1 }
   0xd   : > { %786 = vmatprep.subr.bf16.mxu0 (!%p170_p3), %v872_v2  ;;  %832 = vmatprep.subr.bf16.mxu1 (!%p170_p3), %v872_v2 }
   0xe   : > { %s1097_s18 = smov (!%p204_p4, %s727_s18), 415 }
   0xf   : > { %s728_s23 = sshll.u32 %s1097_s18, 2  ;;  %s730_s10 = sshll.u32 %s1097_s18, 3 }
  0x10   : > { %s971_s26 = scalar_lea.vmem %s1088_s0, %s728_s23  ;;  %787 = vmatpush3.bf16.msra.mxu0 %v872_v2  ;;  %840 = vmatpush3.bf16.msra.mxu1 %v872_v2  ;;  %s1013_s19 = scalar_lea.vmem %s1091_s3, %s730_s10 }
  0x11   : > { %v878_v4 = vld [vmem:[%s971_s26] sm:$0xff]   ;;  %788 = vmatprep.subr.bf16.mxu0 %v873_v3  ;;  %833 = vmatprep.subr.bf16.mxu1 %v873_v3  ;;  %v880_v10 = vld [vmem:[%s971_s26 + $0x8] sm:$0xff]   ;;  %v882_v12 = vld [vmem:[%s971_s26 + $0x10] sm:$0xff]  }
  0x12   : > { %v879_v5 = vld [vmem:[%s971_s26 + $0x40] sm:$0xff]   ;;  %798 = vmatprep.mubr.bf16.mxu0 %v878_v4  ;;  %v881_v11 = vld [vmem:[%s971_s26 + $0x48] sm:$0xff]   ;;  %v883_v13 = vld [vmem:[%s971_s26 + $0x50] sm:$0xff]  }
  0x13   : > { %814 = vmatprep.mubr.bf16.mxu1 %v879_v5  ;;  %v884_v14 = vld [vmem:[%s971_s26 + $0x18] sm:$0xff]   ;;  %v886_v16 = vld [vmem:[%s971_s26 + $0x20] sm:$0xff]   ;;  %v888_v18 = vld [vmem:[%s971_s26 + $0x28] sm:$0xff]  }
  0x14   : > { %789 = vmatpush3.bf16.msra.mxu0 %v873_v3  ;;  %841 = vmatpush3.bf16.msra.mxu1 %v873_v3  ;;  %v885_v15 = vld [vmem:[%s971_s26 + $0x58] sm:$0xff]   ;;  %v887_v17 = vld [vmem:[%s971_s26 + $0x60] sm:$0xff]   ;;  %v889_v19 = vld [vmem:[%s971_s26 + $0x68] sm:$0xff]  }
  0x15   : > { %790 = vmatprep.subr.bf16.mxu0 %v874_v6  ;;  %834 = vmatprep.subr.bf16.mxu1 %v874_v6  ;;  %v890_v20 = vld [vmem:[%s971_s26 + $0x30] sm:$0xff]   ;;  %v892_v22 = vld [vmem:[%s971_s26 + $0x38] sm:$0xff]  }
  0x16   : > { %v891_v21 = vld [vmem:[%s971_s26 + $0x70] sm:$0xff]   ;;  %v893_v23 = vld [vmem:[%s971_s26 + $0x78] sm:$0xff]  }
  0x18   : > { %791 = vmatpush3.bf16.msra.mxu0 %v874_v6  ;;  %842 = vmatpush3.bf16.msra.mxu1 %v874_v6 }
  0x19   : > { %792 = vmatprep.subr.bf16.mxu0 %v875_v7  ;;  %835 = vmatprep.subr.bf16.mxu1 %v875_v7 }
  0x1c   : > { %793 = vmatpush3.bf16.msra.mxu0 %v875_v7  ;;  %843 = vmatpush3.bf16.msra.mxu1 %v875_v7 }
  0x1d   : > { %794 = vmatprep.subr.bf16.mxu0 %v876_v8  ;;  %836 = vmatprep.subr.bf16.mxu1 %v876_v8 }
  0x20   : > { %795 = vmatpush3.bf16.msra.mxu0 %v876_v8  ;;  %844 = vmatpush3.bf16.msra.mxu1 %v876_v8 }
  0x21   : > { %796 = vmatprep.subr.bf16.mxu0 %v877_v9  ;;  %837 = vmatprep.subr.bf16.mxu1 %v877_v9 }
  0x24   : > { %797 = vmatpush3.bf16.msra.mxu0 %v877_v9  ;;  %845 = vmatpush3.bf16.msra.mxu1 %v877_v9 }
  0x27   : > { %799 = vmatmul.mubr.bf16.vlgmr.msra.gmra.mrb[0].mxu0 %v880_v10  ;;  %815 = vmatmul.mubr.bf16.vlgmr.msra.gmra.mrb[0].mxu1 %v881_v11 }
  0x28   : > { %802 = vmatprep.mubr.bf16.mxu0 %v882_v12  ;;  %818 = vmatprep.mubr.bf16.mxu1 %v883_v13 }
  0x2f   : > { %803 = vmatmul.mubr.bf16.gmra.mrb[4].mxu0 %v884_v14  ;;  %819 = vmatmul.mubr.bf16.gmra.mrb[4].mxu1 %v885_v15 }
  0x30   : > { %806 = vmatprep.mubr.bf16.mxu0 %v886_v16  ;;  %822 = vmatprep.mubr.bf16.mxu1 %v887_v17 }
  0x37   : > { %807 = vmatmul.mubr.bf16.gmra.mrb[8].mxu0 %v888_v18  ;;  %823 = vmatmul.mubr.bf16.gmra.mrb[8].mxu1 %v889_v19 }
  0x38   : > { %810 = vmatprep.mubr.bf16.mxu0 %v890_v20  ;;  %826 = vmatprep.mubr.bf16.mxu1 %v891_v21 }
  0x3f   : > { %811 = vmatmul.mubr.bf16.gmra.mrb[12].mxu0 %v892_v22  ;;  %827 = vmatmul.mubr.bf16.gmra.mrb[12].mxu1 %v893_v23 }
  0xfa   : > { %v800_v25 = vpop.f32.mrb[0].mxu0  ;;  %v816_v26 = vpop.f32.mrb[0].mxu1 }
  0xfb   : > { %v468_v27 = vadd.f32 %v800_v25, %v1008_v24  ;;  %v532_v28 = vadd.f32 %v816_v26, %v1008_v24  ;;  %v459_v29 = vpop.f32.mrb[1].mxu0  ;;  %v523_v30 = vpop.f32.mrb[1].mxu1 }
  0xfc   : > { %v460_v31 = vadd.f32 %v1008_v24, %v459_v29  ;;  %v524_v32 = vadd.f32 %v1008_v24, %v523_v30  ;;  %v801_v33 = vpop.f32.mrb[2].mxu0  ;;  %v817_v34 = vpop.f32.mrb[2].mxu1 }
  0xfd   : > { %588 = vst [vmem:[%s1013_s19 + $0x10] sm:$0xff] %v468_v27  ;;  %604 = vst [vmem:[%s1013_s19 + $0x90] sm:$0xff] %v532_v28  ;;  %v471_v35 = vadd.f32 %v801_v33, %v1008_v24  ;;  %v535_v36 = vadd.f32 %v817_v34, %v1008_v24  ;;  %v462_v37 = vpop.f32.mrb[3].mxu0  ;;  %v526_v38 = vpop.f32.mrb[3].mxu1 }
  0xfe   : > { %586 = vst [vmem:[%s1013_s19] sm:$0xff] %v460_v31  ;;  %602 = vst [vmem:[%s1013_s19 + $0x80] sm:$0xff] %v524_v32  ;;  %v463_v39 = vadd.f32 %v1008_v24, %v462_v37  ;;  %v527_v40 = vadd.f32 %v1008_v24, %v526_v38 }
  0xff   : > { %589 = vst [vmem:[%s1013_s19 + $0x18] sm:$0xff] %v471_v35  ;;  %605 = vst [vmem:[%s1013_s19 + $0x98] sm:$0xff] %v535_v36 }
 0x100   : > { %587 = vst [vmem:[%s1013_s19 + $0x8] sm:$0xff] %v463_v39  ;;  %603 = vst [vmem:[%s1013_s19 + $0x88] sm:$0xff] %v527_v40 }
 0x102   : > { %v804_v41 = vpop.f32.mrb[4].mxu0  ;;  %v820_v42 = vpop.f32.mrb[4].mxu1 }
 0x103   : > { %v484_v43 = vadd.f32 %v804_v41, %v1008_v24  ;;  %v548_v44 = vadd.f32 %v820_v42, %v1008_v24  ;;  %v475_v45 = vpop.f32.mrb[5].mxu0  ;;  %v539_v46 = vpop.f32.mrb[5].mxu1 }
 0x104   : > { %v476_v47 = vadd.f32 %v1008_v24, %v475_v45  ;;  %v540_v48 = vadd.f32 %v1008_v24, %v539_v46  ;;  %v805_v49 = vpop.f32.mrb[6].mxu0  ;;  %v821_v50 = vpop.f32.mrb[6].mxu1 }
 0x105   : > { %592 = vst [vmem:[%s1013_s19 + $0x30] sm:$0xff] %v484_v43  ;;  %608 = vst [vmem:[%s1013_s19 + $0xb0] sm:$0xff] %v548_v44  ;;  %v487_v51 = vadd.f32 %v805_v49, %v1008_v24  ;;  %v551_v52 = vadd.f32 %v821_v50, %v1008_v24  ;;  %v478_v53 = vpop.f32.mrb[7].mxu0  ;;  %v542_v54 = vpop.f32.mrb[7].mxu1 }
 0x106   : > { %590 = vst [vmem:[%s1013_s19 + $0x20] sm:$0xff] %v476_v47  ;;  %606 = vst [vmem:[%s1013_s19 + $0xa0] sm:$0xff] %v540_v48  ;;  %v479_v55 = vadd.f32 %v1008_v24, %v478_v53  ;;  %v543_v56 = vadd.f32 %v1008_v24, %v542_v54 }
 0x107   : > { %593 = vst [vmem:[%s1013_s19 + $0x38] sm:$0xff] %v487_v51  ;;  %609 = vst [vmem:[%s1013_s19 + $0xb8] sm:$0xff] %v551_v52 }
 0x108   : > { %591 = vst [vmem:[%s1013_s19 + $0x28] sm:$0xff] %v479_v55  ;;  %607 = vst [vmem:[%s1013_s19 + $0xa8] sm:$0xff] %v543_v56 }
 0x10a   : > { %v808_v57 = vpop.f32.mrb[8].mxu0  ;;  %v824_v58 = vpop.f32.mrb[8].mxu1 }
 0x10b   : > { %v500_v59 = vadd.f32 %v808_v57, %v1008_v24  ;;  %v564_v60 = vadd.f32 %v824_v58, %v1008_v24  ;;  %v491_v61 = vpop.f32.mrb[9].mxu0  ;;  %v555_v62 = vpop.f32.mrb[9].mxu1 }
 0x10c   : > { %v492_v63 = vadd.f32 %v1008_v24, %v491_v61  ;;  %v556_v0 = vadd.f32 %v1008_v24, %v555_v62  ;;  %v809_v1 = vpop.f32.mrb[10].mxu0  ;;  %v825_v2 = vpop.f32.mrb[10].mxu1 }
 0x10d   : > { %596 = vst [vmem:[%s1013_s19 + $0x50] sm:$0xff] %v500_v59  ;;  %612 = vst [vmem:[%s1013_s19 + $0xd0] sm:$0xff] %v564_v60  ;;  %v503_v3 = vadd.f32 %v809_v1, %v1008_v24  ;;  %v567_v4 = vadd.f32 %v825_v2, %v1008_v24  ;;  %v494_v5 = vpop.f32.mrb[11].mxu0  ;;  %v558_v6 = vpop.f32.mrb[11].mxu1 }
 0x10e   : > { %594 = vst [vmem:[%s1013_s19 + $0x40] sm:$0xff] %v492_v63  ;;  %610 = vst [vmem:[%s1013_s19 + $0xc0] sm:$0xff] %v556_v0  ;;  %v495_v7 = vadd.f32 %v1008_v24, %v494_v5  ;;  %v559_v8 = vadd.f32 %v1008_v24, %v558_v6 }
 0x10f   : > { %597 = vst [vmem:[%s1013_s19 + $0x58] sm:$0xff] %v503_v3  ;;  %613 = vst [vmem:[%s1013_s19 + $0xd8] sm:$0xff] %v567_v4 }
 0x110   : > { %595 = vst [vmem:[%s1013_s19 + $0x48] sm:$0xff] %v495_v7  ;;  %611 = vst [vmem:[%s1013_s19 + $0xc8] sm:$0xff] %v559_v8 }
 0x112   : > { %v812_v9 = vpop.f32.mrb[12].mxu0  ;;  %v828_v10 = vpop.f32.mrb[12].mxu1 }
 0x113   : > { %v516_v11 = vadd.f32 %v812_v9, %v1008_v24  ;;  %v580_v12 = vadd.f32 %v828_v10, %v1008_v24  ;;  %v507_v13 = vpop.f32.mrb[13].mxu0  ;;  %v571_v14 = vpop.f32.mrb[13].mxu1 }
 0x114   : > { %v508_v15 = vadd.f32 %v1008_v24, %v507_v13  ;;  %v572_v16 = vadd.f32 %v1008_v24, %v571_v14  ;;  %v813_v17 = vpop.f32.mrb[14].mxu0  ;;  %v829_v18 = vpop.f32.mrb[14].mxu1 }
 0x115   : > { %600 = vst [vmem:[%s1013_s19 + $0x70] sm:$0xff] %v516_v11  ;;  %616 = vst [vmem:[%s1013_s19 + $0xf0] sm:$0xff] %v580_v12  ;;  %v519_v19 = vadd.f32 %v813_v17, %v1008_v24  ;;  %v583_v20 = vadd.f32 %v829_v18, %v1008_v24  ;;  %v510_v21 = vpop.f32.mrb[15].mxu0  ;;  %v574_v22 = vpop.f32.mrb[15].mxu1 }
 0x116   : > { %598 = vst [vmem:[%s1013_s19 + $0x60] sm:$0xff] %v508_v15  ;;  %614 = vst [vmem:[%s1013_s19 + $0xe0] sm:$0xff] %v572_v16  ;;  %v511_v23 = vadd.f32 %v1008_v24, %v510_v21  ;;  %v575_v25 = vadd.f32 %v1008_v24, %v574_v22 }
 0x117   : > { %601 = vst [vmem:[%s1013_s19 + $0x78] sm:$0xff] %v519_v19  ;;  %617 = vst [vmem:[%s1013_s19 + $0xf8] sm:$0xff] %v583_v20 }
 0x118   : > { %599 = vst [vmem:[%s1013_s19 + $0x68] sm:$0xff] %v511_v23  ;;  %615 = vst [vmem:[%s1013_s19 + $0xe8] sm:$0xff] %v575_v25 }
 0x119 PF: > { %s13_s14 = sadd.s32 1, %s916_s14   ;;  %s1092_s12 = smov %s912_s13 }
 0x11a   : > { %p10_p5 = scmp.ge.s32.totalorder %s13_s14, 15   ;;  %s1093_s13 = smov %s1095_s15 }
 0x11c   :  { %12 = sbr.rel (!%p10_p5) target bundleno = 2 (0x2), region = 68 }

</bundles_post_ra>
